<compile_context>
chip_gen: v7x
topology: tpu7x:2x2x1
jax: 0.10.0
libtpu: 0.0.40
codegen_flags: <defaults>
</compile_context>

<pallas_src>
import functools
import math

import numpy as np
import jax
import jax.numpy as jnp
from jax.experimental import pallas as pl
from jax.experimental.pallas import tpu as pltpu


# ----------------------------------------------------------------------------------
# Kernel
# ----------------------------------------------------------------------------------
def deepsdf_kernel(*refs, num_layers, skip_layer):
    it = iter(refs)
    xyz_ref = next(it)          # (TB, 3) f32
    cf_ref = next(it)           # (3, E_pad) f32: per-coordinate frequency rows (0-padded)
    ph_ref = next(it)           # (1, E_pad) f32: 0 for sin cols, pi/2 for cos cols, 0 in pad

    layer_refs = []
    for i in range(num_layers):
        if i == 0:
            layer_refs.append((next(it), next(it)))            # We (E_pad,H) bf16, b_eff f32
        elif i == skip_layer:
            layer_refs.append((next(it), next(it), next(it)))  # Wh bf16, We bf16, b_eff f32
        else:
            layer_refs.append((next(it), next(it)))            # W bf16, b f32
    wf_ref = next(it)           # (1, H) f32 final weight as a row vector
    bf_ref = next(it)           # (1, 1) f32
    sdf_ref = next(it)          # (TB, 1) output

    f32 = jnp.float32
    cdt = layer_refs[0][0].dtype                 # matmul compute dtype (bf16)

    TB = xyz_ref.shape[0]
    E = cf_ref.shape[1]

    xyz = xyz_ref[...].astype(f32)               # (TB, 3)

    # ---- Fourier embedding (constants precomputed in the wrapper) ----------------
    # arg[:, j] = xyz[:, coord(j)] * 2^{f(j)} * pi ;  cos columns via +pi/2 phase.
    # Padded columns have freq=0, phase=0 -> sin(0)=0 (exact).
    cf = cf_ref[...]                             # (3, E) f32
    fx = jnp.broadcast_to(cf[0:1, :], (TB, E))
    fy = jnp.broadcast_to(cf[1:2, :], (TB, E))
    fz = jnp.broadcast_to(cf[2:3, :], (TB, E))
    phase = jnp.broadcast_to(ph_ref[...], (TB, E))
    arg = xyz[:, 0:1] * fx + xyz[:, 1:2] * fy + xyz[:, 2:3] * fz + phase
    embed_c = jnp.sin(arg).astype(cdt)           # (TB, E) bf16; reused by layer 0 and skip

    # ---- MLP (z @ Wz already folded into biases in the glue) ----------------------
    h = None
    for i in range(num_layers):
        if i == 0:
            we0, b0 = layer_refs[0]
            acc = jnp.dot(embed_c, we0[...], preferred_element_type=f32) + b0[...]
        elif i == skip_layer:
            wh, we, bi = layer_refs[i]
            # explicit accumulation chain (v7x MRB keeps the partial sum in-place)
            acc = jnp.dot(h, wh[...], preferred_element_type=f32)
            acc = acc + jnp.dot(embed_c, we[...], preferred_element_type=f32)
            acc = acc + bi[...]
        else:
            wi, bi = layer_refs[i]
            acc = jnp.dot(h, wi[...], preferred_element_type=f32) + bi[...]
        relu = jnp.maximum(acc, 0.0)
        # carry bf16 between layers (fused ReLU+cast); keep the LAST activation in f32
        # so the head stays at the original precision.
        h = relu if i == num_layers - 1 else relu.astype(cdt)

    # final head: (TB, H) * (1, H) -> lane reduction -> (TB, 1); kept in f32.
    sdf = jnp.tanh(jnp.sum(h * wf_ref[...], axis=-1, keepdims=True) + bf_ref[...])
    sdf_ref[...] = sdf.astype(sdf_ref.dtype)


# ----------------------------------------------------------------------------------
# Parameter init (deterministic, mirrors the PyTorch module's shapes)
# ----------------------------------------------------------------------------------
def init_params(key, latent_dim, hidden_dim, num_layers, skip_layer, num_freqs):
    embed_dim = 3 * 2 * num_freqs
    key, kz = jax.random.split(key)
    params = {"z": 0.01 * jax.random.normal(kz, (1, latent_dim), jnp.float32)}

    layers = []
    in_ch = latent_dim + embed_dim
    for i in range(num_layers):
        if i == skip_layer:
            in_ch += latent_dim + embed_dim
        key, kw = jax.random.split(key)
        bound = math.sqrt(6.0 / in_ch)  # kaiming_uniform, relu gain
        v = jax.random.uniform(kw, (hidden_dim, in_ch), jnp.float32, -bound, bound)
        g = jnp.sqrt(jnp.sum(v * v, axis=1, keepdims=True))  # weight_norm init: g = ||v||
        layers.append({"v": v, "g": g, "b": jnp.zeros((hidden_dim,), jnp.float32)})
        in_ch = hidden_dim
    params["layers"] = layers

    key, kw = jax.random.split(key)
    bound = math.sqrt(6.0 / hidden_dim)
    v = jax.random.uniform(kw, (1, hidden_dim), jnp.float32, -bound, bound)
    g = jnp.sqrt(jnp.sum(v * v, axis=1, keepdims=True))
    params["final"] = {"v": v, "g": g, "b": jnp.zeros((1,), jnp.float32)}
    return params


def _wn_weight(v, g):
    # weight_norm (dim=0): w[o,:] = g[o] * v[o,:] / ||v[o,:]||
    norm = jnp.sqrt(jnp.sum(v * v, axis=1, keepdims=True))
    return v * (g / norm)


def _pad_rows(w, rows):
    """Zero-pad the leading (K) dim of a (k, out) weight to `rows`."""
    pad = rows - w.shape[0]
    if pad > 0:
        w = jnp.concatenate([w, jnp.zeros((pad, w.shape[1]), w.dtype)], axis=0)
    return w


def _build_flat_params(params, latent_dim, hidden_dim, num_layers, skip_layer,
                       num_freqs, e_pad, compute_dtype=jnp.bfloat16):
    """Fold weight_norm, fold z@Wz into biases, zero-pad embed rows to e_pad, cast
    matmul weights to compute_dtype (biases / head stay f32)."""
    E = 3 * 2 * num_freqs
    L = latent_dim
    z = params["z"].astype(jnp.float32)                        # (1, L)
    hp = jax.lax.Precision.HIGHEST
    flat = []
    for i, layer in enumerate(params["layers"]):
        w = _wn_weight(layer["v"].astype(jnp.float32),
                       layer["g"].astype(jnp.float32)).T       # (in, out)
        b = layer["b"].astype(jnp.float32).reshape(1, -1)
        if i == 0:
            wz, we = w[:L], w[L:L + E]
            b_eff = b + jnp.dot(z, wz, precision=hp)           # exact latent fold
            flat += [_pad_rows(we, e_pad).astype(compute_dtype), b_eff]
        elif i == skip_layer:
            wh = w[:hidden_dim]
            wz = w[hidden_dim:hidden_dim + L]
            we = w[hidden_dim + L:hidden_dim + L + E]
            b_eff = b + jnp.dot(z, wz, precision=hp)
            flat += [wh.astype(compute_dtype),
                     _pad_rows(we, e_pad).astype(compute_dtype), b_eff]
        else:
            flat += [w.astype(compute_dtype), b]
    wf = _wn_weight(params["final"]["v"].astype(jnp.float32),
                    params["final"]["g"].astype(jnp.float32))  # (1, H), kept f32
    bf = params["final"]["b"].astype(jnp.float32).reshape(1, 1)
    flat += [wf, bf]
    return flat


def _embedding_constants(num_freqs, e_pad):
    """(3, e_pad) frequency rows + (1, e_pad) phase row, matching torch's per-coordinate
    [sin-block, cos-block] layout.  Columns >= 3*2*K are zero (freq=0, phase=0)."""
    K = num_freqs
    E = 3 * 2 * K
    assert e_pad >= E
    cf = np.zeros((3, e_pad), np.float32)
    ph = np.zeros((1, e_pad), np.float32)
    for c in range(3):
        for w in range(2 * K):
            f = w % K
            cf[c, c * 2 * K + w] = (2.0 ** f) * np.pi
            ph[0, c * 2 * K + w] = 0.0 if w < K else np.pi / 2.0   # cos(x) = sin(x + pi/2)
    return jnp.asarray(cf), jnp.asarray(ph)


def _auto_tb(batch):
    """Pick the batch tile: as large as possible (<=1024, MXU-filling, amortizes the
    ~0.35 us per-step cost) while keeping >= 2 grid steps so ("parallel",) can shard
    across v7x's two TensorCores."""
    target = batch // 2 if batch >= 512 else batch
    for t in (1024, 512, 256, 128, 64, 32, 16, 8):
        if t <= target and batch % t == 0:
            return t
    return batch


def _resident_spec(shape):
    """Grid-invariant block: full-shape, constant block index -> stays VMEM-resident.
    Single-buffered (Buffered(1)); the default double buffer for a never-changing block
    is pure VMEM waste."""
    idx = lambda i: (0,) * len(shape)
    try:
        return pl.BlockSpec(shape, idx, pipeline_mode=pl.Buffered(1))
    except (AttributeError, TypeError):   # older jax without pipeline_mode / Buffered
        return pl.BlockSpec(shape, idx)


# ----------------------------------------------------------------------------------
# Wrapper
# ----------------------------------------------------------------------------------
def deepsdf_pallas(xyz, params, *, latent_dim, hidden_dim,
                   num_layers=8, skip_layer=4, num_freqs=6, tb=None,
                   compute_dtype=jnp.bfloat16):
    assert 0 < skip_layer < num_layers and num_layers >= 2
    B = xyz.shape[0]
    if tb is None:
        tb = _auto_tb(B)
    assert B % tb == 0 and tb % 8 == 0

    E = 3 * 2 * num_freqs
    e_pad = max(128, ((E + 127) // 128) * 128)   # lane-dense embedding width

    cf, ph = _embedding_constants(num_freqs, e_pad)
    flat = _build_flat_params(params, latent_dim, hidden_dim,
                              num_layers, skip_layer, num_freqs, e_pad, compute_dtype)
    consts = [cf, ph] + flat
    inputs = [xyz.astype(jnp.float32)] + consts

    in_specs = [pl.BlockSpec((tb, 3), lambda i: (i, 0))]
    in_specs += [_resident_spec(tuple(a.shape)) for a in consts]

    out_shape = jax.ShapeDtypeStruct((B, 1), jnp.float32)
    out_specs = pl.BlockSpec((tb, 1), lambda i: (i, 0))

    # VMEM budget from actual usage (single-buffered weights + double-buffered IO tiles
    # + activation working set), x2 headroom, clamped to [24 MiB, 48 MiB].
    const_bytes = sum(int(np.prod(a.shape)) * jnp.dtype(a.dtype).itemsize for a in consts)
    io_bytes = 2 * (tb * 3 * 4 + tb * 1 * 4)
    act_bytes = 24 * tb * max(hidden_dim, e_pad)
    vmem_bytes = int(min(max(2 * (const_bytes + io_bytes + act_bytes), 24 << 20), 48 << 20))

    kernel = functools.partial(deepsdf_kernel,
                               num_layers=num_layers, skip_layer=skip_layer)

    sdf = pl.pallas_call(
        kernel,
        out_shape=out_shape,
        grid=(B // tb,),
        in_specs=in_specs,
        out_specs=out_specs,
        compiler_params=pltpu.CompilerParams(
            dimension_semantics=("parallel",),
            vmem_limit_bytes=vmem_bytes),
    )(*inputs)

    # z_expand is a pure broadcast of a (1, L) parameter — produced outside the kernel.
    z_expand = jnp.broadcast_to(params["z"].astype(jnp.float32), (B, latent_dim))
    return sdf, z_expand


# ----------------------------------------------------------------------------------
# Pure-JAX reference (mirrors the PyTorch forward) for correctness check
# ----------------------------------------------------------------------------------
def deepsdf_ref(xyz, params, *, num_freqs, skip_layer):
    B = xyz.shape[0]
    K = num_freqs
    freq = (2.0 ** jnp.arange(K, dtype=jnp.float32)) * jnp.float32(np.pi)
    e = xyz[..., None] * freq                                    # (B, 3, K)
    embed = jnp.concatenate([jnp.sin(e), jnp.cos(e)], axis=-1).reshape(B, 3 * 2 * K)
    z = jnp.broadcast_to(params["z"], (B, params["z"].shape[1]))
    h = jnp.concatenate([z, embed], axis=-1)
    inp = h
    for i, layer in enumerate(params["layers"]):
        if i == skip_layer:
            h = jnp.concatenate([h, inp], axis=-1)
        w = _wn_weight(layer["v"], layer["g"])
        h = jax.nn.relu(jnp.dot(h, w.T, precision=jax.lax.Precision.HIGHEST) + layer["b"])
    wf = _wn_weight(params["final"]["v"], params["final"]["g"])
    sdf = jnp.tanh(jnp.dot(h, wf.T, precision=jax.lax.Precision.HIGHEST)
                   + params["final"]["b"])
    return sdf, z


# ----------------------------------------------------------------------------------
if __name__ == "__main__":
    latent_dim, hidden_dim = 32, 64      # small-shape demo (module defaults: 256 / 512)
    num_layers, skip_layer, num_freqs = 8, 4, 6
    B = 512                              # auto tb -> 256, grid of 2 (keeps both v7x cores busy)

    key = jax.random.PRNGKey(0)
    kparam, kxyz = jax.random.split(key)
    params = init_params(kparam, latent_dim, hidden_dim, num_layers, skip_layer, num_freqs)
    xyz = jax.random.uniform(kxyz, (B, 3), jnp.float32, -1.0, 1.0)

    sdf, z_exp = deepsdf_pallas(xyz, params,
                                latent_dim=latent_dim, hidden_dim=hidden_dim,
                                num_layers=num_layers, skip_layer=skip_layer,
                                num_freqs=num_freqs)
    jax.block_until_ready((sdf, z_exp))

    ref_sdf, ref_z = deepsdf_ref(xyz, params, num_freqs=num_freqs, skip_layer=skip_layer)
    assert sdf.shape == (B, 1) and z_exp.shape == (B, latent_dim)
    # bf16 matmuls (f32 accumulate, f32 bias/head): allow ~3e-2 abs error on a [-1,1] tanh output
    err = float(jnp.max(jnp.abs(sdf - ref_sdf)))
    assert err < 3e-2, f"max |sdf - ref| = {err}"
    assert float(jnp.max(jnp.abs(z_exp - ref_z))) < 1e-6

    print("KERNEL_OK")
</pallas_src>

<mosaic_0001>
module attributes {stable_mosaic.version = 11 : i64} {
  func.func @deepsdf_kernel(%arg0: i32, %arg1: memref<256x3xf32, #tpu.memory_space<vmem>>, %arg2: memref<3x128xf32, #tpu.memory_space<vmem>>, %arg3: memref<1x128xf32, #tpu.memory_space<vmem>>, %arg4: memref<128x64xbf16, #tpu.memory_space<vmem>>, %arg5: memref<1x64xf32, #tpu.memory_space<vmem>>, %arg6: memref<64x64xbf16, #tpu.memory_space<vmem>>, %arg7: memref<1x64xf32, #tpu.memory_space<vmem>>, %arg8: memref<64x64xbf16, #tpu.memory_space<vmem>>, %arg9: memref<1x64xf32, #tpu.memory_space<vmem>>, %arg10: memref<64x64xbf16, #tpu.memory_space<vmem>>, %arg11: memref<1x64xf32, #tpu.memory_space<vmem>>, %arg12: memref<64x64xbf16, #tpu.memory_space<vmem>>, %arg13: memref<128x64xbf16, #tpu.memory_space<vmem>>, %arg14: memref<1x64xf32, #tpu.memory_space<vmem>>, %arg15: memref<64x64xbf16, #tpu.memory_space<vmem>>, %arg16: memref<1x64xf32, #tpu.memory_space<vmem>>, %arg17: memref<64x64xbf16, #tpu.memory_space<vmem>>, %arg18: memref<1x64xf32, #tpu.memory_space<vmem>>, %arg19: memref<64x64xbf16, #tpu.memory_space<vmem>>, %arg20: memref<1x64xf32, #tpu.memory_space<vmem>>, %arg21: memref<1x64xf32, #tpu.memory_space<vmem>>, %arg22: memref<1x1xf32, #tpu.memory_space<vmem>>, %arg23: memref<256x1xf32, #tpu.memory_space<vmem>>) attributes {dimension_semantics = [#tpu.dimension_semantics<parallel>], iteration_bounds = array<i64: 2>, scalar_prefetch = 0 : i64, scratch_operands = 0 : i64, tpu.core_type = #tpu.core_type<tc>, window_params = [{transform_indices = @transform_0, window_bounds = array<i64: 256, 3>}, {pipeline_mode = #tpu.pipeline_mode<synchronous>, transform_indices = @transform_1, window_bounds = array<i64: 3, 128>}, {pipeline_mode = #tpu.pipeline_mode<synchronous>, transform_indices = @transform_2, window_bounds = array<i64: 1, 128>}, {pipeline_mode = #tpu.pipeline_mode<synchronous>, transform_indices = @transform_3, window_bounds = array<i64: 128, 64>}, {pipeline_mode = #tpu.pipeline_mode<synchronous>, transform_indices = @transform_4, window_bounds = array<i64: 1, 64>}, {pipeline_mode = #tpu.pipeline_mode<synchronous>, transform_indices = @transform_5, window_bounds = array<i64: 64, 64>}, {pipeline_mode = #tpu.pipeline_mode<synchronous>, transform_indices = @transform_6, window_bounds = array<i64: 1, 64>}, {pipeline_mode = #tpu.pipeline_mode<synchronous>, transform_indices = @transform_7, window_bounds = array<i64: 64, 64>}, {pipeline_mode = #tpu.pipeline_mode<synchronous>, transform_indices = @transform_8, window_bounds = array<i64: 1, 64>}, {pipeline_mode = #tpu.pipeline_mode<synchronous>, transform_indices = @transform_9, window_bounds = array<i64: 64, 64>}, {pipeline_mode = #tpu.pipeline_mode<synchronous>, transform_indices = @transform_10, window_bounds = array<i64: 1, 64>}, {pipeline_mode = #tpu.pipeline_mode<synchronous>, transform_indices = @transform_11, window_bounds = array<i64: 64, 64>}, {pipeline_mode = #tpu.pipeline_mode<synchronous>, transform_indices = @transform_12, window_bounds = array<i64: 128, 64>}, {pipeline_mode = #tpu.pipeline_mode<synchronous>, transform_indices = @transform_13, window_bounds = array<i64: 1, 64>}, {pipeline_mode = #tpu.pipeline_mode<synchronous>, transform_indices = @transform_14, window_bounds = array<i64: 64, 64>}, {pipeline_mode = #tpu.pipeline_mode<synchronous>, transform_indices = @transform_15, window_bounds = array<i64: 1, 64>}, {pipeline_mode = #tpu.pipeline_mode<synchronous>, transform_indices = @transform_16, window_bounds = array<i64: 64, 64>}, {pipeline_mode = #tpu.pipeline_mode<synchronous>, transform_indices = @transform_17, window_bounds = array<i64: 1, 64>}, {pipeline_mode = #tpu.pipeline_mode<synchronous>, transform_indices = @transform_18, window_bounds = array<i64: 64, 64>}, {pipeline_mode = #tpu.pipeline_mode<synchronous>, transform_indices = @transform_19, window_bounds = array<i64: 1, 64>}, {pipeline_mode = #tpu.pipeline_mode<synchronous>, transform_indices = @transform_20, window_bounds = array<i64: 1, 64>}, {pipeline_mode = #tpu.pipeline_mode<synchronous>, transform_indices = @transform_21, window_bounds = array<i64: 1, 1>}, {transform_indices = @transform_22, window_bounds = array<i64: 256, 1>}]} {
    %c0 = arith.constant 0 : index
    %c0_0 = arith.constant 0 : index
    %0 = vector.load %arg1[%c0, %c0_0] : memref<256x3xf32, #tpu.memory_space<vmem>>, vector<256x3xf32>
    %c0_1 = arith.constant 0 : index
    %c0_2 = arith.constant 0 : index
    %1 = vector.load %arg2[%c0_1, %c0_2] : memref<3x128xf32, #tpu.memory_space<vmem>>, vector<3x128xf32>
    %2 = vector.extract_strided_slice %1 {offsets = [0, 0], sizes = [1, 128], strides = [1, 1]} : vector<3x128xf32> to vector<1x128xf32>
    %3 = vector.shape_cast %2 : vector<1x128xf32> to vector<1x128xf32>
    %4 = vector.broadcast %3 : vector<1x128xf32> to vector<256x128xf32>
    %5 = vector.extract_strided_slice %1 {offsets = [1, 0], sizes = [1, 128], strides = [1, 1]} : vector<3x128xf32> to vector<1x128xf32>
    %6 = vector.shape_cast %5 : vector<1x128xf32> to vector<1x128xf32>
    %7 = vector.broadcast %6 : vector<1x128xf32> to vector<256x128xf32>
    %8 = vector.extract_strided_slice %1 {offsets = [2, 0], sizes = [1, 128], strides = [1, 1]} : vector<3x128xf32> to vector<1x128xf32>
    %9 = vector.shape_cast %8 : vector<1x128xf32> to vector<1x128xf32>
    %10 = vector.broadcast %9 : vector<1x128xf32> to vector<256x128xf32>
    %c0_3 = arith.constant 0 : index
    %c0_4 = arith.constant 0 : index
    %11 = vector.load %arg3[%c0_3, %c0_4] : memref<1x128xf32, #tpu.memory_space<vmem>>, vector<1x128xf32>
    %12 = vector.shape_cast %11 : vector<1x128xf32> to vector<1x128xf32>
    %13 = vector.broadcast %12 : vector<1x128xf32> to vector<256x128xf32>
    %14 = vector.extract_strided_slice %0 {offsets = [0, 0], sizes = [256, 1], strides = [1, 1]} : vector<256x3xf32> to vector<256x1xf32>
    %15 = vector.broadcast %14 : vector<256x1xf32> to vector<256x128xf32>
    %16 = arith.mulf %15, %4 : vector<256x128xf32>
    %17 = vector.extract_strided_slice %0 {offsets = [0, 1], sizes = [256, 1], strides = [1, 1]} : vector<256x3xf32> to vector<256x1xf32>
    %18 = vector.broadcast %17 : vector<256x1xf32> to vector<256x128xf32>
    %19 = arith.mulf %18, %7 : vector<256x128xf32>
    %20 = arith.addf %16, %19 : vector<256x128xf32>
    %21 = vector.extract_strided_slice %0 {offsets = [0, 2], sizes = [256, 1], strides = [1, 1]} : vector<256x3xf32> to vector<256x1xf32>
    %22 = vector.broadcast %21 : vector<256x1xf32> to vector<256x128xf32>
    %23 = arith.mulf %22, %10 : vector<256x128xf32>
    %24 = arith.addf %20, %23 : vector<256x128xf32>
    %25 = arith.addf %24, %13 : vector<256x128xf32>
    %26 = math.sin %25 : vector<256x128xf32>
    %27 = arith.truncf %26 : vector<256x128xf32> to vector<256x128xbf16>
    %c0_5 = arith.constant 0 : index
    %c0_6 = arith.constant 0 : index
    %28 = vector.load %arg4[%c0_5, %c0_6] : memref<128x64xbf16, #tpu.memory_space<vmem>>, vector<128x64xbf16>
    %cst = arith.constant dense<0.000000e+00> : vector<256x64xf32>
    %29 = tpu.matmul %27, %28, %cst {dimension_numbers = #tpu.dot_dimension_numbers<[1], [0], [0], [1], [0, 0, 1, 1], [], []>} : vector<256x128xbf16>, vector<128x64xbf16>, vector<256x64xf32> -> vector<256x64xf32>
    %c0_7 = arith.constant 0 : index
    %c0_8 = arith.constant 0 : index
    %30 = vector.load %arg5[%c0_7, %c0_8] : memref<1x64xf32, #tpu.memory_space<vmem>>, vector<1x64xf32>
    %31 = vector.broadcast %30 : vector<1x64xf32> to vector<256x64xf32>
    %32 = arith.addf %29, %31 : vector<256x64xf32>
    %cst_9 = arith.constant 0.000000e+00 : f32
    %33 = vector.broadcast %cst_9 : f32 to vector<256x64xf32>
    %34 = arith.maximumf %32, %33 : vector<256x64xf32>
    %35 = arith.truncf %34 : vector<256x64xf32> to vector<256x64xbf16>
    %c0_10 = arith.constant 0 : index
    %c0_11 = arith.constant 0 : index
    %36 = vector.load %arg6[%c0_10, %c0_11] : memref<64x64xbf16, #tpu.memory_space<vmem>>, vector<64x64xbf16>
    %cst_12 = arith.constant dense<0.000000e+00> : vector<256x64xf32>
    %37 = tpu.matmul %35, %36, %cst_12 {dimension_numbers = #tpu.dot_dimension_numbers<[1], [0], [0], [1], [0, 0, 1, 1], [], []>} : vector<256x64xbf16>, vector<64x64xbf16>, vector<256x64xf32> -> vector<256x64xf32>
    %c0_13 = arith.constant 0 : index
    %c0_14 = arith.constant 0 : index
    %38 = vector.load %arg7[%c0_13, %c0_14] : memref<1x64xf32, #tpu.memory_space<vmem>>, vector<1x64xf32>
    %39 = vector.broadcast %38 : vector<1x64xf32> to vector<256x64xf32>
    %40 = arith.addf %37, %39 : vector<256x64xf32>
    %cst_15 = arith.constant 0.000000e+00 : f32
    %41 = vector.broadcast %cst_15 : f32 to vector<256x64xf32>
    %42 = arith.maximumf %40, %41 : vector<256x64xf32>
    %43 = arith.truncf %42 : vector<256x64xf32> to vector<256x64xbf16>
    %c0_16 = arith.constant 0 : index
    %c0_17 = arith.constant 0 : index
    %44 = vector.load %arg8[%c0_16, %c0_17] : memref<64x64xbf16, #tpu.memory_space<vmem>>, vector<64x64xbf16>
    %cst_18 = arith.constant dense<0.000000e+00> : vector<256x64xf32>
    %45 = tpu.matmul %43, %44, %cst_18 {dimension_numbers = #tpu.dot_dimension_numbers<[1], [0], [0], [1], [0, 0, 1, 1], [], []>} : vector<256x64xbf16>, vector<64x64xbf16>, vector<256x64xf32> -> vector<256x64xf32>
    %c0_19 = arith.constant 0 : index
    %c0_20 = arith.constant 0 : index
    %46 = vector.load %arg9[%c0_19, %c0_20] : memref<1x64xf32, #tpu.memory_space<vmem>>, vector<1x64xf32>
    %47 = vector.broadcast %46 : vector<1x64xf32> to vector<256x64xf32>
    %48 = arith.addf %45, %47 : vector<256x64xf32>
    %cst_21 = arith.constant 0.000000e+00 : f32
    %49 = vector.broadcast %cst_21 : f32 to vector<256x64xf32>
    %50 = arith.maximumf %48, %49 : vector<256x64xf32>
    %51 = arith.truncf %50 : vector<256x64xf32> to vector<256x64xbf16>
    %c0_22 = arith.constant 0 : index
    %c0_23 = arith.constant 0 : index
    %52 = vector.load %arg10[%c0_22, %c0_23] : memref<64x64xbf16, #tpu.memory_space<vmem>>, vector<64x64xbf16>
    %cst_24 = arith.constant dense<0.000000e+00> : vector<256x64xf32>
    %53 = tpu.matmul %51, %52, %cst_24 {dimension_numbers = #tpu.dot_dimension_numbers<[1], [0], [0], [1], [0, 0, 1, 1], [], []>} : vector<256x64xbf16>, vector<64x64xbf16>, vector<256x64xf32> -> vector<256x64xf32>
    %c0_25 = arith.constant 0 : index
    %c0_26 = arith.constant 0 : index
    %54 = vector.load %arg11[%c0_25, %c0_26] : memref<1x64xf32, #tpu.memory_space<vmem>>, vector<1x64xf32>
    %55 = vector.broadcast %54 : vector<1x64xf32> to vector<256x64xf32>
    %56 = arith.addf %53, %55 : vector<256x64xf32>
    %cst_27 = arith.constant 0.000000e+00 : f32
    %57 = vector.broadcast %cst_27 : f32 to vector<256x64xf32>
    %58 = arith.maximumf %56, %57 : vector<256x64xf32>
    %59 = arith.truncf %58 : vector<256x64xf32> to vector<256x64xbf16>
    %c0_28 = arith.constant 0 : index
    %c0_29 = arith.constant 0 : index
    %60 = vector.load %arg12[%c0_28, %c0_29] : memref<64x64xbf16, #tpu.memory_space<vmem>>, vector<64x64xbf16>
    %cst_30 = arith.constant dense<0.000000e+00> : vector<256x64xf32>
    %61 = tpu.matmul %59, %60, %cst_30 {dimension_numbers = #tpu.dot_dimension_numbers<[1], [0], [0], [1], [0, 0, 1, 1], [], []>} : vector<256x64xbf16>, vector<64x64xbf16>, vector<256x64xf32> -> vector<256x64xf32>
    %c0_31 = arith.constant 0 : index
    %c0_32 = arith.constant 0 : index
    %62 = vector.load %arg13[%c0_31, %c0_32] : memref<128x64xbf16, #tpu.memory_space<vmem>>, vector<128x64xbf16>
    %cst_33 = arith.constant dense<0.000000e+00> : vector<256x64xf32>
    %63 = tpu.matmul %27, %62, %cst_33 {dimension_numbers = #tpu.dot_dimension_numbers<[1], [0], [0], [1], [0, 0, 1, 1], [], []>} : vector<256x128xbf16>, vector<128x64xbf16>, vector<256x64xf32> -> vector<256x64xf32>
    %64 = arith.addf %61, %63 : vector<256x64xf32>
    %c0_34 = arith.constant 0 : index
    %c0_35 = arith.constant 0 : index
    %65 = vector.load %arg14[%c0_34, %c0_35] : memref<1x64xf32, #tpu.memory_space<vmem>>, vector<1x64xf32>
    %66 = vector.broadcast %65 : vector<1x64xf32> to vector<256x64xf32>
    %67 = arith.addf %64, %66 : vector<256x64xf32>
    %cst_36 = arith.constant 0.000000e+00 : f32
    %68 = vector.broadcast %cst_36 : f32 to vector<256x64xf32>
    %69 = arith.maximumf %67, %68 : vector<256x64xf32>
    %70 = arith.truncf %69 : vector<256x64xf32> to vector<256x64xbf16>
    %c0_37 = arith.constant 0 : index
    %c0_38 = arith.constant 0 : index
    %71 = vector.load %arg15[%c0_37, %c0_38] : memref<64x64xbf16, #tpu.memory_space<vmem>>, vector<64x64xbf16>
    %cst_39 = arith.constant dense<0.000000e+00> : vector<256x64xf32>
    %72 = tpu.matmul %70, %71, %cst_39 {dimension_numbers = #tpu.dot_dimension_numbers<[1], [0], [0], [1], [0, 0, 1, 1], [], []>} : vector<256x64xbf16>, vector<64x64xbf16>, vector<256x64xf32> -> vector<256x64xf32>
    %c0_40 = arith.constant 0 : index
    %c0_41 = arith.constant 0 : index
    %73 = vector.load %arg16[%c0_40, %c0_41] : memref<1x64xf32, #tpu.memory_space<vmem>>, vector<1x64xf32>
    %74 = vector.broadcast %73 : vector<1x64xf32> to vector<256x64xf32>
    %75 = arith.addf %72, %74 : vector<256x64xf32>
    %cst_42 = arith.constant 0.000000e+00 : f32
    %76 = vector.broadcast %cst_42 : f32 to vector<256x64xf32>
    %77 = arith.maximumf %75, %76 : vector<256x64xf32>
    %78 = arith.truncf %77 : vector<256x64xf32> to vector<256x64xbf16>
    %c0_43 = arith.constant 0 : index
    %c0_44 = arith.constant 0 : index
    %79 = vector.load %arg17[%c0_43, %c0_44] : memref<64x64xbf16, #tpu.memory_space<vmem>>, vector<64x64xbf16>
    %cst_45 = arith.constant dense<0.000000e+00> : vector<256x64xf32>
    %80 = tpu.matmul %78, %79, %cst_45 {dimension_numbers = #tpu.dot_dimension_numbers<[1], [0], [0], [1], [0, 0, 1, 1], [], []>} : vector<256x64xbf16>, vector<64x64xbf16>, vector<256x64xf32> -> vector<256x64xf32>
    %c0_46 = arith.constant 0 : index
    %c0_47 = arith.constant 0 : index
    %81 = vector.load %arg18[%c0_46, %c0_47] : memref<1x64xf32, #tpu.memory_space<vmem>>, vector<1x64xf32>
    %82 = vector.broadcast %81 : vector<1x64xf32> to vector<256x64xf32>
    %83 = arith.addf %80, %82 : vector<256x64xf32>
    %cst_48 = arith.constant 0.000000e+00 : f32
    %84 = vector.broadcast %cst_48 : f32 to vector<256x64xf32>
    %85 = arith.maximumf %83, %84 : vector<256x64xf32>
    %86 = arith.truncf %85 : vector<256x64xf32> to vector<256x64xbf16>
    %c0_49 = arith.constant 0 : index
    %c0_50 = arith.constant 0 : index
    %87 = vector.load %arg19[%c0_49, %c0_50] : memref<64x64xbf16, #tpu.memory_space<vmem>>, vector<64x64xbf16>
    %cst_51 = arith.constant dense<0.000000e+00> : vector<256x64xf32>
    %88 = tpu.matmul %86, %87, %cst_51 {dimension_numbers = #tpu.dot_dimension_numbers<[1], [0], [0], [1], [0, 0, 1, 1], [], []>} : vector<256x64xbf16>, vector<64x64xbf16>, vector<256x64xf32> -> vector<256x64xf32>
    %c0_52 = arith.constant 0 : index
    %c0_53 = arith.constant 0 : index
    %89 = vector.load %arg20[%c0_52, %c0_53] : memref<1x64xf32, #tpu.memory_space<vmem>>, vector<1x64xf32>
    %90 = vector.broadcast %89 : vector<1x64xf32> to vector<256x64xf32>
    %91 = arith.addf %88, %90 : vector<256x64xf32>
    %cst_54 = arith.constant 0.000000e+00 : f32
    %92 = vector.broadcast %cst_54 : f32 to vector<256x64xf32>
    %93 = arith.maximumf %91, %92 : vector<256x64xf32>
    %c0_55 = arith.constant 0 : index
    %c0_56 = arith.constant 0 : index
    %94 = vector.load %arg21[%c0_55, %c0_56] : memref<1x64xf32, #tpu.memory_space<vmem>>, vector<1x64xf32>
    %95 = vector.broadcast %94 : vector<1x64xf32> to vector<256x64xf32>
    %96 = arith.mulf %93, %95 : vector<256x64xf32>
    %cst_57 = arith.constant dense<0.000000e+00> : vector<256xf32>
    %97 = vector.multi_reduction <add>, %96, %cst_57 [1] : vector<256x64xf32> to vector<256xf32>
    %98 = vector.shape_cast %97 : vector<256xf32> to vector<256x1xf32>
    %c0_58 = arith.constant 0 : index
    %c0_59 = arith.constant 0 : index
    %99 = vector.load %arg22[%c0_58, %c0_59] : memref<1x1xf32, #tpu.memory_space<vmem>>, vector<1x1xf32>
    %100 = vector.broadcast %99 : vector<1x1xf32> to vector<256x1xf32>
    %101 = arith.addf %98, %100 : vector<256x1xf32>
    %102 = math.tanh %101 : vector<256x1xf32>
    %c0_60 = arith.constant 0 : index
    %c0_61 = arith.constant 0 : index
    %103 = vector.load %arg23[%c0_60, %c0_61] : memref<256x1xf32, #tpu.memory_space<vmem>>, vector<256x1xf32>
    tpu.vector_store %arg23[%c0_60, %c0_61], %102 {strides = array<i32>} : memref<256x1xf32, #tpu.memory_space<vmem>>, vector<256x1xf32>,
    return
  }
  func.func @transform_0(%arg0: i32) -> (i32, i32) {
    %c0_i32 = arith.constant 0 : i32
    %c0_i32_0 = arith.constant 0 : i32
    return %arg0, %c0_i32 : i32, i32
  }
  func.func @transform_1(%arg0: i32) -> (i32, i32) {
    %c0_i32 = arith.constant 0 : i32
    %c0_i32_0 = arith.constant 0 : i32
    %c0_i32_1 = arith.constant 0 : i32
    return %c0_i32, %c0_i32_0 : i32, i32
  }
  func.func @transform_2(%arg0: i32) -> (i32, i32) {
    %c0_i32 = arith.constant 0 : i32
    %c0_i32_0 = arith.constant 0 : i32
    %c0_i32_1 = arith.constant 0 : i32
    return %c0_i32, %c0_i32_0 : i32, i32
  }
  func.func @transform_3(%arg0: i32) -> (i32, i32) {
    %c0_i32 = arith.constant 0 : i32
    %c0_i32_0 = arith.constant 0 : i32
    %c0_i32_1 = arith.constant 0 : i32
    return %c0_i32, %c0_i32_0 : i32, i32
  }
  func.func @transform_4(%arg0: i32) -> (i32, i32) {
    %c0_i32 = arith.constant 0 : i32
    %c0_i32_0 = arith.constant 0 : i32
    %c0_i32_1 = arith.constant 0 : i32
    return %c0_i32, %c0_i32_0 : i32, i32
  }
  func.func @transform_5(%arg0: i32) -> (i32, i32) {
    %c0_i32 = arith.constant 0 : i32
    %c0_i32_0 = arith.constant 0 : i32
    %c0_i32_1 = arith.constant 0 : i32
    return %c0_i32, %c0_i32_0 : i32, i32
  }
  func.func @transform_6(%arg0: i32) -> (i32, i32) {
    %c0_i32 = arith.constant 0 : i32
    %c0_i32_0 = arith.constant 0 : i32
    %c0_i32_1 = arith.constant 0 : i32
    return %c0_i32, %c0_i32_0 : i32, i32
  }
  func.func @transform_7(%arg0: i32) -> (i32, i32) {
    %c0_i32 = arith.constant 0 : i32
    %c0_i32_0 = arith.constant 0 : i32
    %c0_i32_1 = arith.constant 0 : i32
    return %c0_i32, %c0_i32_0 : i32, i32
  }
  func.func @transform_8(%arg0: i32) -> (i32, i32) {
    %c0_i32 = arith.constant 0 : i32
    %c0_i32_0 = arith.constant 0 : i32
    %c0_i32_1 = arith.constant 0 : i32
    return %c0_i32, %c0_i32_0 : i32, i32
  }
  func.func @transform_9(%arg0: i32) -> (i32, i32) {
    %c0_i32 = arith.constant 0 : i32
    %c0_i32_0 = arith.constant 0 : i32
    %c0_i32_1 = arith.constant 0 : i32
    return %c0_i32, %c0_i32_0 : i32, i32
  }
  func.func @transform_10(%arg0: i32) -> (i32, i32) {
    %c0_i32 = arith.constant 0 : i32
    %c0_i32_0 = arith.constant 0 : i32
    %c0_i32_1 = arith.constant 0 : i32
    return %c0_i32, %c0_i32_0 : i32, i32
  }
  func.func @transform_11(%arg0: i32) -> (i32, i32) {
    %c0_i32 = arith.constant 0 : i32
    %c0_i32_0 = arith.constant 0 : i32
    %c0_i32_1 = arith.constant 0 : i32
    return %c0_i32, %c0_i32_0 : i32, i32
  }
  func.func @transform_12(%arg0: i32) -> (i32, i32) {
    %c0_i32 = arith.constant 0 : i32
    %c0_i32_0 = arith.constant 0 : i32
    %c0_i32_1 = arith.constant 0 : i32
    return %c0_i32, %c0_i32_0 : i32, i32
  }
  func.func @transform_13(%arg0: i32) -> (i32, i32) {
    %c0_i32 = arith.constant 0 : i32
    %c0_i32_0 = arith.constant 0 : i32
    %c0_i32_1 = arith.constant 0 : i32
    return %c0_i32, %c0_i32_0 : i32, i32
  }
  func.func @transform_14(%arg0: i32) -> (i32, i32) {
    %c0_i32 = arith.constant 0 : i32
    %c0_i32_0 = arith.constant 0 : i32
    %c0_i32_1 = arith.constant 0 : i32
    return %c0_i32, %c0_i32_0 : i32, i32
  }
  func.func @transform_15(%arg0: i32) -> (i32, i32) {
    %c0_i32 = arith.constant 0 : i32
    %c0_i32_0 = arith.constant 0 : i32
    %c0_i32_1 = arith.constant 0 : i32
    return %c0_i32, %c0_i32_0 : i32, i32
  }
  func.func @transform_16(%arg0: i32) -> (i32, i32) {
    %c0_i32 = arith.constant 0 : i32
    %c0_i32_0 = arith.constant 0 : i32
    %c0_i32_1 = arith.constant 0 : i32
    return %c0_i32, %c0_i32_0 : i32, i32
  }
  func.func @transform_17(%arg0: i32) -> (i32, i32) {
    %c0_i32 = arith.constant 0 : i32
    %c0_i32_0 = arith.constant 0 : i32
    %c0_i32_1 = arith.constant 0 : i32
    return %c0_i32, %c0_i32_0 : i32, i32
  }
  func.func @transform_18(%arg0: i32) -> (i32, i32) {
    %c0_i32 = arith.constant 0 : i32
    %c0_i32_0 = arith.constant 0 : i32
    %c0_i32_1 = arith.constant 0 : i32
    return %c0_i32, %c0_i32_0 : i32, i32
  }
  func.func @transform_19(%arg0: i32) -> (i32, i32) {
    %c0_i32 = arith.constant 0 : i32
    %c0_i32_0 = arith.constant 0 : i32
    %c0_i32_1 = arith.constant 0 : i32
    return %c0_i32, %c0_i32_0 : i32, i32
  }
  func.func @transform_20(%arg0: i32) -> (i32, i32) {
    %c0_i32 = arith.constant 0 : i32
    %c0_i32_0 = arith.constant 0 : i32
    %c0_i32_1 = arith.constant 0 : i32
    return %c0_i32, %c0_i32_0 : i32, i32
  }
  func.func @transform_21(%arg0: i32) -> (i32, i32) {
    %c0_i32 = arith.constant 0 : i32
    %c0_i32_0 = arith.constant 0 : i32
    %c0_i32_1 = arith.constant 0 : i32
    return %c0_i32, %c0_i32_0 : i32, i32
  }
  func.func @transform_22(%arg0: i32) -> (i32, i32) {
    %c0_i32 = arith.constant 0 : i32
    %c0_i32_0 = arith.constant 0 : i32
    return %arg0, %c0_i32 : i32, i32
  }
}

</mosaic_0001>

<bundles_post_ra>
// kernel: tpu_custom_call.1
= control target key start
LH: loop header
LB: loop body
LE: loop exit
PB: predicated region body
PF: predicated region fallthrough
CT: control target
= control target key end

     0   :  { %s9057_s29 = smov 0   ;;  %s14463_s0 = inlined_call_operand.vmem [shape: f32[512,3], index: 0, kind: input, shape index: {}]   ;;  %s14464_s1 = inlined_call_operand.vmem [shape: f32[3,128], index: 1, kind: input, shape index: {}]   ;;  %s14465_s2 = inlined_call_operand.vmem [shape: f32[1,128], index: 2, kind: input, shape index: {}]   ;;  %s14466_s3 = inlined_call_operand.vmem [shape: bf16[128,64], index: 3, kind: input, shape index: {}]   ;;  %s14467_s4 = inlined_call_operand.vmem [shape: f32[1,64], index: 4, kind: input, shape index: {}]   ;;  %s14468_s5 = inlined_call_operand.vmem [shape: bf16[64,64], index: 5, kind: input, shape index: {}]   ;;  %s14469_s6 = inlined_call_operand.vmem [shape: f32[1,64], index: 6, kind: input, shape index: {}]   ;;  %s14470_s7 = inlined_call_operand.vmem [shape: bf16[64,64], index: 7, kind: input, shape index: {}]   ;;  %s14471_s8 = inlined_call_operand.vmem [shape: f32[1,64], index: 8, kind: input, shape index: {}]   ;;  %s14472_s9 = inlined_call_operand.vmem [shape: bf16[64,64], index: 9, kind: input, shape index: {}]   ;;  %s14473_s10 = inlined_call_operand.vmem [shape: f32[1,64], index: 10, kind: input, shape index: {}]   ;;  %s14474_s11 = inlined_call_operand.vmem [shape: bf16[64,64], index: 11, kind: input, shape index: {}]   ;;  %s14475_s12 = inlined_call_operand.vmem [shape: bf16[128,64], index: 12, kind: input, shape index: {}]   ;;  %s14476_s13 = inlined_call_operand.vmem [shape: f32[1,64], index: 13, kind: input, shape index: {}]   ;;  %s14477_s14 = inlined_call_operand.vmem [shape: bf16[64,64], index: 14, kind: input, shape index: {}]   ;;  %s14478_s15 = inlined_call_operand.vmem [shape: f32[1,64], index: 15, kind: input, shape index: {}]   ;;  %s14479_s16 = inlined_call_operand.vmem [shape: bf16[64,64], index: 16, kind: input, shape index: {}]   ;;  %s14480_s17 = inlined_call_operand.vmem [shape: f32[1,64], index: 17, kind: input, shape index: {}]   ;;  %s14481_s18 = inlined_call_operand.vmem [shape: bf16[64,64], index: 18, kind: input, shape index: {}]   ;;  %s14482_s19 = inlined_call_operand.vmem [shape: f32[1,64], index: 19, kind: input, shape index: {}]   ;;  %s14483_s20 = inlined_call_operand.vmem [shape: f32[1,64], index: 20, kind: input, shape index: {}]   ;;  %s14484_s21 = inlined_call_operand.<no memory space> [shape: f32[1,1], index: 21, kind: input, shape index: {}]   ;;  %s14485_s22 = inlined_call_operand.vmem [shape: f32[512,1], index: 22, kind: output, shape index: {}]  }
   0x1   :  { %14732 = sst [smem:[#allocation59_spill]] %s14463_s0  ;;  %v27_v0 = vstv %s14484_s21 }
   0x2   :  { %14733 = sst [smem:[#allocation60_spill]] %s14464_s1  ;;  %28 = vst [vmem:[#allocation2] sm:$0x1] %v27_v0 }
   0x3   :  { %14734 = sst [smem:[#allocation61_spill]] %s14465_s2 }
   0x4   :  { %14735 = sst [smem:[#allocation62_spill]] %s14466_s3 }
   0x5   :  { %14736 = sst [smem:[#allocation63_spill]] %s14467_s4 }
   0x6   :  { %14737 = sst [smem:[#allocation64_spill]] %s14468_s5 }
   0x7   :  { %14738 = sst [smem:[#allocation65_spill]] %s14469_s6 }
   0x8 LB: > { %s7583_s30 = sadd.s32 4294967295, %s8928_s29   ;;  %p7587_p0 = scmp.ge.s32.totalorder %s8928_s29, 1  ;;  %s8928_s29 = sphi %s9057_s29, %s34_s29  }
   0x9   : > { %p615_p1 = scmp.lt.s32.totalorder %s8928_s29, 3 }
   0xb   : > { %p616_p2 = pnand %p7587_p0, %p615_p1 }
   0xd   : > { %619 = sbr.rel (%p616_p2) target bundleno = 3030 (0xbd6), region = 108 }
  0x14   : > { %s7588_s4 = sshll.u32 %s7583_s30, 5  ;;  %v14504_v1 = vmov 1   ;;  %s14739_s1 = sld [smem:[#allocation59_spill]]  ;;  %v14500_v8 = vmov 0   ;;  %v14489_v9 = vmov 2   ;;  %v723_v43 = vlaneseq }
  0x15   : > { %8640 = vset.pattern.permute.xlu0 %v14504_v1  ;;  %8638 = vset.pattern.permute.xlu1 %v14504_v1  ;;  %p678_p3 = scmp.lt.s32.totalorder %s7588_s4, 63  ;;  %s14741_s25 = sld [smem:[#allocation62_spill]] }
  0x16   : > { %v724_v46 = vshrl.u32 %v723_v43, 7  ;;  %s14744_s2 = sld [smem:[#allocation60_spill]]  ;;  %s15147_s23 = sld [smem:[#allocation64_spill]] }
  0x17   : > { %s15185_s4 = smov (!%p678_p3, %s7588_s4), 63  ;;  %s15166_s30 = sld [smem:[#allocation63_spill]] }
  0x18   : > { %s7589_s21 = sshll.u32 %s15185_s4, 3  ;;  %v729_v52 = vsub.s32 1, %v724_v46  ;;  %v725_v53 = vsub.s32 0, %v724_v46  ;;  %v733_v57 = vsub.s32 2, %v724_v46  ;;  %s15170_s0 = sld [smem:[#allocation65_spill]] }
  0x19   : > { %s14355_s6 = scalar_lea.vmem %s14485_s22, %s7589_s21 }
  0x1a   : > { %s9075_s5 = scalar_lea.vmem %s14739_s1, %s7589_s21  ;;  %s14746_s1 = sld [smem:[#allocation61_spill]] }
  0x1b   : > { %v692_v2 = vld [vmem:[%s9075_s5 + $0x10] sm:$0xff]  ;;  %v690_v3 = vld [vmem:[%s9075_s5] sm:$0xff]  ;;  %v695_v4 = vld [vmem:[%s9075_s5 + $0x28] sm:$0xff] }
  0x1c   : > { %943 = vperm.xlu0 %8640, %v692_v2   ;;  %935 = vperm.xlu1 %8638, %v690_v3   ;;  %v691_v5 = vld [vmem:[%s9075_s5 + $0x8] sm:$0xff]  ;;  %v696_v6 = vld [vmem:[%s9075_s5 + $0x30] sm:$0xff]  ;;  %v693_v7 = vld [vmem:[%s9075_s5 + $0x18] sm:$0xff] }
  0x1d   : > { %v694_v10 = vld [vmem:[%s9075_s5 + $0x20] sm:$0xff]  ;;  %v697_v11 = vld [vmem:[%s9075_s5 + $0x38] sm:$0xff]  ;;  %v699_v12 = vld [vmem:[%s9075_s5 + $0x48] sm:$0xff] }
  0x1e   : > { %v9091_v13 = vld [vmem:[%s9075_s5 + $0x60] sm:$0xff]  ;;  %v9094_v14 = vld [vmem:[%s9075_s5 + $0x78] sm:$0xff]  ;;  %v9100_v15 = vld [vmem:[%s9075_s5 + $0x88] sm:$0xff] }
  0x1f   : > { %v9105_v16 = vld [vmem:[%s9075_s5 + $0xa0] sm:$0xff]  ;;  %v9110_v17 = vld [vmem:[%s9075_s5 + $0xb8] sm:$0xff]  ;;  %v9114_v18 = vld [vmem:[%s9075_s5 + $0xc8] sm:$0xff] }
  0x20   : > { %955 = vperm.xlu0 %8640, %v695_v4   ;;  %939 = vperm.xlu1 %8638, %v691_v5   ;;  %v698_v19 = vld [vmem:[%s9075_s5 + $0x40] sm:$0xff]  ;;  %v700_v20 = vld [vmem:[%s9075_s5 + $0x50] sm:$0xff]  ;;  %v701_v21 = vld [vmem:[%s9075_s5 + $0x58] sm:$0xff] }
  0x21   : > { %v9130_v22 = vld [vmem:[%s9075_s5 + $0x90] sm:$0xff]  ;;  %v9141_v24 = vld [vmem:[%s9075_s5 + $0xe0] sm:$0xff]  ;;  %v703_v25 = vld [vmem:[%s9075_s5 + $0x68] sm:$0xff] }
  0x22   : > { %v9137_v23 = vld [vmem:[%s9075_s5 + $0xd0] sm:$0xff]  ;;  %14740 = vst [vmem:[#allocation3_spill] sm:$0xff] %v9141_v24  ;;  %v9155_v27 = vld [vmem:[%s9075_s5 + $0xa8] sm:$0xff]  ;;  %v8682_v31 = vld [vmem:[%s14741_s25] sm:$0xff]  }
  0x23   : > { %v704_v26 = vld [vmem:[%s9075_s5 + $0x70] sm:$0xff]  ;;  %8077 = vmatprep.subr.bf16.mxu0 %v8682_v31  ;;  %v706_v34 = vld [vmem:[%s9075_s5 + $0x80] sm:$0xff]  ;;  %v9178_v35 = vld [vmem:[%s9075_s5 + $0xe8] sm:$0xff] }
  0x24   : > { %959 = vperm.xlu0 %8640, %v696_v6   ;;  %8639 = vset.pattern.permute.xlu1 %v14500_v8  ;;  %v9160_v28 = vld [vmem:[%s9075_s5 + $0xb0] sm:$0xff]  ;;  %v8683_v36 = vld [vmem:[%s14741_s25 + $0x8] sm:$0xff]   ;;  %v8685_v44 = vld [vmem:[%s14741_s25 + $0x18] sm:$0xff]  }
  0x25   : > { %759 = vperm.xlu1 %8639, %v693_v7   ;;  %8078 = vmatpush3.bf16.msra.mxu0 %v8682_v31  ;;  %v9188_v39 = vld [vmem:[%s9075_s5 + $0xf0] sm:$0xff]  ;;  %v709_v48 = vld [vmem:[%s9075_s5 + $0x98] sm:$0xff]  ;;  %v8686_v49 = vld [vmem:[%s14741_s25 + $0x20] sm:$0xff]  }
  0x26   : > { %14742 = vst [vmem:[#allocation4_spill] sm:$0xff] %v9188_v39  ;;  %8079 = vmatprep.subr.bf16.mxu0 %v8683_v36  ;;  %v8684_v40 = vld [vmem:[%s14741_s25 + $0x10] sm:$0xff]   ;;  %v9212_v50 = vld [vmem:[%s9075_s5 + $0xf8] sm:$0xff]  ;;  %v8687_v55 = vld [vmem:[%s14741_s25 + $0x28] sm:$0xff]  }
  0x27   : > { %14743 = vst [vmem:[#allocation5_spill] sm:$0xff] %v9212_v50  ;;  %v722_v56 = vld [vmem:[%s14744_s2] sm:$0x7]  ;;  %v8688_v62 = vld [vmem:[%s14741_s25 + $0x30] sm:$0xff]  }
  0x28   : > { %8646 = vset.pattern.permute.xlu0 %v14489_v9  ;;  %v9229_v59 = vrot.slane %v722_v56, %v729_v52  ;;  %v9231_v60 = vrot.slane %v722_v56, %v725_v53  ;;  %v9236_v63 = vrot.slane %v722_v56, %v733_v57 }
  0x29   : > { %1131 = vperm.xlu0 %8646, %v691_v5   ;;  %8641 = vset.pattern.permute.xlu1 %v14504_v1 }
  0x2a   : > { %947 = vperm.xlu1 %8641, %v693_v7   ;;  %8080 = vmatpush3.bf16.msra.mxu0 %v8683_v36  ;;  %14745 = vst [vmem:[#allocation6_spill] sm:$0xff] %v9236_v63 }
  0x2b   : > { %8081 = vmatprep.subr.bf16.mxu0 %v8684_v40 }
  0x2d   : > { %1143 = vperm.xlu0 %8646, %v694_v10  }
  0x2e   : > { %8642 = vset.pattern.permute.xlu1 %v14489_v9  ;;  %8082 = vmatpush3.bf16.msra.mxu0 %v8684_v40 }
  0x2f   : > { %1127 = vperm.xlu1 %8642, %v690_v3   ;;  %8083 = vmatprep.subr.bf16.mxu0 %v8685_v44 }
  0x31   : > { %1155 = vperm.xlu0 %8646, %v697_v11  }
  0x32   : > { %8084 = vmatpush3.bf16.msra.mxu0 %v8685_v44 }
  0x33   : > { %1135 = vperm.xlu1 %8642, %v692_v2   ;;  %8085 = vmatprep.subr.bf16.mxu0 %v8686_v49 }
  0x35   : > { %1163 = vperm.xlu0 %8646, %v699_v12  }
  0x36   : > { %8086 = vmatpush3.bf16.msra.mxu0 %v8686_v49 }
  0x37   : > { %1139 = vperm.xlu1 %8642, %v693_v7   ;;  %8087 = vmatprep.subr.bf16.mxu0 %v8687_v55 }
  0x39   : > { %1175 = vperm.xlu0 %8646, %v9091_v13  }
  0x3a   : > { %8088 = vmatpush3.bf16.msra.mxu0 %v8687_v55 }
  0x3b   : > { %8643 = vset.pattern.permute.xlu1 %v14500_v8  ;;  %8089 = vmatprep.subr.bf16.mxu0 %v8688_v62 }
  0x3c   : > { %769 = vperm.xlu1 %8643, %v695_v4  }
  0x3d   : > { %1187 = vperm.xlu0 %8646, %v9094_v14  }
  0x3e   : > { %8090 = vmatpush3.bf16.msra.mxu0 %v8688_v62 }
  0x40   : > { %8644 = vset.pattern.permute.xlu1 %v14504_v1 }
  0x41   : > { %1195 = vperm.xlu0 %8646, %v9100_v15   ;;  %951 = vperm.xlu1 %8644, %v694_v10  }
  0x45   : > { %1207 = vperm.xlu0 %8646, %v9105_v16   ;;  %8645 = vset.pattern.permute.xlu1 %v14500_v8 }
  0x46   : > { %774 = vperm.xlu1 %8645, %v696_v6  }
  0x49   : > { %1219 = vperm.xlu0 %8646, %v9110_v17  }
  0x4a   : > { %779 = vperm.xlu1 %8645, %v697_v11  }
  0x4d   : > { %1227 = vperm.xlu0 %8646, %v9114_v18  }
  0x4e   : > { %8647 = vset.pattern.permute.xlu1 %v14504_v1 }
  0x4f   : > { %963 = vperm.xlu1 %8647, %v697_v11  }
  0x51   : > { %8674 = vset.pattern.permute.xlu0 %v14500_v8 }
  0x52   : > { %744 = vperm.xlu0 %8674, %v690_v3  }
  0x53   : > { %8648 = vset.pattern.permute.xlu1 %v14489_v9 }
  0x54   : > { %1147 = vperm.xlu1 %8648, %v695_v4  }
  0x56   : > { %749 = vperm.xlu0 %8674, %v691_v5   ;;  %v8689_v5 = vld [vmem:[%s14741_s25 + $0x38] sm:$0xff]  }
  0x57   : > { %8091 = vmatprep.subr.bf16.mxu0 %v8689_v5 }
  0x58   : > { %1151 = vperm.xlu1 %8648, %v696_v6   ;;  %8092 = vmatpush3.bf16.msra.mxu0 %v8689_v5 }
  0x5a   : > { %754 = vperm.xlu0 %8674, %v692_v2  }
  0x5c   : > { %8649 = vset.pattern.permute.xlu1 %v14500_v8 }
  0x5d   : > { %784 = vperm.xlu1 %8649, %v698_v19  }
  0x5e   : > { %764 = vperm.xlu0 %8674, %v694_v10  }
  0x61   : > { %8650 = vset.pattern.permute.xlu1 %v14504_v1 }
  0x62   : > { %789 = vperm.xlu0 %8674, %v699_v12   ;;  %967 = vperm.xlu1 %8650, %v698_v19  }
  0x66   : > { %794 = vperm.xlu0 %8674, %v700_v20   ;;  %971 = vperm.xlu1 %8650, %v699_v12   ;;  %v9252_v12 = vld [vmem:[%s14746_s1] ss:$0 sm:$0xff] }
  0x6a   : > { %804 = vperm.xlu0 %8674, %v9091_v13   ;;  %8651 = vset.pattern.permute.xlu1 %v14500_v8 }
  0x6b   : > { %799 = vperm.xlu1 %8651, %v701_v21  }
  0x6e   : > { %829 = vperm.xlu0 %8674, %v9100_v15  }
  0x6f   : > { %8652 = vset.pattern.permute.xlu1 %v14504_v1 }
  0x70   : > { %979 = vperm.xlu1 %8652, %v701_v21  }
  0x72   : > { %834 = vperm.xlu0 %8674, %v9130_v22  }
  0x74   : > { %8653 = vset.pattern.permute.xlu1 %v14489_v9 }
  0x75   : > { %1159 = vperm.xlu1 %8653, %v698_v19  }
  0x76   : > { %844 = vperm.xlu0 %8674, %v9105_v16  }
  0x79   : > { %1167 = vperm.xlu1 %8653, %v700_v20  }
  0x7a   : > { %869 = vperm.xlu0 %8674, %v9114_v18  }
  0x7d   : > { %1171 = vperm.xlu1 %8653, %v701_v21  }
  0x7e   : > { %874 = vperm.xlu0 %8674, %v9137_v23  }
  0x81   : > { %8654 = vset.pattern.permute.xlu1 %v14500_v8 }
  0x82   : > { %884 = vperm.xlu0 %8674, %v9141_v24   ;;  %809 = vperm.xlu1 %8654, %v703_v25  }
  0x86   : > { %8675 = vset.pattern.permute.xlu0 %v14504_v1  ;;  %8655 = vset.pattern.permute.xlu1 %v14504_v1 }
  0x87   : > { %975 = vperm.xlu0 %8675, %v700_v20   ;;  %983 = vperm.xlu1 %8655, %v9091_v13  }
  0x8b   : > { %987 = vperm.xlu0 %8675, %v703_v25   ;;  %8656 = vset.pattern.permute.xlu1 %v14500_v8 }
  0x8c   : > { %814 = vperm.xlu1 %8656, %v704_v26  }
  0x8f   : > { %991 = vperm.xlu0 %8675, %v704_v26  }
  0x90   : > { %819 = vperm.xlu1 %8656, %v9094_v14  }
  0x93   : > { %1007 = vperm.xlu0 %8675, %v9130_v22  }
  0x94   : > { %8657 = vset.pattern.permute.xlu1 %v14504_v1 }
  0x95   : > { %995 = vperm.xlu1 %8657, %v9094_v14  }
  0x97   : > { %1019 = vperm.xlu0 %8675, %v9155_v27  }
  0x99   : > { %8658 = vset.pattern.permute.xlu1 %v14489_v9 }
  0x9a   : > { %1179 = vperm.xlu1 %8658, %v703_v25  }
  0x9b   : > { %v9163_v29 = vpop.permute.xlu1 %935  ;;  %v9165_v30 = vpop.permute.xlu0 %943  ;;  %1023 = vperm.xlu0 %8675, %v9160_v28  }
  0x9c   : > { %v1062_v40 = vmul.f32 %v9163_v29, %v9229_v59 }
  0x9e   : > { %1183 = vperm.xlu1 %8658, %v704_v26  }
  0x9f   : > { %v9171_v32 = vpop.permute.xlu1 %939  ;;  %v9173_v33 = vpop.permute.xlu0 %955  ;;  %1039 = vperm.xlu0 %8675, %v9137_v23  }
  0xa2   : > { %8659 = vset.pattern.permute.xlu1 %v14500_v8 }
  0xa3   : > { %824 = vperm.xlu1 %8659, %v706_v34   ;;  %v9184_v37 = vpop.permute.xlu0 %959  ;;  %1051 = vperm.xlu0 %8675, %v9178_v35  }
  0xa4   : > { %v760_v38 = vpop.permute.xlu1 %759  ;;  %v1068_v5 = vmul.f32 %v9184_v37, %v9229_v59 }
  0xa5   : > { %v905_v3 = vmul.f32 %v760_v38, %v9231_v60 }
  0xa7   : > { %8660 = vset.pattern.permute.xlu1 %v14504_v1  ;;  %1055 = vperm.xlu0 %8675, %v9188_v39  }
  0xa8   : > { %999 = vperm.xlu1 %8660, %v706_v34   ;;  %v9195_v41 = vpop.permute.xlu0 %1131 }
  0xa9   : > { %v948_v42 = vpop.permute.xlu1 %947 }
  0xaa   : > { %v1065_v0 = vmul.f32 %v948_v42, %v9229_v59 }
  0xab   : > { %8680 = vset.pattern.permute.xlu0 %v14489_v9 }
  0xac   : > { %1003 = vperm.xlu1 %8660, %v9100_v15   ;;  %v9202_v45 = vpop.permute.xlu0 %1143  ;;  %1239 = vperm.xlu0 %8680, %v9141_v24   ;;  %v1097_v7 = vadd.f32 %v1065_v0, %v905_v3 }
  0xae   : > { %v9205_v47 = vpop.permute.xlu1 %1127 }
  0xaf   : > { %v1254_v46 = vmul.f32 %v9205_v47, %v9236_v63 }
  0xb0   : > { %8661 = vset.pattern.permute.xlu1 %v14500_v8  ;;  %v9215_v51 = vpop.permute.xlu0 %1155  ;;  %1251 = vperm.xlu0 %8680, %v9212_v50  }
  0xb1   : > { %839 = vperm.xlu1 %8661, %v709_v48   ;;  %v1261_v37 = vmul.f32 %v9215_v51, %v9236_v63 }
  0xb2   : > { %v9218_v54 = vpop.permute.xlu1 %1135 }
  0xb4   : > { %v9226_v58 = vpop.permute.xlu0 %1163 }
  0xb5   : > { %8662 = vset.pattern.permute.xlu1 %v14504_v1 }
  0xb6   : > { %1011 = vperm.xlu1 %8662, %v709_v48   ;;  %v1140_v61 = vpop.permute.xlu1 %1139 }
  0xb7   : > { %v1257_v4 = vmul.f32 %v1140_v61, %v9236_v63  ;;  %v1067_v61 = vmul.f32 %v9173_v33, %v9229_v59 }
  0xb8   : > { %v9239_v2 = vpop.permute.xlu0 %1175 }
  0xb9   : > { %v1289_v11 = vadd.f32 %v1257_v4, %v1097_v7 }
  0xba   : > { %8663 = vset.pattern.permute.xlu1 %v14489_v9 }
  0xbb   : > { %1191 = vperm.xlu1 %8663, %v706_v34   ;;  %v770_v6 = vpop.permute.xlu1 %769  ;;  %v9260_v15 = vadd.f32 %v9252_v12, %v1289_v11 }
  0xbc   : > { %v9247_v10 = vpop.permute.xlu0 %1187  ;;  %v907_v62 = vmul.f32 %v770_v6, %v9231_v60  ;;  %v9310_v6 = vmul.f32 %v9165_v30, %v9229_v59 }
  0xbd   : > { %14747 = vst [vmem:[#allocation7_spill] sm:$0xff] %v9260_v15  ;;  %v1665_v21 = vand.u32 2139095040, %v9260_v15  ;;  %v14499_v30 = vand.u32 2147483647, %v9260_v15 }
  0xbe   : > { %v1099_v7 = vadd.f32 %v1067_v61, %v907_v62 }
  0xbf   : > { %1199 = vperm.xlu1 %8663, %v9130_v22   ;;  %v1666_v26 = vshrl.u32 %v1665_v21, 23  ;;  %v9314_v21 = vmul.f32 %v9171_v32, %v9229_v59  ;;  %v14493_v32 = vmov 920167782  }
  0xc0   : > { %v9255_v13 = vpop.permute.xlu1 %951  ;;  %v9257_v14 = vpop.permute.xlu0 %1195 }
  0xc1   : > { %v7605_v34 = vadd.s32 4294967169, %v1666_v26 }
  0xc3   : > { %1203 = vperm.xlu1 %8663, %v709_v48   ;;  %v1672_v42 = vadd.s32 1, %v7605_v34  ;;  %v14491_v34 = vmov 1326507024  }
  0xc4   : > { %v9262_v19 = vpop.permute.xlu0 %1207 }
  0xc5   : > { %v775_v20 = vpop.permute.xlu1 %774  ;;  %vm1673_vm0 = vcmp.gt.s32.totalorder %v1672_v42, 0 }
  0xc6   : > { %v1674_v29 = vsel %vm1673_vm0, %v1672_v42, 0  ;;  %v908_v11 = vmul.f32 %v775_v20, %v9231_v60 }
  0xc7   : > { %8664 = vset.pattern.permute.xlu1 %v14500_v8  ;;  %v1676_v56 = vand.u32 31, %v1674_v29 }
  0xc8   : > { %849 = vperm.xlu1 %8664, %v9155_v27   ;;  %v9267_v25 = vpop.permute.xlu0 %1219 }
  0xc9   : > { %v780_v22 = vpop.permute.xlu1 %779  ;;  %v9297_v3 = vsub.s32 32, %v1676_v56 }
  0xca   : > { %v909_v42 = vmul.f32 %v780_v22, %v9231_v60 }
  0xcb   : > { %v1692_v20 = vshrl.u32 %v14491_v34, %v9297_v3  ;;  %v14502_v34 = vmov 683565275  }
  0xcc   : > { %8665 = vset.pattern.permute.xlu1 %v14504_v1  ;;  %v9270_v31 = vpop.permute.xlu0 %1227 }
  0xcd   : > { %1015 = vperm.xlu1 %8665, %v9105_v16  }
  0xce   : > { %v964_v36 = vpop.permute.xlu1 %963 }
  0xd1   : > { %v745_v38 = vpop.permute.xlu0 %744  ;;  %8666 = vset.pattern.permute.xlu1 %v14500_v8 }
  0xd2   : > { %v902_v43 = vmul.f32 %v745_v38, %v9231_v60  ;;  %854 = vperm.xlu1 %8666, %v9160_v28  }
  0xd3   : > { %v1148_v44 = vpop.permute.xlu1 %1147 }
  0xd4   : > { %v1094_v48 = vadd.f32 %v1062_v40, %v902_v43  ;;  %v1259_v4 = vmul.f32 %v1148_v44, %v9236_v63  ;;  %v9323_v40 = vshrl.u32 %v1674_v29, 5  ;;  %v1691_v44 = vshll.u32 %v14493_v32, %v1676_v56 }
  0xd5   : > { %v9280_v49 = vpop.permute.xlu0 %749  ;;  %v14495_v29 = vmov 2102212464  }
  0xd6   : > { %v1286_v16 = vadd.f32 %v1254_v46, %v1094_v48  ;;  %859 = vperm.xlu1 %8666, %v9110_v17   ;;  %v1291_v38 = vadd.f32 %v1259_v4, %v1099_v7  ;;  %v1100_v46 = vadd.f32 %v1068_v5, %v908_v11  ;;  %v9333_v48 = vld [vmem:[%s9075_s5 + $0xc0] sm:$0xff]  ;;  %v1688_v61 = vshll.u32 %v14495_v29, %v1676_v56 }
  0xd7   : > { %v1152_v52 = vpop.permute.xlu1 %1151  ;;  %v1693_v4 = vor.u32 %v1692_v20, %v1691_v44  ;;  %v1669_v44 = vand.u32 8388607, %v14499_v30  ;;  %vm1697_vm1 = vcmp.lt.s32.totalorder %v9323_v40, 4  ;;  %vm1694_vm3 = vcmp.lt.s32.totalorder %v9323_v40, 1 }
  0xd8   : > { %v9284_v53 = vadd.f32 %v9252_v12, %v1286_v16  ;;  %v1260_v43 = vmul.f32 %v1152_v52, %v9236_v63  ;;  %v14519_v52 = vmov 2475754826   ;;  %v9342_v5 = vadd.f32 %v9252_v12, %v1291_v38 }
  0xd9   : > { %v9289_v47 = vpop.permute.xlu0 %754  ;;  %v1680_v11 = vshrl.u32 %v14519_v52, %v9297_v3  ;;  %vm1696_vm4 = vcmp.lt.s32.totalorder %v9323_v40, 3  ;;  %vm1695_vm5 = vcmp.lt.s32.totalorder %v9323_v40, 2 }
  0xda   : > { %14748 = vst [vmem:[#allocation8_spill] sm:$0xff] %v9284_v53  ;;  %8667 = vset.pattern.permute.xlu1 %v14504_v1  ;;  %v1353_v55 = vand.u32 2139095040, %v9284_v53  ;;  %14749 = vst [vmem:[#allocation9_spill] sm:$0xff] %v9342_v5 }
  0xdb   : > { %1027 = vperm.xlu1 %8667, %v9110_v17  }
  0xdc   : > { %v9291_v57 = vpop.permute.xlu1 %784  ;;  %v1354_v0 = vshrl.u32 %v1353_v55, 23  ;;  %v1686_v55 = vshrl.u32 %v14495_v29, %v9297_v3 }
  0xdd   : > { %v9306_v33 = vpop.permute.xlu0 %764 }
  0xde   : > { %v7593_v26 = vadd.s32 4294967169, %v1354_v0  ;;  %v1682_v0 = vshll.u32 %v14519_v52, %v1676_v56 }
  0xdf   : > { %8668 = vset.pattern.permute.xlu1 %v14489_v9 }
  0xe0   : > { %1211 = vperm.xlu1 %8668, %v9155_v27   ;;  %v1069_v27 = vmul.f32 %v964_v36, %v9229_v59  ;;  %v1689_v36 = vshrl.u32 %v14493_v32, %v9297_v3  ;;  %v1360_v62 = vadd.s32 1, %v7593_v26  ;;  %v9354_v26 = vmul.f32 %v9202_v45, %v9236_v63 }
  0xe1   : > { %v9301_v17 = vpop.permute.xlu1 %967  ;;  %v9344_v7 = vpop.permute.xlu0 %789  ;;  %v1679_v32 = vshll.u32 %v14502_v34, %v1676_v56  ;;  %v903_v45 = vmul.f32 %v9280_v49, %v9231_v60 }
  0xe2   : > { %v1101_v22 = vadd.f32 %v1069_v27, %v909_v42  ;;  %v1255_v27 = vmul.f32 %v9195_v41, %v9236_v63  ;;  %v1690_v20 = vor.u32 %v1689_v36, %v1688_v61  ;;  %v1292_v42 = vadd.f32 %v1260_v43, %v1100_v46 }
  0xe3   : > { %vm1361_vm2 = vcmp.gt.s32.totalorder %v1360_v62, 0  ;;  %v1256_v36 = vmul.f32 %v9218_v54, %v9236_v63  ;;  %v1707_v43 = vsel %vm1697_vm1, %v1693_v4, 1326507024  ;;  %v1873_v46 = vand.u32 2139095040, %v9342_v5 }
  0xe4   : > { %1215 = vperm.xlu1 %8668, %v9160_v28   ;;  %v14497_v28 = vmov 2131351028   ;;  %v1293_v41 = vadd.f32 %v1261_v37, %v1101_v22  ;;  %v1681_v61 = vor.u32 %v1680_v11, %v1679_v32  ;;  %v9379_v37 = vadd.f32 %v9252_v12, %v1292_v42 }
  0xe5   : > { %v9329_v51 = vpop.permute.xlu1 %971  ;;  %v1683_v16 = vshrl.u32 %v14497_v28, %v9297_v3  ;;  %v1685_v9 = vshll.u32 %v14497_v28, %v1676_v56  ;;  %v9374_v56 = vmul.f32 %v9226_v58, %v9236_v63  ;;  %v9383_v54 = vsel %vm1361_vm2, %v1360_v62, 0  ;;  %v9385_v49 = vpop.permute.xlu0 %794 }
  0xe6   : > { %14750 = vst [vmem:[#allocation10_spill] sm:$0xff] %v9379_v37  ;;  %14751 = vst [vmem:[#allocation11_spill] sm:$0xff] %v9385_v49  ;;  %v1670_v32 = vor.u32 8388608, %v1669_v44  ;;  %v904_v22 = vmul.f32 %v9289_v47, %v9231_v60  ;;  %v9404_v4 = vmul.f32 %v9239_v2, %v9236_v63  ;;  %v1874_v11 = vshrl.u32 %v1873_v46, 23 }
  0xe7   : > { %v9362_v29 = vor.u32 %v1683_v16, %v1682_v0  ;;  %v1687_v28 = vor.u32 %v1686_v55, %v1685_v9  ;;  %v1703_v9 = vsel %vm1697_vm1, %v1690_v20, 920167782  ;;  %v9393_v16 = vadd.f32 %v9252_v12, %v1293_v41 }
  0xe8   : > { %8669 = vset.pattern.permute.xlu1 %v14500_v8  ;;  %v1095_v55 = vadd.f32 %v9314_v21, %v903_v45  ;;  %v1708_v0 = vsel %vm1696_vm4, %v1690_v20, %v1707_v43  ;;  %v9413_v47 = vmul.f32 %v9247_v10, %v9236_v63  ;;  %v1364_v44 = vand.u32 31, %v9383_v54 }
  0xe9   : > { %864 = vperm.xlu1 %8669, %v9333_v48   ;;  %v1706_v58 = vsel %vm1694_vm3, %v9362_v29, %v1687_v28  ;;  %14752 = vst [vmem:[#allocation12_spill] sm:$0xff] %v9393_v16  ;;  %v1702_v42 = vsel %vm1694_vm3, %v1681_v61, %v9362_v29  ;;  %v1704_v21 = vsel %vm1696_vm4, %v1687_v28, %v1703_v9  ;;  %v1977_v20 = vand.u32 2139095040, %v9379_v37 }
  0xea   : > { %v9357_v38 = vpop.permute.xlu1 %799  ;;  %14753 = vst [vmem:[#allocation13_spill] sm:$0xff] %v9413_v47  ;;  %v1066_v2 = vmul.f32 %v9255_v13, %v9229_v59  ;;  %v1678_v41 = vshrl.u32 %v14502_v34, %v9297_v3  ;;  %v9425_v45 = vsel %vm1695_vm5, %v1706_v58, %v1708_v0  ;;  %v9427_v10 = vshll.u32 %v1670_v32, 8  ;;  %v9439_v3 = vpop.permute.xlu0 %804  ;;  %v9442_v0 = vld [vmem:[%s9075_s5 + $0xd8] sm:$0xff] }
  0xeb   : > { %v2081_v43 = vand.u32 2139095040, %v9393_v16  ;;  %v1287_v46 = vadd.f32 %v1255_v27, %v1095_v55  ;;  %v1096_v9 = vadd.f32 %v9310_v6, %v904_v22  ;;  %v9433_v30 = vsel %vm1695_vm5, %v1702_v42, %v1704_v21 }
  0xec   : > { %v7613_v13 = vadd.s32 4294967169, %v1874_v11  ;;  %v14508_v32 = vand.u32 2147483647, %v9284_v53  ;;  %v9447_v27 = vsel %vm1694_vm3, %v1678_v41, %v1681_v61  ;;  %v9449_v6 = vsub.s32 32, %v1364_v44 }
  0xed   : > { %8670 = vset.pattern.permute.xlu1 %v14504_v1  ;;  %v1978_v55 = vshrl.u32 %v1977_v20, 23  ;;  %v1070_v11 = vmul.f32 %v9301_v17, %v9229_v59  ;;  %v9462_v42 = vsel %vm1697_vm1, %v1687_v28, 2102212464  ;;  %v2082_v20 = vshrl.u32 %v2081_v43, 23 }
  0xee   : > { %1031 = vperm.xlu1 %8670, %v9333_v48   ;;  %v9466_v61 = vmul.u32.u64.low %v9427_v10, %v9433_v30  ;;  %v9467_v21 = vmul.u32.u64.high %v9427_v10, %v9433_v30, %v9466_v61  ;;  %v9471_v41 = vadd.f32 %v9252_v12, %v1287_v46  ;;  %v910_v17 = vmul.f32 %v9291_v57, %v9231_v60 }
  0xef   : > { %v9398_v62 = vpop.permute.xlu1 %979  ;;  %v906_v28 = vmul.f32 %v9306_v33, %v9231_v60  ;;  %v1357_v30 = vand.u32 8388607, %v14508_v32  ;;  %v7617_v43 = vadd.s32 4294967169, %v1978_v55  ;;  %v1368_v57 = vshrl.u32 %v14519_v52, %v9449_v6 }
  0xf0   : > { %v14756_v46 = vmov 2131351028   ;;  %v1071_v33 = vmul.f32 %v9329_v51, %v9229_v59  ;;  %v14758_v1 = vmov 2102212464   ;;  %v14759_v55 = vmov 920167782  }
  0xf1   : > { %v1374_v16 = vshrl.u32 %v14758_v1, %v9449_v6  ;;  %v1377_v32 = vshrl.u32 %v14759_v55, %v9449_v6  ;;  %v14760_v37 = vmov 1   ;;  %v1370_v15 = vshll.u32 %v14519_v52, %v1364_v44 }
  0xf2   : > { %1035 = vperm.xlu1 %8670, %v9114_v18   ;;  %v9437_v18 = vmul.f32 %v9257_v14, %v9236_v63  ;;  %v9453_v22 = vmul.u32.u64.low %v9427_v10, %v9425_v45  ;;  %v9454_v14 = vmul.u32.u64.high %v9427_v10, %v9425_v45, %v9453_v22  ;;  %v1288_v45 = vadd.f32 %v1256_v36, %v1096_v9 }
  0xf3   : > { %v1880_v22 = vadd.s32 1, %v7613_v13  ;;  %v911_v36 = vmul.f32 %v9344_v7, %v9231_v60  ;;  %v1371_v9 = vshrl.u32 %v14756_v46, %v9449_v6  ;;  %v1102_v13 = vadd.f32 %v1070_v11, %v910_v17 }
  0xf4   : > { %14754 = vst [vmem:[#allocation14_spill] sm:$0xff] %v9437_v18  ;;  %v1160_v58 = vpop.permute.xlu1 %1159  ;;  %v14761_v7 = vmov 683565275   ;;  %v1376_v47 = vshll.u32 %v14758_v1, %v1364_v44  ;;  %v14762_v11 = vmov 1326507024   ;;  %v9504_v51 = vshrl.u32 %v9383_v54, 5 }
  0xf5   : > { %v1367_v5 = vshll.u32 %v14761_v7, %v1364_v44  ;;  %v1380_v17 = vshrl.u32 %v14762_v11, %v9449_v6  ;;  %v1098_v18 = vadd.f32 %v1066_v2, %v906_v28  ;;  %v9510_v50 = vor.u32 %v1371_v9, %v1370_v15 }
  0xf6   : > { %8671 = vset.pattern.permute.xlu1 %v14500_v8  ;;  %v1262_v8 = vmul.f32 %v1160_v58, %v9236_v63  ;;  %v9491_v58 = vpop.permute.xlu0 %829  ;;  %v1378_v52 = vor.u32 %v1377_v32, %v1376_v47  ;;  %v1379_v39 = vshll.u32 %v14759_v55, %v1364_v44  ;;  %v7621_v1 = vadd.s32 4294967169, %v2082_v20 }
  0xf7   : > { %879 = vperm.xlu1 %8671, %v9442_v0   ;;  %14757 = vst [vmem:[#allocation16_spill] sm:$0xff] %v9491_v58  ;;  %v1373_v58 = vshll.u32 %v14756_v46, %v1364_v44  ;;  %v9508_v49 = vor.u32 %v1368_v57, %v1367_v5  ;;  %v1457_v11 = vand.u32 2139095040, %v9471_v41  ;;  %v1103_v24 = vadd.f32 %v1071_v33, %v911_v36 }
  0xf8   : > { %v9479_v34 = vpop.permute.xlu1 %1167  ;;  %v1294_v53 = vadd.f32 %v1262_v8, %v1102_v13  ;;  %vm1881_vm6 = vcmp.gt.s32.totalorder %v1880_v22, 0  ;;  %v1984_v2 = vadd.s32 1, %v7617_v43  ;;  %v9515_v8 = vadd.f32 %v9252_v12, %v1288_v45 }
  0xf9   : > { %14755 = vst [vmem:[#allocation15_spill] sm:$0xff] %v9479_v34  ;;  %v1375_v54 = vor.u32 %v1374_v16, %v1373_v58  ;;  %v1381_v28 = vor.u32 %v1380_v17, %v1379_v39  ;;  %v1290_v13 = vadd.f32 %v9354_v26, %v1098_v18  ;;  %v14764_v47 = vmov 2  }
  0xfa   : > { %v9518_v5 = vpop.permute.xlu0 %834  ;;  %v9521_v15 = vadd.f32 %v9252_v12, %v1294_v53  ;;  %vm1382_vm7 = vcmp.lt.s32.totalorder %v9504_v51, 1  ;;  %vm1385_vm8 = vcmp.lt.s32.totalorder %v9504_v51, 4  ;;  %v1358_v44 = vor.u32 8388608, %v1357_v30 }
  0xfb   : > { %8672 = vset.pattern.permute.xlu1 %v14760_v37  ;;  %vm1384_vm9 = vcmp.lt.s32.totalorder %v9504_v51, 3  ;;  %v1390_v39 = vsel %vm1382_vm7, %v9508_v49, %v9510_v50  ;;  %v1391_v53 = vsel %vm1385_vm8, %v1378_v52, 920167782  ;;  %v9536_v26 = vadd.s32 1, %v7621_v1 }
  0xfc   : > { %1043 = vperm.xlu1 %8672, %v9442_v0   ;;  %v1172_v34 = vpop.permute.xlu1 %1171  ;;  %14763 = vst [vmem:[#allocation17_spill] sm:$0xff] %v9521_v15  ;;  %v1295_v18 = vadd.f32 %v9374_v56, %v1103_v24  ;;  %v1394_v32 = vsel %vm1382_vm7, %v9510_v50, %v1375_v54  ;;  %v9545_v20 = vsel %vm1881_vm6, %v1880_v22, 0  ;;  %v1458_v45 = vshrl.u32 %v1457_v11, 23 }
  0xfd   : > { %vm1383_vm10 = vcmp.lt.s32.totalorder %v9504_v51, 2  ;;  %v1395_v30 = vsel %vm1385_vm8, %v1381_v28, 1326507024  ;;  %v1561_v1 = vand.u32 2139095040, %v9515_v8  ;;  %v2185_v24 = vand.u32 2139095040, %v9521_v15 }
  0xfe   : > { %v1396_v43 = vsel %vm1384_vm9, %v1378_v52, %v1395_v30  ;;  %vm1985_vm11 = vcmp.gt.s32.totalorder %v1984_v2, 0  ;;  %v9557_v22 = vadd.f32 %v9252_v12, %v1290_v13  ;;  %v9562_v57 = vshll.u32 %v1358_v44, 8  ;;  %v9573_v11 = vpop.permute.xlu0 %844 }
  0xff   : > { %v1397_v36 = vsel %vm1383_vm10, %v1394_v32, %v1396_v43  ;;  %v9565_v9 = vadd.f32 %v9252_v12, %v1295_v18  ;;  %v914_v33 = vmul.f32 %v9439_v3, %v9231_v60  ;;  %v913_v52 = vmul.f32 %v9357_v38, %v9231_v60 }
 0x100   : > { %8673 = vset.pattern.permute.xlu1 %v14764_v47  ;;  %14765 = vst [vmem:[#allocation18_spill] sm:$0xff] %v9557_v22  ;;  %v1073_v58 = vmul.f32 %v9398_v62, %v9229_v59  ;;  %v9576_v17 = vmul.u32.u64.low %v9562_v57, %v1397_v36  ;;  %v9577_v28 = vmul.u32.u64.high %v9562_v57, %v1397_v36, %v9576_v17  ;;  %v1265_v3 = vmul.f32 %v1172_v34, %v9236_v63 }
 0x101   : > { %1223 = vperm.xlu1 %8673, %v9333_v48   ;;  %v9527_v16 = vpop.permute.xlu1 %809  ;;  %v1392_v48 = vsel %vm1384_vm9, %v1375_v54, %v1391_v53  ;;  %14766 = vst [vmem:[#allocation19_spill] sm:$0xff] %v9565_v9  ;;  %v1387_v62 = vsel %vm1385_vm8, %v1375_v54, 2102212464  ;;  %vm2089_vm12 = vcmp.gt.s32.totalorder %v9536_v26, 0  ;;  %v1769_v53 = vand.u32 2139095040, %v9557_v22  ;;  %v14789_v22 = vld [vmem:[#allocation5_spill] sm:$0xff] }
 0x102   : > { %v1393_v56 = vsel %vm1383_vm10, %v1390_v39, %v1392_v48  ;;  %v2186_v39 = vshrl.u32 %v2185_v24, 23  ;;  %v1366_v18 = vshrl.u32 %v14761_v7, %v9449_v6  ;;  %v1700_v48 = vsel %vm1696_vm4, %v9362_v29, %v9462_v42 }
 0x103   : > { %v9580_v13 = vmul.u32.u64.low %v9562_v57, %v1393_v56  ;;  %v9581_v44 = vmul.u32.u64.high %v9562_v57, %v1393_v56, %v9580_v13  ;;  %v9598_v34 = vand.u32 31, %v9545_v20  ;;  %v7597_v32 = vadd.s32 4294967169, %v1458_v45  ;;  %v9612_v45 = vpop.permute.xlu0 %869 }
 0x104   : > { %v1105_v30 = vadd.f32 %v1073_v58, %v913_v52  ;;  %v9601_v24 = vsel %vm1985_vm11, %v1984_v2, 0  ;;  %v1562_v56 = vshrl.u32 %v1561_v1, 23  ;;  %v1388_v29 = vsel %vm1384_vm9, %v9510_v50, %v1387_v62 }
 0x105   : > { %1231 = vperm.xlu1 %8673, %v9137_v23   ;;  %14767 = vst [vmem:[#allocation20_spill] sm:$0xff] %v9598_v34  ;;  %v2289_v6 = vand.u32 2139095040, %v9565_v9  ;;  %v7625_v42 = vadd.s32 4294967169, %v2186_v39  ;;  %v9619_v1 = vmul.f32 %v9262_v19, %v9236_v63  ;;  %v9627_v50 = vmul.f32 %v9270_v31, %v9236_v63 }
 0x106   : > { %v984_v23 = vpop.permute.xlu1 %983  ;;  %v1297_v36 = vadd.f32 %v1265_v3, %v1105_v30  ;;  %v14771_v52 = vmov 0   ;;  %v1464_v58 = vadd.s32 1, %v7597_v32  ;;  %v2090_v31 = vsel %vm2089_vm12, %v9536_v26, 0 }
 0x107   : > { %v1074_v38 = vmul.f32 %v984_v23, %v9229_v59  ;;  %14768 = vst [vmem:[#allocation21_spill] sm:$0xff] %v9619_v1  ;;  %14770 = vst [vmem:[#allocation23_spill] sm:$0xff] %v9627_v50  ;;  %v9631_v23 = vand.u32 31, %v9601_v24  ;;  %vm1407_vm13 = vc.u32 %v9577_v28, %v9580_v13  ;;  %v1408_v39 = vadd.s32 1, %v9581_v44  ;;  %v14784_v1 = vld [vmem:[#allocation4_spill] sm:$0xff] }
 0x108   : > { %v9650_v51 = vsub.s32 32, %v9598_v34  ;;  %v2290_v3 = vshrl.u32 %v2289_v6, 23  ;;  %v9653_v40 = vadd.f32 %v9252_v12, %v1297_v36  ;;  %vm1465_vm14 = vcmp.gt.s32.totalorder %v1464_v58, 0 }
 0x109   : > { %1235 = vperm.xlu1 %8673, %v9442_v0   ;;  %v1106_v54 = vadd.f32 %v1074_v38, %v914_v33  ;;  %v1386_v0 = vsel %vm1382_vm7, %v1366_v18, %v9508_v49  ;;  %v9623_v49 = vmul.f32 %v9267_v25, %v9236_v63  ;;  %v1770_v33 = vshrl.u32 %v1769_v53, 23  ;;  %14772 = vst [vmem:[#allocation24_spill] sm:$0xff] %v9631_v23 }
 0x10a   : > { %v1389_v19 = vsel %vm1383_vm10, %v1386_v0, %v1388_v29  ;;  %v9639_v25 = vsel %vm1695_vm5, %v9447_v27, %v1700_v48  ;;  %14773 = vst [vmem:[#allocation25_spill] sm:$0xff] %v9650_v51  ;;  %v2192_v38 = vadd.s32 1, %v7625_v42  ;;  %14774 = vst [vmem:[#allocation26_spill] sm:$0xff] %v9653_v40  ;;  %v9660_v53 = vadd.s32 %v9466_v61, %v9454_v14  ;;  %v9665_v48 = vpop.permute.xlu0 %874  ;;  %v14779_v0 = vld [vmem:[#allocation3_spill] sm:$0xff] }
 0x10b   : > { %v9603_v43 = vpop.permute.xlu1 %814  ;;  %v9615_v2 = vadd.f32 %v9404_v4, %v1106_v54  ;;  %14769 = vst [vmem:[#allocation22_spill] sm:$0xff] %v9623_v49  ;;  %v7601_v4 = vadd.s32 4294967169, %v1562_v56  ;;  %v7609_v27 = vadd.s32 4294967169, %v1770_v33  ;;  %v1405_v62 = vmul.u32 %v9562_v57, %v1389_v19 }
 0x10c   : > { %14775 = vst [vmem:[#allocation27_spill] sm:$0xff] %v9660_v53  ;;  %v9663_v18 = vsub.s32 32, %v9631_v23  ;;  %v1409_v32 = vsel %vm1407_vm13, %v1408_v39, %v9581_v44  ;;  %v9670_v30 = vadd.s32 1, %v9467_v21  ;;  %v9672_v57 = vshrl.u32 %v2090_v31, 5 }
 0x10d   : > { %8676 = vset.pattern.permute.xlu1 %v14771_v52  ;;  %v9674_v54 = vand.u32 31, %v2090_v31  ;;  %v1568_v56 = vadd.s32 1, %v7601_v4  ;;  %v1410_v29 = vadd.s32 %v1409_v32, %v1405_v62  ;;  %v1897_v6 = vshrl.u32 %v14759_v55, %v9650_v51 }
 0x10e   : > { %889 = vperm.xlu1 %8676, %v9178_v35   ;;  %14776 = vst [vmem:[#allocation28_spill] sm:$0xff] %v9663_v18  ;;  %14777 = vst [vmem:[#allocation29_spill] sm:$0xff] %v9672_v57  ;;  %v7629_v42 = vadd.s32 4294967169, %v2290_v3  ;;  %vm2193_vm15 = vcmp.gt.s32.totalorder %v2192_v38, 0  ;;  %v2497_v36 = vand.u32 2139095040, %v9653_v40  ;;  %v9683_v44 = vshrl.u32 %v9545_v20, 5  ;;  %v9703_v15 = vpop.permute.xlu0 %884 }
 0x10f   : > { %v9644_v17 = vpop.permute.xlu1 %819  ;;  %14778 = vst [vmem:[#allocation30_spill] sm:$0xff] %v9674_v54  ;;  %v1466_v19 = vsel %vm1465_vm14, %v1464_v58, 0  ;;  %v1776_v31 = vadd.s32 1, %v7609_v27  ;;  %v1411_v39 = vadd.s32 536870912, %v1410_v29  ;;  %v14781_v4 = vmov 2102212464  }
 0x110   : > { %14780 = vst [vmem:[#allocation3_spill] sm:$0xff] %v9683_v44  ;;  %v1899_v62 = vshll.u32 %v14759_v55, %v9598_v34  ;;  %v14782_v3 = vmov 1326507024   ;;  %v2001_v26 = vshrl.u32 %v14759_v55, %v9663_v18  ;;  %vm1569_vm0 = vcmp.gt.s32.totalorder %v1568_v56, 0 }
 0x111   : > { %v1900_v32 = vshrl.u32 %v14782_v3, %v9650_v51  ;;  %v2004_v20 = vshrl.u32 %v14782_v3, %v9663_v18  ;;  %v2194_v50 = vsel %vm2193_vm15, %v2192_v38, 0  ;;  %v9697_v58 = vshrl.u32 %v1411_v39, 30 }
 0x112   : > { %8677 = vset.pattern.permute.xlu1 %v14760_v37  ;;  %v9701_v49 = vand.u32 31, %v1466_v19  ;;  %v2296_v40 = vadd.s32 1, %v7629_v42  ;;  %v2498_v9 = vshrl.u32 %v2497_v36, 23  ;;  %v2000_v57 = vshll.u32 %v14781_v4, %v9631_v23 }
 0x113   : > { %1047 = vperm.xlu1 %8677, %v14779_v0   ;;  %v1896_v0 = vshll.u32 %v14781_v4, %v9598_v34  ;;  %v2003_v38 = vshll.u32 %v14759_v55, %v9631_v23  ;;  %vm1777_vm1 = vcmp.gt.s32.totalorder %v1776_v31, 0  ;;  %v1901_v39 = vor.u32 %v1900_v32, %v1899_v62 }
 0x114   : > { %v9680_v33 = vpop.permute.xlu1 %995  ;;  %v1570_v42 = vsel %vm1569_vm0, %v1568_v56, 0  ;;  %v9717_v36 = vand.u32 31, %v2194_v50  ;;  %v9720_v18 = vsub.s32 32, %v9674_v54  ;;  %vm1905_vm2 = vcmp.lt.s32.totalorder %v9683_v44, 4  ;;  %v14795_v54 = vld [vmem:[#allocation11_spill] sm:$0xff] }
 0x115   : > { %v9699_v27 = vor.u32 %v1897_v6, %v1896_v0  ;;  %v1413_v6 = vshll.u32 %v9697_v58, 30  ;;  %v9714_v0 = vshrl.u32 %v9601_v24, 5  ;;  %v9723_v34 = vor.u32 %v2001_v26, %v2000_v57 }
 0x116   : > { %14786 = vst [vmem:[#allocation32_spill] sm:$0xff] %v9717_v36  ;;  %14787 = vst [vmem:[#allocation33_spill] sm:$0xff] %v9720_v18  ;;  %v2005_v23 = vor.u32 %v2004_v20, %v2003_v38  ;;  %v1778_v51 = vsel %vm1777_vm1, %v1776_v31, 0  ;;  %vm2297_vm3 = vcmp.gt.s32.totalorder %v2296_v40, 0  ;;  %v7637_v53 = vadd.s32 4294967169, %v2498_v9  ;;  %v976_v31 = vpop.permute.xlu0 %975 }
 0x117   : > { %8678 = vset.pattern.permute.xlu1 %v14771_v52  ;;  %14783 = vst [vmem:[#allocation31_spill] sm:$0xff] %v9699_v27  ;;  %14785 = vst [vmem:[#allocation4_spill] sm:$0xff] %v9714_v0  ;;  %v9726_v62 = vsub.s32 %v1410_v29, %v1413_v6  ;;  %v9731_v24 = vsel %vm1905_vm2, %v9699_v27, 920167782  ;;  %v9733_v56 = vshrl.u32 %v1466_v19, 5  ;;  %v9736_v32 = vsub.s32 32, %v9701_v49 }
 0x118   : > { %894 = vperm.xlu1 %8678, %v14784_v1   ;;  %14788 = vst [vmem:[#allocation34_spill] sm:$0xff] %v9723_v34  ;;  %14790 = vst [vmem:[#allocation5_spill] sm:$0xff] %v9731_v24  ;;  %v9738_v26 = vand.u32 31, %v1570_v42  ;;  %v9744_v9 = vsel %vm1905_vm2, %v1901_v39, 1326507024  ;;  %vm2009_vm4 = vcmp.lt.s32.totalorder %v9714_v0, 4  ;;  %v912_v18 = vmul.f32 %v14795_v54, %v9231_v60 }
 0x119   : > { %v9710_v52 = vpop.permute.xlu1 %1179  ;;  %14792 = vst [vmem:[#allocation36_spill] sm:$0xff] %v9744_v9  ;;  %v9748_v29 = vsub.s32 32, %v9717_v36  ;;  %v1416_v19 = vsub.s32 0, %v9726_v62  ;;  %v9751_v20 = vshrl.u32 %v1570_v42, 5  ;;  %v9753_v38 = vand.u32 31, %v1778_v51 }
 0x11a   : > { %v2298_v6 = vsel %vm2297_vm3, %v2296_v40, 0  ;;  %v9761_v39 = vsel %vm2009_vm4, %v9723_v34, 920167782  ;;  %v9765_v24 = vsel %vm2009_vm4, %v2005_v23, 1326507024  ;;  %v2504_v27 = vadd.s32 1, %v7637_v53 }
 0x11b   : > { %14793 = vst [vmem:[#allocation37_spill] sm:$0xff] %v9748_v29  ;;  %14794 = vst [vmem:[#allocation38_spill] sm:$0xff] %v9753_v38  ;;  %v7594_v42 = vmin.u32 %v1416_v19, %v9726_v62  ;;  %v9770_v9 = vsub.s32 32, %v9738_v26  ;;  %v14798_v40 = vld [vmem:[#allocation16_spill] sm:$0xff]  ;;  %v9778_v34 = vmul.f32 %v9518_v5, %v9231_v60  ;;  %v9782_v23 = vand.u32 31, %v2298_v6 }
 0x11c   : > { %899 = vperm.xlu1 %8678, %v14789_v22   ;;  %14796 = vst [vmem:[#allocation11_spill] sm:$0xff] %v9761_v39  ;;  %14797 = vst [vmem:[#allocation39_spill] sm:$0xff] %v9765_v24  ;;  %v9774_v54 = vmul.f32 %v14798_v40, %v9231_v60  ;;  %v1072_v39 = vmul.f32 %v976_v31, %v9229_v59  ;;  %v9788_v53 = vmul.f32 %v9573_v11, %v9231_v60 }
 0x11d   : > { %v9740_v57 = vpop.permute.xlu1 %1183  ;;  %14799 = vst [vmem:[#allocation16_spill] sm:$0xff] %v9778_v34  ;;  %14800 = vst [vmem:[#allocation40_spill] sm:$0xff] %v9782_v23  ;;  %v1418_v40 = vclz %v7594_v42  ;;  %v9792_v24 = vshrl.u32 %v1778_v51, 5  ;;  %v9795_v5 = vsub.s32 32, %v9753_v38  ;;  %v9797_v31 = vshrl.u32 %v2194_v50, 5 }
 0x11e   : > { %14791 = vst [vmem:[#allocation35_spill] sm:$0xff] %v9740_v57  ;;  %14801 = vst [vmem:[#allocation41_spill] sm:$0xff] %v9788_v53  ;;  %v2208_v0 = vshll.u32 %v14781_v4, %v9717_v36  ;;  %v9805_v11 = vshrl.u32 %v14782_v3, %v9748_v29  ;;  %vm2505_vm5 = vcmp.gt.s32.totalorder %v2504_v27, 0  ;;  %v9807_v42 = vshrl.u32 %v2298_v6, 5 }
 0x11f   : > { %14803 = vst [vmem:[#allocation43_spill] sm:$0xff] %v9792_v24  ;;  %14804 = vst [vmem:[#allocation44_spill] sm:$0xff] %v9795_v5  ;;  %v7595_v53 = vadd.s32 4294967294, %v1418_v40  ;;  %v9811_v51 = vmul.f32 %v9612_v45, %v9231_v60  ;;  %v9815_v50 = vmul.f32 %v9665_v48, %v9231_v60  ;;  %v9825_v6 = vshll.u32 %v14759_v55, %v9717_v36  ;;  %v988_v40 = vpop.permute.xlu0 %987 }
 0x120   : > { %8679 = vset.pattern.permute.xlu1 %v14760_v37  ;;  %v2209_v37 = vshrl.u32 %v14759_v55, %v9748_v29  ;;  %14805 = vst [vmem:[#allocation45_spill] sm:$0xff] %v9797_v31  ;;  %14808 = vst [vmem:[#allocation46_spill] sm:$0xff] %v9807_v42  ;;  %v2506_v45 = vsel %vm2505_vm5, %v2504_v27, 0  ;;  %v915_v48 = vmul.f32 %v9527_v16, %v9231_v60  ;;  %vm2217_vm7 = vcmp.lt.s32.totalorder %v9797_v31, 4 }
 0x121   : > { %1059 = vperm.xlu1 %8679, %v14789_v22   ;;  %v14806_v22 = vld [vmem:[#allocation15_spill] sm:$0xff]  ;;  %14809 = vst [vmem:[#allocation47_spill] sm:$0xff] %v9811_v51  ;;  %14810 = vst [vmem:[#allocation48_spill] sm:$0xff] %v9815_v50  ;;  %vm7596_vm6 = vcmp.lt.s32.totalorder %v7595_v53, 0  ;;  %v1075_v16 = vmul.f32 %v988_v40, %v9229_v59  ;;  %v9852_v50 = vand.u32 31, %v2506_v45  ;;  %v1481_v51 = vshrl.u32 %v14759_v55, %v9736_v32 }
 0x122   : > { %v9790_v19 = vpop.permute.xlu1 %824  ;;  %v1264_v34 = vmul.f32 %v14806_v22, %v9236_v63  ;;  %14807 = vst [vmem:[#allocation15_spill] sm:$0xff] %v9805_v11  ;;  %v1104_v22 = vadd.f32 %v1072_v39, %v912_v18  ;;  %v9821_v29 = vor.u32 %v2209_v37, %v2208_v0  ;;  %14813 = vst [vmem:[#allocation51_spill] sm:$0xff] %v9825_v6  ;;  %vm1486_vm9 = vcmp.lt.s32.totalorder %v9733_v56, 1 }
 0x123   : > { %14802 = vst [vmem:[#allocation42_spill] sm:$0xff] %v9790_v19  ;;  %v9819_v19 = vsub.s32 32, %v9782_v23  ;;  %v9838_v37 = vmul.f32 %v9703_v15, %v9231_v60  ;;  %14817 = vst [vmem:[#allocation55_spill] sm:$0xff] %v9852_v50  ;;  %v14818_v15 = vmov 2475754826   ;;  %v1484_v23 = vshrl.u32 %v14782_v3, %v9736_v32 }
 0x124   : > { %14812 = vst [vmem:[#allocation50_spill] sm:$0xff] %v9821_v29  ;;  %v1296_v27 = vadd.f32 %v1264_v34, %v1104_v22  ;;  %v9850_v0 = vsel %vm2217_vm7, %v9821_v29, 920167782  ;;  %v1480_v36 = vshll.u32 %v14781_v4, %v9701_v49  ;;  %v1483_v31 = vshll.u32 %v14759_v55, %v9701_v49 }
 0x125   : > { %8681 = vset.pattern.permute.xlu1 %v14764_v47  ;;  %14811 = vst [vmem:[#allocation49_spill] sm:$0xff] %v9819_v19  ;;  %v1421_v47 = vsel %vm7596_vm6, 0, %v7595_v53  ;;  %14815 = vst [vmem:[#allocation53_spill] sm:$0xff] %v9838_v37  ;;  %v9845_v53 = vmul.f32 %v9603_v43, %v9231_v60  ;;  %v14819_v43 = vand.u32 2147483647, %v9471_v41  ;;  %v1478_v37 = vshrl.u32 %v14781_v4, %v9736_v32 }
 0x126   : > { %1243 = vperm.xlu1 %8681, %v9178_v35   ;;  %v1406_v35 = vadd.s32 %v9580_v13, %v9577_v28  ;;  %v1422_v39 = vsub.s32 32, %v1421_v47  ;;  %14816 = vst [vmem:[#allocation54_spill] sm:$0xff] %v9850_v0  ;;  %v1472_v28 = vshrl.u32 %v14818_v15, %v9736_v32  ;;  %v1475_v13 = vshrl.u32 %v14756_v46, %v9736_v32 }
 0x127   : > { %v9830_v18 = vpop.permute.xlu1 %999  ;;  %v1426_v22 = vsub.s32 4294967266, %v1421_v47  ;;  %v1461_v40 = vand.u32 8388607, %v14819_v43  ;;  %v1474_v19 = vshll.u32 %v14818_v15, %v9701_v49  ;;  %v1477_v43 = vshll.u32 %v14756_v46, %v9701_v49 }
 0x128   : > { %14814 = vst [vmem:[#allocation52_spill] sm:$0xff] %v9830_v18  ;;  %v1424_v42 = vshrl.u32 %v1406_v35, %v1422_v39  ;;  %v1423_v39 = vshll.u32 %v9726_v62, %v1421_v47  ;;  %v1482_v24 = vor.u32 %v1481_v51, %v1480_v36  ;;  %v1485_v5 = vor.u32 %v1484_v23, %v1483_v31  ;;  %v14824_v36 = vld [vmem:[#allocation14_spill] sm:$0xff] }
 0x129   : > { %v1427_v29 = vadd.s32 127, %v1426_v22  ;;  %v1476_v18 = vor.u32 %v1475_v13, %v1474_v19  ;;  %v1479_v44 = vor.u32 %v1478_v37, %v1477_v43  ;;  %v9882_v22 = vadd.f32 %v1075_v16, %v915_v48 }
 0x12a   : > { %1247 = vperm.xlu1 %8681, %v14784_v1   ;;  %v1471_v1 = vshll.u32 %v14761_v7, %v9701_v49  ;;  %v1425_v38 = vor.u32 %v1424_v42, %v1423_v39  ;;  %v9885_v57 = vsub.s32 32, %v9852_v50  ;;  %v9888_v62 = vadd.f32 %v9252_v12, %v1296_v27 }
 0x12b   : > { %v1004_v34 = vpop.permute.xlu1 %1003  ;;  %v1428_v11 = vshll.u32 %v1427_v29, 23  ;;  %v9892_v49 = vadd.f32 %v9252_v12, %v9615_v2  ;;  %v1462_v29 = vor.u32 8388608, %v1461_v40  ;;  %vm1489_vm10 = vcmp.lt.s32.totalorder %v9733_v56, 4  ;;  %v992_v2 = vpop.permute.xlu0 %991 }
 0x12c   : > { %v1079_v0 = vmul.f32 %v1004_v34, %v9229_v59  ;;  %v1473_v35 = vor.u32 %v1472_v28, %v1471_v1  ;;  %v9880_v34 = vshrl.u32 %v2506_v45, 5  ;;  %14821 = vst [vmem:[#allocation57_spill] sm:$0xff] %v9885_v57  ;;  %vm1488_vm11 = vcmp.lt.s32.totalorder %v9733_v56, 3 }
 0x12d   : > { %14822 = vst [vmem:[#allocation58_spill] sm:$0xff] %v9892_v49  ;;  %v1429_v51 = vor.u32 4788187, %v1428_v11  ;;  %v1495_v31 = vsel %vm1489_vm10, %v1482_v24, 920167782  ;;  %v1498_v12 = vsel %vm1486_vm9, %v1476_v18, %v1479_v44  ;;  %v1432_v45 = vcvt.s32.f32 %v1425_v38 }
 0x12e   : > { %v1111_v6 = vadd.f32 %v1079_v0, %v9774_v54  ;;  %14820 = vst [vmem:[#allocation56_spill] sm:$0xff] %v9880_v34  ;;  %v14823_v54 = vld [vmem:[#allocation8_spill] sm:$0xff]  ;;  %v1494_v23 = vsel %vm1486_vm9, %v1473_v35, %v1476_v18  ;;  %v1496_v48 = vsel %vm1488_vm11, %v1479_v44, %v1495_v31  ;;  %v1499_v47 = vsel %vm1489_vm10, %v1485_v5, 1326507024 }
 0x12f   : > { %vm1352_vm8 = vcmp.lt.s32.totalorder %v14823_v54, 0  ;;  %v14825_v42 = vand.u32 2147483647, %v14823_v54  ;;  %v1430_v11 = vand.u32 2147483647, %v1429_v51  ;;  %v1470_v0 = vshrl.u32 %v14761_v7, %v9736_v32 }
 0x130   : > { %v9896_v19 = vadd.f32 %v14824_v36, %v1111_v6  ;;  %vm1487_vm13 = vcmp.lt.s32.totalorder %v9733_v56, 2  ;;  %v1491_v37 = vsel %vm1489_vm10, %v1479_v44, 2102212464  ;;  %v1500_v27 = vsel %vm1488_vm11, %v1482_v24, %v1499_v47 }
 0x131   : > { %vm9907_vm12 = vcmp.le.f32.partialorder %v14825_v42, 0.7853982  ;;  %v1433_v16 = vmul.f32 %v1432_v45, %v1430_v11  ;;  %v1497_v28 = vsel %vm1487_vm13, %v1494_v23, %v1496_v48  ;;  %v1501_v38 = vsel %vm1487_vm13, %v1498_v12, %v1500_v27 }
 0x132   : > { %v1502_v13 = vshll.u32 %v1462_v29, 8  ;;  %v2393_v40 = vand.u32 2139095040, %v9888_v62  ;;  %v2601_v5 = vand.u32 2139095040, %v9892_v49  ;;  %v1076_v32 = vmul.f32 %v992_v2, %v9229_v59 }
 0x133   : > { %v1490_v44 = vsel %vm1486_vm9, %v1470_v0, %v1473_v35  ;;  %v1434_v1 = vxor.u32 2147483648, %v1433_v16  ;;  %v1492_v24 = vsel %vm1488_vm11, %v1476_v18, %v1491_v37  ;;  %v2521_v36 = vshrl.u32 %v14759_v55, %v9885_v57 }
 0x134   : > { %v9929_v43 = vmul.u32.u64.low %v1502_v13, %v1501_v38  ;;  %v9930_v39 = vmul.u32.u64.high %v1502_v13, %v1501_v38, %v9929_v43  ;;  %v1077_v29 = vmul.f32 %v9680_v33, %v9229_v59  ;;  %v2520_v35 = vshll.u32 %v14781_v4, %v9852_v50 }
 0x135   : > { %v9936_v51 = vmul.u32.u64.low %v1502_v13, %v1497_v28  ;;  %v9937_v23 = vmul.u32.u64.high %v1502_v13, %v1497_v28, %v9936_v51  ;;  %v1435_v31 = vsel %vm1352_vm8, %v1434_v1, %v1433_v16  ;;  %v1436_v18 = vsub.s32 4, %v9697_v58 }
 0x136   : > { %v14569_v12 = vand.u32 2147483647, %v9515_v8  ;;  %v9948_v2 = vshll.u32 %v14759_v55, %v9852_v50  ;;  %v9951_v33 = vadd.f32 %v1076_v32, %v9845_v53  ;;  %v917_v42 = vmul.f32 %v9644_v17, %v9231_v60 }
 0x137   : > { %v1493_v11 = vsel %vm1487_vm13, %v1490_v44, %v1492_v24  ;;  %v9959_v45 = vshrl.u32 %v14782_v3, %v9885_v57  ;;  %v2394_v48 = vshrl.u32 %v2393_v40, 23  ;;  %v9961_v47 = vshrl.u32 %v2601_v5, 23 }
 0x138   : > { %vm1511_vm14 = vc.u32 %v9930_v39, %v9936_v51  ;;  %v9965_v0 = vor.u32 %v2521_v36, %v2520_v35  ;;  %v1109_v53 = vadd.f32 %v1077_v29, %v917_v42  ;;  %v1438_v17 = vsel %vm9907_vm12, %v14823_v54, %v1435_v31 }
 0x139   : > { %v1512_v56 = vadd.s32 1, %v9937_v23  ;;  %v1437_v37 = vsel %vm1352_vm8, %v1436_v18, %v9697_v58  ;;  %v1509_v27 = vmul.u32 %v1502_v13, %v1493_v11  ;;  %v1565_v16 = vand.u32 8388607, %v14569_v12 }
 0x13a   : > { %14828 = vst [vmem:[#allocation8_spill] sm:$0xff] %v9965_v0  ;;  %v1579_v28 = vshrl.u32 %v14756_v46, %v9770_v9  ;;  %v1576_v40 = vshrl.u32 %v14818_v15, %v9770_v9  ;;  %v1578_v5 = vshll.u32 %v14818_v15, %v9738_v26  ;;  %v1582_v32 = vshrl.u32 %v14781_v4, %v9770_v9 }
 0x13b   : > { %v1513_v38 = vsel %vm1511_vm14, %v1512_v56, %v9937_v23  ;;  %8726 = vcosq.f32 %v1438_v17  ;;  %v1575_v13 = vshll.u32 %v14761_v7, %v9738_v26  ;;  %v1581_v44 = vshll.u32 %v14756_v46, %v9738_v26 }
 0x13c   : > { %v1514_v58 = vadd.s32 %v1513_v38, %v1509_v27  ;;  %vm1719_vm15 = vc.u32 %v9454_v14, %v9466_v61  ;;  %8728 = vsinq.f32 %v1438_v17  ;;  %v1580_v1 = vor.u32 %v1579_v28, %v1578_v5  ;;  %v14829_v17 = vld [vmem:[#allocation13_spill] sm:$0xff] }
 0x13d   : > { %v1584_v24 = vshll.u32 %v14781_v4, %v9738_v26  ;;  %v1585_v43 = vshrl.u32 %v14759_v55, %v9770_v9  ;;  %v1583_v29 = vor.u32 %v1582_v32, %v1581_v44  ;;  %v1587_v23 = vshll.u32 %v14759_v55, %v9738_v26 }
 0x13e   : > { %v1515_v36 = vadd.s32 536870912, %v1514_v58  ;;  %v1588_v35 = vshrl.u32 %v14782_v3, %v9770_v9  ;;  %v1439_v18 = vsel %vm9907_vm12, 0, %v1437_v37  ;;  %v1577_v42 = vor.u32 %v1576_v40, %v1575_v13  ;;  %v10023_v13 = vld [vmem:[%s14746_s1] ss:$0 sm:$0xff] }
 0x13f   : > { %v1586_v11 = vor.u32 %v1585_v43, %v1584_v24  ;;  %v1301_v56 = vadd.f32 %v14829_v17, %v1109_v53  ;;  %vm1593_vm0 = vcmp.lt.s32.totalorder %v9751_v20, 4  ;;  %v1267_v26 = vmul.f32 %v9710_v52, %v9236_v63 }
 0x140   : > { %v1516_v27 = vshrl.u32 %v1515_v36, 30  ;;  %v1589_v28 = vor.u32 %v1588_v35, %v1587_v23  ;;  %v1566_v38 = vor.u32 8388608, %v1565_v16  ;;  %vm1590_vm1 = vcmp.lt.s32.totalorder %v9751_v20, 1 }
 0x141   : > { %v1599_v5 = vsel %vm1593_vm0, %v1586_v11, 920167782  ;;  %v1443_v32 = vadd.s32 3, %v1439_v18  ;;  %vm1456_vm3 = vcmp.lt.s32.totalorder %v9471_v41, 0  ;;  %vm1592_vm5 = vcmp.lt.s32.totalorder %v9751_v20, 3 }
 0x142   : > { %v1517_v6 = vshll.u32 %v1516_v27, 30  ;;  %v1602_v53 = vsel %vm1590_vm1, %v1580_v1, %v1583_v29  ;;  %v7633_v37 = vadd.s32 4294967169, %v2394_v48  ;;  %v1598_v40 = vsel %vm1590_vm1, %v1577_v42, %v1580_v1 }
 0x143   : > { %v1600_v52 = vsel %vm1592_vm5, %v1583_v29, %v1599_v5  ;;  %v1603_v16 = vsel %vm1593_vm0, %v1589_v28, 1326507024  ;;  %v10026_v44 = vadd.f32 %v10023_v13, %v1301_v56  ;;  %vm1591_vm6 = vcmp.lt.s32.totalorder %v9751_v20, 2 }
 0x144   : > { %v10028_v24 = vsub.s32 %v1514_v58, %v1517_v6  ;;  %v1604_v48 = vsel %vm1592_vm5, %v1586_v11, %v1603_v16  ;;  %v1299_v43 = vadd.f32 %v1267_v26, %v9882_v22  ;;  %v14831_v36 = vand.u32 2147483647, %v9471_v41 }
 0x145   : > { %14830 = vst [vmem:[#allocation14_spill] sm:$0xff] %v10026_v44  ;;  %v1595_v35 = vsel %vm1593_vm0, %v1583_v29, 2102212464  ;;  %v1605_v58 = vsel %vm1591_vm6, %v1602_v53, %v1604_v48  ;;  %v1606_v18 = vshll.u32 %v1566_v38, 8  ;;  %v8727_v17 = vpop.eup %8726  ;;  %v1444_v56 = vand.u32 3, %v1443_v32 }
 0x146   : > { %vm10036_vm8 = vcmp.le.f32.partialorder %v14831_v36, 0.7853982  ;;  %v1520_v28 = vsub.s32 0, %v10028_v24  ;;  %v1574_v22 = vshrl.u32 %v14761_v7, %v9770_v9  ;;  %v1601_v11 = vsel %vm1591_vm6, %v1598_v40, %v1600_v52  ;;  %v8729_v26 = vpop.eup %8728 }
 0x147   : > { %v1540_v5 = vsub.s32 4, %v1516_v27  ;;  %v10049_v6 = vmul.u32.u64.low %v1606_v18, %v1605_v58  ;;  %v10050_v16 = vmul.u32.u64.high %v1606_v18, %v1605_v58, %v10049_v6  ;;  %v1721_v29 = vsel %vm1719_vm15, %v9670_v30, %v9467_v21 }
 0x148   : > { %v7598_v38 = vmin.u32 %v1520_v28, %v10028_v24  ;;  %v1594_v32 = vsel %vm1590_vm1, %v1574_v22, %v1577_v42  ;;  %v1596_v9 = vsel %vm1592_vm5, %v1580_v1, %v1595_v35  ;;  %v14834_v53 = vmul.u32 %v9427_v10, %v9639_v25 }
 0x149   : > { %v7641_v52 = vadd.s32 4294967169, %v9961_v47  ;;  %v1450_v48 = vxor.u32 2147483648, %v8727_v17  ;;  %v10066_v36 = vmul.u32.u64.low %v1606_v18, %v1601_v11  ;;  %v10067_v58 = vmul.u32.u64.high %v1606_v18, %v1601_v11, %v10066_v36 }
 0x14a   : > { %v1722_v40 = vadd.s32 %v1721_v29, %v14834_v53  ;;  %v10069_v14 = vadd.s32 1, %v7633_v37  ;;  %v2913_v61 = vand.u32 2139095040, %v10026_v44  ;;  %v1447_v21 = vxor.u32 2147483648, %v8729_v26 }
 0x14b   : > { %v1522_v30 = vclz %v7598_v38  ;;  %v10073_v42 = vadd.f32 %v10023_v13, %v1299_v43  ;;  %v1541_v1 = vsel %vm1456_vm3, %v1540_v5, %v1516_v27  ;;  %v1597_v10 = vsel %vm1591_vm6, %v1594_v32, %v1596_v9 }
 0x14c   : > { %v1723_v25 = vadd.s32 536870912, %v1722_v40  ;;  %vm1442_vm9 = vweird.f32 %v14823_v54  ;;  %vm1445_vm10 = vcmp.lt.s32.totalorder %v1444_v56, 2  ;;  %vm1449_vm11 = vcmp.eq.s32.totalorder %v1444_v56, 2 }
 0x14d   : > { %14835 = vst [vmem:[#allocation13_spill] sm:$0xff] %v10073_v42  ;;  %v7599_v47 = vadd.s32 4294967294, %v1522_v30  ;;  %vm1615_vm12 = vc.u32 %v10050_v16, %v10066_v36  ;;  %vm1446_vm13 = vcmp.eq.s32.totalorder %v1444_v56, 0  ;;  %v1451_v37 = vsel %vm1449_vm11, %v1450_v48, %v8729_v26  ;;  %v14836_v26 = vld [vmem:[#allocation18_spill] sm:$0xff] }
 0x14e   : > { %v1616_v35 = vadd.s32 1, %v10067_v58  ;;  %v1724_v43 = vshrl.u32 %v1723_v25, 30  ;;  %v1448_v28 = vsel %vm1446_vm13, %v8727_v17, %v1447_v21  ;;  %v1543_v27 = vsel %vm10036_vm8, 0, %v1541_v1  ;;  %v14837_v21 = vld [vmem:[#allocation7_spill] sm:$0xff] }
 0x14f   : > { %vm7600_vm14 = vcmp.lt.s32.totalorder %v7599_v47, 0  ;;  %v1613_v20 = vmul.u32 %v1606_v18, %v1597_v10  ;;  %v1510_v22 = vadd.s32 %v9936_v51, %v9930_v39  ;;  %v14568_v9 = vand.u32 2147483647, %v14836_v26  ;;  %v14838_v25 = vld [vmem:[#allocation35_spill] sm:$0xff] }
 0x150   : > { %v1525_v11 = vsel %vm7600_vm14, 0, %v7599_v47  ;;  %v1617_v5 = vsel %vm1615_vm12, %v1616_v35, %v10067_v58  ;;  %v1725_v6 = vshll.u32 %v1724_v43, 30  ;;  %v10088_v53 = vadd.s32 1, %v7641_v52 }
 0x151   : > { %v1526_v29 = vsub.s32 32, %v1525_v11  ;;  %v1530_v38 = vsub.s32 4294967266, %v1525_v11  ;;  %v1618_v32 = vadd.s32 %v1617_v5, %v1613_v20  ;;  %v1452_v17 = vsel %vm1445_vm10, %v1448_v28, %v1451_v37  ;;  %v14839_v5 = vld [vmem:[#allocation44_spill] sm:$0xff] }
 0x152   : > { %v1547_v48 = vadd.s32 3, %v1543_v27  ;;  %vm1664_vm15 = vcmp.lt.s32.totalorder %v14837_v21, 0  ;;  %v10092_v18 = vsub.s32 %v1722_v40, %v1725_v6  ;;  %v1527_v39 = vshll.u32 %v10028_v24, %v1525_v11 }
 0x153   : > { %v1528_v51 = vshrl.u32 %v1510_v22, %v1526_v29  ;;  %v1531_v30 = vadd.s32 127, %v1530_v38  ;;  %v1619_v58 = vadd.s32 536870912, %v1618_v32  ;;  %v10095_v1 = vshrl.u32 %v2913_v61, 23  ;;  %v14840_v38 = vld [vmem:[#allocation38_spill] sm:$0xff] }
 0x154   : > { %v10100_v52 = vmul.f32 %v14838_v25, %v9236_v63  ;;  %v1728_v56 = vsub.s32 0, %v10092_v18  ;;  %v10107_v24 = vand.u32 8388607, %v14568_v9  ;;  %v10111_v40 = vsel %vm1442_vm9, nan, %v1452_v17 }
 0x155   : > { %v1529_v47 = vor.u32 %v1528_v51, %v1527_v39  ;;  %v1532_v37 = vshll.u32 %v1531_v30, 23  ;;  %v10103_v35 = vshrl.u32 %v1619_v58, 30  ;;  %v10113_v61 = vand.u32 3, %v1547_v48 }
 0x156   : > { %v10116_v28 = vadd.s32 %v10066_v36, %v10050_v16  ;;  %v7606_v27 = vmin.u32 %v1728_v56, %v10092_v18  ;;  %v1748_v11 = vsub.s32 4, %v1724_v43  ;;  %v1784_v6 = vshrl.u32 %v14818_v15, %v14839_v5 }
 0x157   : > { %v1533_v20 = vor.u32 4788187, %v1532_v37  ;;  %v1621_v22 = vshll.u32 %v10103_v35, 30  ;;  %v10124_v54 = vshrl.u32 %v14761_v7, %v14839_v5  ;;  %v1783_v17 = vshll.u32 %v14761_v7, %v14840_v38 }
 0x158   : > { %v1730_v29 = vclz %v7606_v27  ;;  %v1787_v16 = vshrl.u32 %v14756_v46, %v14839_v5  ;;  %v1536_v48 = vcvt.s32.f32 %v1529_v47  ;;  %v1774_v51 = vor.u32 8388608, %v10107_v24 }
 0x159   : > { %v1534_v36 = vand.u32 2147483647, %v1533_v20  ;;  %v10130_v39 = vsub.s32 %v1618_v32, %v1621_v22  ;;  %v1786_v58 = vshll.u32 %v14818_v15, %v14840_v38  ;;  %v1790_v25 = vshrl.u32 %v14781_v4, %v14839_v5 }
 0x15a   : > { %v7607_v30 = vadd.s32 4294967294, %v1730_v29  ;;  %v1793_v56 = vshrl.u32 %v14759_v55, %v14839_v5  ;;  %v10142_v47 = vsel %vm1664_vm15, %v1748_v11, %v1724_v43  ;;  %v1785_v32 = vor.u32 %v1784_v6, %v1783_v17 }
 0x15b   : > { %v1537_v37 = vmul.f32 %v1536_v48, %v1534_v36  ;;  %v1624_v27 = vsub.s32 0, %v10130_v39  ;;  %v1788_v24 = vor.u32 %v1787_v16, %v1786_v58  ;;  %v1789_v20 = vshll.u32 %v14756_v46, %v14840_v38  ;;  %v14841_v58 = vld [vmem:[#allocation43_spill] sm:$0xff] }
 0x15c   : > { %vm7608_vm0 = vcmp.lt.s32.totalorder %v7607_v30, 0  ;;  %v1792_v22 = vshll.u32 %v14781_v4, %v14840_v38  ;;  %v1796_v36 = vshrl.u32 %v14782_v3, %v14839_v5  ;;  %v1795_v16 = vshll.u32 %v14759_v55, %v14840_v38  ;;  %v14842_v5 = vld [vmem:[#allocation27_spill] sm:$0xff] }
 0x15d   : > { %v1538_v29 = vxor.u32 2147483648, %v1537_v37  ;;  %v7602_v9 = vmin.u32 %v1624_v27, %v10130_v39  ;;  %v1733_v31 = vsel %vm7608_vm0, 0, %v7607_v30  ;;  %v1791_v43 = vor.u32 %v1790_v25, %v1789_v20 }
 0x15e   : > { %v1734_v48 = vsub.s32 32, %v1733_v31  ;;  %v1738_v10 = vsub.s32 4294967266, %v1733_v31  ;;  %v1794_v11 = vor.u32 %v1793_v56, %v1792_v22  ;;  %vm1798_vm1 = vcmp.lt.s32.totalorder %v14841_v58, 1 }
 0x15f   : > { %v1539_v6 = vsel %vm1456_vm3, %v1538_v29, %v1537_v37  ;;  %v1626_v17 = vclz %v7602_v9  ;;  %v1735_v27 = vshll.u32 %v10092_v18, %v1733_v31  ;;  %v1797_v56 = vor.u32 %v1796_v36, %v1795_v16 }
 0x160   : > { %v1542_v30 = vsel %vm10036_vm8, %v9471_v41, %v1539_v6  ;;  %v1736_v12 = vshrl.u32 %v14842_v5, %v1734_v48  ;;  %v1739_v44 = vadd.s32 127, %v1738_v10  ;;  %vm1799_vm3 = vcmp.lt.s32.totalorder %v14841_v58, 2 }
 0x161   : > { %8730 = vcosq.f32 %v1542_v30  ;;  %v7603_v25 = vadd.s32 4294967294, %v1626_v17  ;;  %v14843_v9 = vand.u32 2147483647, %v14837_v21  ;;  %vm1801_vm6 = vcmp.lt.s32.totalorder %v14841_v58, 4 }
 0x162   : > { %8732 = vsinq.f32 %v1542_v30  ;;  %v1737_v37 = vor.u32 %v1736_v12, %v1735_v27  ;;  %v1740_v23 = vshll.u32 %v1739_v44, 23  ;;  %vm1800_vm9 = vcmp.lt.s32.totalorder %v14841_v58, 3 }
 0x163   : > { %vm10164_vm5 = vcmp.le.f32.partialorder %v14843_v9, 0.7853982  ;;  %vm7604_vm8 = vcmp.lt.s32.totalorder %v7603_v25, 0  ;;  %v1806_v31 = vsel %vm1798_vm1, %v1785_v32, %v1788_v24  ;;  %v1807_v18 = vsel %vm1801_vm6, %v1794_v11, 920167782 }
 0x164   : > { %v1629_v10 = vsel %vm7604_vm8, 0, %v7603_v25  ;;  %v1741_v20 = vor.u32 4788187, %v1740_v23  ;;  %v1744_v22 = vcvt.s32.f32 %v1737_v37  ;;  %v1803_v29 = vsel %vm1801_vm6, %v1791_v43, 2102212464 }
 0x165   : > { %v1630_v36 = vsub.s32 32, %v1629_v10  ;;  %v1631_v12 = vshll.u32 %v10130_v39, %v1629_v10  ;;  %v1634_v44 = vsub.s32 4294967266, %v1629_v10  ;;  %v1808_v48 = vsel %vm1800_vm9, %v1791_v43, %v1807_v18 }
 0x166   : > { %v1742_v6 = vand.u32 2147483647, %v1741_v20  ;;  %v1809_v17 = vsel %vm1799_vm3, %v1806_v31, %v1808_v48  ;;  %v1810_v16 = vsel %vm1798_vm1, %v1788_v24, %v1791_v43  ;;  %v1811_v30 = vsel %vm1801_vm6, %v1797_v56, 1326507024 }
 0x167   : > { %vm1549_vm10 = vcmp.lt.s32.totalorder %v10113_v61, 2  ;;  %vm1560_vm11 = vcmp.lt.s32.totalorder %v9515_v8, 0  ;;  %v1632_v39 = vshrl.u32 %v10116_v28, %v1630_v36  ;;  %v1635_v27 = vadd.s32 127, %v1634_v44 }
 0x168   : > { %v1812_v5 = vsel %vm1800_vm9, %v1794_v11, %v1811_v30  ;;  %v1814_v25 = vshll.u32 %v1774_v51, 8  ;;  %vm1546_vm12 = vweird.f32 %v9471_v41  ;;  %v1745_v9 = vmul.f32 %v1744_v22, %v1742_v6  ;;  %v14849_v6 = vld [vmem:[#allocation9_spill] sm:$0xff] }
 0x169   : > { %v1802_v43 = vsel %vm1798_vm1, %v10124_v54, %v1785_v32  ;;  %v1804_v56 = vsel %vm1800_vm9, %v1788_v24, %v1803_v29  ;;  %v1813_v37 = vsel %vm1799_vm3, %v1810_v16, %v1812_v5  ;;  %v1633_v23 = vor.u32 %v1632_v39, %v1631_v12  ;;  %v14854_v32 = vld [vmem:[#allocation36_spill] sm:$0xff] }
 0x16a   : > { %v1636_v28 = vshll.u32 %v1635_v27, 23  ;;  %v10198_v31 = vmul.u32.u64.low %v1814_v25, %v1813_v37  ;;  %v10199_v18 = vmul.u32.u64.high %v1814_v25, %v1813_v37, %v10198_v31  ;;  %vm1550_vm13 = vcmp.eq.s32.totalorder %v10113_v61, 0 }
 0x16b   : > { %v1746_v51 = vxor.u32 2147483648, %v1745_v9  ;;  %v10202_v11 = vmul.u32.u64.low %v1814_v25, %v1809_v17  ;;  %v10203_v10 = vmul.u32.u64.high %v1814_v25, %v1809_v17, %v10202_v11  ;;  %v8731_v20 = vpop.eup %8730  ;;  %vm1553_vm14 = vcmp.eq.s32.totalorder %v10113_v61, 2 }
 0x16c   : > { %v14846_v54 = vand.u32 2147483647, %v9515_v8  ;;  %v1637_v24 = vor.u32 4788187, %v1636_v28  ;;  %v1644_v22 = vsub.s32 4, %v10103_v35  ;;  %v1751_v29 = vsel %vm10164_vm5, 0, %v10142_v47  ;;  %v8733_v36 = vpop.eup %8732 }
 0x16d   : > { %v1554_v12 = vxor.u32 2147483648, %v8731_v20  ;;  %v1747_v44 = vsel %vm1664_vm15, %v1746_v51, %v1745_v9  ;;  %v1805_v48 = vsel %vm1799_vm3, %v1802_v43, %v1804_v56  ;;  %v14573_v17 = vand.u32 2147483647, %v14849_v6 }
 0x16e   : > { %vm10209_vm0 = vcmp.le.f32.partialorder %v14846_v54, 0.7853982  ;;  %v1551_v16 = vxor.u32 2147483648, %v8733_v36  ;;  %v1638_v30 = vand.u32 2147483647, %v1637_v24  ;;  %v1640_v39 = vcvt.s32.f32 %v1633_v23  ;;  %v14850_v23 = vld [vmem:[#allocation25_spill] sm:$0xff] }
 0x16f   : > { %v1750_v27 = vsel %vm10164_vm5, %v14837_v21, %v1747_v44  ;;  %v1555_v47 = vsel %vm1553_vm14, %v1554_v12, %v8733_v36  ;;  %vm1823_vm1 = vc.u32 %v10199_v18, %v10202_v11  ;;  %v1824_v5 = vadd.s32 1, %v10203_v10  ;;  %v14852_v54 = vld [vmem:[#allocation20_spill] sm:$0xff] }
 0x170   : > { %8734 = vcosq.f32 %v1750_v27  ;;  %v1552_v58 = vsel %vm1550_vm13, %v8731_v20, %v1551_v16  ;;  %v1641_v9 = vmul.f32 %v1640_v39, %v1638_v30  ;;  %v1821_v43 = vmul.u32 %v1814_v25, %v1805_v48 }
 0x171   : > { %8736 = vsinq.f32 %v1750_v27  ;;  %v1556_v56 = vsel %vm1549_vm10, %v1552_v58, %v1555_v47  ;;  %v1645_v38 = vsel %vm1560_vm11, %v1644_v22, %v10103_v35  ;;  %v1825_v37 = vsel %vm1823_vm1, %v1824_v5, %v10203_v10  ;;  %v14853_v58 = vld [vmem:[#allocation3_spill] sm:$0xff] }
 0x172   : > { %v1888_v28 = vshrl.u32 %v14818_v15, %v14850_v23  ;;  %v1557_v31 = vsel %vm1546_vm12, nan, %v1556_v56  ;;  %v1642_v51 = vxor.u32 2147483648, %v1641_v9  ;;  %v1826_v20 = vadd.s32 %v1825_v37, %v1821_v43  ;;  %v14855_v43 = vld [vmem:[#allocation31_spill] sm:$0xff] }
 0x173   : > { %v1877_v25 = vand.u32 8388607, %v14573_v17  ;;  %v10245_v61 = vpack.c.bf16 %v1557_v31, %v10111_v40  ;;  %v1887_v24 = vshll.u32 %v14761_v7, %v14852_v54  ;;  %v1890_v35 = vshll.u32 %v14818_v15, %v14852_v54 }
 0x174   : > { %v1891_v10 = vshrl.u32 %v14756_v46, %v14850_v23  ;;  %v1643_v41 = vsel %vm1560_vm11, %v1642_v51, %v1641_v9  ;;  %v1827_v22 = vadd.s32 536870912, %v1826_v20  ;;  %v1893_v36 = vshll.u32 %v14756_v46, %v14852_v54 }
 0x175   : > { %14851 = vst [vmem:[#allocation18_spill] sm:$0xff] %v10245_v61  ;;  %v1894_v40 = vshrl.u32 %v14781_v4, %v14850_v23  ;;  %8093 = vmatprep.mubr.bf16.mxu0 %v10245_v61  ;;  %v1646_v12 = vsel %vm10209_vm0, %v9515_v8, %v1643_v41  ;;  %v1755_v44 = vadd.s32 3, %v1751_v29  ;;  %v1889_v48 = vor.u32 %v1888_v28, %v1887_v24 }
 0x176   : > { %v1892_v16 = vor.u32 %v1891_v10, %v1890_v35  ;;  %v1647_v30 = vsel %vm10209_vm0, 0, %v1645_v38  ;;  %8738 = vcosq.f32 %v1646_v12  ;;  %v10265_v39 = vshrl.u32 %v1827_v22, 30 }
 0x177   : > { %v1895_v27 = vor.u32 %v1894_v40, %v1893_v36  ;;  %v1300_v47 = vadd.f32 %v10100_v52, %v9951_v33  ;;  %8740 = vsinq.f32 %v1646_v12  ;;  %v1878_v5 = vor.u32 8388608, %v1877_v25  ;;  %v14856_v52 = vld [vmem:[#allocation5_spill] sm:$0xff] }
 0x178   : > { %vm1904_vm15 = vcmp.lt.s32.totalorder %v14853_v58, 3  ;;  %v10271_v9 = vadd.s32 4294967169, %v10095_v1  ;;  %v1829_v29 = vshll.u32 %v10265_v39, 30  ;;  %vm1902_vm3 = vcmp.lt.s32.totalorder %v14853_v58, 1 }
 0x179   : > { %v1916_v56 = vsel %vm1904_vm15, %v14855_v43, %v14854_v32  ;;  %v1651_v37 = vadd.s32 3, %v1647_v30  ;;  %v1910_v33 = vsel %vm1902_vm3, %v1889_v48, %v1892_v16  ;;  %v1912_v28 = vsel %vm1904_vm15, %v1895_v27, %v14856_v52 }
 0x17a   : > { %v8735_v38 = vpop.eup %8734  ;;  %v1914_v1 = vsel %vm1902_vm3, %v1892_v16, %v1895_v27  ;;  %v14857_v51 = vand.u32 2139095040, %v10073_v42  ;;  %v1756_v54 = vand.u32 3, %v1755_v44  ;;  %v10288_v24 = vsub.s32 %v1826_v20, %v1829_v29 }
 0x17b   : > { %v8737_v31 = vpop.eup %8736  ;;  %vm1903_vm5 = vcmp.lt.s32.totalorder %v14853_v58, 2  ;;  %v10292_v35 = vadd.f32 %v10023_v13, %v1300_v47  ;;  %v1907_v10 = vsel %vm1905_vm2, %v1895_v27, 2102212464  ;;  %v1918_v22 = vshll.u32 %v1878_v5, 8 }
 0x17c   : > { %v2706_v25 = vshrl.u32 %v14857_v51, 23  ;;  %v1917_v41 = vsel %vm1903_vm5, %v1914_v1, %v1916_v56  ;;  %v1759_v36 = vxor.u32 2147483648, %v8737_v31  ;;  %v1762_v40 = vxor.u32 2147483648, %v8735_v38 }
 0x17d   : > { %14858 = vst [vmem:[#allocation7_spill] sm:$0xff] %v10292_v35  ;;  %v1832_v12 = vsub.s32 0, %v10288_v24  ;;  %v1913_v20 = vsel %vm1903_vm5, %v1910_v33, %v1912_v28  ;;  %v1652_v44 = vand.u32 3, %v1651_v37  ;;  %vm1754_vm6 = vweird.f32 %v14837_v21 }
 0x17e   : > { %v1886_v30 = vshrl.u32 %v14761_v7, %v14850_v23  ;;  %v10304_v47 = vmul.u32.u64.low %v1918_v22, %v1917_v41  ;;  %v10305_v29 = vmul.u32.u64.high %v1918_v22, %v1917_v41, %v10304_v47  ;;  %vm2401_vm2 = vcmp.gt.s32.totalorder %v10069_v14, 0 }
 0x17f   : > { %v7645_v27 = vadd.s32 4294967169, %v2706_v25  ;;  %vm1758_vm8 = vcmp.eq.s32.totalorder %v1756_v54, 0  ;;  %vm1761_vm9 = vcmp.eq.s32.totalorder %v1756_v54, 2  ;;  %v7610_v5 = vmin.u32 %v1832_v12, %v10288_v24 }
 0x180   : > { %v1906_v32 = vsel %vm1902_vm3, %v1886_v30, %v1889_v48  ;;  %v1908_v43 = vsel %vm1904_vm15, %v1892_v16, %v1907_v10  ;;  %v10313_v56 = vmul.u32.u64.low %v1918_v22, %v1913_v20  ;;  %v10314_v37 = vmul.u32.u64.high %v1918_v22, %v1913_v20, %v10313_v56  ;;  %v8739_v23 = vpop.eup %8738 }
 0x181   : > { %v2809_v33 = vand.u32 2139095040, %v10292_v35  ;;  %v1760_v52 = vsel %vm1758_vm8, %v8735_v38, %v1759_v36  ;;  %v1763_v28 = vsel %vm1761_vm9, %v1762_v40, %v8737_v31  ;;  %v1834_v1 = vclz %v7610_v5  ;;  %v8741_v51 = vpop.eup %8740 }
 0x182   : > { %vm1650_vm10 = vweird.f32 %v9515_v8  ;;  %vm1657_vm11 = vcmp.eq.s32.totalorder %v1652_v44, 2  ;;  %v1658_v25 = vxor.u32 2147483648, %v8739_v23  ;;  %vm1757_vm12 = vcmp.lt.s32.totalorder %v1756_v54, 2 }
 0x183   : > { %v1655_v48 = vxor.u32 2147483648, %v8741_v51  ;;  %v7611_v41 = vadd.s32 4294967294, %v1834_v1  ;;  %v1909_v16 = vsel %vm1903_vm5, %v1906_v32, %v1908_v43  ;;  %vm1927_vm13 = vc.u32 %v10305_v29, %v10313_v56 }
 0x184   : > { %vm1654_vm14 = vcmp.eq.s32.totalorder %v1652_v44, 0  ;;  %v1659_v10 = vsel %vm1657_vm11, %v1658_v25, %v8741_v51  ;;  %v1764_v12 = vsel %vm1757_vm12, %v1760_v52, %v1763_v28  ;;  %v1928_v38 = vadd.s32 1, %v10314_v37  ;;  %v14860_v28 = vld [vmem:[#allocation15_spill] sm:$0xff]  ;;  %v14863_v51 = vld [vmem:[#allocation45_spill] sm:$0xff] }
 0x185   : > { %vm1653_vm0 = vcmp.lt.s32.totalorder %v1652_v44, 2  ;;  %v1656_v31 = vsel %vm1654_vm14, %v8739_v23, %v1655_v48  ;;  %v1822_v36 = vadd.s32 %v10202_v11, %v10199_v18  ;;  %vm7612_vm1 = vcmp.lt.s32.totalorder %v7611_v41, 0 }
 0x186   : > { %v1660_v54 = vsel %vm1653_vm0, %v1656_v31, %v1659_v10  ;;  %v1837_v40 = vsel %vm7612_vm1, 0, %v7611_v41  ;;  %v1925_v20 = vmul.u32 %v1918_v22, %v1909_v16  ;;  %v1929_v58 = vsel %vm1927_vm13, %v1928_v38, %v10314_v37  ;;  %v14867_v10 = vld [vmem:[#allocation10_spill] sm:$0xff] }
 0x187   : > { %v1661_v30 = vsel %vm1650_vm10, nan, %v1660_v54  ;;  %v1765_v47 = vsel %vm1754_vm6, nan, %v1764_v12  ;;  %v1838_v5 = vsub.s32 32, %v1837_v40  ;;  %v1842_v32 = vsub.s32 4294967266, %v1837_v40 }
 0x188   : > { %vm2609_vm15 = vcmp.gt.s32.totalorder %v10088_v53, 0  ;;  %v2920_v44 = vadd.s32 1, %v10271_v9  ;;  %v10333_v43 = vpack.c.bf16 %v1765_v47, %v1661_v30  ;;  %v1930_v18 = vadd.s32 %v1929_v58, %v1925_v20  ;;  %v14861_v9 = vld [vmem:[#allocation51_spill] sm:$0xff] }
 0x189   : > { %v2712_v11 = vadd.s32 1, %v7645_v27  ;;  %v1839_v22 = vshll.u32 %v10288_v24, %v1837_v40  ;;  %v1840_v23 = vshrl.u32 %v1822_v36, %v1838_v5  ;;  %v1843_v37 = vadd.s32 127, %v1842_v32  ;;  %v14869_v40 = vld [vmem:[#allocation28_spill] sm:$0xff] }
 0x18a   : > { %14859 = vst [vmem:[#allocation35_spill] sm:$0xff] %v10333_v43  ;;  %vm2529_vm3 = vcmp.lt.s32.totalorder %v9880_v34, 4  ;;  %v2402_v8 = vsel %vm2401_vm2, %v10069_v14, 0  ;;  %v2810_v21 = vshrl.u32 %v2809_v33, 23  ;;  %8094 = vmatmul.mubr.bf16.vlgmr.msra.gmra.mrb[0].mxu0 %v10333_v43  ;;  %v1931_v52 = vadd.s32 536870912, %v1930_v18  ;;  %v14870_v5 = vld [vmem:[#allocation52_spill] sm:$0xff] }
 0x18b   : > { %v14862_v1 = vor.u32 %v14860_v28, %v14861_v9  ;;  %v10351_v24 = vsel %vm2529_vm3, %v9965_v0, 920167782  ;;  %v1841_v25 = vor.u32 %v1840_v23, %v1839_v22  ;;  %v1844_v48 = vshll.u32 %v1843_v37, 23 }
 0x18c   : > { %14864 = vst [vmem:[#allocation44_spill] sm:$0xff] %v10351_v24  ;;  %v14865_v14 = vor.u32 %v9959_v45, %v9948_v2  ;;  %v10363_v41 = vsel %vm2609_vm15, %v10088_v53, 0  ;;  %v10365_v16 = vshrl.u32 %v1931_v52, 30  ;;  %v14572_v12 = vand.u32 2147483647, %v14867_v10  ;;  %v10370_v2 = vpop.permute.xlu1 %839 }
 0x18d   : > { %v10346_v27 = vsel %vm2217_vm7, %v14862_v1, 1326507024  ;;  %v10368_v38 = vshrl.u32 %v2402_v8, 5  ;;  %vm2921_vm5 = vcmp.gt.s32.totalorder %v2920_v44, 0  ;;  %vm2713_vm6 = vcmp.gt.s32.totalorder %v2712_v11, 0 }
 0x18e   : > { %v10358_v33 = vsel %vm2529_vm3, %v14865_v14, 1326507024  ;;  %v1845_v31 = vor.u32 4788187, %v1844_v48  ;;  %v7649_v36 = vadd.s32 4294967169, %v2810_v21  ;;  %v1852_v45 = vsub.s32 4, %v10265_v39 }
 0x18f   : > { %14866 = vst [vmem:[#allocation38_spill] sm:$0xff] %v10358_v33  ;;  %14868 = vst [vmem:[#allocation43_spill] sm:$0xff] %v10368_v38  ;;  %v1933_v54 = vshll.u32 %v10365_v16, 30  ;;  %v1992_v53 = vshrl.u32 %v14818_v15, %v14869_v40  ;;  %v1848_v58 = vcvt.s32.f32 %v1841_v25  ;;  %v1995_v30 = vshrl.u32 %v14756_v46, %v14869_v40  ;;  %v14871_v21 = vld [vmem:[#allocation24_spill] sm:$0xff]  ;;  %v14872_v25 = vld [vmem:[#allocation42_spill] sm:$0xff] }
 0x190   : > { %v1846_v20 = vand.u32 2147483647, %v1845_v31  ;;  %v1998_v47 = vshrl.u32 %v14781_v4, %v14869_v40  ;;  %v1078_v32 = vmul.f32 %v14870_v5, %v9229_v59  ;;  %vm1768_vm2 = vcmp.lt.s32.totalorder %v14836_v26, 0  ;;  %v14917_v38 = vld [vmem:[#allocation19_spill] sm:$0xff] }
 0x191   : > { %v10383_v22 = vsub.s32 %v1930_v18, %v1933_v54  ;;  %v1981_v23 = vand.u32 8388607, %v14572_v12  ;;  %v1991_v52 = vshll.u32 %v14761_v7, %v14871_v21  ;;  %v1994_v28 = vshll.u32 %v14818_v15, %v14871_v21 }
 0x192   : > { %v1849_v37 = vmul.f32 %v1848_v58, %v1846_v20  ;;  %v1997_v9 = vshll.u32 %v14756_v46, %v14871_v21  ;;  %v10393_v1 = vand.u32 31, %v2402_v8  ;;  %v918_v48 = vmul.f32 %v14872_v25, %v9231_v60  ;;  %v10409_v21 = vpop.permute.xlu1 %1011 }
 0x193   : > { %v1853_v18 = vsel %vm1768_vm2, %v1852_v45, %v10265_v39  ;;  %v1936_v14 = vsub.s32 0, %v10383_v22  ;;  %v10402_v31 = vsel %vm2921_vm5, %v2920_v44, 0  ;;  %v1993_v54 = vor.u32 %v1992_v53, %v1991_v52 }
 0x194   : > { %v1996_v20 = vor.u32 %v1995_v30, %v1994_v28  ;;  %v1999_v58 = vor.u32 %v1998_v47, %v1997_v9  ;;  %v10405_v5 = vsel %vm2713_vm6, %v2712_v11, 0  ;;  %v10407_v8 = vadd.s32 1, %v7649_v36  ;;  %v14876_v47 = vld [vmem:[#allocation4_spill] sm:$0xff]  ;;  %v14877_v9 = vld [vmem:[#allocation11_spill] sm:$0xff] }
 0x195   : > { %v14873_v25 = vand.u32 2147483647, %v14836_v26  ;;  %v7614_v39 = vmin.u32 %v1936_v14, %v10383_v22  ;;  %v10418_v44 = vadd.f32 %v1078_v32, %v918_v48  ;;  %v1850_v45 = vxor.u32 2147483648, %v1849_v37 }
 0x196   : > { %v1982_v11 = vor.u32 8388608, %v1981_v23  ;;  %v1990_v36 = vshrl.u32 %v14761_v7, %v14869_v40  ;;  %vm2006_vm9 = vcmp.lt.s32.totalorder %v14876_v47, 1  ;;  %vm2008_vm10 = vcmp.lt.s32.totalorder %v14876_v47, 3  ;;  %v1192_v61 = vpop.permute.xlu1 %1191 }
 0x197   : > { %vm10413_vm8 = vcmp.le.f32.partialorder %v14873_v25, 0.7853982  ;;  %v1938_v30 = vclz %v7614_v39  ;;  %v2011_v52 = vsel %vm2009_vm4, %v1999_v58, 2102212464  ;;  %v2014_v28 = vsel %vm2006_vm9, %v1993_v54, %v1996_v20  ;;  %v14878_v25 = vld [vmem:[#allocation39_spill] sm:$0xff]  ;;  %v14879_v39 = vld [vmem:[#allocation34_spill] sm:$0xff] }
 0x198   : > { %v1855_v53 = vsel %vm10413_vm8, 0, %v1853_v18  ;;  %v2016_v32 = vsel %vm2008_vm10, %v1999_v58, %v14877_v9  ;;  %v2018_v48 = vsel %vm2006_vm9, %v1996_v20, %v1999_v58  ;;  %vm1872_vm11 = vcmp.lt.s32.totalorder %v14849_v6, 0 }
 0x199   : > { %v1859_v14 = vadd.s32 3, %v1855_v53  ;;  %v7615_v18 = vadd.s32 4294967294, %v1938_v30  ;;  %vm2007_vm12 = vcmp.lt.s32.totalorder %v14876_v47, 2  ;;  %v1851_v40 = vsel %vm1768_vm2, %v1850_v45, %v1849_v37  ;;  %v14884_v47 = vld [vmem:[#allocation33_spill] sm:$0xff] }
 0x19a   : > { %v2010_v23 = vsel %vm2006_vm9, %v1990_v36, %v1993_v54  ;;  %v2020_v17 = vsel %vm2008_vm10, %v14879_v39, %v14878_v25  ;;  %v2022_v43 = vshll.u32 %v1982_v11, 8  ;;  %v2012_v35 = vsel %vm2008_vm10, %v1996_v20, %v2011_v52 }
 0x19b   : > { %vm7616_vm13 = vcmp.lt.s32.totalorder %v7615_v18, 0  ;;  %v2017_v58 = vsel %vm2007_vm12, %v2014_v28, %v2016_v32  ;;  %v2021_v53 = vsel %vm2007_vm12, %v2018_v48, %v2020_v17  ;;  %v1956_v9 = vsub.s32 4, %v10365_v16  ;;  %v14883_v32 = vld [vmem:[#allocation12_spill] sm:$0xff] }
 0x19c   : > { %v1941_v30 = vsel %vm7616_vm13, 0, %v7615_v18  ;;  %v10440_v42 = vmul.u32.u64.low %v2022_v43, %v2021_v53  ;;  %v10441_v49 = vmul.u32.u64.high %v2022_v43, %v2021_v53, %v10440_v42  ;;  %v1854_v37 = vsel %vm10413_vm8, %v14836_v26, %v1851_v40 }
 0x19d   : > { %v1926_v54 = vadd.s32 %v10313_v56, %v10305_v29  ;;  %v1942_v20 = vsub.s32 32, %v1941_v30  ;;  %v1946_v45 = vsub.s32 4294967266, %v1941_v30  ;;  %v1270_v11 = vmul.f32 %v1192_v61, %v9236_v63 }
 0x19e   : > { %v2013_v17 = vsel %vm2007_vm12, %v2010_v23, %v2012_v35  ;;  %v10451_v36 = vmul.u32.u64.low %v2022_v43, %v2017_v58  ;;  %v10452_v52 = vmul.u32.u64.high %v2022_v43, %v2017_v58, %v10451_v36  ;;  %v14880_v42 = vand.u32 2147483647, %v14849_v6 }
 0x19f   : > { %v1943_v12 = vshll.u32 %v10383_v22, %v1941_v30  ;;  %v1944_v29 = vshrl.u32 %v1926_v54, %v1942_v20  ;;  %v1947_v56 = vadd.s32 127, %v1946_v45  ;;  %v14582_v48 = vand.u32 2147483647, %v14883_v32  ;;  %v10472_v22 = vpop.permute.xlu1 %1199 }
 0x1a0   : > { %vm10457_vm4 = vcmp.le.f32.partialorder %v14880_v42, 0.7853982  ;;  %8742 = vcosq.f32 %v1854_v37  ;;  %v10463_v61 = vand.u32 3, %v1859_v14  ;;  %v1957_v35 = vsel %vm1872_vm11, %v1956_v9, %v10365_v16  ;;  %v14885_v14 = vld [vmem:[#allocation30_spill] sm:$0xff] }
 0x1a1   : > { %v2096_v18 = vshrl.u32 %v14818_v15, %v14884_v47  ;;  %8744 = vsinq.f32 %v1854_v37  ;;  %v1945_v40 = vor.u32 %v1944_v29, %v1943_v12  ;;  %v1948_v23 = vshll.u32 %v1947_v56, 23 }
 0x1a2   : > { %vm2031_vm14 = vc.u32 %v10441_v49, %v10451_v36  ;;  %v2029_v25 = vmul.u32 %v2022_v43, %v2013_v17  ;;  %v2032_v39 = vadd.s32 1, %v10452_v52  ;;  %v2095_v58 = vshll.u32 %v14761_v7, %v14885_v14 }
 0x1a3   : > { %v2099_v16 = vshrl.u32 %v14756_v46, %v14884_v47  ;;  %v1949_v53 = vor.u32 4788187, %v1948_v23  ;;  %v2085_v30 = vand.u32 8388607, %v14582_v48  ;;  %v2102_v9 = vshrl.u32 %v14781_v4, %v14884_v47  ;;  %v10497_v0 = vpop.permute.xlu1 %1203 }
 0x1a4   : > { %v2105_v37 = vshrl.u32 %v14759_v55, %v14884_v47  ;;  %v2033_v43 = vsel %vm2031_vm14, %v2032_v39, %v10452_v52  ;;  %v2097_v54 = vor.u32 %v2096_v18, %v2095_v58  ;;  %v2098_v20 = vshll.u32 %v14818_v15, %v14885_v14 }
 0x1a5   : > { %v2104_v45 = vshll.u32 %v14781_v4, %v14885_v14  ;;  %v1950_v17 = vand.u32 2147483647, %v1949_v53  ;;  %v1952_v42 = vcvt.s32.f32 %v1945_v40  ;;  %v2034_v12 = vadd.s32 %v2033_v43, %v2029_v25  ;;  %v14886_v43 = vld [vmem:[#allocation29_spill] sm:$0xff] }
 0x1a6   : > { %v2101_v29 = vshll.u32 %v14756_v46, %v14885_v14  ;;  %v2100_v56 = vor.u32 %v2099_v16, %v2098_v20  ;;  %v2107_v48 = vshll.u32 %v14759_v55, %v14885_v14  ;;  %v2108_v52 = vshrl.u32 %v14782_v3, %v14884_v47 }
 0x1a7   : > { %v2106_v23 = vor.u32 %v2105_v37, %v2104_v45  ;;  %v1953_v18 = vmul.f32 %v1952_v42, %v1950_v17  ;;  %v1302_v39 = vadd.f32 %v1270_v11, %v10418_v44  ;;  %v2035_v58 = vadd.s32 536870912, %v2034_v12 }
 0x1a8   : > { %v2103_v24 = vor.u32 %v2102_v9, %v2101_v29  ;;  %vm2817_vm0 = vcmp.gt.s32.totalorder %v10407_v8, 0  ;;  %v1959_v40 = vsel %vm10457_vm4, 0, %v1957_v35  ;;  %v2086_v25 = vor.u32 8388608, %v2085_v30 }
 0x1a9   : > { %v2094_v16 = vshrl.u32 %v14761_v7, %v14884_v47  ;;  %v2109_v14 = vor.u32 %v2108_v52, %v2107_v48  ;;  %v1954_v53 = vxor.u32 2147483648, %v1953_v18  ;;  %v10504_v37 = vshrl.u32 %v2035_v58, 30 }
 0x1aa   : > { %vm2110_vm1 = vcmp.lt.s32.totalorder %v14886_v43, 1  ;;  %vm2113_vm15 = vcmp.lt.s32.totalorder %v14886_v43, 4  ;;  %v8743_v44 = vpop.eup %8742  ;;  %vm2111_vm5 = vcmp.lt.s32.totalorder %v14886_v43, 2  ;;  %vm2112_vm6 = vcmp.lt.s32.totalorder %v14886_v43, 3 }
 0x1ab   : > { %v2118_v11 = vsel %vm2110_vm1, %v2097_v54, %v2100_v56  ;;  %v2119_v9 = vsel %vm2113_vm15, %v2106_v23, 920167782  ;;  %v2123_v35 = vsel %vm2113_vm15, %v2109_v14, 1326507024  ;;  %v8745_v30 = vpop.eup %8744  ;;  %v1955_v47 = vsel %vm1872_vm11, %v1954_v53, %v1953_v18  ;;  %v10528_v14 = vpop.permute.xlu1 %849 }
 0x1ac   : > { %v2037_v48 = vshll.u32 %v10504_v37, 30  ;;  %v2122_v20 = vsel %vm2110_vm1, %v2100_v56, %v2103_v24  ;;  %v1958_v45 = vsel %vm10457_vm4, %v14849_v6, %v1955_v47  ;;  %v2115_v17 = vsel %vm2113_vm15, %v2103_v24, 2102212464 }
 0x1ad   : > { %v2120_v42 = vsel %vm2112_vm6, %v2103_v24, %v2119_v9  ;;  %v2124_v29 = vsel %vm2112_vm6, %v2106_v23, %v2123_v35  ;;  %8746 = vcosq.f32 %v1958_v45  ;;  %v2126_v58 = vshll.u32 %v2086_v25, 8 }
 0x1ae   : > { %v10524_v52 = vsub.s32 %v2034_v12, %v2037_v48  ;;  %v2121_v18 = vsel %vm2111_vm5, %v2118_v11, %v2120_v42  ;;  %8748 = vsinq.f32 %v1958_v45  ;;  %v1963_v53 = vadd.s32 3, %v1959_v40 }
 0x1af   : > { %v2114_v28 = vsel %vm2110_vm1, %v2094_v16, %v2097_v54  ;;  %v2125_v24 = vsel %vm2111_vm5, %v2122_v20, %v2124_v29  ;;  %v2116_v12 = vsel %vm2112_vm6, %v2100_v56, %v2115_v17  ;;  %v1863_v11 = vxor.u32 2147483648, %v8745_v30 }
 0x1b0   : > { %v2040_v9 = vsub.s32 0, %v10524_v52  ;;  %v10537_v23 = vmul.u32.u64.low %v2126_v58, %v2125_v24  ;;  %v10538_v35 = vmul.u32.u64.high %v2126_v58, %v2125_v24, %v10537_v23  ;;  %v1866_v25 = vxor.u32 2147483648, %v8743_v44 }
 0x1b1   : > { %v10540_v47 = vmul.u32.u64.low %v2126_v58, %v2121_v18  ;;  %v10541_v48 = vmul.u32.u64.high %v2126_v58, %v2121_v18, %v10540_v47  ;;  %v10545_v40 = vshrl.u32 %v10363_v41, 5  ;;  %v10548_v54 = vand.u32 31, %v10363_v41  ;;  %v1016_v18 = vpop.permute.xlu1 %1015 }
 0x1b2   : > { %v10551_v16 = vand.u32 31, %v10402_v31  ;;  %v7618_v56 = vmin.u32 %v2040_v9, %v10524_v52  ;;  %v10555_v20 = vand.u32 31, %v10405_v5  ;;  %v1964_v45 = vand.u32 3, %v1963_v53 }
 0x1b3   : > { %14887 = vst [vmem:[#allocation27_spill] sm:$0xff] %v10545_v40  ;;  %14888 = vst [vmem:[#allocation9_spill] sm:$0xff] %v10548_v54  ;;  %v10558_v17 = vadd.f32 %v10023_v13, %v1302_v39  ;;  %v2117_v42 = vsel %vm2111_vm5, %v2114_v28, %v2116_v12  ;;  %v10565_v41 = vsel %vm2817_vm0, %v10407_v8, 0  ;;  %vm1862_vm2 = vcmp.eq.s32.totalorder %v10463_v61, 0  ;;  %v14892_v40 = vld [vmem:[#allocation41_spill] sm:$0xff] }
 0x1b4   : > { %14889 = vst [vmem:[#allocation25_spill] sm:$0xff] %v10551_v16  ;;  %14890 = vst [vmem:[#allocation20_spill] sm:$0xff] %v10555_v20  ;;  %vm1865_vm8 = vcmp.eq.s32.totalorder %v10463_v61, 2  ;;  %v2042_v29 = vclz %v7618_v56  ;;  %v1864_v24 = vsel %vm1862_vm2, %v8743_v44, %v1863_v11  ;;  %vm2135_vm9 = vc.u32 %v10538_v35, %v10540_v47 }
 0x1b5   : > { %14891 = vst [vmem:[#allocation3_spill] sm:$0xff] %v10558_v17  ;;  %v1867_v9 = vsel %vm1865_vm8, %v1866_v25, %v8745_v30  ;;  %v2136_v39 = vadd.s32 1, %v10541_v48  ;;  %vm1858_vm10 = vweird.f32 %v14836_v26  ;;  %vm1861_vm11 = vcmp.lt.s32.totalorder %v10463_v61, 2 }
 0x1b6   : > { %v7619_v43 = vadd.s32 4294967294, %v2042_v29  ;;  %v2133_v8 = vmul.u32 %v2126_v58, %v2117_v42  ;;  %vm1965_vm12 = vcmp.lt.s32.totalorder %v1964_v45, 2  ;;  %v3017_v53 = vand.u32 2139095040, %v10558_v17 }
 0x1b7   : > { %v2137_v28 = vsel %vm2135_vm9, %v2136_v39, %v10541_v48  ;;  %v1082_v12 = vmul.f32 %v1016_v18, %v9229_v59  ;;  %v8747_v44 = vpop.eup %8746  ;;  %v1868_v30 = vsel %vm1861_vm11, %v1864_v24, %v1867_v9  ;;  %vm1966_vm13 = vcmp.eq.s32.totalorder %v1964_v45, 0 }
 0x1b8   : > { %vm7620_vm4 = vcmp.lt.s32.totalorder %v7619_v43, 0  ;;  %v2138_v23 = vadd.s32 %v2137_v28, %v2133_v8  ;;  %v8749_v11 = vpop.eup %8748  ;;  %vm1969_vm14 = vcmp.eq.s32.totalorder %v1964_v45, 2  ;;  %v1970_v25 = vxor.u32 2147483648, %v8747_v44 }
 0x1b9   : > { %v2045_v56 = vsel %vm7620_vm4, 0, %v7619_v43  ;;  %v1114_v61 = vadd.f32 %v1082_v12, %v14892_v40  ;;  %v1967_v29 = vxor.u32 2147483648, %v8749_v11  ;;  %v2030_v58 = vadd.s32 %v10451_v36, %v10441_v49  ;;  %v14893_v43 = vld [vmem:[#allocation21_spill] sm:$0xff] }
 0x1ba   : > { %v2046_v42 = vsub.s32 32, %v2045_v56  ;;  %v2050_v17 = vsub.s32 4294967266, %v2045_v56  ;;  %v1869_v48 = vsel %vm1858_vm10, nan, %v1868_v30  ;;  %v1971_v18 = vsel %vm1969_vm14, %v1970_v25, %v8749_v11 }
 0x1bb   : > { %v2047_v24 = vshll.u32 %v10524_v52, %v2045_v56  ;;  %v2139_v9 = vadd.s32 536870912, %v2138_v23  ;;  %v1968_v39 = vsel %vm1966_vm13, %v8747_v44, %v1967_v29  ;;  %v10585_v33 = vadd.f32 %v14893_v43, %v1114_v61 }
 0x1bc   : > { %v2048_v8 = vshrl.u32 %v2030_v58, %v2046_v42  ;;  %v2051_v28 = vadd.s32 127, %v2050_v17  ;;  %vm1962_vm0 = vweird.f32 %v14849_v6  ;;  %v1972_v49 = vsel %vm1965_vm12, %v1968_v39, %v1971_v18 }
 0x1bd   : > { %v3018_v36 = vshrl.u32 %v3017_v53, 23  ;;  %v10589_v40 = vshrl.u32 %v2139_v9, 30  ;;  %v10593_v26 = vadd.f32 %v10023_v13, %v9896_v19  ;;  %v1973_v52 = vsel %vm1962_vm0, nan, %v1972_v49 }
 0x1be   : > { %v2049_v12 = vor.u32 %v2048_v8, %v2047_v24  ;;  %v2052_v30 = vshll.u32 %v2051_v28, 23  ;;  %v10596_v44 = vsub.s32 32, %v10555_v20  ;;  %v10598_v17 = vpack.c.bf16 %v1973_v52, %v1869_v48  ;;  %v1008_v24 = vpop.permute.xlu0 %1007 }
 0x1bf   : > { %14894 = vst [vmem:[#allocation36_spill] sm:$0xff] %v10593_v26  ;;  %v2060_v11 = vsub.s32 4, %v10504_v37  ;;  %v2141_v6 = vshll.u32 %v10589_v40, 30  ;;  %v10603_v45 = vsub.s32 32, %v10393_v1  ;;  %v10606_v53 = vsub.s32 32, %v10548_v54 }
 0x1c0   : > { %14895 = vst [vmem:[#allocation31_spill] sm:$0xff] %v10596_v44  ;;  %14896 = vst [vmem:[#allocation5_spill] sm:$0xff] %v10598_v17  ;;  %v10609_v19 = vand.u32 31, %v10565_v41  ;;  %v2053_v13 = vor.u32 4788187, %v2052_v30  ;;  %v10612_v25 = vshrl.u32 %v10402_v31, 5  ;;  %8097 = vmatprep.mubr.bf16.mxu0 %v10598_v17  ;;  %v2056_v48 = vcvt.s32.f32 %v2049_v12 }
 0x1c1   : > { %14897 = vst [vmem:[#allocation15_spill] sm:$0xff] %v10606_v53  ;;  %v10615_v56 = vsub.s32 32, %v10551_v16  ;;  %v7657_v61 = vadd.s32 4294967169, %v3018_v36  ;;  %v10618_v29 = vsub.s32 %v2138_v23, %v2141_v6  ;;  %v3121_v58 = vand.u32 2139095040, %v10593_v26 }
 0x1c2   : > { %14898 = vst [vmem:[#allocation51_spill] sm:$0xff] %v10609_v19  ;;  %14899 = vst [vmem:[#allocation45_spill] sm:$0xff] %v10612_v25  ;;  %vm1976_vm1 = vcmp.lt.s32.totalorder %v14867_v10, 0  ;;  %v2054_v42 = vand.u32 2147483647, %v2053_v13  ;;  %v2729_v18 = vshrl.u32 %v14759_v55, %v10596_v44  ;;  %v10626_v31 = vshrl.u32 %v14782_v3, %v10596_v44 }
 0x1c3   : > { %14900 = vst [vmem:[#allocation10_spill] sm:$0xff] %v10615_v56  ;;  %v2061_v9 = vsel %vm1976_vm1, %v2060_v11, %v10504_v37  ;;  %v2144_v23 = vsub.s32 0, %v10618_v29  ;;  %v10633_v39 = vshrl.u32 %v10405_v5, 5  ;;  %v2728_v8 = vshll.u32 %v14781_v4, %v10555_v20 }
 0x1c4   : > { %v10638_v28 = vsub.s32 32, %v10609_v19  ;;  %v2057_v43 = vmul.f32 %v2056_v48, %v2054_v42  ;;  %v10642_v49 = vshll.u32 %v14759_v55, %v10555_v20  ;;  %v3024_v36 = vadd.s32 1, %v7657_v61 }
 0x1c5   : > { %v14902_v52 = vand.u32 2147483647, %v14867_v10  ;;  %v7622_v5 = vmin.u32 %v2144_v23, %v10618_v29  ;;  %v3122_v12 = vshrl.u32 %v3121_v58, 23  ;;  %v1080_v30 = vmul.f32 %v1008_v24, %v9229_v59 }
 0x1c6   : > { %14901 = vst [vmem:[#allocation28_spill] sm:$0xff] %v10638_v28  ;;  %v2058_v11 = vxor.u32 2147483648, %v2057_v43  ;;  %v10654_v13 = vor.u32 %v2729_v18, %v2728_v8  ;;  %v10659_v42 = vshrl.u32 %v10565_v41, 5  ;;  %v10667_v58 = vshrl.u32 %v14759_v55, %v10638_v28 }
 0x1c7   : > { %vm10646_vm15 = vcmp.le.f32.partialorder %v14902_v52, 0.7853982  ;;  %v2146_v48 = vclz %v7622_v5  ;;  %v10663_v52 = vshll.u32 %v14781_v4, %v10609_v19  ;;  %v10671_v24 = vshll.u32 %v14759_v55, %v10609_v19  ;;  %v14905_v5 = vld [vmem:[#allocation16_spill] sm:$0xff] }
 0x1c8   : > { %v2063_v6 = vsel %vm10646_vm15, 0, %v2061_v9  ;;  %v2059_v18 = vsel %vm1976_vm1, %v2058_v11, %v2057_v43  ;;  %vm3025_vm5 = vcmp.gt.s32.totalorder %v3024_v36, 0  ;;  %v7661_v8 = vadd.s32 4294967169, %v3122_v12  ;;  %v14906_v43 = vld [vmem:[#allocation17_spill] sm:$0xff] }
 0x1c9   : > { %v2062_v41 = vsel %vm10646_vm15, %v14867_v10, %v2059_v18  ;;  %v2067_v9 = vadd.s32 3, %v2063_v6  ;;  %v7623_v23 = vadd.s32 4294967294, %v2146_v48  ;;  %v1112_v61 = vadd.f32 %v1080_v30, %v14905_v5 }
 0x1ca   : > { %8750 = vcosq.f32 %v2062_v41  ;;  %v1272_v17 = vmul.f32 %v10472_v22, %v9236_v63  ;;  %v10683_v26 = vshrl.u32 %v14782_v3, %v10638_v28  ;;  %v10688_v37 = vmul.f32 %v10370_v2, %v9231_v60 }
 0x1cb   : > { %8752 = vsinq.f32 %v2062_v41  ;;  %vm7624_vm6 = vcmp.lt.s32.totalorder %v7623_v23, 0  ;;  %v10690_v6 = vsel %vm3025_vm5, %v3024_v36, 0  ;;  %v2164_v30 = vsub.s32 4, %v10589_v40 }
 0x1cc   : > { %v2149_v12 = vsel %vm7624_vm6, 0, %v7623_v23  ;;  %v10693_v48 = vand.u32 3, %v2067_v9  ;;  %v2134_v22 = vadd.s32 %v10540_v47, %v10538_v35  ;;  %v10697_v41 = vadd.s32 1, %v7661_v8 }
 0x1cd   : > { %v2150_v18 = vsub.s32 32, %v2149_v12  ;;  %v2154_v5 = vsub.s32 4294967266, %v2149_v12  ;;  %v10701_v11 = vmul.f32 %v10409_v21, %v9229_v59  ;;  %vm2080_vm2 = vcmp.lt.s32.totalorder %v14883_v32, 0 }
 0x1ce   : > { %v1304_v2 = vadd.f32 %v1272_v17, %v1112_v61  ;;  %v2151_v36 = vshll.u32 %v10618_v29, %v2149_v12  ;;  %v14907_v9 = vand.u32 2147483647, %v14906_v43  ;;  %v10708_v35 = vand.u32 31, %v10690_v6  ;;  %v14912_v12 = vld [vmem:[#allocation32_spill] sm:$0xff] }
 0x1cf   : > { %v2152_v23 = vshrl.u32 %v2134_v22, %v2150_v18  ;;  %v2155_v25 = vadd.s32 127, %v2154_v5  ;;  %v14909_v47 = vand.u32 2147483647, %v14883_v32  ;;  %v2165_v21 = vsel %vm2080_vm2, %v2164_v30, %v10589_v40  ;;  %v14913_v18 = vld [vmem:[#allocation37_spill] sm:$0xff]  ;;  %v10732_v40 = vld [vmem:[%s14746_s1] ss:$0 sm:$0xff] }
 0x1d0   : > { %v2189_v16 = vand.u32 8388607, %v14907_v9  ;;  %14908 = vst [vmem:[#allocation52_spill] sm:$0xff] %v10708_v35  ;;  %v10721_v17 = vmul.f32 %v10497_v0, %v9236_v63  ;;  %vm2070_vm9 = vcmp.eq.s32.totalorder %v10693_v48, 0  ;;  %v2199_v22 = vshll.u32 %v14761_v7, %v14912_v12 }
 0x1d1   : > { %vm10712_vm8 = vcmp.le.f32.partialorder %v14909_v47, 0.7853982  ;;  %v2153_v29 = vor.u32 %v2152_v23, %v2151_v36  ;;  %v2156_v61 = vshll.u32 %v2155_v25, 23  ;;  %v2200_v5 = vshrl.u32 %v14818_v15, %v14913_v18 }
 0x1d2   : > { %vm2073_vm10 = vcmp.eq.s32.totalorder %v10693_v48, 2  ;;  %v10735_v0 = vadd.f32 %v10732_v40, %v1304_v2  ;;  %v2202_v30 = vshll.u32 %v14818_v15, %v14912_v12  ;;  %v2203_v25 = vshrl.u32 %v14756_v46, %v14913_v18 }
 0x1d3   : > { %v2157_v36 = vor.u32 4788187, %v2156_v61  ;;  %v2167_v23 = vsel %vm10712_vm8, 0, %v2165_v21  ;;  %v2190_v9 = vor.u32 8388608, %v2189_v16  ;;  %v2201_v47 = vor.u32 %v2200_v5, %v2199_v22 }
 0x1d4   : > { %14914 = vst [vmem:[#allocation24_spill] sm:$0xff] %v10735_v0  ;;  %v8751_v56 = vpop.eup %8750  ;;  %vm2069_vm11 = vcmp.lt.s32.totalorder %v10693_v48, 2  ;;  %v2198_v28 = vshrl.u32 %v14761_v7, %v14913_v18  ;;  %v2204_v2 = vor.u32 %v2203_v25, %v2202_v30  ;;  %v2205_v19 = vshll.u32 %v14756_v46, %v14912_v12  ;;  %v14915_v12 = vld [vmem:[#allocation50_spill] sm:$0xff] }
 0x1d5   : > { %v2206_v20 = vshrl.u32 %v14781_v4, %v14913_v18  ;;  %v8753_v44 = vpop.eup %8752  ;;  %v2074_v61 = vxor.u32 2147483648, %v8751_v56  ;;  %v2158_v54 = vand.u32 2147483647, %v2157_v36  ;;  %v2160_v53 = vcvt.s32.f32 %v2153_v29  ;;  %v14916_v36 = vld [vmem:[#allocation54_spill] sm:$0xff] }
 0x1d6   : > { %vm2214_vm12 = vcmp.lt.s32.totalorder %v14863_v51, 1  ;;  %v2071_v16 = vxor.u32 2147483648, %v8753_v44  ;;  %vm2216_vm13 = vcmp.lt.s32.totalorder %v14863_v51, 3  ;;  %v2171_v63 = vadd.s32 3, %v2167_v23 }
 0x1d7   : > { %v2207_v21 = vor.u32 %v2206_v20, %v2205_v19  ;;  %v2222_v22 = vsel %vm2214_vm12, %v2201_v47, %v2204_v2  ;;  %v2161_v5 = vmul.f32 %v2160_v53, %v2158_v54  ;;  %vm2215_vm4 = vcmp.lt.s32.totalorder %v14863_v51, 2 }
 0x1d8   : > { %v2228_v30 = vsel %vm2216_vm13, %v14915_v12, %v10346_v27  ;;  %v2218_v25 = vsel %vm2214_vm12, %v2198_v28, %v2201_v47  ;;  %v2230_v19 = vshll.u32 %v2190_v9, 8  ;;  %v2072_v54 = vsel %vm2070_vm9, %v8751_v56, %v2071_v16 }
 0x1d9   : > { %v2219_v18 = vsel %vm2217_vm7, %v2207_v21, 2102212464  ;;  %v2224_v29 = vsel %vm2216_vm13, %v2207_v21, %v14916_v36  ;;  %v2226_v34 = vsel %vm2214_vm12, %v2204_v2, %v2207_v21  ;;  %v2162_v50 = vxor.u32 2147483648, %v2161_v5  ;;  %v14919_v21 = vld [vmem:[#allocation49_spill] sm:$0xff] }
 0x1da   : > { %v2220_v57 = vsel %vm2216_vm13, %v2204_v2, %v2219_v18  ;;  %v2225_v20 = vsel %vm2215_vm4, %v2222_v22, %v2224_v29  ;;  %v2075_v53 = vsel %vm2073_vm10, %v2074_v61, %v8753_v44  ;;  %v2229_v23 = vsel %vm2215_vm4, %v2226_v34, %v2228_v30  ;;  %v14918_v61 = vld [vmem:[#allocation40_spill] sm:$0xff] }
 0x1db   : > { %v14614_v27 = vand.u32 2147483647, %v14917_v38  ;;  %v2163_v51 = vsel %vm2080_vm2, %v2162_v50, %v2161_v5  ;;  %v2221_v28 = vsel %vm2215_vm4, %v2218_v25, %v2220_v57  ;;  %v3225_v2 = vand.u32 2139095040, %v10735_v0 }
 0x1dc   : > { %v10765_v47 = vmul.u32.u64.low %v2230_v19, %v2229_v23  ;;  %v10766_v12 = vmul.u32.u64.high %v2230_v19, %v2229_v23, %v10765_v47  ;;  %v2166_v9 = vsel %vm10712_vm8, %v14883_v32, %v2163_v51  ;;  %v2076_v34 = vsel %vm2069_vm11, %v2072_v54, %v2075_v53 }
 0x1dd   : > { %v10772_v56 = vmul.u32.u64.low %v2230_v19, %v2225_v20  ;;  %v10773_v16 = vmul.u32.u64.high %v2230_v19, %v2225_v20, %v10772_v56  ;;  %8754 = vcosq.f32 %v2166_v9  ;;  %v10778_v44 = vand.u32 3, %v2171_v63 }
 0x1de   : > { %v2293_v57 = vand.u32 8388607, %v14614_v27  ;;  %8756 = vsinq.f32 %v2166_v9  ;;  %v2237_v50 = vmul.u32 %v2230_v19, %v2221_v28  ;;  %v2303_v8 = vshll.u32 %v14761_v7, %v14918_v61 }
 0x1df   : > { %v2304_v22 = vshrl.u32 %v14818_v15, %v14919_v21  ;;  %vm2239_vm7 = vc.u32 %v10766_v12, %v10772_v56  ;;  %v2302_v48 = vshrl.u32 %v14761_v7, %v14919_v21  ;;  %v2306_v63 = vshll.u32 %v14818_v15, %v14918_v61 }
 0x1e0   : > { %v2307_v5 = vshrl.u32 %v14756_v46, %v14919_v21  ;;  %v2240_v30 = vadd.s32 1, %v10773_v16  ;;  %v2309_v18 = vshll.u32 %v14756_v46, %v14918_v61  ;;  %v2310_v36 = vshrl.u32 %v14781_v4, %v14919_v21 }
 0x1e1   : > { %v2305_v25 = vor.u32 %v2304_v22, %v2303_v8  ;;  %v2294_v29 = vor.u32 8388608, %v2293_v57  ;;  %v2312_v19 = vshll.u32 %v14781_v4, %v14918_v61  ;;  %v2313_v54 = vshrl.u32 %v14759_v55, %v14919_v21  ;;  %v14920_v57 = vld [vmem:[#allocation46_spill] sm:$0xff] }
 0x1e2   : > { %v2308_v20 = vor.u32 %v2307_v5, %v2306_v63  ;;  %vm2066_vm14 = vweird.f32 %v14867_v10  ;;  %v2241_v53 = vsel %vm2239_vm7, %v2240_v30, %v10773_v16  ;;  %v2311_v23 = vor.u32 %v2310_v36, %v2309_v18 }
 0x1e3   : > { %v2315_v51 = vshll.u32 %v14759_v55, %v14918_v61  ;;  %v2316_v28 = vshrl.u32 %v14782_v3, %v14919_v21  ;;  %v2242_v47 = vadd.s32 %v2241_v53, %v2237_v50  ;;  %v2314_v9 = vor.u32 %v2313_v54, %v2312_v19 }
 0x1e4   : > { %vm2318_vm0 = vcmp.lt.s32.totalorder %v14920_v57, 1  ;;  %vm2319_vm1 = vcmp.lt.s32.totalorder %v14920_v57, 2  ;;  %vm2320_vm15 = vcmp.lt.s32.totalorder %v14920_v57, 3  ;;  %vm2321_vm5 = vcmp.lt.s32.totalorder %v14920_v57, 4  ;;  %v1020_v57 = vpop.permute.xlu0 %1019 }
 0x1e5   : > { %v2317_v8 = vor.u32 %v2316_v28, %v2315_v51  ;;  %v2326_v22 = vsel %vm2318_vm0, %v2305_v25, %v2308_v20  ;;  %vm3129_vm6 = vcmp.gt.s32.totalorder %v10697_v41, 0  ;;  %v2243_v16 = vadd.s32 536870912, %v2242_v47 }
 0x1e6   : > { %v2323_v63 = vsel %vm2321_vm5, %v2311_v23, 2102212464  ;;  %v2327_v61 = vsel %vm2321_vm5, %v2314_v9, 920167782  ;;  %v2330_v5 = vsel %vm2318_vm0, %v2308_v20, %v2311_v23  ;;  %v2322_v30 = vsel %vm2318_vm0, %v2302_v48, %v2305_v25 }
 0x1e7   : > { %v2328_v50 = vsel %vm2320_vm15, %v2311_v23, %v2327_v61  ;;  %v2331_v21 = vsel %vm2321_vm5, %v2317_v8, 1326507024  ;;  %v2334_v18 = vshll.u32 %v2294_v29, 8  ;;  %v8755_v36 = vpop.eup %8754  ;;  %v10816_v19 = vshrl.u32 %v2243_v16, 30 }
 0x1e8   : > { %v2324_v54 = vsel %vm2320_vm15, %v2308_v20, %v2323_v63  ;;  %v2329_v53 = vsel %vm2319_vm1, %v2326_v22, %v2328_v50  ;;  %v2332_v51 = vsel %vm2320_vm15, %v2314_v9, %v2331_v21  ;;  %v8757_v28 = vpop.eup %8756  ;;  %v2178_v27 = vxor.u32 2147483648, %v8755_v36 }
 0x1e9   : > { %v2333_v48 = vsel %vm2319_vm1, %v2330_v5, %v2332_v51  ;;  %v10826_v25 = vmul.u32.u64.low %v2334_v18, %v2329_v53  ;;  %v10827_v23 = vmul.u32.u64.high %v2334_v18, %v2329_v53, %v10826_v25  ;;  %vm2173_vm2 = vcmp.lt.s32.totalorder %v10778_v44, 2 }
 0x1ea   : > { %v2175_v29 = vxor.u32 2147483648, %v8757_v28  ;;  %vm2177_vm8 = vcmp.eq.s32.totalorder %v10778_v44, 2  ;;  %v2245_v20 = vshll.u32 %v10816_v19, 30  ;;  %vm2174_vm9 = vcmp.eq.s32.totalorder %v10778_v44, 0 }
 0x1eb   : > { %v2179_v8 = vsel %vm2177_vm8, %v2178_v27, %v8757_v28  ;;  %v10834_v9 = vmul.u32.u64.low %v2334_v18, %v2333_v48  ;;  %v10835_v22 = vmul.u32.u64.high %v2334_v18, %v2333_v48, %v10834_v9  ;;  %v2077_v16 = vsel %vm2066_vm14, nan, %v2076_v34 }
 0x1ec   : > { %v2176_v63 = vsel %vm2174_vm9, %v8755_v36, %v2175_v29  ;;  %v10839_v61 = vsub.s32 %v2242_v47, %v2245_v20  ;;  %v2325_v5 = vsel %vm2319_vm1, %v2322_v30, %v2324_v54  ;;  %v1113_v50 = vadd.f32 %v10701_v11, %v10688_v37 }
 0x1ed   : > { %vm2170_vm10 = vweird.f32 %v14883_v32  ;;  %v2180_v21 = vsel %vm2173_vm2, %v2176_v63, %v2179_v8  ;;  %v2344_v27 = vadd.s32 1, %v10827_v23  ;;  %v10848_v44 = vsub.s32 32, %v10708_v35 }
 0x1ee   : > { %v2181_v53 = vsel %vm2170_vm10, nan, %v2180_v21  ;;  %v3226_v10 = vshrl.u32 %v3225_v2, 23  ;;  %v2248_v34 = vsub.s32 0, %v10839_v61  ;;  %v1305_v30 = vadd.f32 %v10721_v17, %v1113_v50 }
 0x1ef   : > { %14921 = vst [vmem:[#allocation42_spill] sm:$0xff] %v10848_v44  ;;  %v10853_v47 = vpack.c.bf16 %v2181_v53, %v2077_v16  ;;  %v2341_v11 = vmul.u32 %v2334_v18, %v2325_v5  ;;  %vm2343_vm11 = vc.u32 %v10835_v22, %v10826_v25  ;;  %v10860_v32 = vor.u32 %v10667_v58, %v10663_v52  ;;  %v1024_v16 = vpop.permute.xlu0 %1023 }
 0x1f0   : > { %v2837_v37 = vor.u32 %v10683_v26, %v10671_v24  ;;  %v7626_v2 = vmin.u32 %v2248_v34, %v10839_v61  ;;  %v2345_v36 = vsel %vm2343_vm11, %v2344_v27, %v10827_v23  ;;  %vm2737_vm12 = vcmp.lt.s32.totalorder %v10633_v39, 4  ;;  %v10892_v23 = vpop.permute.xlu1 %854 }
 0x1f1   : > { %14922 = vst [vmem:[#allocation4_spill] sm:$0xff] %v10853_v47  ;;  %vm2841_vm13 = vcmp.lt.s32.totalorder %v10659_v42, 4  ;;  %v3130_v17 = vsel %vm3129_vm6, %v10697_v41, 0  ;;  %8098 = vmatmul.mubr.bf16.gmra.mrb[4].mxu0 %v10853_v47  ;;  %v2346_v18 = vadd.s32 %v2345_v36, %v2341_v11  ;;  %v10875_v52 = vsel %vm2737_vm12, %v10654_v13, 920167782 }
 0x1f2   : > { %v10878_v26 = vshrl.u32 %v10690_v6, 5  ;;  %v7665_v58 = vadd.s32 4294967169, %v3226_v10  ;;  %v2250_v24 = vclz %v7626_v2  ;;  %v14924_v54 = vor.u32 %v10626_v31, %v10642_v49 }
 0x1f3   : > { %v3041_v41 = vshrl.u32 %v14759_v55, %v10848_v44  ;;  %v10890_v28 = vadd.f32 %v10732_v40, %v1305_v30  ;;  %v2347_v48 = vadd.s32 536870912, %v2346_v18  ;;  %v10897_v6 = vsel %vm2841_vm13, %v10860_v32, 920167782 }
 0x1f4   : > { %14923 = vst [vmem:[#allocation11_spill] sm:$0xff] %v10878_v26  ;;  %v10885_v51 = vsel %vm2737_vm12, %v14924_v54, 1326507024  ;;  %v10901_v31 = vsel %vm2841_vm13, %v2837_v37, 1326507024  ;;  %v10903_v49 = vshrl.u32 %v3130_v17, 5  ;;  %v3040_v8 = vshll.u32 %v14781_v4, %v10708_v35 }
 0x1f5   : > { %14925 = vst [vmem:[#allocation39_spill] sm:$0xff] %v10890_v28  ;;  %v7627_v29 = vadd.s32 4294967294, %v2250_v24  ;;  %v10905_v20 = vand.u32 31, %v3130_v17  ;;  %v3044_v9 = vshrl.u32 %v14782_v3, %v10848_v44  ;;  %v10911_v63 = vshrl.u32 %v2347_v48, 30  ;;  %v860_v24 = vpop.permute.xlu1 %859 }
 0x1f6   : > { %14926 = vst [vmem:[#allocation34_spill] sm:$0xff] %v10903_v49  ;;  %v3043_v5 = vshll.u32 %v14759_v55, %v10708_v35  ;;  %vm3049_vm4 = vcmp.lt.s32.totalorder %v10878_v26, 4  ;;  %v3232_v50 = vadd.s32 1, %v7665_v58  ;;  %v10916_v21 = vor.u32 %v3041_v41, %v3040_v8 }
 0x1f7   : > { %14927 = vst [vmem:[#allocation12_spill] sm:$0xff] %v10905_v20  ;;  %vm7628_vm7 = vcmp.lt.s32.totalorder %v7627_v29, 0  ;;  %v3329_v27 = vand.u32 2139095040, %v10890_v28  ;;  %v2349_v10 = vshll.u32 %v10911_v63, 30  ;;  %v2238_v34 = vadd.s32 %v10772_v56, %v10766_v12 }
 0x1f8   : > { %14928 = vst [vmem:[#allocation33_spill] sm:$0xff] %v10916_v21  ;;  %v2253_v53 = vsel %vm7628_vm7, 0, %v7627_v29  ;;  %v2268_v37 = vsub.s32 4, %v10816_v19  ;;  %v3045_v2 = vor.u32 %v3044_v9, %v3043_v5  ;;  %v1083_v36 = vmul.f32 %v1020_v57, %v9229_v59  ;;  %v1040_v57 = vpop.permute.xlu0 %1039 }
 0x1f9   : > { %v2254_v30 = vsub.s32 32, %v2253_v53  ;;  %v2258_v11 = vsub.s32 4294967266, %v2253_v53  ;;  %v923_v17 = vmul.f32 %v10528_v14, %v9231_v60  ;;  %v10926_v58 = vsub.s32 %v2346_v18, %v2349_v10 }
 0x1fa   : > { %vm3233_vm14 = vcmp.gt.s32.totalorder %v3232_v50, 0  ;;  %v2255_v54 = vshll.u32 %v10839_v61, %v2253_v53  ;;  %v10930_v12 = vsub.s32 32, %v10905_v20  ;;  %v10935_v56 = vsel %vm3049_vm4, %v10916_v21, 920167782 }
 0x1fb   : > { %v2256_v41 = vshrl.u32 %v2238_v34, %v2254_v30  ;;  %v2259_v48 = vadd.s32 127, %v2258_v11  ;;  %14930 = vst [vmem:[#allocation29_spill] sm:$0xff] %v10935_v56  ;;  %vm2184_vm0 = vcmp.lt.s32.totalorder %v14906_v43, 0  ;;  %v2352_v14 = vsub.s32 0, %v10926_v58 }
 0x1fc   : > { %14929 = vst [vmem:[#allocation30_spill] sm:$0xff] %v10930_v12  ;;  %v3330_v18 = vshrl.u32 %v3329_v27, 23  ;;  %v2269_v61 = vsel %vm2184_vm0, %v2268_v37, %v10816_v19  ;;  %v10944_v9 = vsel %vm3049_vm4, %v3045_v2, 1326507024  ;;  %v3234_v5 = vsel %vm3233_vm14, %v3232_v50, 0  ;;  %v1028_v2 = vpop.permute.xlu1 %1027 }
 0x1fd   : > { %v2257_v29 = vor.u32 %v2256_v41, %v2255_v54  ;;  %v2260_v8 = vshll.u32 %v2259_v48, 23  ;;  %14931 = vst [vmem:[#allocation41_spill] sm:$0xff] %v10944_v9  ;;  %v10947_v53 = vmul.f32 %v1024_v16, %v9229_v59  ;;  %v7630_v10 = vmin.u32 %v2352_v14, %v10926_v58 }
 0x1fe   : > { %v10950_v34 = vadd.f32 %v1083_v36, %v923_v17  ;;  %v10953_v27 = vmul.f32 %v1040_v57, %v9229_v59  ;;  %v14932_v30 = vand.u32 2147483647, %v14906_v43  ;;  %v10963_v50 = vadd.f32 %v10732_v40, %v10585_v33 }
 0x1ff   : > { %v2261_v19 = vor.u32 4788187, %v2260_v8  ;;  %v2354_v37 = vclz %v7630_v10  ;;  %v14615_v36 = vand.u32 2147483647, %v9888_v62  ;;  %v10968_v17 = vshrl.u32 %v3234_v5, 5 }
 0x200   : > { %vm10957_vm1 = vcmp.le.f32.partialorder %v14932_v30, 0.7853982  ;;  %14935 = vst [vmem:[#allocation21_spill] sm:$0xff] %v10963_v50  ;;  %v10970_v54 = vadd.s32 4294967169, %v3330_v18  ;;  %v2264_v48 = vcvt.s32.f32 %v2257_v29  ;;  %v10972_v57 = vand.u32 31, %v3234_v5  ;;  %v11011_v12 = vpop.permute.xlu1 %1211 }
 0x201   : > { %v2271_v16 = vsel %vm10957_vm1, 0, %v2269_v61  ;;  %14936 = vst [vmem:[#allocation16_spill] sm:$0xff] %v10968_v17  ;;  %v2262_v41 = vand.u32 2147483647, %v2261_v19  ;;  %v7631_v14 = vadd.s32 4294967294, %v2354_v37  ;;  %v10975_v8 = vmul.f32 %v860_v24, %v9231_v60 }
 0x202   : > { %14937 = vst [vmem:[#allocation17_spill] sm:$0xff] %v10972_v57  ;;  %v2408_v33 = vshrl.u32 %v14818_v15, %v10603_v45  ;;  %v10979_v10 = vadd.s32 3, %v2271_v16  ;;  %v2342_v30 = vadd.s32 %v10826_v25, %v10835_v22  ;;  %v10984_v18 = vmul.f32 %v1028_v2, %v9229_v59 }
 0x203   : > { %v2265_v61 = vmul.f32 %v2264_v48, %v2262_v41  ;;  %vm7632_vm15 = vcmp.lt.s32.totalorder %v7631_v14, 0  ;;  %v2397_v29 = vand.u32 8388607, %v14615_v36  ;;  %v2407_v24 = vshll.u32 %v14761_v7, %v10393_v1 }
 0x204   : > { %v2411_v5 = vshrl.u32 %v14756_v46, %v10603_v45  ;;  %v2357_v37 = vsel %vm7632_vm15, 0, %v7631_v14  ;;  %v2414_v16 = vshrl.u32 %v14781_v4, %v10603_v45  ;;  %v2417_v25 = vshrl.u32 %v14759_v55, %v10603_v45 }
 0x205   : > { %v2266_v19 = vxor.u32 2147483648, %v2265_v61  ;;  %vm2288_vm5 = vcmp.lt.s32.totalorder %v14917_v38, 0  ;;  %v2358_v22 = vsub.s32 32, %v2357_v37  ;;  %v2362_v2 = vsub.s32 4294967266, %v2357_v37 }
 0x206   : > { %v2409_v41 = vor.u32 %v2408_v33, %v2407_v24  ;;  %v2410_v48 = vshll.u32 %v14818_v15, %v10393_v1  ;;  %v2413_v14 = vshll.u32 %v14756_v46, %v10393_v1  ;;  %v2416_v47 = vshll.u32 %v14781_v4, %v10393_v1 }
 0x207   : > { %v2267_v36 = vsel %vm2184_vm0, %v2266_v19, %v2265_v61  ;;  %v2420_v28 = vshrl.u32 %v14782_v3, %v10603_v45  ;;  %v2359_v33 = vshll.u32 %v10926_v58, %v2357_v37  ;;  %v2360_v24 = vshrl.u32 %v2342_v30, %v2358_v22  ;;  %v14941_v22 = vld [vmem:[#allocation43_spill] sm:$0xff] }
 0x208   : > { %v2270_v0 = vsel %vm10957_vm1, %v14906_v43, %v2267_v36  ;;  %v2363_v49 = vadd.s32 127, %v2362_v2  ;;  %v14938_v61 = vand.u32 2147483647, %v14917_v38  ;;  %v2412_v20 = vor.u32 %v2411_v5, %v2410_v48 }
 0x209   : > { %v2415_v56 = vor.u32 %v2414_v16, %v2413_v14  ;;  %v2418_v21 = vor.u32 %v2417_v25, %v2416_v47  ;;  %v2419_v9 = vshll.u32 %v14759_v55, %v10393_v1  ;;  %v2361_v11 = vor.u32 %v2360_v24, %v2359_v33 }
 0x20a   : > { %vm11015_vm6 = vcmp.le.f32.partialorder %v14938_v61, 0.7853982  ;;  %v2364_v36 = vshll.u32 %v2363_v49, 23  ;;  %v2398_v26 = vor.u32 8388608, %v2397_v29  ;;  %v2406_v58 = vshrl.u32 %v14761_v7, %v10603_v45 }
 0x20b   : > { %8758 = vcosq.f32 %v2270_v0  ;;  %v2372_v30 = vsub.s32 4, %v10911_v63  ;;  %v2421_v37 = vor.u32 %v2420_v28, %v2419_v9  ;;  %vm2422_vm2 = vcmp.lt.s32.totalorder %v14941_v22, 1  ;;  %v11034_v9 = vpop.permute.xlu1 %1215 }
 0x20c   : > { %8760 = vsinq.f32 %v2270_v0  ;;  %v2365_v2 = vor.u32 4788187, %v2364_v36  ;;  %vm2423_vm8 = vcmp.lt.s32.totalorder %v14941_v22, 2  ;;  %vm2425_vm9 = vcmp.lt.s32.totalorder %v14941_v22, 4  ;;  %v14942_v36 = vld [vmem:[#allocation26_spill] sm:$0xff] }
 0x20d   : > { %vm2424_vm10 = vcmp.lt.s32.totalorder %v14941_v22, 3  ;;  %v2427_v1 = vsel %vm2425_vm9, %v2415_v56, 2102212464  ;;  %v2430_v47 = vsel %vm2422_vm2, %v2409_v41, %v2412_v20  ;;  %v2431_v49 = vsel %vm2425_vm9, %v2418_v21, 920167782 }
 0x20e   : > { %v2366_v45 = vand.u32 2147483647, %v2365_v2  ;;  %v2368_v29 = vcvt.s32.f32 %v2361_v11  ;;  %v2432_v28 = vsel %vm2424_vm10, %v2415_v56, %v2431_v49  ;;  %v2434_v0 = vsel %vm2422_vm2, %v2412_v20, %v2415_v56 }
 0x20f   : > { %v2373_v5 = vsel %vm2288_vm5, %v2372_v30, %v10911_v63  ;;  %v2433_v16 = vsel %vm2423_vm8, %v2430_v47, %v2432_v28  ;;  %v2435_v25 = vsel %vm2425_vm9, %v2421_v37, 1326507024  ;;  %v2438_v48 = vshll.u32 %v2398_v26, 8  ;;  %v11077_v28 = vpop.permute.xlu1 %864 }
 0x210   : > { %v2369_v14 = vmul.f32 %v2368_v29, %v2366_v45  ;;  %v2426_v33 = vsel %vm2422_vm2, %v2406_v58, %v2409_v41  ;;  %v2428_v24 = vsel %vm2424_vm10, %v2412_v20, %v2427_v1  ;;  %v2436_v56 = vsel %vm2424_vm10, %v2418_v21, %v2435_v25  ;;  %v14944_v29 = vld [vmem:[#allocation57_spill] sm:$0xff] }
 0x211   : > { %v2437_v61 = vsel %vm2423_vm8, %v2434_v0, %v2436_v56  ;;  %v11049_v11 = vmul.u32.u64.low %v2438_v48, %v2433_v16  ;;  %v11050_v63 = vmul.u32.u64.high %v2438_v48, %v2433_v16, %v11049_v11  ;;  %v14628_v30 = vand.u32 2147483647, %v14942_v36 }
 0x212   : > { %v2370_v26 = vxor.u32 2147483648, %v2369_v14  ;;  %v2375_v37 = vsel %vm11015_vm6, 0, %v2373_v5  ;;  %v11056_v41 = vmul.u32.u64.low %v2438_v48, %v2437_v61  ;;  %v11057_v58 = vmul.u32.u64.high %v2438_v48, %v2437_v61, %v11056_v41 }
 0x213   : > { %v11060_v20 = vadd.s32 1, %v10970_v54  ;;  %v11064_v2 = vand.u32 3, %v10979_v10  ;;  %v2429_v1 = vsel %vm2423_vm8, %v2426_v33, %v2428_v24  ;;  %v11069_v47 = vsub.s32 32, %v10972_v57 }
 0x214   : > { %v2371_v49 = vsel %vm2288_vm5, %v2370_v26, %v2369_v14  ;;  %v1117_v45 = vadd.f32 %v10984_v18, %v10975_v8  ;;  %v2512_v54 = vshrl.u32 %v14818_v15, %v14944_v29  ;;  %v2379_v22 = vadd.s32 3, %v2375_v37  ;;  %v14945_v8 = vld [vmem:[#allocation55_spill] sm:$0xff] }
 0x215   : > { %14943 = vst [vmem:[#allocation32_spill] sm:$0xff] %v11069_v47  ;;  %v8759_v0 = vpop.eup %8758  ;;  %v2374_v10 = vsel %vm11015_vm6, %v14917_v38, %v2371_v49  ;;  %v2448_v5 = vadd.s32 1, %v11050_v63  ;;  %v2501_v16 = vand.u32 8388607, %v14628_v30  ;;  %v2445_v14 = vmul.u32 %v2438_v48, %v2429_v1 }
 0x216   : > { %v8761_v25 = vpop.eup %8760  ;;  %8762 = vcosq.f32 %v2374_v10  ;;  %vm2447_vm11 = vc.u32 %v11057_v58, %v11049_v11  ;;  %v2511_v18 = vshll.u32 %v14761_v7, %v14945_v8  ;;  %vm2278_vm7 = vcmp.eq.s32.totalorder %v11064_v2, 0 }
 0x217   : > { %vm2281_vm14 = vcmp.eq.s32.totalorder %v11064_v2, 2  ;;  %8764 = vsinq.f32 %v2374_v10  ;;  %v2449_v19 = vsel %vm2447_vm11, %v2448_v5, %v11050_v63  ;;  %vm2277_vm0 = vcmp.lt.s32.totalorder %v11064_v2, 2  ;;  %v11101_v5 = vpop.permute.xlu1 %1031 }
 0x218   : > { %v2450_v33 = vadd.s32 %v2449_v19, %v2445_v14  ;;  %v2513_v24 = vor.u32 %v2512_v54, %v2511_v18  ;;  %v2514_v48 = vshll.u32 %v14818_v15, %v14945_v8  ;;  %v2515_v56 = vshrl.u32 %v14756_v46, %v14944_v29  ;;  %14946 = vst [vmem:[#allocation37_spill] sm:$0xff] %v11101_v5  ;;  %v14948_v18 = vld [vmem:[#allocation38_spill] sm:$0xff]  ;;  %v14949_v19 = vld [vmem:[#allocation8_spill] sm:$0xff] }
 0x219   : > { %v2380_v61 = vand.u32 3, %v2379_v22  ;;  %v2502_v26 = vor.u32 8388608, %v2501_v16  ;;  %v2517_v37 = vshll.u32 %v14756_v46, %v14945_v8  ;;  %v2518_v41 = vshrl.u32 %v14781_v4, %v14944_v29  ;;  %v14947_v22 = vld [vmem:[#allocation56_spill] sm:$0xff] }
 0x21a   : > { %v2279_v1 = vxor.u32 2147483648, %v8761_v25  ;;  %v2282_v63 = vxor.u32 2147483648, %v8759_v0  ;;  %v2451_v49 = vadd.s32 536870912, %v2450_v33  ;;  %v2516_v10 = vor.u32 %v2515_v56, %v2514_v48  ;;  %v14950_v56 = vld [vmem:[#allocation44_spill] sm:$0xff] }
 0x21b   : > { %vm2274_vm1 = vweird.f32 %v14906_v43  ;;  %v2510_v54 = vshrl.u32 %v14761_v7, %v14944_v29  ;;  %v2519_v14 = vor.u32 %v2518_v41, %v2517_v37  ;;  %vm2526_vm15 = vcmp.lt.s32.totalorder %v14947_v22, 1 }
 0x21c   : > { %vm2528_vm5 = vcmp.lt.s32.totalorder %v14947_v22, 3  ;;  %v11108_v16 = vshrl.u32 %v2451_v49, 30  ;;  %vm2527_vm6 = vcmp.lt.s32.totalorder %v14947_v22, 2  ;;  %v2534_v8 = vsel %vm2526_vm15, %v2513_v24, %v2516_v10 }
 0x21d   : > { %v2540_v48 = vsel %vm2528_vm5, %v14949_v19, %v14948_v18  ;;  %vm3337_vm2 = vcmp.gt.s32.totalorder %v11060_v20, 0  ;;  %vm2378_vm8 = vweird.f32 %v14917_v38  ;;  %v2531_v29 = vsel %vm2529_vm3, %v2519_v14, 2102212464  ;;  %v14955_v38 = vld [vmem:[#allocation23_spill] sm:$0xff] }
 0x21e   : > { %v2536_v37 = vsel %vm2528_vm5, %v2519_v14, %v14950_v56  ;;  %v2538_v41 = vsel %vm2526_vm15, %v2516_v10, %v2519_v14  ;;  %v2542_v49 = vshll.u32 %v2502_v26, 8  ;;  %v2280_v30 = vsel %vm2278_vm7, %v8759_v0, %v2279_v1 }
 0x21f   : > { %v2283_v18 = vsel %vm2281_vm14, %v2282_v63, %v8761_v25  ;;  %v2453_v19 = vshll.u32 %v11108_v16, 30  ;;  %v2537_v21 = vsel %vm2527_vm6, %v2534_v8, %v2536_v37  ;;  %v2530_v44 = vsel %vm2526_vm15, %v2510_v54, %v2513_v24  ;;  %v1036_v8 = vpop.permute.xlu1 %1035 }
 0x220   : > { %v2541_v56 = vsel %vm2527_vm6, %v2538_v41, %v2540_v48  ;;  %v11137_v35 = vmul.u32.u64.low %v2542_v49, %v2537_v21  ;;  %v11138_v14 = vmul.u32.u64.high %v2542_v49, %v2537_v21, %v11137_v35  ;;  %v8763_v26 = vpop.eup %8762  ;;  %v2532_v25 = vsel %vm2528_vm5, %v2516_v10, %v2531_v29  ;;  %v14951_v48 = vld [vmem:[#allocation22_spill] sm:$0xff] }
 0x221   : > { %v11141_v0 = vsub.s32 %v2450_v33, %v2453_v19  ;;  %v11145_v1 = vmul.u32.u64.low %v2542_v49, %v2541_v56  ;;  %v11146_v63 = vmul.u32.u64.high %v2542_v49, %v2541_v56, %v11145_v1  ;;  %v8765_v37 = vpop.eup %8764  ;;  %v2284_v24 = vsel %vm2277_vm0, %v2280_v30, %v2283_v18  ;;  %v14952_v21 = vld [vmem:[#allocation6_spill] sm:$0xff] }
 0x222   : > { %v2386_v54 = vxor.u32 2147483648, %v8763_v26  ;;  %v1309_v41 = vadd.f32 %v14951_v48, %v1117_v45  ;;  %v1275_v5 = vmul.f32 %v11011_v12, %v14952_v21  ;;  %vm2382_vm3 = vcmp.eq.s32.totalorder %v2380_v61, 0 }
 0x223   : > { %v2383_v33 = vxor.u32 2147483648, %v8765_v37  ;;  %vm2385_vm9 = vcmp.eq.s32.totalorder %v2380_v61, 2  ;;  %v2456_v19 = vsub.s32 0, %v11141_v0  ;;  %v2533_v29 = vsel %vm2527_vm6, %v2530_v44, %v2532_v25 }
 0x224   : > { %v2387_v10 = vsel %vm2385_vm9, %v2386_v54, %v8765_v37  ;;  %v2552_v56 = vadd.s32 1, %v11138_v14  ;;  %v1087_v2 = vmul.f32 %v1036_v8, %v9229_v59  ;;  %v2285_v30 = vsel %vm2274_vm1, nan, %v2284_v24  ;;  %v14953_v37 = vld [vmem:[#allocation47_spill] sm:$0xff] }
 0x225   : > { %vm2381_vm10 = vcmp.lt.s32.totalorder %v2380_v61, 2  ;;  %v2384_v45 = vsel %vm2382_vm3, %v8763_v26, %v2383_v33  ;;  %v7634_v12 = vmin.u32 %v2456_v19, %v11141_v0  ;;  %v1307_v1 = vadd.f32 %v1275_v5, %v10950_v34 }
 0x226   : > { %v2388_v18 = vsel %vm2381_vm10, %v2384_v45, %v2387_v10  ;;  %vm2551_vm11 = vc.u32 %v11146_v63, %v11137_v35  ;;  %v1119_v22 = vadd.f32 %v1087_v2, %v14953_v37  ;;  %v3248_v44 = vshll.u32 %v14781_v4, %v10972_v57 }
 0x227   : > { %v2389_v25 = vsel %vm2378_vm8, nan, %v2388_v18  ;;  %v2458_v43 = vclz %v7634_v12  ;;  %v2549_v8 = vmul.u32 %v2542_v49, %v2533_v29  ;;  %v3249_v61 = vshrl.u32 %v14759_v55, %v11069_v47 }
 0x228   : > { %v3251_v26 = vshll.u32 %v14759_v55, %v10972_v57  ;;  %v11173_v34 = vpack.c.bf16 %v2389_v25, %v2285_v30  ;;  %v2553_v5 = vsel %vm2551_vm11, %v2552_v56, %v11138_v14  ;;  %v3338_v24 = vsel %vm3337_vm2, %v11060_v20, 0 }
 0x229   : > { %v7635_v54 = vadd.s32 4294967294, %v2458_v43  ;;  %v2554_v48 = vadd.s32 %v2553_v5, %v2549_v8  ;;  %v11180_v33 = vadd.f32 %v14955_v38, %v1119_v22  ;;  %v3252_v49 = vshrl.u32 %v14782_v3, %v11069_v47 }
 0x22a   : > { %14954 = vst [vmem:[#allocation50_spill] sm:$0xff] %v11173_v34  ;;  %8101 = vmatprep.mubr.bf16.mxu0 %v11173_v34  ;;  %v11186_v19 = vadd.f32 %v10732_v40, %v1309_v41  ;;  %v11189_v10 = vadd.f32 %v10732_v40, %v1307_v1  ;;  %v2476_v14 = vsub.s32 4, %v11108_v16  ;;  %vm3257_vm7 = vcmp.lt.s32.totalorder %v10968_v17, 4 }
 0x22b   : > { %v14958_v20 = vand.u32 2139095040, %v10963_v50  ;;  %vm7636_vm14 = vcmp.lt.s32.totalorder %v7635_v54, 0  ;;  %v2555_v56 = vadd.s32 536870912, %v2554_v48  ;;  %v11195_v2 = vor.u32 %v3249_v61, %v3248_v44 }
 0x22c   : > { %14956 = vst [vmem:[#allocation54_spill] sm:$0xff] %v11186_v19  ;;  %14957 = vst [vmem:[#allocation19_spill] sm:$0xff] %v11189_v10  ;;  %v11197_v30 = vand.u32 31, %v3338_v24  ;;  %vm2392_vm0 = vcmp.lt.s32.totalorder %v9888_v62, 0  ;;  %v2461_v41 = vsel %vm7636_vm14, 0, %v7635_v54  ;;  %v2446_v40 = vadd.s32 %v11049_v11, %v11057_v58 }
 0x22d   : > { %v3434_v29 = vshrl.u32 %v14958_v20, 23  ;;  %14959 = vst [vmem:[#allocation40_spill] sm:$0xff] %v11195_v2  ;;  %v2462_v45 = vsub.s32 32, %v2461_v41  ;;  %v2466_v12 = vsub.s32 4294967266, %v2461_v41  ;;  %v11202_v18 = vshrl.u32 %v2555_v56, 30  ;;  %v14967_v20 = vld [vmem:[#allocation48_spill] sm:$0xff] }
 0x22e   : > { %14960 = vst [vmem:[#allocation49_spill] sm:$0xff] %v11197_v30  ;;  %v3253_v1 = vor.u32 %v3252_v49, %v3251_v26  ;;  %v3745_v37 = vand.u32 2139095040, %v11186_v19  ;;  %v3537_v22 = vand.u32 2139095040, %v11189_v10  ;;  %v2477_v44 = vsel %vm2392_vm0, %v2476_v14, %v11108_v16  ;;  %v14969_v56 = vld [vmem:[#allocation58_spill] sm:$0xff]  ;;  %v14971_v19 = vld [vmem:[#allocation9_spill] sm:$0xff] }
 0x22f   : > { %v2463_v25 = vshll.u32 %v11141_v0, %v2461_v41  ;;  %v2464_v43 = vshrl.u32 %v2446_v40, %v2462_v45  ;;  %v2467_v8 = vadd.s32 127, %v2466_v12  ;;  %v2557_v61 = vshll.u32 %v11202_v18, 30 }
 0x230   : > { %v11211_v11 = vshrl.u32 %v3338_v24, 5  ;;  %v11214_v58 = vsub.s32 32, %v11197_v30  ;;  %v7673_v26 = vadd.s32 4294967169, %v3434_v29  ;;  %v14962_v5 = vand.u32 2147483647, %v9888_v62 }
 0x231   : > { %v2465_v38 = vor.u32 %v2464_v43, %v2463_v25  ;;  %v2468_v16 = vshll.u32 %v2467_v8, 23  ;;  %v11224_v49 = vsub.s32 %v2554_v48, %v2557_v61  ;;  %v11229_v24 = vsel %vm3257_vm7, %v11195_v2, 920167782 }
 0x232   : > { %14961 = vst [vmem:[#allocation46_spill] sm:$0xff] %v11214_v58  ;;  %vm11218_vm1 = vcmp.le.f32.partialorder %v14962_v5, 0.7853982  ;;  %14965 = vst [vmem:[#allocation43_spill] sm:$0xff] %v11229_v24  ;;  %v11233_v14 = vsel %vm3257_vm7, %v3253_v1, 1326507024  ;;  %v11237_v29 = vadd.f32 %v10953_v27, %v14967_v20  ;;  %v11247_v25 = vshll.u32 %v14759_v55, %v11197_v30 }
 0x233   : > { %v2479_v0 = vsel %vm11218_vm1, 0, %v2477_v44  ;;  %14966 = vst [vmem:[#allocation26_spill] sm:$0xff] %v11233_v14  ;;  %v14638_v41 = vand.u32 2147483647, %v14969_v56  ;;  %v3746_v40 = vshrl.u32 %v3745_v37, 23  ;;  %v3538_v45 = vshrl.u32 %v3537_v22, 23 }
 0x234   : > { %14968 = vst [vmem:[#allocation57_spill] sm:$0xff] %v11237_v29  ;;  %v2469_v12 = vor.u32 4788187, %v2468_v16  ;;  %v2560_v48 = vsub.s32 0, %v11224_v49  ;;  %v11243_v44 = vshll.u32 %v14781_v4, %v11197_v30  ;;  %v11249_v1 = vadd.s32 1, %v7673_v26  ;;  %v14970_v16 = vld [vmem:[#allocation15_spill] sm:$0xff] }
 0x235   : > { %v2483_v43 = vadd.s32 3, %v2479_v0  ;;  %v11253_v27 = vshrl.u32 %v14759_v55, %v11214_v58  ;;  %v2472_v22 = vcvt.s32.f32 %v2465_v38  ;;  %v11258_v61 = vshrl.u32 %v14782_v3, %v11214_v58 }
 0x236   : > { %v2470_v37 = vand.u32 2147483647, %v2469_v12  ;;  %v7638_v8 = vmin.u32 %v2560_v48, %v11224_v49  ;;  %v11262_v5 = vmul.f32 %v10892_v23, %v9231_v60  ;;  %v2605_v26 = vand.u32 8388607, %v14638_v41 }
 0x237   : > { %v2616_v0 = vshrl.u32 %v14818_v15, %v14970_v16  ;;  %v11268_v20 = vadd.s32 4294967169, %v3746_v40  ;;  %v11270_v12 = vadd.s32 4294967169, %v3538_v45  ;;  %v11272_v34 = vand.u32 3, %v2483_v43 }
 0x238   : > { %v2473_v38 = vmul.f32 %v2472_v22, %v2470_v37  ;;  %v2562_v48 = vclz %v7638_v8  ;;  %vm2496_vm15 = vcmp.lt.s32.totalorder %v14942_v36, 0  ;;  %v2550_v23 = vadd.s32 %v11137_v35, %v11146_v63 }
 0x239   : > { %v2615_v10 = vshll.u32 %v14761_v7, %v14971_v19  ;;  %v2619_v40 = vshrl.u32 %v14756_v46, %v14970_v16  ;;  %v2622_v45 = vshrl.u32 %v14781_v4, %v14970_v16  ;;  %v2580_v37 = vsub.s32 4, %v11202_v18 }
 0x23a   : > { %v2474_v41 = vxor.u32 2147483648, %v2473_v38  ;;  %v7639_v50 = vadd.s32 4294967294, %v2562_v48  ;;  %v2606_v43 = vor.u32 8388608, %v2605_v26  ;;  %v2614_v22 = vshrl.u32 %v14761_v7, %v14970_v16 }
 0x23b   : > { %v2617_v8 = vor.u32 %v2616_v0, %v2615_v10  ;;  %v2618_v63 = vshll.u32 %v14818_v15, %v14971_v19  ;;  %v2621_v48 = vshll.u32 %v14756_v46, %v14971_v19  ;;  %vm3441_vm6 = vcmp.gt.s32.totalorder %v11249_v1, 0 }
 0x23c   : > { %v2475_v35 = vsel %vm2392_vm0, %v2474_v41, %v2473_v38  ;;  %vm7640_vm5 = vcmp.lt.s32.totalorder %v7639_v50, 0  ;;  %v2624_v10 = vshll.u32 %v14781_v4, %v14971_v19  ;;  %v2625_v41 = vshrl.u32 %v14759_v55, %v14970_v16 }
 0x23d   : > { %v2478_v26 = vsel %vm11218_vm1, %v9888_v62, %v2475_v35  ;;  %v2565_v30 = vsel %vm7640_vm5, 0, %v7639_v50  ;;  %v2620_v58 = vor.u32 %v2619_v40, %v2618_v63  ;;  %v2623_v2 = vor.u32 %v2622_v45, %v2621_v48  ;;  %v14972_v40 = vld [vmem:[#allocation27_spill] sm:$0xff] }
 0x23e   : > { %v2566_v0 = vsub.s32 32, %v2565_v30  ;;  %v2570_v38 = vsub.s32 4294967266, %v2565_v30  ;;  %v2581_v14 = vsel %vm2496_vm15, %v2580_v37, %v11202_v18  ;;  %v2626_v24 = vor.u32 %v2625_v41, %v2624_v10 }
 0x23f   : > { %v2627_v54 = vshll.u32 %v14759_v55, %v14971_v19  ;;  %v2628_v50 = vshrl.u32 %v14782_v3, %v14970_v16  ;;  %8766 = vcosq.f32 %v2478_v26  ;;  %v2567_v35 = vshll.u32 %v11224_v49, %v2565_v30 }
 0x240   : > { %v2568_v17 = vshrl.u32 %v2550_v23, %v2566_v0  ;;  %v2571_v57 = vadd.s32 127, %v2570_v38  ;;  %8768 = vsinq.f32 %v2478_v26  ;;  %vm2630_vm2 = vcmp.lt.s32.totalorder %v14972_v40, 1 }
 0x241   : > { %v2629_v47 = vor.u32 %v2628_v50, %v2627_v54  ;;  %vm2633_vm8 = vcmp.lt.s32.totalorder %v14972_v40, 4  ;;  %v2638_v63 = vsel %vm2630_vm2, %v2617_v8, %v2620_v58  ;;  %vm2632_vm3 = vcmp.lt.s32.totalorder %v14972_v40, 3  ;;  %v14973_v54 = vld [vmem:[#allocation13_spill] sm:$0xff] }
 0x242   : > { %v2569_v45 = vor.u32 %v2568_v17, %v2567_v35  ;;  %v2572_v18 = vshll.u32 %v2571_v57, 23  ;;  %v2635_v37 = vsel %vm2633_vm8, %v2623_v2, 2102212464  ;;  %v2639_v19 = vsel %vm2633_vm8, %v2626_v24, 920167782 }
 0x243   : > { %v2642_v48 = vsel %vm2630_vm2, %v2620_v58, %v2623_v2  ;;  %v2643_v16 = vsel %vm2633_vm8, %v2629_v47, 1326507024  ;;  %vm2631_vm9 = vcmp.lt.s32.totalorder %v14972_v40, 2  ;;  %v2634_v30 = vsel %vm2630_vm2, %v2614_v22, %v2617_v8 }
 0x244   : > { %v2573_v10 = vor.u32 4788187, %v2572_v18  ;;  %v2640_v49 = vsel %vm2632_vm3, %v2623_v2, %v2639_v19  ;;  %v2636_v23 = vsel %vm2632_vm3, %v2620_v58, %v2635_v37  ;;  %v2644_v41 = vsel %vm2632_vm3, %v2626_v24, %v2643_v16 }
 0x245   : > { %v2641_v26 = vsel %vm2631_vm9, %v2638_v63, %v2640_v49  ;;  %v2646_v0 = vshll.u32 %v2606_v43, 8  ;;  %v2576_v57 = vcvt.s32.f32 %v2569_v45  ;;  %v2645_v38 = vsel %vm2631_vm9, %v2642_v48, %v2644_v41 }
 0x246   : > { %v2574_v17 = vand.u32 2147483647, %v2573_v10  ;;  %v14654_v50 = vand.u32 2147483647, %v14973_v54  ;;  %v11326_v2 = vor.u32 %v11253_v27, %v11243_v44  ;;  %v11331_v58 = vsel %vm3441_vm6, %v11249_v1, 0  ;;  %v14977_v27 = vld [vmem:[#allocation31_spill] sm:$0xff] }
 0x247   : > { %v11317_v35 = vmul.u32.u64.low %v2646_v0, %v2645_v38  ;;  %v11318_v47 = vmul.u32.u64.high %v2646_v0, %v2645_v38, %v11317_v35  ;;  %v11320_v18 = vmul.u32.u64.low %v2646_v0, %v2641_v26  ;;  %v11321_v29 = vmul.u32.u64.high %v2646_v0, %v2641_v26, %v11320_v18 }
 0x248   : > { %v11335_v24 = vadd.f32 %v10947_v53, %v11262_v5  ;;  %v2577_v43 = vmul.f32 %v2576_v57, %v2574_v17  ;;  %v11338_v22 = vadd.s32 1, %v11268_v20  ;;  %v14974_v8 = vand.u32 2147483647, %v14942_v36 }
 0x249   : > { %v2637_v44 = vsel %vm2631_vm9, %v2634_v30, %v2636_v23  ;;  %v2720_v1 = vshrl.u32 %v14818_v15, %v14977_v27  ;;  %v8767_v37 = vpop.eup %8766  ;;  %v11351_v53 = vadd.s32 1, %v11270_v12  ;;  %v1276_v63 = vmul.f32 %v11034_v9, %v14952_v21  ;;  %v14978_v12 = vld [vmem:[#allocation20_spill] sm:$0xff] }
 0x24a   : > { %vm11342_vm10 = vcmp.le.f32.partialorder %v14974_v8, 0.7853982  ;;  %v2578_v5 = vxor.u32 2147483648, %v2577_v43  ;;  %v8769_v19 = vpop.eup %8768  ;;  %vm2486_vm11 = vcmp.eq.s32.totalorder %v11272_v34, 0  ;;  %vm2655_vm14 = vc.u32 %v11318_v47, %v11320_v18 }
 0x24b   : > { %v2583_v20 = vsel %vm11342_vm10, 0, %v2581_v14  ;;  %v2656_v40 = vadd.s32 1, %v11321_v29  ;;  %v2709_v48 = vand.u32 8388607, %v14654_v50  ;;  %v2719_v16 = vshll.u32 %v14761_v7, %v14978_v12  ;;  %v11613_v50 = vpop.permute.xlu1 %879 }
 0x24c   : > { %v2579_v14 = vsel %vm2496_vm15, %v2578_v5, %v2577_v43  ;;  %v2653_v10 = vmul.u32 %v2646_v0, %v2637_v44  ;;  %v2722_v9 = vshll.u32 %v14818_v15, %v14978_v12  ;;  %v2723_v30 = vshrl.u32 %v14756_v46, %v14977_v27 }
 0x24d   : > { %v2582_v49 = vsel %vm11342_vm10, %v14942_v36, %v2579_v14  ;;  %v2587_v23 = vadd.s32 3, %v2583_v20  ;;  %v2657_v26 = vsel %vm2655_vm14, %v2656_v40, %v11321_v29  ;;  %v2721_v41 = vor.u32 %v2720_v1, %v2719_v16 }
 0x24e   : > { %vm2485_vm0 = vcmp.lt.s32.totalorder %v11272_v34, 2  ;;  %vm2489_vm1 = vcmp.eq.s32.totalorder %v11272_v34, 2  ;;  %8770 = vcosq.f32 %v2582_v49  ;;  %v2658_v0 = vadd.s32 %v2657_v26, %v2653_v10 }
 0x24f   : > { %v2724_v17 = vor.u32 %v2723_v30, %v2722_v9  ;;  %8772 = vsinq.f32 %v2582_v49  ;;  %v2710_v57 = vor.u32 8388608, %v2709_v48  ;;  %v2725_v38 = vshll.u32 %v14756_v46, %v14978_v12 }
 0x250   : > { %v2726_v35 = vshrl.u32 %v14781_v4, %v14977_v27  ;;  %v2487_v43 = vxor.u32 2147483648, %v8769_v19  ;;  %v2490_v8 = vxor.u32 2147483648, %v8767_v37  ;;  %v2659_v45 = vadd.s32 536870912, %v2658_v0 }
 0x251   : > { %vm2734_vm15 = vcmp.lt.s32.totalorder %v10633_v39, 1  ;;  %v2588_v29 = vand.u32 3, %v2587_v23  ;;  %vm2736_vm5 = vcmp.lt.s32.totalorder %v10633_v39, 3  ;;  %v2718_v20 = vshrl.u32 %v14761_v7, %v14977_v27 }
 0x252   : > { %v2727_v44 = vor.u32 %v2726_v35, %v2725_v38  ;;  %v2742_v1 = vsel %vm2734_vm15, %v2721_v41, %v2724_v17  ;;  %v11385_v5 = vshrl.u32 %v2659_v45, 30  ;;  %vm2735_vm6 = vcmp.lt.s32.totalorder %v10633_v39, 2  ;;  %v14979_v35 = vld [vmem:[#allocation7_spill] sm:$0xff] }
 0x253   : > { %v2748_v40 = vsel %vm2736_vm5, %v10654_v13, %v10885_v51  ;;  %v2750_v14 = vshll.u32 %v2710_v57, 8  ;;  %v2488_v27 = vsel %vm2486_vm11, %v8767_v37, %v2487_v43  ;;  %v2491_v10 = vsel %vm2489_vm1, %v2490_v8, %v8769_v19 }
 0x254   : > { %v2739_v48 = vsel %vm2737_vm12, %v2727_v44, 2102212464  ;;  %v2744_v12 = vsel %vm2736_vm5, %v2727_v44, %v10875_v52  ;;  %v2746_v16 = vsel %vm2734_vm15, %v2724_v17, %v2727_v44  ;;  %v2661_v9 = vshll.u32 %v11385_v5, 30 }
 0x255   : > { %v2745_v13 = vsel %vm2735_vm6, %v2742_v1, %v2744_v12  ;;  %v2738_v51 = vsel %vm2734_vm15, %v2718_v20, %v2721_v41  ;;  %v2749_v52 = vsel %vm2735_vm6, %v2746_v16, %v2748_v40  ;;  %v2740_v37 = vsel %vm2736_vm5, %v2724_v17, %v2739_v48  ;;  %v14981_v48 = vld [vmem:[#allocation28_spill] sm:$0xff] }
 0x256   : > { %v11412_v30 = vmul.u32.u64.low %v2750_v14, %v2745_v13  ;;  %v11413_v49 = vmul.u32.u64.high %v2750_v14, %v2745_v13, %v11412_v30  ;;  %v11416_v23 = vsub.s32 %v2658_v0, %v2661_v9  ;;  %vm2482_vm12 = vweird.f32 %v9888_v62 }
 0x257   : > { %v11420_v19 = vmul.u32.u64.low %v2750_v14, %v2749_v52  ;;  %v11421_v26 = vmul.u32.u64.high %v2750_v14, %v2749_v52, %v11420_v19  ;;  %v2492_v41 = vsel %vm2485_vm0, %v2488_v27, %v2491_v10  ;;  %vm2586_vm2 = vweird.f32 %v14942_v36 }
 0x258   : > { %v1308_v57 = vadd.f32 %v1276_v63, %v11335_v24  ;;  %v8771_v38 = vpop.eup %8770  ;;  %vm2589_vm8 = vcmp.lt.s32.totalorder %v2588_v29, 2  ;;  %vm2590_vm3 = vcmp.eq.s32.totalorder %v2588_v29, 0  ;;  %v2664_v0 = vsub.s32 0, %v11416_v23  ;;  %v14980_v63 = vld [vmem:[#allocation51_spill] sm:$0xff] }
 0x259   : > { %v14652_v43 = vand.u32 2147483647, %v14979_v35  ;;  %v8773_v17 = vpop.eup %8772  ;;  %vm2593_vm9 = vcmp.eq.s32.totalorder %v2588_v29, 2  ;;  %v2594_v8 = vxor.u32 2147483648, %v8771_v38  ;;  %v2741_v45 = vsel %vm2735_vm6, %v2738_v51, %v2740_v37  ;;  %v11462_v29 = vld [vmem:[%s14746_s1] ss:$0 sm:$0xff] }
 0x25a   : > { %v2760_v34 = vadd.s32 1, %v11413_v49  ;;  %v2493_v44 = vsel %vm2482_vm12, nan, %v2492_v41  ;;  %v2591_v1 = vxor.u32 2147483648, %v8773_v17  ;;  %v7642_v24 = vmin.u32 %v2664_v0, %v11416_v23 }
 0x25b   : > { %v2823_v20 = vshll.u32 %v14761_v7, %v14980_v63  ;;  %v2595_v40 = vsel %vm2593_vm9, %v2594_v8, %v8773_v17  ;;  %vm2759_vm10 = vc.u32 %v11421_v26, %v11412_v30  ;;  %v2824_v12 = vshrl.u32 %v14818_v15, %v14981_v48 }
 0x25c   : > { %v2827_v39 = vshrl.u32 %v14756_v46, %v14981_v48  ;;  %v2592_v16 = vsel %vm2590_vm3, %v8771_v38, %v2591_v1  ;;  %v2666_v62 = vclz %v7642_v24  ;;  %v2757_v27 = vmul.u32 %v2750_v14, %v2741_v45 }
 0x25d   : > { %v2813_v10 = vand.u32 8388607, %v14652_v43  ;;  %v2596_v9 = vsel %vm2589_vm8, %v2592_v16, %v2595_v40  ;;  %v2761_v13 = vsel %vm2759_vm10, %v2760_v34, %v11413_v49  ;;  %v2826_v51 = vshll.u32 %v14818_v15, %v14980_v63  ;;  %v14991_v43 = vld [vmem:[#allocation45_spill] sm:$0xff] }
 0x25e   : > { %v2829_v52 = vshll.u32 %v14756_v46, %v14980_v63  ;;  %v2597_v37 = vsel %vm2586_vm2, nan, %v2596_v9  ;;  %v7643_v19 = vadd.s32 4294967294, %v2666_v62  ;;  %v2762_v41 = vadd.s32 %v2761_v13, %v2757_v27 }
 0x25f   : > { %v2830_v14 = vshrl.u32 %v14781_v4, %v14981_v48  ;;  %v11457_v38 = vpack.c.bf16 %v2597_v37, %v2493_v44  ;;  %v11465_v49 = vadd.f32 %v11462_v29, %v1308_v57  ;;  %v2825_v0 = vor.u32 %v2824_v12, %v2823_v20 }
 0x260   : > { %v2828_v17 = vor.u32 %v2827_v39, %v2826_v51  ;;  %v2654_v36 = vadd.s32 %v11320_v18, %v11318_v47  ;;  %vm7644_vm11 = vcmp.lt.s32.totalorder %v7643_v19, 0  ;;  %v2763_v8 = vadd.s32 536870912, %v2762_v41 }
 0x261   : > { %14982 = vst [vmem:[#allocation55_spill] sm:$0xff] %v11457_v38  ;;  %14983 = vst [vmem:[#allocation56_spill] sm:$0xff] %v11465_v49  ;;  %v2831_v45 = vor.u32 %v2830_v14, %v2829_v52  ;;  %8102 = vmatmul.mubr.bf16.gmra.mrb[8].mxu0 %v11457_v38  ;;  %v2669_v34 = vsel %vm7644_vm11, 0, %v7643_v19  ;;  %v2814_v44 = vor.u32 8388608, %v2813_v10  ;;  %vm2838_vm14 = vcmp.lt.s32.totalorder %v10659_v42, 1 }
 0x262   : > { %vm2840_vm0 = vcmp.lt.s32.totalorder %v10659_v42, 3  ;;  %v2670_v1 = vsub.s32 32, %v2669_v34  ;;  %v2674_v24 = vsub.s32 4294967266, %v2669_v34  ;;  %v11472_v57 = vshrl.u32 %v2763_v8, 30 }
 0x263   : > { %v2852_v47 = vsel %vm2840_vm0, %v10860_v32, %v10901_v31  ;;  %vm2839_vm1 = vcmp.lt.s32.totalorder %v10659_v42, 2  ;;  %v2846_v18 = vsel %vm2838_vm14, %v2825_v0, %v2828_v17  ;;  %v2848_v63 = vsel %vm2840_vm0, %v2831_v45, %v10897_v6 }
 0x264   : > { %v2850_v20 = vsel %vm2838_vm14, %v2828_v17, %v2831_v45  ;;  %vm3361_vm15 = vcmp.lt.s32.totalorder %v11211_v11, 4  ;;  %v2671_v40 = vshll.u32 %v11416_v23, %v2669_v34  ;;  %v2672_v12 = vshrl.u32 %v2654_v36, %v2670_v1 }
 0x265   : > { %v2675_v39 = vadd.s32 127, %v2674_v24  ;;  %v2765_v32 = vshll.u32 %v11472_v57, 30  ;;  %v2822_v31 = vshrl.u32 %v14761_v7, %v14981_v48  ;;  %v2843_v16 = vsel %vm2841_vm13, %v2831_v45, 2102212464 }
 0x266   : > { %v2853_v6 = vsel %vm2839_vm1, %v2850_v20, %v2852_v47  ;;  %v2854_v62 = vshll.u32 %v2814_v44, 8  ;;  %v2673_v27 = vor.u32 %v2672_v12, %v2671_v40  ;;  %v2849_v23 = vsel %vm2839_vm1, %v2846_v18, %v2848_v63 }
 0x267   : > { %v2676_v10 = vshll.u32 %v2675_v39, 23  ;;  %v11495_v9 = vsub.s32 %v2762_v41, %v2765_v32  ;;  %vm3753_vm5 = vcmp.gt.s32.totalorder %v11338_v22, 0  ;;  %v3641_v13 = vand.u32 2139095040, %v11465_v49 }
 0x268   : > { %v11501_v51 = vmul.u32.u64.low %v2854_v62, %v2853_v6  ;;  %v11502_v48 = vmul.u32.u64.high %v2854_v62, %v2853_v6, %v11501_v51  ;;  %v2842_v19 = vsel %vm2838_vm14, %v2822_v31, %v2825_v0  ;;  %v2844_v41 = vsel %vm2840_vm0, %v2828_v17, %v2843_v16 }
 0x269   : > { %v2677_v52 = vor.u32 4788187, %v2676_v10  ;;  %v2768_v37 = vsub.s32 0, %v11495_v9  ;;  %v3357_v14 = vor.u32 %v11258_v61, %v11247_v25  ;;  %v11512_v36 = vand.u32 31, %v11331_v58 }
 0x26a   : > { %v11514_v8 = vmul.u32.u64.low %v2854_v62, %v2849_v23  ;;  %v11515_v45 = vmul.u32.u64.high %v2854_v62, %v2849_v23, %v11514_v8  ;;  %v2680_v44 = vcvt.s32.f32 %v2673_v27  ;;  %v2684_v1 = vsub.s32 4, %v11385_v5 }
 0x26b   : > { %v2678_v34 = vand.u32 2147483647, %v2677_v52  ;;  %v7646_v24 = vmin.u32 %v2768_v37, %v11495_v9  ;;  %v11521_v0 = vshrl.u32 %v11331_v58, 5  ;;  %v11526_v25 = vsel %vm3753_vm5, %v11338_v22, 0 }
 0x26c   : > { %vm3545_vm13 = vcmp.gt.s32.totalorder %v11351_v53, 0  ;;  %v2845_v61 = vsel %vm2839_vm1, %v2842_v19, %v2844_v41  ;;  %v3642_v17 = vshrl.u32 %v3641_v13, 23  ;;  %vm2863_vm6 = vc.u32 %v11502_v48, %v11514_v8  ;;  %v14988_v13 = vld [vmem:[#allocation14_spill] sm:$0xff] }
 0x26d   : > { %v2681_v47 = vmul.f32 %v2680_v44, %v2678_v34  ;;  %v2770_v18 = vclz %v7646_v24  ;;  %v11536_v58 = vsel %vm3361_vm15, %v11326_v2, 920167782  ;;  %v11540_v22 = vsel %vm3361_vm15, %v3357_v14, 1326507024  ;;  %v14989_v19 = vld [vmem:[#allocation10_spill] sm:$0xff]  ;;  %v14990_v24 = vld [vmem:[#allocation25_spill] sm:$0xff] }
 0x26e   : > { %vm2600_vm12 = vcmp.lt.s32.totalorder %v14969_v56, 0  ;;  %v2864_v42 = vadd.s32 1, %v11515_v45  ;;  %v11545_v63 = vsub.s32 32, %v11512_v36  ;;  %v2861_v12 = vmul.u32 %v2854_v62, %v2845_v61 }
 0x26f   : > { %v11550_v20 = vsel %vm2600_vm12, %v2684_v1, %v11385_v5  ;;  %v7647_v40 = vadd.s32 4294967294, %v2770_v18  ;;  %v11553_v39 = vand.u32 31, %v11526_v25  ;;  %v11558_v32 = vsel %vm3545_vm13, %v11351_v53, 0 }
 0x270   : > { %v2682_v31 = vxor.u32 2147483648, %v2681_v47  ;;  %v2865_v16 = vsel %vm2863_vm6, %v2864_v42, %v11515_v45  ;;  %v11561_v6 = vadd.s32 4294967169, %v3642_v17  ;;  %v14985_v27 = vand.u32 2147483647, %v14969_v56 }
 0x271   : > { %14984 = vst [vmem:[#allocation38_spill] sm:$0xff] %v11553_v39  ;;  %vm7648_vm8 = vcmp.lt.s32.totalorder %v7647_v40, 0  ;;  %v2866_v62 = vadd.s32 %v2865_v16, %v2861_v12  ;;  %v2758_v53 = vadd.s32 %v11412_v30, %v11421_v26  ;;  %v14653_v51 = vand.u32 2147483647, %v14988_v13 }
 0x272   : > { %vm11565_vm2 = vcmp.le.f32.partialorder %v14985_v27, 0.7853982  ;;  %v2773_v23 = vsel %vm7648_vm8, 0, %v7647_v40  ;;  %v2931_v41 = vshrl.u32 %v14756_v46, %v14989_v19  ;;  %v2934_v14 = vshrl.u32 %v14781_v4, %v14989_v19 }
 0x273   : > { %v2774_v52 = vsub.s32 32, %v2773_v23  ;;  %v2778_v37 = vsub.s32 4294967266, %v2773_v23  ;;  %v2683_v45 = vsel %vm2600_vm12, %v2682_v31, %v2681_v47  ;;  %v2775_v34 = vshll.u32 %v11495_v9, %v2773_v23 }
 0x274   : > { %v2867_v44 = vadd.s32 536870912, %v2866_v62  ;;  %v2937_v30 = vshrl.u32 %v14759_v55, %v14989_v19  ;;  %v2936_v61 = vshll.u32 %v14781_v4, %v14990_v24  ;;  %v2940_v17 = vshrl.u32 %v14782_v3, %v14989_v19 }
 0x275   : > { %v2776_v26 = vshrl.u32 %v2758_v53, %v2774_v52  ;;  %v2779_v1 = vadd.s32 127, %v2778_v37  ;;  %vm2704_vm3 = vcmp.lt.s32.totalorder %v14973_v54, 0  ;;  %v2928_v47 = vshrl.u32 %v14818_v15, %v14989_v19 }
 0x276   : > { %v11589_v18 = vshrl.u32 %v2867_v44, 30  ;;  %v2930_v9 = vshll.u32 %v14818_v15, %v14990_v24  ;;  %v2933_v42 = vshll.u32 %v14756_v46, %v14990_v24  ;;  %v2938_v31 = vor.u32 %v2937_v30, %v2936_v61 }
 0x277   : > { %v2777_v40 = vor.u32 %v2776_v26, %v2775_v34  ;;  %v2780_v12 = vshll.u32 %v2779_v1, 23  ;;  %v2939_v16 = vshll.u32 %v14759_v55, %v14990_v24  ;;  %v2686_v27 = vsel %vm11565_vm2, %v14969_v56, %v2683_v45 }
 0x278   : > { %v2869_v53 = vshll.u32 %v11589_v18, 30  ;;  %v2917_v23 = vand.u32 8388607, %v14653_v51  ;;  %v2927_v52 = vshll.u32 %v14761_v7, %v14990_v24  ;;  %v2932_v44 = vor.u32 %v2931_v41, %v2930_v9 }
 0x279   : > { %v2781_v37 = vor.u32 4788187, %v2780_v12  ;;  %v2935_v34 = vor.u32 %v2934_v14, %v2933_v42  ;;  %v2941_v26 = vor.u32 %v2940_v17, %v2939_v16  ;;  %v2788_v30 = vsub.s32 4, %v11472_v57 }
 0x27a   : > { %v11608_v1 = vsub.s32 %v2866_v62, %v2869_v53  ;;  %v2929_v61 = vor.u32 %v2928_v47, %v2927_v52  ;;  %vm2945_vm9 = vcmp.lt.s32.totalorder %v14991_v43, 4  ;;  %8774 = vcosq.f32 %v2686_v27 }
 0x27b   : > { %v2782_v45 = vand.u32 2147483647, %v2781_v37  ;;  %v2784_v10 = vcvt.s32.f32 %v2777_v40  ;;  %v2951_v51 = vsel %vm2945_vm9, %v2938_v31, 920167782  ;;  %8776 = vsinq.f32 %v2686_v27 }
 0x27c   : > { %v2872_v41 = vsub.s32 0, %v11608_v1  ;;  %v2918_v14 = vor.u32 8388608, %v2917_v23  ;;  %vm2942_vm10 = vcmp.lt.s32.totalorder %v14991_v43, 1  ;;  %vm2944_vm11 = vcmp.lt.s32.totalorder %v14991_v43, 3 }
 0x27d   : > { %v2785_v24 = vmul.f32 %v2784_v10, %v2782_v45  ;;  %v2954_v62 = vsel %vm2942_vm10, %v2932_v44, %v2935_v34  ;;  %v2955_v17 = vsel %vm2945_vm9, %v2941_v26, 1326507024  ;;  %v2950_v9 = vsel %vm2942_vm10, %v2929_v61, %v2932_v44  ;;  %v11653_v45 = vpop.permute.xlu1 %1043 }
 0x27e   : > { %v7650_v47 = vmin.u32 %v2872_v41, %v11608_v1  ;;  %v2952_v42 = vsel %vm2944_vm11, %v2935_v34, %v2951_v51  ;;  %v2956_v40 = vsel %vm2944_vm11, %v2938_v31, %v2955_v17  ;;  %v14992_v10 = vand.u32 2147483647, %v14973_v54 }
 0x27f   : > { %v2786_v16 = vxor.u32 2147483648, %v2785_v24  ;;  %v2789_v27 = vsel %vm2704_vm3, %v2788_v30, %v11472_v57  ;;  %vm2943_vm0 = vcmp.lt.s32.totalorder %v14991_v43, 2  ;;  %v2926_v51 = vshrl.u32 %v14761_v7, %v14989_v19 }
 0x280   : > { %vm11631_vm14 = vcmp.le.f32.partialorder %v14992_v10, 0.7853982  ;;  %v2874_v53 = vclz %v7650_v47  ;;  %v2947_v31 = vsel %vm2945_vm9, %v2935_v34, 2102212464  ;;  %v2957_v23 = vsel %vm2943_vm0, %v2954_v62, %v2956_v40 }
 0x281   : > { %v14995_v52 = vsel %vm11565_vm2, 0, %v11550_v20  ;;  %v2787_v57 = vsel %vm2704_vm3, %v2786_v16, %v2785_v24  ;;  %v2953_v26 = vsel %vm2943_vm0, %v2950_v9, %v2952_v42  ;;  %v2958_v30 = vshll.u32 %v2918_v14, 8 }
 0x282   : > { %v2691_v37 = vadd.s32 3, %v14995_v52  ;;  %v2790_v19 = vsel %vm11631_vm14, %v14973_v54, %v2787_v57  ;;  %v2791_v34 = vsel %vm11631_vm14, 0, %v2789_v27  ;;  %v7651_v5 = vadd.s32 4294967294, %v2874_v53  ;;  %v14996_v53 = vld [vmem:[#allocation37_spill] sm:$0xff] }
 0x283   : > { %v2946_v20 = vsel %vm2942_vm10, %v2926_v51, %v2929_v61  ;;  %8778 = vcosq.f32 %v2790_v19  ;;  %v2948_v41 = vsel %vm2944_vm11, %v2932_v44, %v2947_v31  ;;  %v11672_v9 = vand.u32 31, %v11558_v32 }
 0x284   : > { %v11664_v24 = vmul.u32.u64.low %v2958_v30, %v2957_v23  ;;  %v11665_v62 = vmul.u32.u64.high %v2958_v30, %v2957_v23, %v11664_v24  ;;  %8780 = vsinq.f32 %v2790_v19  ;;  %vm7652_vm1 = vcmp.lt.s32.totalorder %v7651_v5, 0  ;;  %v8775_v47 = vpop.eup %8774 }
 0x285   : > { %v11667_v14 = vmul.u32.u64.low %v2958_v30, %v2953_v26  ;;  %v11668_v17 = vmul.u32.u64.high %v2958_v30, %v2953_v26, %v11667_v14  ;;  %v3648_v42 = vadd.s32 1, %v11561_v6  ;;  %v926_v61 = vmul.f32 %v11077_v28, %v9231_v60  ;;  %v8777_v44 = vpop.eup %8776  ;;  %v1224_v6 = vpop.permute.xlu1 %1223 }
 0x286   : > { %v2877_v40 = vsel %vm7652_vm1, 0, %v7651_v5  ;;  %v2862_v10 = vadd.s32 %v11514_v8, %v11502_v48  ;;  %v2949_v27 = vsel %vm2943_vm0, %v2946_v20, %v2948_v41  ;;  %v1086_v51 = vmul.f32 %v14996_v53, %v9229_v59 }
 0x287   : > { %v2878_v12 = vsub.s32 32, %v2877_v40  ;;  %v2882_v16 = vsub.s32 4294967266, %v2877_v40  ;;  %v2692_v31 = vand.u32 3, %v2691_v37  ;;  %v2795_v23 = vadd.s32 3, %v2791_v34 }
 0x288   : > { %vm2967_vm5 = vc.u32 %v11665_v62, %v11667_v14  ;;  %v2879_v28 = vshll.u32 %v11608_v1, %v2877_v40  ;;  %v2968_v48 = vadd.s32 1, %v11668_v17  ;;  %vm3649_vm13 = vcmp.gt.s32.totalorder %v3648_v42, 0 }
 0x289   : > { %v2880_v52 = vshrl.u32 %v2862_v10, %v2878_v12  ;;  %v2883_v57 = vadd.s32 127, %v2882_v16  ;;  %v2695_v8 = vxor.u32 2147483648, %v8777_v44  ;;  %v2698_v26 = vxor.u32 2147483648, %v8775_v47 }
 0x28a   : > { %v2965_v43 = vmul.u32 %v2958_v30, %v2949_v27  ;;  %v2969_v20 = vsel %vm2967_vm5, %v2968_v48, %v11668_v17  ;;  %v1278_v37 = vmul.f32 %v1224_v6, %v14952_v21  ;;  %v11690_v34 = vsub.s32 32, %v11672_v9 }
 0x28b   : > { %v2881_v19 = vor.u32 %v2880_v52, %v2879_v28  ;;  %v2884_v5 = vshll.u32 %v2883_v57, 23  ;;  %v1118_v41 = vadd.f32 %v1086_v51, %v926_v61  ;;  %v2796_v24 = vand.u32 3, %v2795_v23 }
 0x28c   : > { %14997 = vst [vmem:[#allocation8_spill] sm:$0xff] %v11690_v34  ;;  %v2970_v1 = vadd.s32 %v2969_v20, %v2965_v43  ;;  %v11694_v40 = vadd.f32 %v11462_v29, %v11180_v33  ;;  %vm2694_vm6 = vcmp.eq.s32.totalorder %v2692_v31, 0  ;;  %vm2697_vm12 = vcmp.eq.s32.totalorder %v2692_v31, 2 }
 0x28d   : > { %v2885_v10 = vor.u32 4788187, %v2884_v5  ;;  %v8779_v30 = vpop.eup %8778  ;;  %v11697_v12 = vsel %vm3649_vm13, %v3648_v42, 0  ;;  %v2696_v17 = vsel %vm2694_vm6, %v8775_v47, %v2695_v8  ;;  %v2699_v16 = vsel %vm2697_vm12, %v2698_v26, %v8777_v44  ;;  %v1232_v44 = vpop.permute.xlu1 %1231 }
 0x28e   : > { %14998 = vst [vmem:[#allocation44_spill] sm:$0xff] %v11694_v40  ;;  %v2971_v27 = vadd.s32 536870912, %v2970_v1  ;;  %v8781_v53 = vpop.eup %8780  ;;  %v2802_v6 = vxor.u32 2147483648, %v8779_v30  ;;  %v2888_v61 = vcvt.s32.f32 %v2881_v19  ;;  %v1310_v51 = vadd.f32 %v1278_v37, %v1118_v41 }
 0x28f   : > { %v2886_v28 = vand.u32 2147483647, %v2885_v10  ;;  %vm2693_vm2 = vcmp.lt.s32.totalorder %v2692_v31, 2  ;;  %v2799_v23 = vxor.u32 2147483648, %v8781_v53  ;;  %vm2801_vm8 = vcmp.eq.s32.totalorder %v2796_v24, 2 }
 0x290   : > { %v11699_v33 = vshrl.u32 %v2971_v27, 30  ;;  %v2700_v52 = vsel %vm2693_vm2, %v2696_v17, %v2699_v16  ;;  %vm2798_vm3 = vcmp.eq.s32.totalorder %v2796_v24, 0  ;;  %v2803_v57 = vsel %vm2801_vm8, %v2802_v6, %v8781_v53 }
 0x291   : > { %v2889_v48 = vmul.f32 %v2888_v61, %v2886_v28  ;;  %vm2690_vm9 = vweird.f32 %v14969_v56  ;;  %vm2797_vm10 = vcmp.lt.s32.totalorder %v2796_v24, 2  ;;  %v2800_v47 = vsel %vm2798_vm3, %v8779_v30, %v2799_v23 }
 0x292   : > { %v2973_v42 = vshll.u32 %v11699_v33, 30  ;;  %vm2794_vm11 = vweird.f32 %v14973_v54  ;;  %v2804_v8 = vsel %vm2797_vm10, %v2800_v47, %v2803_v57  ;;  %v11705_v31 = vadd.f32 %v11462_v29, %v1310_v51 }
 0x293   : > { %v2890_v26 = vxor.u32 2147483648, %v2889_v48  ;;  %v3561_v43 = vshrl.u32 %v14759_v55, %v11690_v34  ;;  %v2701_v19 = vsel %vm2690_vm9, nan, %v2700_v52  ;;  %v2805_v5 = vsel %vm2794_vm11, nan, %v2804_v8  ;;  %v15009_v52 = vld [vmem:[#allocation57_spill] sm:$0xff]  ;;  %v1236_v8 = vpop.permute.xlu1 %1235 }
 0x294   : > { %14999 = vst [vmem:[#allocation22_spill] sm:$0xff] %v11705_v31  ;;  %v11709_v20 = vsub.s32 %v2970_v1, %v2973_v42  ;;  %v3560_v56 = vshll.u32 %v14781_v4, %v11672_v9  ;;  %v11713_v37 = vpack.c.bf16 %v2805_v5, %v2701_v19  ;;  %v2892_v41 = vsub.s32 4, %v11589_v18 }
 0x295   : > { %v1280_v54 = vmul.f32 %v1232_v44, %v14952_v21  ;;  %v11718_v24 = vand.u32 31, %v11697_v12  ;;  %v3953_v10 = vand.u32 2139095040, %v11694_v40  ;;  %vm2808_vm14 = vcmp.lt.s32.totalorder %v14979_v35, 0  ;;  %v15022_v40 = vld [vmem:[#allocation11_spill] sm:$0xff] }
 0x296   : > { %15000 = vst [vmem:[#allocation6_spill] sm:$0xff] %v11713_v37  ;;  %v2976_v30 = vsub.s32 0, %v11709_v20  ;;  %v11724_v1 = vshrl.u32 %v11558_v32, 5  ;;  %v11728_v17 = vshrl.u32 %v14782_v3, %v11690_v34  ;;  %8105 = vmatprep.mubr.bf16.mxu0 %v11713_v37  ;;  %v2891_v16 = vsel %vm2808_vm14, %v2890_v26, %v2889_v48 }
 0x297   : > { %15001 = vst [vmem:[#allocation47_spill] sm:$0xff] %v11718_v24  ;;  %v3849_v27 = vand.u32 2139095040, %v11705_v31  ;;  %v11733_v53 = vshrl.u32 %v11526_v25, 5  ;;  %v11736_v6 = vsub.s32 32, %v11553_v39  ;;  %v11738_v28 = vor.u32 %v3561_v43, %v3560_v56  ;;  %v15023_v31 = vld [vmem:[#allocation41_spill] sm:$0xff] }
 0x298   : > { %15002 = vst [vmem:[#allocation23_spill] sm:$0xff] %v11724_v1  ;;  %v7654_v32 = vmin.u32 %v2976_v30, %v11709_v20  ;;  %v11743_v61 = vshll.u32 %v14759_v55, %v11672_v9  ;;  %v15006_v51 = vand.u32 2147483647, %v14979_v35  ;;  %v2893_v25 = vsel %vm2808_vm14, %v2892_v41, %v11589_v18 }
 0x299   : > { %15003 = vst [vmem:[#allocation48_spill] sm:$0xff] %v11733_v53  ;;  %15004 = vst [vmem:[#allocation58_spill] sm:$0xff] %v11736_v6  ;;  %v1312_v57 = vadd.f32 %v1280_v54, %v15009_v52  ;;  %v11754_v48 = vsub.s32 32, %v11718_v24  ;;  %v3954_v47 = vshrl.u32 %v3953_v10, 23  ;;  %vm3569_vm1 = vcmp.lt.s32.totalorder %v11724_v1, 4  ;;  %v15024_v53 = vld [vmem:[#allocation33_spill] sm:$0xff] }
 0x29a   : > { %15005 = vst [vmem:[#allocation15_spill] sm:$0xff] %v11738_v28  ;;  %vm11747_vm0 = vcmp.le.f32.partialorder %v15006_v51, 0.7853982  ;;  %v2978_v44 = vclz %v7654_v32  ;;  %v1089_v18 = vmul.f32 %v11653_v45, %v9229_v59  ;;  %v3850_v43 = vshrl.u32 %v3849_v27, 23 }
 0x29b   : > { %15010 = vst [vmem:[#allocation9_spill] sm:$0xff] %v11754_v48  ;;  %v2894_v42 = vsel %vm11747_vm0, %v14979_v35, %v2891_v16  ;;  %v11767_v19 = vsel %vm3569_vm1, %v11738_v28, 920167782  ;;  %v2895_v5 = vsel %vm11747_vm0, 0, %v2893_v25  ;;  %v929_v41 = vmul.f32 %v11613_v50, %v9231_v60 }
 0x29c   : > { %15011 = vst [vmem:[#allocation27_spill] sm:$0xff] %v11767_v19  ;;  %v7655_v56 = vadd.s32 4294967294, %v2978_v44  ;;  %8782 = vcosq.f32 %v2894_v42  ;;  %v2996_v54 = vsub.s32 4, %v11699_v33  ;;  %v11775_v10 = vadd.f32 %v11462_v29, %v1312_v57  ;;  %v1052_v19 = vpop.permute.xlu0 %1051 }
 0x29d   : > { %v1281_v45 = vmul.f32 %v1236_v8, %v14952_v21  ;;  %v3665_v30 = vshrl.u32 %v14759_v55, %v11754_v48  ;;  %v11782_v16 = vshrl.u32 %v14782_v3, %v11754_v48  ;;  %v7693_v27 = vadd.s32 4294967169, %v3954_v47  ;;  %v15013_v47 = vld [vmem:[#allocation3_spill] sm:$0xff] }
 0x29e   : > { %15012 = vst [vmem:[#allocation13_spill] sm:$0xff] %v11775_v10  ;;  %vm7656_vm5 = vcmp.lt.s32.totalorder %v7655_v56, 0  ;;  %vm2912_vm13 = vcmp.lt.s32.totalorder %v14988_v13, 0  ;;  %v1121_v32 = vadd.f32 %v1089_v18, %v929_v41  ;;  %v7689_v51 = vadd.s32 4294967169, %v3850_v43 }
 0x29f   : > { %v2981_v50 = vsel %vm7656_vm5, 0, %v7655_v56  ;;  %v2899_v23 = vadd.s32 3, %v2895_v5  ;;  %v2966_v25 = vadd.s32 %v11667_v14, %v11665_v62  ;;  %v2997_v44 = vsel %vm2912_vm13, %v2996_v54, %v11699_v33 }
 0x2a0   : > { %v2982_v52 = vsub.s32 32, %v2981_v50  ;;  %v2986_v57 = vsub.s32 4294967266, %v2981_v50  ;;  %v4057_v8 = vand.u32 2139095040, %v11775_v10  ;;  %v1313_v26 = vadd.f32 %v1281_v45, %v1121_v32 }
 0x2a1   : > { %v14656_v37 = vand.u32 2147483647, %v15013_v47  ;;  %8784 = vsinq.f32 %v2894_v42  ;;  %v2983_v56 = vshll.u32 %v11709_v20, %v2981_v50  ;;  %v11794_v5 = vshrl.u32 %v11697_v12, 5 }
 0x2a2   : > { %v2984_v18 = vshrl.u32 %v2966_v25, %v2982_v52  ;;  %v2987_v43 = vadd.s32 127, %v2986_v57  ;;  %v3664_v62 = vshll.u32 %v14781_v4, %v11718_v24  ;;  %v15015_v14 = vand.u32 2147483647, %v14988_v13 }
 0x2a3   : > { %15014 = vst [vmem:[#allocation31_spill] sm:$0xff] %v11794_v5  ;;  %v11804_v41 = vadd.s32 1, %v7689_v51  ;;  %v11808_v42 = vshll.u32 %v14759_v55, %v11718_v24  ;;  %v11814_v50 = vadd.s32 1, %v7693_v27  ;;  %v11816_v32 = vand.u32 3, %v2899_v23  ;;  %v15021_v23 = vld [vmem:[#allocation42_spill] sm:$0xff] }
 0x2a4   : > { %vm11800_vm6 = vcmp.le.f32.partialorder %v15015_v14, 0.7853982  ;;  %v2985_v20 = vor.u32 %v2984_v18, %v2983_v56  ;;  %v2988_v54 = vshll.u32 %v2987_v43, 23  ;;  %v11812_v45 = vor.u32 %v3665_v30, %v3664_v62  ;;  %v15020_v30 = vld [vmem:[#allocation52_spill] sm:$0xff] }
 0x2a5   : > { %v2999_v12 = vsel %vm11800_vm6, 0, %v2997_v44  ;;  %v3021_v25 = vand.u32 8388607, %v14656_v37  ;;  %v4058_v57 = vshrl.u32 %v4057_v8, 23  ;;  %v11823_v56 = vadd.f32 %v11462_v29, %v1313_v26 }
 0x2a6   : > { %15018 = vst [vmem:[#allocation20_spill] sm:$0xff] %v11812_v45  ;;  %v2989_v52 = vor.u32 4788187, %v2988_v54  ;;  %v8783_v18 = vpop.eup %8782  ;;  %v3003_v43 = vadd.s32 3, %v2999_v12  ;;  %vm3857_vm12 = vcmp.gt.s32.totalorder %v11804_v41, 0  ;;  %v3031_v27 = vshll.u32 %v14761_v7, %v15020_v30 }
 0x2a7   : > { %15019 = vst [vmem:[#allocation7_spill] sm:$0xff] %v11823_v56  ;;  %v3032_v44 = vshrl.u32 %v14818_v15, %v15021_v23  ;;  %v2992_v14 = vcvt.s32.f32 %v2985_v20  ;;  %v3034_v37 = vshll.u32 %v14818_v15, %v15020_v30  ;;  %v3035_v8 = vshrl.u32 %v14756_v46, %v15021_v23 }
 0x2a8   : > { %v2990_v62 = vand.u32 2147483647, %v2989_v52  ;;  %vm2905_vm2 = vcmp.eq.s32.totalorder %v11816_v32, 2  ;;  %v3022_v29 = vor.u32 8388608, %v3021_v25  ;;  %v3037_v54 = vshll.u32 %v14756_v46, %v15020_v30 }
 0x2a9   : > { %v3033_v26 = vor.u32 %v3032_v44, %v3031_v27  ;;  %v3038_v12 = vshrl.u32 %v14781_v4, %v15021_v23  ;;  %vm2902_vm8 = vcmp.eq.s32.totalorder %v11816_v32, 0  ;;  %v2906_v52 = vxor.u32 2147483648, %v8783_v18 }
 0x2aa   : > { %v2993_v20 = vmul.f32 %v2992_v14, %v2990_v62  ;;  %v3030_v51 = vshrl.u32 %v14761_v7, %v15021_v23  ;;  %v3036_v38 = vor.u32 %v3035_v8, %v3034_v37  ;;  %vm3046_vm3 = vcmp.lt.s32.totalorder %v15022_v40, 1  ;;  %v15025_v14 = vld [vmem:[#allocation29_spill] sm:$0xff] }
 0x2ab   : > { %v3039_v10 = vor.u32 %v3038_v12, %v3037_v54  ;;  %vm3047_vm9 = vcmp.lt.s32.totalorder %v15022_v40, 2  ;;  %vm3048_vm10 = vcmp.lt.s32.totalorder %v15022_v40, 3  ;;  %v8785_v25 = vpop.eup %8784  ;;  %v3062_v8 = vshll.u32 %v3022_v29, 8  ;;  %v15027_v40 = vld [vmem:[#allocation12_spill] sm:$0xff] }
 0x2ac   : > { %v2994_v30 = vxor.u32 2147483648, %v2993_v20  ;;  %v3050_v27 = vsel %vm3046_vm3, %v3030_v51, %v3033_v26  ;;  %v3054_v44 = vsel %vm3046_vm3, %v3033_v26, %v3036_v38  ;;  %v3060_v39 = vsel %vm3048_vm10, %v15024_v53, %v15023_v31 }
 0x2ad   : > { %v3051_v62 = vsel %vm3049_vm4, %v3039_v10, 2102212464  ;;  %v3056_v23 = vsel %vm3048_vm10, %v3039_v10, %v15025_v14  ;;  %v3058_v37 = vsel %vm3046_vm3, %v3036_v38, %v3039_v10  ;;  %vm2901_vm11 = vcmp.lt.s32.totalorder %v11816_v32, 2 }
 0x2ae   : > { %v2995_v54 = vsel %vm2912_vm13, %v2994_v30, %v2993_v20  ;;  %v3052_v12 = vsel %vm3048_vm10, %v3036_v38, %v3051_v62  ;;  %v3057_v6 = vsel %vm3047_vm9, %v3054_v44, %v3056_v23  ;;  %v3061_v51 = vsel %vm3047_vm9, %v3058_v37, %v3060_v39  ;;  %v15026_v44 = vld [vmem:[#allocation36_spill] sm:$0xff] }
 0x2af   : > { %v2903_v31 = vxor.u32 2147483648, %v8785_v25  ;;  %v2998_v53 = vsel %vm11800_vm6, %v14988_v13, %v2995_v54  ;;  %v11860_v26 = vmul.u32.u64.low %v3062_v8, %v3061_v51  ;;  %v11861_v10 = vmul.u32.u64.high %v3062_v8, %v3061_v51, %v11860_v26 }
 0x2b0   : > { %8786 = vcosq.f32 %v2998_v53  ;;  %v3053_v38 = vsel %vm3047_vm9, %v3050_v27, %v3052_v12  ;;  %v11865_v29 = vmul.u32.u64.low %v3062_v8, %v3057_v6  ;;  %v11866_v20 = vmul.u32.u64.high %v3062_v8, %v3057_v6, %v11865_v29  ;;  %v15028_v27 = vld [vmem:[#allocation30_spill] sm:$0xff] }
 0x2b1   : > { %8788 = vsinq.f32 %v2998_v53  ;;  %v11869_v39 = vand.u32 3, %v3003_v43  ;;  %v11871_v30 = vadd.s32 4294967169, %v4058_v57  ;;  %v14668_v62 = vand.u32 2147483647, %v15026_v44 }
 0x2b2   : > { %v2907_v33 = vsel %vm2905_vm2, %v2906_v52, %v8785_v25  ;;  %v11879_v14 = vsel %vm3857_vm12, %v11804_v41, 0  ;;  %v3135_v6 = vshll.u32 %v14761_v7, %v15027_v40  ;;  %v3136_v23 = vshrl.u32 %v14818_v15, %v15028_v27 }
 0x2b3   : > { %v2904_v57 = vsel %vm2902_vm8, %v8783_v18, %v2903_v31  ;;  %v3069_v43 = vmul.u32 %v3062_v8, %v3053_v38  ;;  %vm3071_vm4 = vc.u32 %v11861_v10, %v11865_v29  ;;  %v3138_v52 = vshll.u32 %v14818_v15, %v15027_v40 }
 0x2b4   : > { %v3072_v25 = vadd.s32 1, %v11866_v20  ;;  %v3125_v41 = vand.u32 8388607, %v14668_v62  ;;  %v3137_v37 = vor.u32 %v3136_v23, %v3135_v6  ;;  %v3139_v54 = vshrl.u32 %v14756_v46, %v15028_v27 }
 0x2b5   : > { %vm2898_vm14 = vweird.f32 %v14979_v35  ;;  %vm3006_vm0 = vcmp.eq.s32.totalorder %v11869_v39, 0  ;;  %v3141_v18 = vshll.u32 %v14756_v46, %v15027_v40  ;;  %v3142_v8 = vshrl.u32 %v14781_v4, %v15028_v27 }
 0x2b6   : > { %v3144_v12 = vshll.u32 %v14781_v4, %v15027_v40  ;;  %v3145_v51 = vshrl.u32 %v14759_v55, %v15028_v27  ;;  %vm3005_vm5 = vcmp.lt.s32.totalorder %v11869_v39, 2  ;;  %v3073_v31 = vsel %vm3071_vm4, %v3072_v25, %v11866_v20 }
 0x2b7   : > { %v3140_v53 = vor.u32 %v3139_v54, %v3138_v52  ;;  %v3147_v26 = vshll.u32 %v14759_v55, %v15027_v40  ;;  %v3148_v38 = vshrl.u32 %v14782_v3, %v15028_v27  ;;  %vm3961_vm13 = vcmp.gt.s32.totalorder %v11814_v50, 0  ;;  %v15029_v54 = vld [vmem:[#allocation34_spill] sm:$0xff] }
 0x2b8   : > { %vm3002_vm6 = vweird.f32 %v14988_v13  ;;  %vm3009_vm12 = vcmp.eq.s32.totalorder %v11869_v39, 2  ;;  %v3074_v6 = vadd.s32 %v3073_v31, %v3069_v43  ;;  %v3143_v23 = vor.u32 %v3142_v8, %v3141_v18  ;;  %v890_v18 = vpop.permute.xlu1 %889 }
 0x2b9   : > { %v3146_v62 = vor.u32 %v3145_v51, %v3144_v12  ;;  %v2908_v24 = vsel %vm2901_vm11, %v2904_v57, %v2907_v33  ;;  %v3126_v20 = vor.u32 8388608, %v3125_v41  ;;  %v3134_v52 = vshrl.u32 %v14761_v7, %v15028_v27 }
 0x2ba   : > { %v3149_v40 = vor.u32 %v3148_v38, %v3147_v26  ;;  %vm3673_vm2 = vcmp.lt.s32.totalorder %v11794_v5, 4  ;;  %v3075_v25 = vadd.s32 536870912, %v3074_v6  ;;  %vm3150_vm8 = vcmp.lt.s32.totalorder %v15029_v54, 1  ;;  %v8787_v43 = vpop.eup %8786 }
 0x2bb   : > { %vm3152_vm3 = vcmp.lt.s32.totalorder %v15029_v54, 3  ;;  %vm3153_vm9 = vcmp.lt.s32.totalorder %v15029_v54, 4  ;;  %v3158_v32 = vsel %vm3150_vm8, %v3137_v37, %v3140_v53  ;;  %v3162_v57 = vsel %vm3150_vm8, %v3140_v53, %v3143_v23  ;;  %v8789_v41 = vpop.eup %8788 }
 0x2bc   : > { %v3159_v33 = vsel %vm3153_vm9, %v3146_v62, 920167782  ;;  %v3163_v27 = vsel %vm3153_vm9, %v3149_v40, 1326507024  ;;  %v3010_v8 = vxor.u32 2147483648, %v8787_v43  ;;  %v11927_v12 = vshrl.u32 %v3075_v25, 30 }
 0x2bd   : > { %vm3151_vm10 = vcmp.lt.s32.totalorder %v15029_v54, 2  ;;  %v3160_v51 = vsel %vm3152_vm3, %v3143_v23, %v3159_v33  ;;  %v3007_v31 = vxor.u32 2147483648, %v8789_v41  ;;  %v3155_v26 = vsel %vm3153_vm9, %v3143_v23, 2102212464 }
 0x2be   : > { %v3164_v38 = vsel %vm3152_vm3, %v3146_v62, %v3163_v27  ;;  %v3166_v48 = vshll.u32 %v3126_v20, 8  ;;  %v3011_v49 = vsel %vm3009_vm12, %v3010_v8, %v8789_v41  ;;  %v3077_v40 = vshll.u32 %v11927_v12, 30 }
 0x2bf   : > { %v3161_v25 = vsel %vm3151_vm10, %v3158_v32, %v3160_v51  ;;  %v3165_v28 = vsel %vm3151_vm10, %v3162_v57, %v3164_v38  ;;  %v2909_v33 = vsel %vm2898_vm14, nan, %v2908_v24  ;;  %v3008_v23 = vsel %vm3006_vm0, %v8787_v43, %v3007_v31  ;;  %v1048_v43 = vpop.permute.xlu1 %1047  ;;  %v1056_v31 = vpop.permute.xlu0 %1055 }
 0x2c0   : > { %v11945_v62 = vmul.u32.u64.low %v3166_v48, %v3165_v28  ;;  %v11946_v20 = vmul.u32.u64.high %v3166_v48, %v3165_v28, %v11945_v62  ;;  %v3012_v27 = vsel %vm3005_vm5, %v3008_v23, %v3011_v49  ;;  %v11950_v41 = vsub.s32 %v3074_v6, %v3077_v40 }
 0x2c1   : > { %v3154_v32 = vsel %vm3150_vm8, %v3134_v52, %v3137_v37  ;;  %v3156_v57 = vsel %vm3152_vm3, %v3140_v53, %v3155_v26  ;;  %v3013_v35 = vsel %vm3002_vm6, nan, %v3012_v27  ;;  %v4161_v24 = vand.u32 2139095040, %v11823_v56 }
 0x2c2   : > { %v11959_v8 = vmul.u32.u64.low %v3166_v48, %v3161_v25  ;;  %v11960_v28 = vmul.u32.u64.high %v3166_v48, %v3161_v25, %v11959_v8  ;;  %v11963_v39 = vpack.c.bf16 %v3013_v35, %v2909_v33  ;;  %v11966_v49 = vand.u32 31, %v11879_v14 }
 0x2c3   : > { %v4064_v37 = vadd.s32 1, %v11871_v30  ;;  %v3080_v6 = vsub.s32 0, %v11950_v41  ;;  %v15032_v13 = vor.u32 %v11728_v17, %v11743_v61  ;;  %v11980_v52 = vsel %vm3673_vm2, %v11812_v45, 920167782 }
 0x2c4   : > { %15030 = vst [vmem:[#allocation51_spill] sm:$0xff] %v11963_v39  ;;  %15031 = vst [vmem:[#allocation28_spill] sm:$0xff] %v11966_v49  ;;  %v3962_v51 = vsel %vm3961_vm13, %v11814_v50, 0  ;;  %v3157_v30 = vsel %vm3151_vm10, %v3154_v32, %v3156_v57  ;;  %8106 = vmatmul.mubr.bf16.gmra.mrb[12].mxu0 %v11963_v39  ;;  %v931_v17 = vmul.f32 %v890_v18, %v9231_v60  ;;  %v4162_v40 = vshrl.u32 %v4161_v24, 23 }
 0x2c5   : > { %v11975_v53 = vsel %vm3569_vm1, %v15032_v13, 1326507024  ;;  %15034 = vst [vmem:[#allocation10_spill] sm:$0xff] %v11980_v52  ;;  %v1090_v61 = vmul.f32 %v1048_v43, %v9229_v59  ;;  %v7658_v26 = vmin.u32 %v3080_v6, %v11950_v41  ;;  %vm3175_vm11 = vc.u32 %v11946_v20, %v11959_v8 }
 0x2c6   : > { %15033 = vst [vmem:[#allocation14_spill] sm:$0xff] %v11975_v53  ;;  %v15035_v38 = vor.u32 %v11782_v16, %v11808_v42  ;;  %v1091_v54 = vmul.f32 %v1052_v19, %v9229_v59  ;;  %v3176_v25 = vadd.s32 1, %v11960_v28  ;;  %v12003_v18 = vsub.s32 32, %v11966_v49  ;;  %v15040_v19 = vld [vmem:[#allocation53_spill] sm:$0xff] }
 0x2c7   : > { %vm4065_vm4 = vcmp.gt.s32.totalorder %v4064_v37, 0  ;;  %v3082_v33 = vclz %v7658_v26  ;;  %v3173_v23 = vmul.u32 %v3166_v48, %v3157_v30  ;;  %v12005_v62 = vshrl.u32 %v3962_v51, 5  ;;  %v15042_v26 = vld [vmem:[#allocation32_spill] sm:$0xff] }
 0x2c8   : > { %v11998_v50 = vsel %vm3673_vm2, %v15035_v38, 1326507024  ;;  %15037 = vst [vmem:[#allocation45_spill] sm:$0xff] %v12003_v18  ;;  %v12007_v27 = vand.u32 31, %v3962_v51  ;;  %v12010_v16 = vmul.f32 %v1056_v31, %v9229_v59  ;;  %v3177_v42 = vsel %vm3175_vm11, %v3176_v25, %v11960_v28 }
 0x2c9   : > { %15036 = vst [vmem:[#allocation25_spill] sm:$0xff] %v11998_v50  ;;  %15038 = vst [vmem:[#allocation37_spill] sm:$0xff] %v12005_v62  ;;  %v12013_v32 = vadd.f32 %v1091_v54, %v931_v17  ;;  %v12016_v57 = vadd.f32 %v1090_v61, %v15040_v19  ;;  %v7659_v35 = vadd.s32 4294967294, %v3082_v33  ;;  %v3178_v24 = vadd.s32 %v3177_v42, %v3173_v23  ;;  %v15041_v17 = vld [vmem:[#allocation24_spill] sm:$0xff] }
 0x2ca   : > { %15039 = vst [vmem:[#allocation57_spill] sm:$0xff] %v12007_v27  ;;  %v12019_v43 = vshrl.u32 %v11879_v14, 5  ;;  %v3872_v48 = vshll.u32 %v14781_v4, %v11966_v49  ;;  %v4066_v6 = vsel %vm4065_vm4, %v4064_v37, 0  ;;  %v7701_v13 = vadd.s32 4294967169, %v4162_v40 }
 0x2cb   : > { %v3873_v51 = vshrl.u32 %v14759_v55, %v12003_v18  ;;  %v3070_v28 = vadd.s32 %v11865_v29, %v11861_v10  ;;  %vm7660_vm14 = vcmp.lt.s32.totalorder %v7659_v35, 0  ;;  %v3179_v30 = vadd.s32 536870912, %v3178_v24  ;;  %v15043_v29 = vld [vmem:[#allocation17_spill] sm:$0xff] }
 0x2cc   : > { %v3085_v31 = vsel %vm7660_vm14, 0, %v7659_v35  ;;  %v3240_v14 = vshrl.u32 %v14818_v15, %v15042_v26  ;;  %v3243_v38 = vshrl.u32 %v14756_v46, %v15042_v26  ;;  %v3246_v25 = vshrl.u32 %v14781_v4, %v15042_v26 }
 0x2cd   : > { %v3086_v54 = vsub.s32 32, %v3085_v31  ;;  %v3090_v37 = vsub.s32 4294967266, %v3085_v31  ;;  %v12032_v40 = vshrl.u32 %v3179_v30, 30  ;;  %v12038_v10 = vshrl.u32 %v14782_v3, %v12003_v18 }
 0x2ce   : > { %v3239_v33 = vshll.u32 %v14761_v7, %v15043_v29  ;;  %v3242_v23 = vshll.u32 %v14818_v15, %v15043_v29  ;;  %v3245_v42 = vshll.u32 %v14756_v46, %v15043_v29  ;;  %v3087_v19 = vshll.u32 %v11950_v41, %v3085_v31 }
 0x2cf   : > { %v3088_v35 = vshrl.u32 %v3070_v28, %v3086_v54  ;;  %v3091_v30 = vadd.s32 127, %v3090_v37  ;;  %v3181_v61 = vshll.u32 %v12032_v40, 30  ;;  %v12050_v39 = vshll.u32 %v14759_v55, %v11966_v49 }
 0x2d0   : > { %vm3016_vm0 = vcmp.lt.s32.totalorder %v15013_v47, 0  ;;  %v15044_v56 = vand.u32 2147483647, %v15041_v17  ;;  %v3241_v18 = vor.u32 %v3240_v14, %v3239_v33  ;;  %v3244_v45 = vor.u32 %v3243_v38, %v3242_v23  ;;  %v1240_v23 = vpop.permute.xlu0 %1239 }
 0x2d1   : > { %v3089_v50 = vor.u32 %v3088_v35, %v3087_v19  ;;  %v3092_v52 = vshll.u32 %v3091_v30, 23  ;;  %v12055_v29 = vsub.s32 %v3178_v24, %v3181_v61  ;;  %v3247_v41 = vor.u32 %v3246_v25, %v3245_v42  ;;  %v15049_v42 = vld [vmem:[#allocation43_spill] sm:$0xff]  ;;  %v15050_v30 = vld [vmem:[#allocation26_spill] sm:$0xff] }
 0x2d2   : > { %v3229_v62 = vand.u32 8388607, %v15044_v56  ;;  %v12057_v28 = vor.u32 %v3873_v51, %v3872_v48  ;;  %v12059_v31 = vshrl.u32 %v4066_v6, 5  ;;  %v12061_v54 = vand.u32 31, %v4066_v6  ;;  %v15048_v48 = vld [vmem:[#allocation16_spill] sm:$0xff] }
 0x2d3   : > { %v12063_v37 = vadd.s32 1, %v7701_v13  ;;  %v15045_v56 = vand.u32 2147483647, %v15013_v47  ;;  %v3093_v24 = vor.u32 4788187, %v3092_v52  ;;  %v3184_v61 = vsub.s32 0, %v12055_v29 }
 0x2d4   : > { %vm3254_vm13 = vcmp.lt.s32.totalorder %v15048_v48, 1  ;;  %v3100_v51 = vsub.s32 4, %v11927_v12  ;;  %v3230_v6 = vor.u32 8388608, %v3229_v62  ;;  %vm3256_vm6 = vcmp.lt.s32.totalorder %v15048_v48, 3 }
 0x2d5   : > { %vm12069_vm5 = vcmp.le.f32.partialorder %v15045_v56, 0.7853982  ;;  %v3262_v13 = vsel %vm3254_vm13, %v3241_v18, %v3244_v45  ;;  %v3094_v38 = vand.u32 2147483647, %v3093_v24  ;;  %v3096_v25 = vcvt.s32.f32 %v3089_v50  ;;  %v15051_v56 = vld [vmem:[#allocation40_spill] sm:$0xff] }
 0x2d6   : > { %v7662_v33 = vmin.u32 %v3184_v61, %v12055_v29  ;;  %v3264_v52 = vsel %vm3256_vm6, %v3247_v41, %v15049_v42  ;;  %v12084_v19 = vsub.s32 32, %v12061_v54  ;;  %v12088_v62 = vshll.u32 %v14781_v4, %v12061_v54 }
 0x2d7   : > { %v3266_v35 = vsel %vm3254_vm13, %v3244_v45, %v3247_v41  ;;  %v3268_v50 = vsel %vm3256_vm6, %v15051_v56, %v15050_v30  ;;  %v3097_v24 = vmul.f32 %v3096_v25, %v3094_v38  ;;  %vm3255_vm12 = vcmp.lt.s32.totalorder %v15048_v48, 2  ;;  %v15056_v48 = vld [vmem:[#allocation39_spill] sm:$0xff] }
 0x2d8   : > { %v3186_v61 = vclz %v7662_v33  ;;  %v3259_v42 = vsel %vm3257_vm7, %v3247_v41, 2102212464  ;;  %v1282_v49 = vmul.f32 %v1240_v23, %v14952_v21  ;;  %v3238_v5 = vshrl.u32 %v14761_v7, %v15042_v26 }
 0x2d9   : > { %v3265_v27 = vsel %vm3255_vm12, %v3262_v13, %v3264_v52  ;;  %v3270_v53 = vshll.u32 %v3230_v6, 8  ;;  %v3098_v1 = vxor.u32 2147483648, %v3097_v24  ;;  %v3101_v38 = vsel %vm3016_vm0, %v3100_v51, %v11927_v12 }
 0x2da   : > { %v7663_v25 = vadd.s32 4294967294, %v3186_v61  ;;  %v3269_v33 = vsel %vm3255_vm12, %v3266_v35, %v3268_v50  ;;  %v3258_v41 = vsel %vm3254_vm13, %v3238_v5, %v3241_v18  ;;  %v3260_v23 = vsel %vm3256_vm6, %v3244_v45, %v3259_v42 }
 0x2db   : > { %v12113_v26 = vmul.u32.u64.low %v3270_v53, %v3269_v33  ;;  %v12114_v30 = vmul.u32.u64.high %v3270_v53, %v3269_v33, %v12113_v26  ;;  %v3099_v6 = vsel %vm3016_vm0, %v3098_v1, %v3097_v24  ;;  %vm3120_vm8 = vcmp.lt.s32.totalorder %v15026_v44, 0  ;;  %v15057_v33 = vld [vmem:[#allocation46_spill] sm:$0xff] }
 0x2dc   : > { %vm7664_vm7 = vcmp.lt.s32.totalorder %v7663_v25, 0  ;;  %v12118_v13 = vmul.u32.u64.low %v3270_v53, %v3265_v27  ;;  %v12119_v52 = vmul.u32.u64.high %v3270_v53, %v3265_v27, %v12118_v13  ;;  %v3102_v12 = vsel %vm12069_vm5, %v15013_v47, %v3099_v6 }
 0x2dd   : > { %v3189_v5 = vsel %vm7664_vm7, 0, %v7663_v25  ;;  %v1314_v45 = vadd.f32 %v1282_v49, %v12016_v57  ;;  %v15052_v18 = vand.u32 2147483647, %v15026_v44  ;;  %v3174_v1 = vadd.s32 %v11959_v8, %v11946_v20  ;;  %v12146_v20 = vld [vmem:[%s14746_s1] ss:$0 sm:$0xff] }
 0x2de   : > { %v3190_v27 = vsub.s32 32, %v3189_v5  ;;  %v3194_v35 = vsub.s32 4294967266, %v3189_v5  ;;  %v3103_v56 = vsel %vm12069_vm5, 0, %v3101_v38  ;;  %8790 = vcosq.f32 %v3102_v12 }
 0x2df   : > { %vm12129_vm3 = vcmp.le.f32.partialorder %v15052_v18, 0.7853982  ;;  %v3204_v50 = vsub.s32 4, %v12032_v40  ;;  %v3261_v49 = vsel %vm3255_vm12, %v3258_v41, %v3260_v23  ;;  %v3191_v57 = vshll.u32 %v12055_v29, %v3189_v5 }
 0x2e0   : > { %v3192_v24 = vshrl.u32 %v3174_v1, %v3190_v27  ;;  %v3195_v61 = vadd.s32 127, %v3194_v35  ;;  %vm3279_vm9 = vc.u32 %v12114_v30, %v12118_v13  ;;  %8792 = vsinq.f32 %v3102_v12  ;;  %v15058_v12 = vld [vmem:[#allocation49_spill] sm:$0xff] }
 0x2e1   : > { %v12149_v8 = vadd.f32 %v12146_v20, %v1314_v45  ;;  %v3280_v14 = vadd.s32 1, %v12119_v52  ;;  %v14690_v42 = vand.u32 2147483647, %v15056_v48  ;;  %v3277_v25 = vmul.u32 %v3270_v53, %v3261_v49 }
 0x2e2   : > { %v3193_v38 = vor.u32 %v3192_v24, %v3191_v57  ;;  %v3196_v29 = vshll.u32 %v3195_v61, 23  ;;  %v3344_v41 = vshrl.u32 %v14818_v15, %v15057_v33  ;;  %v3107_v23 = vadd.s32 3, %v3103_v56  ;;  %v12173_v57 = vpop.permute.xlu1 %894 }
 0x2e3   : > { %15055 = vst [vmem:[#allocation3_spill] sm:$0xff] %v12149_v8  ;;  %v3205_v26 = vsel %vm3120_vm8, %v3204_v50, %v12032_v40  ;;  %v3281_v6 = vsel %vm3279_vm9, %v3280_v14, %v12119_v52  ;;  %v3343_v5 = vshll.u32 %v14761_v7, %v15058_v12  ;;  %v3333_v1 = vand.u32 8388607, %v14690_v42 }
 0x2e4   : > { %v3197_v45 = vor.u32 4788187, %v3196_v29  ;;  %v3282_v18 = vadd.s32 %v3281_v6, %v3277_v25  ;;  %v3346_v53 = vshll.u32 %v14818_v15, %v15058_v12  ;;  %v3347_v35 = vshrl.u32 %v14756_v46, %v15057_v33 }
 0x2e5   : > { %v3345_v27 = vor.u32 %v3344_v41, %v3343_v5  ;;  %v3349_v40 = vshll.u32 %v14756_v46, %v15058_v12  ;;  %v3350_v52 = vshrl.u32 %v14781_v4, %v15057_v33  ;;  %vm4169_vm10 = vcmp.gt.s32.totalorder %v12063_v37, 0 }
 0x2e6   : > { %v3198_v56 = vand.u32 2147483647, %v3197_v45  ;;  %v3200_v50 = vcvt.s32.f32 %v3193_v38  ;;  %v4265_v49 = vand.u32 2139095040, %v12149_v8  ;;  %v3283_v24 = vadd.s32 536870912, %v3282_v18 }
 0x2e7   : > { %v4081_v61 = vshrl.u32 %v14759_v55, %v12084_v19  ;;  %v3207_v14 = vsel %vm12129_vm3, 0, %v3205_v26  ;;  %v3348_v29 = vor.u32 %v3347_v35, %v3346_v53  ;;  %v3351_v25 = vor.u32 %v3350_v52, %v3349_v40 }
 0x2e8   : > { %v3201_v41 = vmul.f32 %v3200_v50, %v3198_v56  ;;  %v12179_v6 = vshrl.u32 %v3283_v24, 30  ;;  %vm3358_vm11 = vcmp.lt.s32.totalorder %v11211_v11, 1  ;;  %vm3360_vm4 = vcmp.lt.s32.totalorder %v11211_v11, 3  ;;  %v8791_v38 = vpop.eup %8790  ;;  %v900_v24 = vpop.permute.xlu1 %899 }
 0x2e9   : > { %v3108_v12 = vand.u32 3, %v3107_v23  ;;  %v3334_v5 = vor.u32 8388608, %v3333_v1  ;;  %v3366_v45 = vsel %vm3358_vm11, %v3345_v27, %v3348_v29  ;;  %v3368_v42 = vsel %vm3360_vm4, %v3351_v25, %v11536_v58 }
 0x2ea   : > { %v3202_v26 = vxor.u32 2147483648, %v3201_v41  ;;  %v3211_v53 = vadd.s32 3, %v3207_v14  ;;  %v4266_v35 = vshrl.u32 %v4265_v49, 23  ;;  %v3285_v40 = vshll.u32 %v12179_v6, 30  ;;  %v8793_v52 = vpop.eup %8792 }
 0x2eb   : > { %v3342_v56 = vshrl.u32 %v14761_v7, %v15057_v33  ;;  %vm3359_vm14 = vcmp.lt.s32.totalorder %v11211_v11, 2  ;;  %v3363_v23 = vsel %vm3361_vm15, %v3351_v25, 2102212464  ;;  %v3372_v1 = vsel %vm3360_vm4, %v11326_v2, %v11540_v22 }
 0x2ec   : > { %v3203_v58 = vsel %vm3120_vm8, %v3202_v26, %v3201_v41  ;;  %v12200_v50 = vsub.s32 %v3282_v18, %v3285_v40  ;;  %v3369_v49 = vsel %vm3359_vm14, %v3366_v45, %v3368_v42  ;;  %v3370_v33 = vsel %vm3358_vm11, %v3348_v29, %v3351_v25 }
 0x2ed   : > { %v3114_v14 = vxor.u32 2147483648, %v8791_v38  ;;  %v3206_v8 = vsel %vm12129_vm3, %v15026_v44, %v3203_v58  ;;  %v3362_v2 = vsel %vm3358_vm11, %v3342_v56, %v3345_v27  ;;  %v3374_v22 = vshll.u32 %v3334_v5, 8  ;;  %v1060_v58 = vpop.permute.xlu1 %1059 }
 0x2ee   : > { %v3111_v34 = vxor.u32 2147483648, %v8793_v52  ;;  %8794 = vcosq.f32 %v3206_v8  ;;  %v3288_v18 = vsub.s32 0, %v12200_v50  ;;  %v3364_v42 = vsel %vm3360_vm4, %v3348_v29, %v3363_v23 }
 0x2ef   : > { %8796 = vsinq.f32 %v3206_v8  ;;  %v3373_v25 = vsel %vm3359_vm14, %v3370_v33, %v3372_v1  ;;  %v12216_v41 = vmul.u32.u64.low %v3374_v22, %v3369_v49  ;;  %v12217_v45 = vmul.u32.u64.high %v3374_v22, %v3369_v49, %v12216_v41 }
 0x2f0   : > { %v12222_v51 = vshll.u32 %v14759_v55, %v12061_v54  ;;  %v7666_v27 = vmin.u32 %v3288_v18, %v12200_v50  ;;  %v12225_v5 = vmul.u32.u64.low %v3374_v22, %v3373_v25  ;;  %v12226_v26 = vmul.u32.u64.high %v3374_v22, %v3373_v25, %v12225_v5 }
 0x2f1   : > { %v12230_v29 = vshrl.u32 %v14782_v3, %v12084_v19  ;;  %v12235_v8 = vsel %vm4169_vm10, %v12063_v37, 0  ;;  %v7705_v40 = vadd.s32 4294967169, %v4266_v35  ;;  %v3365_v56 = vsel %vm3359_vm14, %v3362_v2, %v3364_v42  ;;  %v1252_v42 = vpop.permute.xlu0 %1251 }
 0x2f2   : > { %vm3110_vm15 = vcmp.eq.s32.totalorder %v3108_v12, 0  ;;  %vm3113_vm0 = vcmp.eq.s32.totalorder %v3108_v12, 2  ;;  %v3212_v23 = vand.u32 3, %v3211_v53  ;;  %v3290_v1 = vclz %v7666_v27 }
 0x2f3   : > { %v12240_v49 = vor.u32 %v4081_v61, %v12088_v62  ;;  %v3112_v33 = vsel %vm3110_vm15, %v8791_v38, %v3111_v34  ;;  %v3115_v18 = vsel %vm3113_vm0, %v3114_v14, %v8793_v52  ;;  %v3384_v25 = vadd.s32 1, %v12217_v45 }
 0x2f4   : > { %v12244_v5 = vand.u32 31, %v12235_v8  ;;  %v7667_v37 = vadd.s32 4294967294, %v3290_v1  ;;  %v3381_v35 = vmul.u32 %v3374_v22, %v3365_v56  ;;  %vm3383_vm5 = vc.u32 %v12226_v26, %v12216_v41 }
 0x2f5   : > { %vm3106_vm13 = vweird.f32 %v15013_v47  ;;  %vm3109_vm6 = vcmp.lt.s32.totalorder %v3108_v12, 2  ;;  %v4272_v11 = vadd.s32 1, %v7705_v40  ;;  %v3385_v53 = vsel %vm3383_vm5, %v3384_v25, %v12217_v45  ;;  %v1244_v45 = vpop.permute.xlu1 %1243 }
 0x2f6   : > { %15059 = vst [vmem:[#allocation52_spill] sm:$0xff] %v12244_v5  ;;  %vm3881_vm12 = vcmp.lt.s32.totalorder %v12019_v43, 4  ;;  %v3116_v34 = vsel %vm3109_vm6, %v3112_v33, %v3115_v18  ;;  %vm3213_vm7 = vcmp.lt.s32.totalorder %v3212_v23, 2  ;;  %vm7668_vm8 = vcmp.lt.s32.totalorder %v7667_v37, 0 }
 0x2f7   : > { %v3386_v62 = vadd.s32 %v3385_v53, %v3381_v35  ;;  %vm3214_vm3 = vcmp.eq.s32.totalorder %v3212_v23, 0  ;;  %vm3217_vm9 = vcmp.eq.s32.totalorder %v3212_v23, 2  ;;  %v3293_v61 = vsel %vm7668_vm8, 0, %v7667_v37 }
 0x2f8   : > { %v1093_v38 = vmul.f32 %v1060_v58, %v9229_v59  ;;  %v8795_v52 = vpop.eup %8794  ;;  %vm4089_vm10 = vcmp.lt.s32.totalorder %v12059_v31, 4  ;;  %v3278_v12 = vadd.s32 %v12118_v13, %v12114_v30  ;;  %v3294_v14 = vsub.s32 32, %v3293_v61 }
 0x2f9   : > { %v3298_v2 = vsub.s32 4294967266, %v3293_v61  ;;  %v3387_v22 = vadd.s32 536870912, %v3386_v62  ;;  %v8797_v27 = vpop.eup %8796  ;;  %v3117_v40 = vsel %vm3106_vm13, nan, %v3116_v34  ;;  %v3218_v56 = vxor.u32 2147483648, %v8795_v52 }
 0x2fa   : > { %v3295_v1 = vshll.u32 %v12200_v50, %v3293_v61  ;;  %v933_v59 = vmul.f32 %v900_v24, %v9231_v60  ;;  %v3215_v58 = vxor.u32 2147483648, %v8797_v27  ;;  %v3296_v33 = vshrl.u32 %v3278_v12, %v3294_v14 }
 0x2fb   : > { %v3299_v18 = vadd.s32 127, %v3298_v2  ;;  %v12259_v25 = vshrl.u32 %v3387_v22, 30  ;;  %v3219_v30 = vsel %vm3217_vm9, %v3218_v56, %v8797_v27  ;;  %v1285_v37 = vmul.f32 %v1252_v42, %v14952_v21 }
 0x2fc   : > { %v1125_v13 = vadd.f32 %v1093_v38, %v933_v59  ;;  %v1283_v35 = vmul.f32 %v1244_v45, %v14952_v21  ;;  %v3216_v47 = vsel %vm3214_vm3, %v8795_v52, %v3215_v58  ;;  %v3297_v53 = vor.u32 %v3296_v33, %v3295_v1 }
 0x2fd   : > { %v3300_v34 = vshll.u32 %v3299_v18, 23  ;;  %v3389_v50 = vshll.u32 %v12259_v25, 30  ;;  %v4085_v24 = vor.u32 %v12230_v29, %v12222_v51  ;;  %v12269_v61 = vsub.s32 32, %v12244_v5 }
 0x2fe   : > { %vm3210_vm11 = vweird.f32 %v15026_v44  ;;  %v3220_v38 = vsel %vm3213_vm7, %v3216_v47, %v3219_v30  ;;  %vm4273_vm4 = vcmp.gt.s32.totalorder %v4272_v11, 0  ;;  %v12278_v52 = vsel %vm3881_vm12, %v12057_v28, 920167782 }
 0x2ff   : > { %15060 = vst [vmem:[#allocation42_spill] sm:$0xff] %v12269_v61  ;;  %v3221_v12 = vsel %vm3210_vm11, nan, %v3220_v38  ;;  %v3301_v14 = vor.u32 4788187, %v3300_v34  ;;  %v12273_v2 = vsub.s32 %v3386_v62, %v3389_v50  ;;  %v1317_v51 = vadd.f32 %v1285_v37, %v1125_v13 }
 0x300   : > { %v12280_v22 = vpack.c.bf16 %v3221_v12, %v3117_v40  ;;  %v1315_v29 = vadd.f32 %v1283_v35, %v12013_v32  ;;  %v15062_v44 = vor.u32 %v12038_v10, %v12050_v39  ;;  %v3304_v62 = vcvt.s32.f32 %v3297_v53 }
 0x301   : > { %v3302_v42 = vand.u32 2147483647, %v3301_v14  ;;  %v3392_v45 = vsub.s32 0, %v12273_v2  ;;  %v12294_v27 = vsel %vm4089_vm10, %v12240_v49, 920167782  ;;  %v12297_v40 = vshrl.u32 %v12235_v8, 5 }
 0x302   : > { %15061 = vst [vmem:[#allocation11_spill] sm:$0xff] %v12280_v22  ;;  %v12288_v23 = vsel %vm3881_vm12, %v15062_v44, 1326507024  ;;  %8109 = vmatprep.mubr.bf16.mxu0 %v12280_v22  ;;  %v12300_v32 = vsel %vm4273_vm4, %v4272_v11, 0  ;;  %v3308_v39 = vsub.s32 4, %v12179_v6  ;;  %v4185_v56 = vshrl.u32 %v14759_v55, %v12269_v61 }
 0x303   : > { %15063 = vst [vmem:[#allocation41_spill] sm:$0xff] %v12297_v40  ;;  %v12305_v10 = vsel %vm4089_vm10, %v4085_v24, 1326507024  ;;  %v3305_v1 = vmul.f32 %v3304_v62, %v3302_v42  ;;  %v7670_v59 = vmin.u32 %v3392_v45, %v12273_v2  ;;  %v4184_v8 = vshll.u32 %v14781_v4, %v12244_v5 }
 0x304   : > { %v932_v58 = vmul.f32 %v12173_v57, %v9231_v60  ;;  %v12315_v11 = vadd.f32 %v12146_v20, %v1317_v51  ;;  %v12318_v33 = vadd.f32 %v12146_v20, %v1315_v29  ;;  %v12321_v18 = vand.u32 31, %v12300_v32  ;;  %v1248_v51 = vpop.permute.xlu1 %1247 }
 0x305   : > { %vm3224_vm14 = vcmp.lt.s32.totalorder %v15041_v17, 0  ;;  %v3306_v30 = vxor.u32 2147483648, %v3305_v1  ;;  %v3394_v13 = vclz %v7670_v59  ;;  %v4187_v37 = vshll.u32 %v14759_v55, %v12244_v5 }
 0x306   : > { %15064 = vst [vmem:[#allocation33_spill] sm:$0xff] %v12315_v11  ;;  %15065 = vst [vmem:[#allocation29_spill] sm:$0xff] %v12318_v33  ;;  %v4188_v35 = vshrl.u32 %v14782_v3, %v12269_v61  ;;  %vm4193_vm15 = vcmp.lt.s32.totalorder %v12297_v40, 4  ;;  %v3309_v60 = vsel %vm3224_vm14, %v3308_v39, %v12179_v6  ;;  %v12330_v57 = vor.u32 %v4185_v56, %v4184_v8 }
 0x307   : > { %15066 = vst [vmem:[#allocation36_spill] sm:$0xff] %v12321_v18  ;;  %v3307_v47 = vsel %vm3224_vm14, %v3306_v30, %v3305_v1  ;;  %v7671_v53 = vadd.s32 4294967294, %v3394_v13  ;;  %v3412_v34 = vsub.s32 4, %v12259_v25  ;;  %v1124_v50 = vadd.f32 %v12010_v16, %v932_v58 }
 0x308   : > { %15067 = vst [vmem:[#allocation12_spill] sm:$0xff] %v12330_v57  ;;  %v15068_v24 = vand.u32 2147483647, %v15041_v17  ;;  %v4577_v12 = vand.u32 2139095040, %v12315_v11  ;;  %v4369_v14 = vand.u32 2139095040, %v12318_v33  ;;  %v12343_v6 = vsub.s32 32, %v12321_v18 }
 0x309   : > { %vm7672_vm5 = vcmp.lt.s32.totalorder %v7671_v53, 0  ;;  %v15072_v44 = vand.u32 2147483647, %v15056_v48  ;;  %vm3328_vm6 = vcmp.lt.s32.totalorder %v15056_v48, 0  ;;  %v3382_v62 = vadd.s32 %v12216_v41, %v12226_v26 }
 0x30a   : > { %vm12336_vm0 = vcmp.le.f32.partialorder %v15068_v24, 0.7853982  ;;  %15071 = vst [vmem:[#allocation30_spill] sm:$0xff] %v12343_v6  ;;  %v3397_v45 = vsel %vm7672_vm5, 0, %v7671_v53  ;;  %v3413_v1 = vsel %vm3328_vm6, %v3412_v34, %v12259_v25  ;;  %v1284_v59 = vmul.f32 %v1248_v51, %v14952_v21 }
 0x30b   : > { %v3310_v29 = vsel %vm12336_vm0, %v15041_v17, %v3307_v47  ;;  %v3311_v16 = vsel %vm12336_vm0, 0, %v3309_v60  ;;  %vm12352_vm13 = vcmp.le.f32.partialorder %v15072_v44, 0.7853982  ;;  %v3398_v39 = vsub.s32 32, %v3397_v45 }
 0x30c   : > { %v3402_v56 = vsub.s32 4294967266, %v3397_v45  ;;  %8798 = vcosq.f32 %v3310_v29  ;;  %v3315_v8 = vadd.s32 3, %v3311_v16  ;;  %v4578_v58 = vshrl.u32 %v4577_v12, 23  ;;  %v15076_v12 = vld [vmem:[#allocation21_spill] sm:$0xff] }
 0x30d   : > { %v4370_v30 = vshrl.u32 %v4369_v14, 23  ;;  %8800 = vsinq.f32 %v3310_v29  ;;  %v3399_v13 = vshll.u32 %v12273_v2, %v3397_v45  ;;  %v3400_v60 = vshrl.u32 %v3382_v62, %v3398_v39 }
 0x30e   : > { %v3403_v47 = vadd.s32 127, %v3402_v56  ;;  %v4189_v24 = vor.u32 %v4188_v35, %v4187_v37  ;;  %v4289_v41 = vshrl.u32 %v14759_v55, %v12343_v6  ;;  %v12368_v26 = vshrl.u32 %v14782_v3, %v12343_v6  ;;  %v15100_v6 = vld [vmem:[#allocation31_spill] sm:$0xff] }
 0x30f   : > { %v3415_v21 = vsel %vm12352_vm13, 0, %v3413_v1  ;;  %v12375_v25 = vsel %vm4193_vm15, %v12330_v57, 920167782  ;;  %v3401_v53 = vor.u32 %v3400_v60, %v3399_v13  ;;  %v1316_v34 = vadd.f32 %v1284_v59, %v1124_v50 }
 0x310   : > { %15075 = vst [vmem:[#allocation34_spill] sm:$0xff] %v12375_v25  ;;  %v3404_v2 = vshll.u32 %v3403_v47, 23  ;;  %v4288_v37 = vshll.u32 %v14781_v4, %v12321_v18  ;;  %v12381_v35 = vshll.u32 %v14759_v55, %v12321_v18  ;;  %v7717_v38 = vadd.s32 4294967169, %v4578_v58 }
 0x311   : > { %v14695_v14 = vand.u32 2147483647, %v15076_v12  ;;  %v12384_v51 = vand.u32 3, %v3315_v8  ;;  %v3419_v16 = vadd.s32 3, %v3415_v21  ;;  %v7709_v44 = vadd.s32 4294967169, %v4370_v30 }
 0x312   : > { %v3405_v29 = vor.u32 4788187, %v3404_v2  ;;  %v12388_v62 = vsel %vm4193_vm15, %v4189_v24, 1326507024  ;;  %v12391_v50 = vshrl.u32 %v12300_v32, 5  ;;  %v12393_v45 = vor.u32 %v4289_v41, %v4288_v37 }
 0x313   : > { %15077 = vst [vmem:[#allocation53_spill] sm:$0xff] %v12388_v62  ;;  %v3408_v1 = vcvt.s32.f32 %v3401_v53  ;;  %v12398_v59 = vadd.f32 %v12146_v20, %v1316_v34  ;;  %v3448_v8 = vshrl.u32 %v14818_v15, %v11545_v63  ;;  %v12402_v58 = vadd.s32 1, %v7717_v38 }
 0x314   : > { %15078 = vst [vmem:[#allocation24_spill] sm:$0xff] %v12391_v50  ;;  %15079 = vst [vmem:[#allocation32_spill] sm:$0xff] %v12393_v45  ;;  %v3406_v56 = vand.u32 2147483647, %v3405_v29  ;;  %v3437_v30 = vand.u32 8388607, %v14695_v14  ;;  %v3451_v32 = vshrl.u32 %v14756_v46, %v11545_v63  ;;  %v3454_v13 = vshrl.u32 %v14781_v4, %v11545_v63 }
 0x315   : > { %15080 = vst [vmem:[#allocation17_spill] sm:$0xff] %v12398_v59  ;;  %vm3321_vm7 = vcmp.eq.s32.totalorder %v12384_v51, 2  ;;  %v12411_v47 = vand.u32 3, %v3419_v16  ;;  %v12413_v20 = vadd.s32 1, %v7709_v44  ;;  %v3447_v24 = vshll.u32 %v14761_v7, %v11512_v36 }
 0x316   : > { %v3409_v60 = vmul.f32 %v3408_v1, %v3406_v56  ;;  %v8799_v41 = vpop.eup %8798  ;;  %vm3318_vm8 = vcmp.eq.s32.totalorder %v12384_v51, 0  ;;  %v3450_v21 = vshll.u32 %v14818_v15, %v11512_v36  ;;  %v3453_v53 = vshll.u32 %v14756_v46, %v11512_v36 }
 0x317   : > { %v3456_v2 = vshll.u32 %v14781_v4, %v11512_v36  ;;  %v3457_v34 = vshrl.u32 %v14759_v55, %v11545_v63  ;;  %v8801_v37 = vpop.eup %8800  ;;  %v3449_v29 = vor.u32 %v3448_v8, %v3447_v24  ;;  %v3459_v16 = vshll.u32 %v14759_v55, %v11512_v36 }
 0x318   : > { %v3410_v38 = vxor.u32 2147483648, %v3409_v60  ;;  %v3460_v44 = vshrl.u32 %v14782_v3, %v11545_v63  ;;  %v3438_v56 = vor.u32 8388608, %v3437_v30  ;;  %v3452_v1 = vor.u32 %v3451_v32, %v3450_v21 }
 0x319   : > { %v3455_v14 = vor.u32 %v3454_v13, %v3453_v53  ;;  %v3458_v39 = vor.u32 %v3457_v34, %v3456_v2  ;;  %vm3317_vm3 = vcmp.lt.s32.totalorder %v12384_v51, 2  ;;  %v3322_v22 = vxor.u32 2147483648, %v8799_v41 }
 0x31a   : > { %v3411_v11 = vsel %vm3328_vm6, %v3410_v38, %v3409_v60  ;;  %v3446_v33 = vshrl.u32 %v14761_v7, %v11545_v63  ;;  %v3461_v8 = vor.u32 %v3460_v44, %v3459_v16  ;;  %v3319_v24 = vxor.u32 2147483648, %v8801_v37  ;;  %v15081_v44 = vld [vmem:[#allocation19_spill] sm:$0xff] }
 0x31b   : > { %v3414_v36 = vsel %vm12352_vm13, %v15056_v48, %v3411_v11  ;;  %vm3462_vm9 = vcmp.lt.s32.totalorder %v11521_v0, 1  ;;  %vm3463_vm11 = vcmp.lt.s32.totalorder %v11521_v0, 2  ;;  %vm3464_vm4 = vcmp.lt.s32.totalorder %v11521_v0, 3 }
 0x31c   : > { %8802 = vcosq.f32 %v3414_v36  ;;  %vm3465_vm14 = vcmp.lt.s32.totalorder %v11521_v0, 4  ;;  %v3466_v30 = vsel %vm3462_vm9, %v3446_v33, %v3449_v29  ;;  %v3470_v13 = vsel %vm3462_vm9, %v3449_v29, %v3452_v1 }
 0x31d   : > { %8804 = vsinq.f32 %v3414_v36  ;;  %v3467_v32 = vsel %vm3465_vm14, %v3455_v14, 2102212464  ;;  %v3471_v63 = vsel %vm3465_vm14, %v3458_v39, 920167782  ;;  %v3474_v53 = vsel %vm3462_vm9, %v3452_v1, %v3455_v14 }
 0x31e   : > { %v3468_v60 = vsel %vm3464_vm4, %v3452_v1, %v3467_v32  ;;  %v3472_v21 = vsel %vm3464_vm4, %v3455_v14, %v3471_v63  ;;  %v3475_v2 = vsel %vm3465_vm14, %v3461_v8, 1326507024  ;;  %v3323_v11 = vsel %vm3321_vm7, %v3322_v22, %v8801_v37 }
 0x31f   : > { %v3473_v42 = vsel %vm3463_vm11, %v3470_v13, %v3472_v21  ;;  %v3476_v34 = vsel %vm3464_vm4, %v3458_v39, %v3475_v2  ;;  %v3478_v38 = vshll.u32 %v3438_v56, 8  ;;  %v3320_v16 = vsel %vm3318_vm8, %v8799_v41, %v3319_v24  ;;  %v15082_v56 = vld [vmem:[#allocation8_spill] sm:$0xff] }
 0x320   : > { %v3469_v33 = vsel %vm3463_vm11, %v3466_v30, %v3468_v60  ;;  %v3477_v29 = vsel %vm3463_vm11, %v3474_v53, %v3476_v34  ;;  %v14702_v14 = vand.u32 2147483647, %v15081_v44  ;;  %vm3421_vm0 = vcmp.lt.s32.totalorder %v12411_v47, 2 }
 0x321   : > { %v12453_v1 = vmul.u32.u64.low %v3478_v38, %v3477_v29  ;;  %v12454_v8 = vmul.u32.u64.high %v3478_v38, %v3477_v29, %v12453_v1  ;;  %v12456_v22 = vmul.u32.u64.low %v3478_v38, %v3473_v42  ;;  %v12457_v37 = vmul.u32.u64.high %v3478_v38, %v3473_v42, %v12456_v22  ;;  %v15083_v42 = vld [vmem:[#allocation23_spill] sm:$0xff] }
 0x322   : > { %vm3422_vm5 = vcmp.eq.s32.totalorder %v12411_v47, 0  ;;  %vm3425_vm13 = vcmp.eq.s32.totalorder %v12411_v47, 2  ;;  %v3541_v39 = vand.u32 8388607, %v14702_v14  ;;  %vm3314_vm6 = vweird.f32 %v15041_v17  ;;  %v15085_v29 = vld [vmem:[#allocation15_spill] sm:$0xff]  ;;  %v15088_v17 = vld [vmem:[#allocation56_spill] sm:$0xff] }
 0x323   : > { %v3324_v0 = vsel %vm3317_vm3, %v3320_v16, %v3323_v11  ;;  %vm3418_vm7 = vweird.f32 %v15056_v48  ;;  %v3551_v41 = vshll.u32 %v14761_v7, %v11672_v9  ;;  %v3552_v24 = vshrl.u32 %v14818_v15, %v15082_v56  ;;  %v15089_v48 = vld [vmem:[#allocation57_spill] sm:$0xff] }
 0x324   : > { %v3555_v36 = vshrl.u32 %v14756_v46, %v15082_v56  ;;  %v3485_v30 = vmul.u32 %v3478_v38, %v3469_v33  ;;  %v3554_v32 = vshll.u32 %v14818_v15, %v11672_v9  ;;  %v3557_v13 = vshll.u32 %v14756_v46, %v11672_v9  ;;  %v15084_v33 = vld [vmem:[#allocation14_spill] sm:$0xff] }
 0x325   : > { %v3558_v51 = vshrl.u32 %v14781_v4, %v15082_v56  ;;  %vm4585_vm8 = vcmp.gt.s32.totalorder %v12402_v58, 0  ;;  %vm3487_vm3 = vc.u32 %v12454_v8, %v12456_v22  ;;  %v3488_v63 = vadd.s32 1, %v12457_v37 }
 0x326   : > { %v3550_v60 = vshrl.u32 %v14761_v7, %v15082_v56  ;;  %v3553_v21 = vor.u32 %v3552_v24, %v3551_v41  ;;  %v8803_v53 = vpop.eup %8802  ;;  %vm4297_vm9 = vcmp.lt.s32.totalorder %v12391_v50, 4  ;;  %v3542_v2 = vor.u32 8388608, %v3541_v39 }
 0x327   : > { %v3556_v11 = vor.u32 %v3555_v36, %v3554_v32  ;;  %v3559_v9 = vor.u32 %v3558_v51, %v3557_v13  ;;  %vm3568_vm11 = vcmp.lt.s32.totalorder %v15083_v42, 3  ;;  %v8805_v34 = vpop.eup %8804  ;;  %v3426_v38 = vxor.u32 2147483648, %v8803_v53  ;;  %v15086_v32 = vld [vmem:[#allocation27_spill] sm:$0xff] }
 0x328   : > { %v3489_v16 = vsel %vm3487_vm3, %v3488_v63, %v12457_v37  ;;  %vm3566_vm4 = vcmp.lt.s32.totalorder %v15083_v42, 1  ;;  %v3580_v1 = vsel %vm3568_vm11, %v15085_v29, %v15084_v33  ;;  %v3423_v41 = vxor.u32 2147483648, %v8805_v34 }
 0x329   : > { %v3490_v56 = vadd.s32 %v3489_v16, %v3485_v30  ;;  %v3571_v39 = vsel %vm3569_vm1, %v3559_v9, 2102212464  ;;  %v3574_v24 = vsel %vm3566_vm4, %v3553_v21, %v3556_v11  ;;  %v3427_v36 = vsel %vm3425_vm13, %v3426_v38, %v8805_v34 }
 0x32a   : > { %vm3567_vm14 = vcmp.lt.s32.totalorder %v15083_v42, 2  ;;  %v3576_v37 = vsel %vm3568_vm11, %v3559_v9, %v15086_v32  ;;  %v3578_v13 = vsel %vm3566_vm4, %v3556_v11, %v3559_v9  ;;  %v3424_v51 = vsel %vm3422_vm5, %v8803_v53, %v3423_v41 }
 0x32b   : > { %v3491_v63 = vadd.s32 536870912, %v3490_v56  ;;  %v3570_v33 = vsel %vm3566_vm4, %v3550_v60, %v3553_v21  ;;  %v3572_v30 = vsel %vm3568_vm11, %v3556_v11, %v3571_v39  ;;  %v3428_v16 = vsel %vm3421_vm0, %v3424_v51, %v3427_v36 }
 0x32c   : > { %v3577_v34 = vsel %vm3567_vm14, %v3574_v24, %v3576_v37  ;;  %v3581_v38 = vsel %vm3567_vm14, %v3578_v13, %v3580_v1  ;;  %v3582_v29 = vshll.u32 %v3542_v2, 8  ;;  %v3325_v9 = vsel %vm3314_vm6, nan, %v3324_v0 }
 0x32d   : > { %v3429_v53 = vsel %vm3418_vm7, nan, %v3428_v16  ;;  %vm4377_vm1 = vcmp.gt.s32.totalorder %v12413_v20, 0  ;;  %v3492_v60 = vshrl.u32 %v3491_v63, 30  ;;  %v3573_v47 = vsel %vm3567_vm14, %v3570_v33, %v3572_v30 }
 0x32e   : > { %v12518_v21 = vpack.c.bf16 %v3429_v53, %v3325_v9  ;;  %v12522_v11 = vmul.u32.u64.low %v3582_v29, %v3581_v38  ;;  %v12523_v41 = vmul.u32.u64.high %v3582_v29, %v3581_v38, %v12522_v11  ;;  %v14701_v0 = vand.u32 2147483647, %v15088_v17 }
 0x32f   : > { %v3493_v39 = vshll.u32 %v3492_v60, 30  ;;  %v12525_v1 = vmul.u32.u64.low %v3582_v29, %v3577_v34  ;;  %v12526_v2 = vmul.u32.u64.high %v3582_v29, %v3577_v34, %v12525_v1  ;;  %v12531_v24 = vsub.s32 32, %v15089_v48 }
 0x330   : > { %15087 = vst [vmem:[#allocation16_spill] sm:$0xff] %v12518_v21  ;;  %v12536_v36 = vsel %vm4297_vm9, %v12393_v45, 920167782  ;;  %v15091_v42 = vor.u32 %v12368_v26, %v12381_v35  ;;  %8110 = vmatmul.mubr.bf16.gmra.mrb[16].mxu0 %v12518_v21  ;;  %vm3432_vm0 = vcmp.lt.s32.totalorder %v15076_v12, 0  ;;  %v4586_v37 = vsel %vm4585_vm8, %v12402_v58, 0  ;;  %v15093_v35 = vld [vmem:[#allocation9_spill] sm:$0xff] }
 0x331   : > { %15090 = vst [vmem:[#allocation43_spill] sm:$0xff] %v12536_v36  ;;  %v4378_v13 = vsel %vm4377_vm1, %v12413_v20, 0  ;;  %v4473_v51 = vand.u32 2139095040, %v12398_v59  ;;  %v12552_v63 = vsub.s32 %v3490_v56, %v3493_v39  ;;  %v3516_v33 = vsub.s32 4, %v3492_v60  ;;  %v15094_v20 = vld [vmem:[#allocation47_spill] sm:$0xff] }
 0x332   : > { %v12543_v32 = vsel %vm4297_vm9, %v15091_v42, 1326507024  ;;  %v3589_v26 = vmul.u32 %v3582_v29, %v3573_v47  ;;  %vm3591_vm5 = vc.u32 %v12523_v41, %v12525_v1  ;;  %v3656_v30 = vshrl.u32 %v14818_v15, %v15093_v35 }
 0x333   : > { %15092 = vst [vmem:[#allocation26_spill] sm:$0xff] %v12543_v32  ;;  %v3496_v16 = vsub.s32 0, %v12552_v63  ;;  %v3592_v34 = vadd.s32 1, %v12526_v2  ;;  %v3645_v58 = vand.u32 8388607, %v14701_v0  ;;  %v3655_v38 = vshll.u32 %v14761_v7, %v15094_v20 }
 0x334   : > { %v15095_v56 = vand.u32 2147483647, %v15076_v12  ;;  %v3658_v9 = vshll.u32 %v14818_v15, %v15094_v20  ;;  %v3659_v53 = vshrl.u32 %v14756_v46, %v15093_v35  ;;  %v3661_v47 = vshll.u32 %v14756_v46, %v15094_v20 }
 0x335   : > { %v3662_v11 = vshrl.u32 %v14781_v4, %v15093_v35  ;;  %v12578_v39 = vshrl.u32 %v4586_v37, 5  ;;  %v4474_v42 = vshrl.u32 %v4473_v51, 23  ;;  %v3593_v0 = vsel %vm3591_vm5, %v3592_v34, %v12526_v2 }
 0x336   : > { %vm12566_vm13 = vcmp.le.f32.partialorder %v15095_v56, 0.7853982  ;;  %v7674_v56 = vmin.u32 %v3496_v16, %v12552_v63  ;;  %v3594_v14 = vadd.s32 %v3593_v0, %v3589_v26  ;;  %v3657_v21 = vor.u32 %v3656_v30, %v3655_v38  ;;  %v15103_v26 = vld [vmem:[#allocation20_spill] sm:$0xff] }
 0x337   : > { %15098 = vst [vmem:[#allocation40_spill] sm:$0xff] %v12578_v39  ;;  %v3660_v59 = vor.u32 %v3659_v53, %v3658_v9  ;;  %v3663_v36 = vor.u32 %v3662_v11, %v3661_v47  ;;  %v12582_v45 = vand.u32 31, %v4586_v37  ;;  %v12584_v32 = vshrl.u32 %v4378_v13, 5 }
 0x338   : > { %v12586_v50 = vand.u32 31, %v4378_v13  ;;  %v3498_v20 = vclz %v7674_v56  ;;  %v3517_v18 = vsel %vm3432_vm0, %v3516_v33, %v3492_v60  ;;  %v3595_v39 = vadd.s32 536870912, %v3594_v14  ;;  %v15101_v13 = vld [vmem:[#allocation10_spill] sm:$0xff]  ;;  %v15102_v33 = vld [vmem:[#allocation25_spill] sm:$0xff] }
 0x339   : > { %15099 = vst [vmem:[#allocation39_spill] sm:$0xff] %v12582_v45  ;;  %v3646_v51 = vor.u32 8388608, %v3645_v58  ;;  %vm3670_vm6 = vcmp.lt.s32.totalorder %v15100_v6, 1  ;;  %vm3671_vm7 = vcmp.lt.s32.totalorder %v15100_v6, 2  ;;  %vm3672_vm8 = vcmp.lt.s32.totalorder %v15100_v6, 3 }
 0x33a   : > { %v7675_v16 = vadd.s32 4294967294, %v3498_v20  ;;  %v3682_v2 = vsel %vm3670_vm6, %v3660_v59, %v3663_v36  ;;  %v3596_v0 = vshrl.u32 %v3595_v39, 30  ;;  %v3678_v37 = vsel %vm3670_vm6, %v3657_v21, %v3660_v59 }
 0x33b   : > { %v3680_v60 = vsel %vm3672_vm8, %v3663_v36, %v15101_v13  ;;  %v3684_v30 = vsel %vm3672_vm8, %v15103_v26, %v15102_v33  ;;  %v3486_v34 = vadd.s32 %v12456_v22, %v12454_v8  ;;  %v3654_v58 = vshrl.u32 %v14761_v7, %v15093_v35 }
 0x33c   : > { %vm7676_vm3 = vcmp.lt.s32.totalorder %v7675_v16, 0  ;;  %v3685_v38 = vsel %vm3671_vm7, %v3682_v2, %v3684_v30  ;;  %v3597_v53 = vshll.u32 %v3596_v0, 30  ;;  %v3675_v47 = vsel %vm3673_vm2, %v3663_v36, 2102212464 }
 0x33d   : > { %v3501_v9 = vsel %vm7676_vm3, 0, %v7675_v16  ;;  %v3686_v11 = vshll.u32 %v3646_v51, 8  ;;  %v3519_v20 = vsel %vm12566_vm13, 0, %v3517_v18  ;;  %v3681_v8 = vsel %vm3671_vm7, %v3678_v37, %v3680_v60 }
 0x33e   : > { %v3502_v39 = vsub.s32 32, %v3501_v9  ;;  %v3506_v56 = vsub.s32 4294967266, %v3501_v9  ;;  %v12616_v22 = vsub.s32 %v3594_v14, %v3597_v53  ;;  %v3674_v35 = vsel %vm3670_vm6, %v3654_v58, %v3657_v21 }
 0x33f   : > { %v12620_v2 = vmul.u32.u64.low %v3686_v11, %v3685_v38  ;;  %v12621_v16 = vmul.u32.u64.high %v3686_v11, %v3685_v38, %v12620_v2  ;;  %v3503_v13 = vshll.u32 %v12552_v63, %v3501_v9  ;;  %v3676_v33 = vsel %vm3672_vm8, %v3660_v59, %v3675_v47 }
 0x340   : > { %v3504_v36 = vshrl.u32 %v3486_v34, %v3502_v39  ;;  %v3507_v51 = vadd.s32 127, %v3506_v56  ;;  %v3600_v18 = vsub.s32 0, %v12616_v22  ;;  %v3620_v26 = vsub.s32 4, %v3596_v0  ;;  %v15105_v56 = vld [vmem:[#allocation54_spill] sm:$0xff] }
 0x341   : > { %v12627_v30 = vmul.u32.u64.low %v3686_v11, %v3681_v8  ;;  %v12628_v37 = vmul.u32.u64.high %v3686_v11, %v3681_v8, %v12627_v30  ;;  %v12632_v14 = vsub.s32 32, %v12582_v45  ;;  %v7713_v21 = vadd.s32 4294967169, %v4474_v42 }
 0x342   : > { %v3505_v60 = vor.u32 %v3504_v36, %v3503_v13  ;;  %v3508_v58 = vshll.u32 %v3507_v51, 23  ;;  %v12636_v63 = vshll.u32 %v14781_v4, %v12582_v45  ;;  %v12640_v59 = vshll.u32 %v14759_v55, %v12582_v45 }
 0x343   : > { %v12643_v34 = vsub.s32 32, %v12586_v50  ;;  %v7678_v38 = vmin.u32 %v3600_v18, %v12616_v22  ;;  %v3523_v53 = vadd.s32 3, %v3519_v20  ;;  %vm3536_vm2 = vcmp.lt.s32.totalorder %v15081_v44, 0 }
 0x344   : > { %15104 = vst [vmem:[#allocation46_spill] sm:$0xff] %v12636_v63  ;;  %v3509_v9 = vor.u32 4788187, %v3508_v58  ;;  %v3677_v42 = vsel %vm3671_vm7, %v3674_v35, %v3676_v33  ;;  %v3621_v39 = vsel %vm3536_vm2, %v3620_v26, %v3596_v0  ;;  %vm3695_vm11 = vc.u32 %v12621_v16, %v12627_v30 }
 0x345   : > { %v3602_v47 = vclz %v7678_v38  ;;  %v14714_v8 = vand.u32 2147483647, %v15105_v56  ;;  %v12654_v2 = vadd.s32 1, %v7713_v21  ;;  %v3512_v36 = vcvt.s32.f32 %v3505_v60 }
 0x346   : > { %v3510_v13 = vand.u32 2147483647, %v3509_v9  ;;  %v3696_v20 = vadd.s32 1, %v12628_v37  ;;  %v15106_v51 = vand.u32 2147483647, %v15081_v44  ;;  %v3590_v0 = vadd.s32 %v12525_v1, %v12523_v41  ;;  %v15109_v9 = vld [vmem:[#allocation58_spill] sm:$0xff] }
 0x347   : > { %v7679_v35 = vadd.s32 4294967294, %v3602_v47  ;;  %v3693_v33 = vmul.u32 %v3686_v11, %v3677_v42  ;;  %v12665_v26 = vand.u32 3, %v3523_v53  ;;  %v12672_v38 = vand.u32 8388607, %v14714_v8  ;;  %v15110_v11 = vld [vmem:[#allocation38_spill] sm:$0xff] }
 0x348   : > { %vm12659_vm4 = vcmp.le.f32.partialorder %v15106_v51, 0.7853982  ;;  %v3513_v18 = vmul.f32 %v3512_v36, %v3510_v13  ;;  %v3697_v60 = vsel %vm3695_vm11, %v3696_v20, %v12628_v37  ;;  %v3760_v51 = vshrl.u32 %v14818_v15, %v15109_v9 }
 0x349   : > { %v3623_v21 = vsel %vm12659_vm4, 0, %v3621_v39  ;;  %vm7680_vm14 = vcmp.lt.s32.totalorder %v7679_v35, 0  ;;  %v3698_v58 = vadd.s32 %v3697_v60, %v3693_v33  ;;  %v3762_v53 = vshll.u32 %v14818_v15, %v15110_v11 }
 0x34a   : > { %v3514_v41 = vxor.u32 2147483648, %v3513_v18  ;;  %v3605_v1 = vsel %vm7680_vm14, 0, %v7679_v35  ;;  %v3763_v42 = vshrl.u32 %v14756_v46, %v15109_v9  ;;  %v3766_v13 = vshrl.u32 %v14781_v4, %v15109_v9 }
 0x34b   : > { %v3606_v47 = vsub.s32 32, %v3605_v1  ;;  %v3610_v39 = vsub.s32 4294967266, %v3605_v1  ;;  %v3699_v37 = vadd.s32 536870912, %v3698_v58  ;;  %v3607_v20 = vshll.u32 %v12616_v22, %v3605_v1 }
 0x34c   : > { %v3515_v36 = vsel %vm3432_vm0, %v3514_v41, %v3513_v18  ;;  %v3769_v35 = vshrl.u32 %v14759_v55, %v15109_v9  ;;  %v3772_v33 = vshrl.u32 %v14782_v3, %v15109_v9  ;;  %v3765_v18 = vshll.u32 %v14756_v46, %v15110_v11 }
 0x34d   : > { %v3518_v60 = vsel %vm12566_vm13, %v15076_v12, %v3515_v36  ;;  %v3608_v8 = vshrl.u32 %v3590_v0, %v3606_v47  ;;  %v3611_v45 = vadd.s32 127, %v3610_v39  ;;  %v12692_v63 = vshrl.u32 %v3699_v37, 30 }
 0x34e   : > { %8806 = vcosq.f32 %v3518_v60  ;;  %v3768_v22 = vshll.u32 %v14781_v4, %v15110_v11  ;;  %v3771_v41 = vshll.u32 %v14759_v55, %v15110_v11  ;;  %v3759_v0 = vshll.u32 %v14761_v7, %v15110_v11 }
 0x34f   : > { %8808 = vsinq.f32 %v3518_v60  ;;  %v3609_v1 = vor.u32 %v3608_v8, %v3607_v20  ;;  %v3612_v57 = vshll.u32 %v3611_v45, 23  ;;  %v3701_v29 = vshll.u32 %v12692_v63, 30  ;;  %v15111_v45 = vld [vmem:[#allocation48_spill] sm:$0xff] }
 0x350   : > { %v3764_v47 = vor.u32 %v3763_v42, %v3762_v53  ;;  %v3767_v39 = vor.u32 %v3766_v13, %v3765_v18  ;;  %v3773_v37 = vor.u32 %v3772_v33, %v3771_v41  ;;  %v3627_v62 = vadd.s32 3, %v3623_v21 }
 0x351   : > { %v3613_v36 = vor.u32 4788187, %v3612_v57  ;;  %v12703_v25 = vsub.s32 %v3698_v58, %v3701_v29  ;;  %v3770_v40 = vor.u32 %v3769_v35, %v3768_v22  ;;  %v3750_v5 = vor.u32 8388608, %v12672_v38 }
 0x352   : > { %v3758_v60 = vshrl.u32 %v14761_v7, %v15109_v9  ;;  %v3761_v8 = vor.u32 %v3760_v51, %v3759_v0  ;;  %vm3774_vm1 = vcmp.lt.s32.totalorder %v15111_v45, 1  ;;  %v3616_v61 = vcvt.s32.f32 %v3609_v1 }
 0x353   : > { %v3614_v20 = vand.u32 2147483647, %v3613_v36  ;;  %vm3640_vm0 = vcmp.lt.s32.totalorder %v15088_v17, 0  ;;  %v3704_v11 = vsub.s32 0, %v12703_v25  ;;  %vm3777_vm5 = vcmp.lt.s32.totalorder %v15111_v45, 4 }
 0x354   : > { %vm3526_vm13 = vcmp.eq.s32.totalorder %v12665_v26, 0  ;;  %vm3776_vm6 = vcmp.lt.s32.totalorder %v15111_v45, 3  ;;  %v3779_v57 = vsel %vm3777_vm5, %v3767_v39, 2102212464  ;;  %v3786_v21 = vsel %vm3774_vm1, %v3764_v47, %v3767_v39 }
 0x355   : > { %v3787_v58 = vsel %vm3777_vm5, %v3773_v37, 1326507024  ;;  %v3617_v38 = vmul.f32 %v3616_v61, %v3614_v20  ;;  %v7682_v9 = vmin.u32 %v3704_v11, %v12703_v25  ;;  %v3783_v51 = vsel %vm3777_vm5, %v3770_v40, 920167782 }
 0x356   : > { %v3788_v53 = vsel %vm3776_vm6, %v3770_v40, %v3787_v58  ;;  %vm3529_vm7 = vcmp.eq.s32.totalorder %v12665_v26, 2  ;;  %v12720_v42 = vand.u32 3, %v3627_v62  ;;  %v3724_v13 = vsub.s32 4, %v12692_v63 }
 0x357   : > { %vm3775_vm8 = vcmp.lt.s32.totalorder %v15111_v45, 2  ;;  %vm3525_vm3 = vcmp.lt.s32.totalorder %v12665_v26, 2  ;;  %v3618_v35 = vxor.u32 2147483648, %v3617_v38  ;;  %v3706_v33 = vclz %v7682_v9 }
 0x358   : > { %v3778_v61 = vsel %vm3774_vm1, %v3758_v60, %v3761_v8  ;;  %v3789_v18 = vsel %vm3775_vm8, %v3786_v21, %v3788_v53  ;;  %v8807_v22 = vpop.eup %8806  ;;  %v3780_v40 = vsel %vm3776_vm6, %v3764_v47, %v3779_v57  ;;  %v3782_v62 = vsel %vm3774_vm1, %v3761_v8, %v3764_v47  ;;  %v15112_v60 = vld [vmem:[#allocation22_spill] sm:$0xff] }
 0x359   : > { %v3784_v41 = vsel %vm3776_vm6, %v3767_v39, %v3783_v51  ;;  %v3790_v1 = vshll.u32 %v3750_v5, 8  ;;  %v8809_v29 = vpop.eup %8808  ;;  %v3530_v0 = vxor.u32 2147483648, %v8807_v22  ;;  %v3619_v37 = vsel %vm3536_vm2, %v3618_v35, %v3617_v38 }
 0x35a   : > { %v7683_v36 = vadd.s32 4294967294, %v3706_v33  ;;  %v14725_v20 = vand.u32 2147483647, %v15112_v60  ;;  %vm3522_vm11 = vweird.f32 %v15076_v12  ;;  %v3527_v11 = vxor.u32 2147483648, %v8809_v29  ;;  %v15113_v33 = vld [vmem:[#allocation28_spill] sm:$0xff] }
 0x35b   : > { %v3622_v57 = vsel %vm12659_vm4, %v15081_v44, %v3619_v37  ;;  %v12742_v47 = vmul.u32.u64.low %v3790_v1, %v3789_v18  ;;  %v12743_v8 = vmul.u32.u64.high %v3790_v1, %v3789_v18, %v12742_v47  ;;  %v3694_v5 = vadd.s32 %v12627_v30, %v12621_v16  ;;  %v15114_v18 = vld [vmem:[#allocation45_spill] sm:$0xff] }
 0x35c   : > { %8810 = vcosq.f32 %v3622_v57  ;;  %vm7684_vm14 = vcmp.lt.s32.totalorder %v7683_v36, 0  ;;  %v3785_v39 = vsel %vm3775_vm8, %v3782_v62, %v3784_v41  ;;  %v12752_v58 = vsel %vm3640_vm0, %v3724_v13, %v12692_v63 }
 0x35d   : > { %8812 = vsinq.f32 %v3622_v57  ;;  %v3709_v21 = vsel %vm7684_vm14, 0, %v7683_v36  ;;  %v3781_v6 = vsel %vm3775_vm8, %v3778_v61, %v3780_v40  ;;  %v3528_v38 = vsel %vm3526_vm13, %v8807_v22, %v3527_v11 }
 0x35e   : > { %v3531_v16 = vsel %vm3529_vm7, %v3530_v0, %v8809_v29  ;;  %v3710_v30 = vsub.s32 32, %v3709_v21  ;;  %v3714_v9 = vsub.s32 4294967266, %v3709_v21  ;;  %v3711_v51 = vshll.u32 %v12703_v25, %v3709_v21 }
 0x35f   : > { %v12761_v53 = vmul.u32.u64.low %v3790_v1, %v3785_v39  ;;  %v12762_v35 = vmul.u32.u64.high %v3790_v1, %v3785_v39, %v12761_v53  ;;  %v3853_v63 = vand.u32 8388607, %v14725_v20  ;;  %vm3633_vm2 = vcmp.eq.s32.totalorder %v12720_v42, 2  ;;  %v15123_v20 = vld [vmem:[#allocation37_spill] sm:$0xff] }
 0x360   : > { %v3712_v45 = vshrl.u32 %v3694_v5, %v3710_v30  ;;  %v3715_v13 = vadd.s32 127, %v3714_v9  ;;  %v3863_v61 = vshll.u32 %v14761_v7, %v15113_v33  ;;  %v3864_v22 = vshrl.u32 %v14818_v15, %v15114_v18 }
 0x361   : > { %v3532_v25 = vsel %vm3525_vm3, %v3528_v38, %v3531_v16  ;;  %vm3630_vm4 = vcmp.eq.s32.totalorder %v12720_v42, 0  ;;  %v3797_v40 = vmul.u32 %v3790_v1, %v3781_v6  ;;  %v3866_v62 = vshll.u32 %v14818_v15, %v15113_v33 }
 0x362   : > { %v3867_v41 = vshrl.u32 %v14756_v46, %v15114_v18  ;;  %vm3629_vm1 = vcmp.lt.s32.totalorder %v12720_v42, 2  ;;  %v3713_v29 = vor.u32 %v3712_v45, %v3711_v51  ;;  %v3716_v0 = vshll.u32 %v3715_v13, 23 }
 0x363   : > { %vm3799_vm5 = vc.u32 %v12743_v8, %v12761_v53  ;;  %v3865_v37 = vor.u32 %v3864_v22, %v3863_v61  ;;  %vm3626_vm13 = vweird.f32 %v15081_v44  ;;  %v3800_v26 = vadd.s32 1, %v12762_v35 }
 0x364   : > { %v3868_v36 = vor.u32 %v3867_v41, %v3866_v62  ;;  %v3869_v1 = vshll.u32 %v14756_v46, %v15113_v33  ;;  %v3870_v11 = vshrl.u32 %v14781_v4, %v15114_v18  ;;  %v3533_v57 = vsel %vm3522_vm11, nan, %v3532_v25 }
 0x365   : > { %v3717_v47 = vor.u32 4788187, %v3716_v0  ;;  %v3854_v5 = vor.u32 8388608, %v3853_v63  ;;  %v3862_v39 = vshrl.u32 %v14761_v7, %v15114_v18  ;;  %v15115_v21 = vand.u32 2147483647, %v15088_v17 }
 0x366   : > { %v3801_v38 = vsel %vm3799_vm5, %v3800_v26, %v12762_v35  ;;  %v3871_v16 = vor.u32 %v3870_v11, %v3869_v1  ;;  %vm3878_vm7 = vcmp.lt.s32.totalorder %v12019_v43, 1  ;;  %vm3880_vm8 = vcmp.lt.s32.totalorder %v12019_v43, 3  ;;  %v8811_v12 = vpop.eup %8810 }
 0x367   : > { %vm12794_vm6 = vcmp.le.f32.partialorder %v15115_v21, 0.7853982  ;;  %v3718_v30 = vand.u32 2147483647, %v3717_v47  ;;  %v3720_v9 = vcvt.s32.f32 %v3713_v29  ;;  %v3802_v51 = vadd.s32 %v3801_v38, %v3797_v40  ;;  %v8813_v45 = vpop.eup %8812 }
 0x368   : > { %v3892_v63 = vsel %vm3880_vm8, %v12057_v28, %v12288_v23  ;;  %v3634_v13 = vxor.u32 2147483648, %v8811_v12  ;;  %v3886_v33 = vsel %vm3878_vm7, %v3865_v37, %v3868_v36  ;;  %v3888_v35 = vsel %vm3880_vm8, %v3871_v16, %v12278_v52 }
 0x369   : > { %v3890_v61 = vsel %vm3878_vm7, %v3868_v36, %v3871_v16  ;;  %v3631_v18 = vxor.u32 2147483648, %v8813_v45  ;;  %v3721_v22 = vmul.f32 %v3720_v9, %v3718_v30  ;;  %v3803_v25 = vadd.s32 536870912, %v3802_v51 }
 0x36a   : > { %vm3879_vm3 = vcmp.lt.s32.totalorder %v12019_v43, 2  ;;  %v3635_v28 = vsel %vm3633_vm2, %v3634_v13, %v8813_v45  ;;  %v3883_v23 = vsel %vm3881_vm12, %v3871_v16, 2102212464  ;;  %v3894_v62 = vshll.u32 %v3854_v5, 8 }
 0x36b   : > { %v3893_v40 = vsel %vm3879_vm3, %v3890_v61, %v3892_v63  ;;  %v3632_v52 = vsel %vm3630_vm4, %v8811_v12, %v3631_v18  ;;  %v3722_v41 = vxor.u32 2147483648, %v3721_v22  ;;  %v3804_v29 = vshrl.u32 %v3803_v25, 30 }
 0x36c   : > { %v3889_v0 = vsel %vm3879_vm3, %v3886_v33, %v3888_v35  ;;  %v3636_v26 = vsel %vm3629_vm1, %v3632_v52, %v3635_v28  ;;  %v3882_v1 = vsel %vm3878_vm7, %v3862_v39, %v3865_v37  ;;  %v3884_v42 = vsel %vm3880_vm8, %v3868_v36, %v3883_v23 }
 0x36d   : > { %v12827_v11 = vmul.u32.u64.low %v3894_v62, %v3893_v40  ;;  %v12828_v47 = vmul.u32.u64.high %v3894_v62, %v3893_v40, %v12827_v11  ;;  %v3637_v5 = vsel %vm3626_vm13, nan, %v3636_v26  ;;  %v3723_v21 = vsel %vm3640_vm0, %v3722_v41, %v3721_v22 }
 0x36e   : > { %v3805_v38 = vshll.u32 %v3804_v29, 30  ;;  %v3828_v16 = vsub.s32 4, %v3804_v29  ;;  %v12834_v12 = vpack.c.bf16 %v3637_v5, %v3533_v57  ;;  %v12844_v37 = vshrl.u32 %v14759_v55, %v12632_v14 }
 0x36f   : > { %v12838_v30 = vmul.u32.u64.low %v3894_v62, %v3889_v0  ;;  %v12839_v9 = vmul.u32.u64.high %v3894_v62, %v3889_v0, %v12838_v30  ;;  %v4393_v44 = vshrl.u32 %v14759_v55, %v12643_v34  ;;  %v3727_v39 = vsel %vm12794_vm6, 0, %v12752_v58 }
 0x370   : > { %15118 = vst [vmem:[#allocation49_spill] sm:$0xff] %v12834_v12  ;;  %v12851_v57 = vsub.s32 %v3802_v51, %v3805_v38  ;;  %v12855_v36 = vshrl.u32 %v14782_v3, %v12643_v34  ;;  %vm4481_vm12 = vcmp.gt.s32.totalorder %v12654_v2, 0  ;;  %8113 = vmatprep.mubr.bf16.mxu0 %v12834_v12  ;;  %v3726_v63 = vsel %vm12794_vm6, %v15088_v17, %v3723_v21 }
 0x371   : > { %vm3744_vm0 = vcmp.lt.s32.totalorder %v15105_v56, 0  ;;  %v3885_v51 = vsel %vm3879_vm3, %v3882_v1, %v3884_v42  ;;  %vm3903_vm11 = vc.u32 %v12828_v47, %v12838_v30  ;;  %v4392_v13 = vshll.u32 %v14781_v4, %v12586_v50 }
 0x372   : > { %v3808_v45 = vsub.s32 0, %v12851_v57  ;;  %v3829_v58 = vsel %vm3744_vm0, %v3828_v16, %v3804_v29  ;;  %v12874_v6 = vshll.u32 %v14759_v55, %v12586_v50  ;;  %v3731_v33 = vadd.s32 3, %v3727_v39  ;;  %v15122_v29 = vld [vmem:[#allocation44_spill] sm:$0xff] }
 0x373   : > { %v3904_v35 = vadd.s32 1, %v12839_v9  ;;  %v12878_v61 = vsel %vm4481_vm12, %v12654_v2, 0  ;;  %8814 = vcosq.f32 %v3726_v63  ;;  %v15119_v43 = vand.u32 2147483647, %v15105_v56 }
 0x374   : > { %v7686_v22 = vmin.u32 %v3808_v45, %v12851_v57  ;;  %v12889_v25 = vshrl.u32 %v14782_v3, %v12632_v14  ;;  %v3901_v23 = vmul.u32 %v3894_v62, %v3885_v51  ;;  %v12894_v40 = vor.u32 %v4393_v44, %v4392_v13 }
 0x375   : > { %vm12882_vm14 = vcmp.le.f32.partialorder %v15119_v43, 0.7853982  ;;  %v3905_v2 = vsel %vm3903_vm11, %v3904_v35, %v12839_v9  ;;  %v14724_v0 = vand.u32 2147483647, %v15122_v29  ;;  %v12900_v26 = vand.u32 31, %v12878_v61 }
 0x376   : > { %v3831_v28 = vsel %vm12882_vm14, 0, %v3829_v58  ;;  %v3810_v41 = vclz %v7686_v22  ;;  %v12902_v1 = vand.u32 3, %v3731_v33  ;;  %v3906_v11 = vadd.s32 %v3905_v2, %v3901_v23 }
 0x377   : > { %v3968_v5 = vshrl.u32 %v14818_v15, %v12531_v24  ;;  %8816 = vsinq.f32 %v3726_v63  ;;  %v3798_v62 = vadd.s32 %v12761_v53, %v12743_v8  ;;  %v12908_v38 = vadd.s32 3, %v3831_v28 }
 0x378   : > { %v7687_v21 = vadd.s32 4294967294, %v3810_v41  ;;  %v3907_v16 = vadd.s32 536870912, %v3906_v11  ;;  %v3967_v42 = vshll.u32 %v14761_v7, %v15089_v48  ;;  %v3971_v9 = vshrl.u32 %v14756_v46, %v12531_v24 }
 0x379   : > { %v3974_v44 = vshrl.u32 %v14781_v4, %v12531_v24  ;;  %v3957_v39 = vand.u32 8388607, %v14724_v0  ;;  %v3970_v8 = vshll.u32 %v14818_v15, %v15089_v48  ;;  %v3977_v53 = vshrl.u32 %v14759_v55, %v12531_v24 }
 0x37a   : > { %vm7688_vm2 = vcmp.lt.s32.totalorder %v7687_v21, 0  ;;  %v12922_v45 = vshrl.u32 %v3907_v16, 30  ;;  %v3969_v58 = vor.u32 %v3968_v5, %v3967_v42  ;;  %v3973_v51 = vshll.u32 %v14756_v46, %v15089_v48 }
 0x37b   : > { %v3813_v63 = vsel %vm7688_vm2, 0, %v7687_v21  ;;  %v3976_v35 = vshll.u32 %v14781_v4, %v15089_v48  ;;  %v3980_v43 = vshrl.u32 %v14782_v3, %v12531_v24  ;;  %v3972_v28 = vor.u32 %v3971_v9, %v3970_v8 }
 0x37c   : > { %v3814_v13 = vsub.s32 32, %v3813_v63  ;;  %v3818_v33 = vsub.s32 4294967266, %v3813_v63  ;;  %v3909_v22 = vshll.u32 %v12922_v45, 30  ;;  %v3975_v23 = vor.u32 %v3974_v44, %v3973_v51 }
 0x37d   : > { %v3979_v2 = vshll.u32 %v14759_v55, %v15089_v48  ;;  %v8815_v41 = vpop.eup %8814  ;;  %v3815_v5 = vshll.u32 %v12851_v57, %v3813_v63  ;;  %v3978_v42 = vor.u32 %v3977_v53, %v3976_v35  ;;  %v3958_v52 = vor.u32 8388608, %v3957_v39 }
 0x37e   : > { %v3816_v21 = vshrl.u32 %v3798_v62, %v3814_v13  ;;  %v3819_v16 = vadd.s32 127, %v3818_v33  ;;  %v12934_v0 = vsub.s32 %v3906_v11, %v3909_v22  ;;  %vm3982_vm4 = vcmp.lt.s32.totalorder %v15123_v20, 1 }
 0x37f   : > { %vm3983_vm1 = vcmp.lt.s32.totalorder %v15123_v20, 2  ;;  %vm3734_vm5 = vcmp.eq.s32.totalorder %v12902_v1, 0  ;;  %vm3737_vm13 = vcmp.eq.s32.totalorder %v12902_v1, 2  ;;  %v3981_v48 = vor.u32 %v3980_v43, %v3979_v2 }
 0x380   : > { %v3817_v9 = vor.u32 %v3816_v21, %v3815_v5  ;;  %v3820_v44 = vshll.u32 %v3819_v16, 23  ;;  %vm3984_vm6 = vcmp.lt.s32.totalorder %v15123_v20, 3  ;;  %v3738_v57 = vxor.u32 2147483648, %v8815_v41 }
 0x381   : > { %v3912_v62 = vsub.s32 0, %v12934_v0  ;;  %vm3985_vm7 = vcmp.lt.s32.totalorder %v15123_v20, 4  ;;  %v3990_v11 = vsel %vm3982_vm4, %v3969_v58, %v3972_v28  ;;  %v8817_v39 = vpop.eup %8816  ;;  %vm3848_vm8 = vcmp.lt.s32.totalorder %v15112_v60, 0 }
 0x382   : > { %v3821_v8 = vor.u32 4788187, %v3820_v44  ;;  %v3966_v53 = vshrl.u32 %v14761_v7, %v12531_v24  ;;  %v3987_v63 = vsel %vm3985_vm7, %v3975_v23, 2102212464  ;;  %v3991_v51 = vsel %vm3985_vm7, %v3978_v42, 920167782 }
 0x383   : > { %v3824_v13 = vcvt.s32.f32 %v3817_v9  ;;  %v7690_v33 = vmin.u32 %v3912_v62, %v12934_v0  ;;  %v3992_v35 = vsel %vm3984_vm6, %v3975_v23, %v3991_v51  ;;  %v3994_v43 = vsel %vm3982_vm4, %v3972_v28, %v3975_v23 }
 0x384   : > { %v3822_v22 = vand.u32 2147483647, %v3821_v8  ;;  %v3993_v2 = vsel %vm3983_vm1, %v3990_v11, %v3992_v35  ;;  %v3995_v5 = vsel %vm3985_vm7, %v3981_v48, 1326507024  ;;  %v3998_v21 = vshll.u32 %v3958_v52, 8  ;;  %v15124_v35 = vld [vmem:[#allocation13_spill] sm:$0xff] }
 0x385   : > { %v3735_v16 = vxor.u32 2147483648, %v8817_v39  ;;  %v3914_v44 = vclz %v7690_v33  ;;  %v3986_v24 = vsel %vm3982_vm4, %v3966_v53, %v3969_v58  ;;  %v3988_v9 = vsel %vm3984_vm6, %v3972_v28, %v3987_v63 }
 0x386   : > { %v3825_v62 = vmul.f32 %v3824_v13, %v3822_v22  ;;  %v3996_v51 = vsel %vm3984_vm6, %v3978_v42, %v3995_v5  ;;  %v12961_v12 = vmul.u32.u64.low %v3998_v21, %v3993_v2  ;;  %v12962_v23 = vmul.u32.u64.high %v3998_v21, %v3993_v2, %v12961_v12 }
 0x387   : > { %v3902_v48 = vadd.s32 %v12838_v30, %v12828_v47  ;;  %v7691_v52 = vadd.s32 4294967294, %v3914_v44  ;;  %v3932_v11 = vsub.s32 4, %v12922_v45  ;;  %v3997_v58 = vsel %vm3983_vm1, %v3994_v43, %v3996_v51 }
 0x388   : > { %vm3733_vm3 = vcmp.lt.s32.totalorder %v12902_v1, 2  ;;  %v3826_v28 = vxor.u32 2147483648, %v3825_v62  ;;  %v12972_v8 = vand.u32 3, %v12908_v38  ;;  %v3736_v63 = vsel %vm3734_vm5, %v8815_v41, %v3735_v16 }
 0x389   : > { %v12974_v42 = vmul.u32.u64.low %v3998_v21, %v3997_v58  ;;  %v12975_v53 = vmul.u32.u64.high %v3998_v21, %v3997_v58, %v12974_v42  ;;  %v3739_v47 = vsel %vm3737_vm13, %v3738_v57, %v8817_v39  ;;  %vm7692_vm12 = vcmp.lt.s32.totalorder %v7691_v52, 0 }
 0x38a   : > { %v3989_v30 = vsel %vm3983_vm1, %v3986_v24, %v3988_v9  ;;  %v3827_v13 = vsel %vm3744_vm0, %v3826_v28, %v3825_v62  ;;  %v3917_v33 = vsel %vm7692_vm12, 0, %v7691_v52  ;;  %v4008_v38 = vadd.s32 1, %v12962_v23 }
 0x38b   : > { %v4054_v43 = vand.u32 2147483647, %v15124_v35  ;;  %v3830_v22 = vsel %vm12882_vm14, %v15105_v56, %v3827_v13  ;;  %v3918_v41 = vsub.s32 32, %v3917_v33  ;;  %v3922_v2 = vsub.s32 4294967266, %v3917_v33 }
 0x38c   : > { %v3933_v57 = vsel %vm3848_vm8, %v3932_v11, %v12922_v45  ;;  %8818 = vcosq.f32 %v3830_v22  ;;  %v3919_v20 = vshll.u32 %v12934_v0, %v3917_v33  ;;  %v4005_v39 = vmul.u32 %v3998_v21, %v3989_v30 }
 0x38d   : > { %vm4007_vm0 = vc.u32 %v12975_v53, %v12961_v12  ;;  %vm3730_vm11 = vweird.f32 %v15088_v17  ;;  %8820 = vsinq.f32 %v3830_v22  ;;  %v3920_v5 = vshrl.u32 %v3902_v48, %v3918_v41 }
 0x38e   : > { %v3923_v16 = vadd.s32 127, %v3922_v2  ;;  %v4009_v18 = vsel %vm4007_vm0, %v4008_v38, %v12962_v23  ;;  %v4061_v24 = vand.u32 8388607, %v4054_v43  ;;  %v4071_v45 = vshll.u32 %v14761_v7, %v12061_v54 }
 0x38f   : > { %v4010_v44 = vadd.s32 %v4009_v18, %v4005_v39  ;;  %v4072_v0 = vshrl.u32 %v14818_v15, %v12084_v19  ;;  %v3921_v21 = vor.u32 %v3920_v5, %v3919_v20  ;;  %v4074_v62 = vshll.u32 %v14818_v15, %v12061_v54 }
 0x390   : > { %v3924_v9 = vshll.u32 %v3923_v16, 23  ;;  %v4075_v51 = vshrl.u32 %v14756_v46, %v12084_v19  ;;  %v15125_v23 = vand.u32 2147483647, %v15112_v60  ;;  %v4077_v11 = vshll.u32 %v14756_v46, %v12061_v54 }
 0x391   : > { %v4011_v52 = vadd.s32 536870912, %v4010_v44  ;;  %v4078_v58 = vshrl.u32 %v14781_v4, %v12084_v19  ;;  %v3740_v28 = vsel %vm3733_vm3, %v3736_v63, %v3739_v47  ;;  %vm3838_vm2 = vcmp.eq.s32.totalorder %v12972_v8, 0 }
 0x392   : > { %vm13010_vm14 = vcmp.le.f32.partialorder %v15125_v23, 0.7853982  ;;  %v3925_v42 = vor.u32 4788187, %v3924_v9  ;;  %v4073_v30 = vor.u32 %v4072_v0, %v4071_v45  ;;  %v4076_v13 = vor.u32 %v4075_v51, %v4074_v62 }
 0x393   : > { %vm3837_vm4 = vcmp.lt.s32.totalorder %v12972_v8, 2  ;;  %v3935_v33 = vsel %vm13010_vm14, 0, %v3933_v57  ;;  %v13024_v38 = vshrl.u32 %v4011_v52, 30  ;;  %v4079_v22 = vor.u32 %v4078_v58, %v4077_v11 }
 0x394   : > { %vm4088_vm1 = vcmp.lt.s32.totalorder %v12059_v31, 3  ;;  %vm4401_vm5 = vcmp.lt.s32.totalorder %v12584_v32, 4  ;;  %vm3834_vm13 = vweird.f32 %v15105_v56  ;;  %v3926_v54 = vand.u32 2147483647, %v3925_v42 }
 0x395   : > { %v3928_v1 = vcvt.s32.f32 %v3921_v21  ;;  %v4062_v63 = vor.u32 8388608, %v4061_v24  ;;  %v4100_v47 = vsel %vm4088_vm1, %v12240_v49, %v12305_v10  ;;  %vm3841_vm6 = vcmp.eq.s32.totalorder %v12972_v8, 2 }
 0x396   : > { %v4013_v41 = vshll.u32 %v13024_v38, 30  ;;  %vm4086_vm7 = vcmp.lt.s32.totalorder %v12059_v31, 1  ;;  %vm4087_vm3 = vcmp.lt.s32.totalorder %v12059_v31, 2  ;;  %v4096_v20 = vsel %vm4088_vm1, %v4079_v22, %v12294_v27  ;;  %v8819_v49 = vpop.eup %8818 }
 0x397   : > { %v3929_v2 = vmul.f32 %v3928_v1, %v3926_v54  ;;  %v4094_v57 = vsel %vm4086_vm7, %v4073_v30, %v4076_v13  ;;  %v4098_v39 = vsel %vm4086_vm7, %v4076_v13, %v4079_v22  ;;  %v3741_v10 = vsel %vm3730_vm11, nan, %v3740_v28  ;;  %v8821_v24 = vpop.eup %8820 }
 0x398   : > { %v3939_v5 = vadd.s32 3, %v3935_v33  ;;  %v13046_v16 = vsub.s32 %v4010_v44, %v4013_v41  ;;  %v4101_v18 = vsel %vm4087_vm3, %v4098_v39, %v4100_v47  ;;  %v3842_v45 = vxor.u32 2147483648, %v8819_v49  ;;  %v15130_v39 = vld [vmem:[#allocation7_spill] sm:$0xff] }
 0x399   : > { %v3930_v0 = vxor.u32 2147483648, %v3929_v2  ;;  %v4091_v21 = vsel %vm4089_vm10, %v4079_v22, 2102212464  ;;  %v4102_v27 = vshll.u32 %v4062_v63, 8  ;;  %v3839_v9 = vxor.u32 2147483648, %v8821_v24 }
 0x39a   : > { %v4016_v62 = vsub.s32 0, %v13046_v16  ;;  %v4070_v17 = vshrl.u32 %v14761_v7, %v12084_v19  ;;  %v4097_v44 = vsel %vm4087_vm3, %v4094_v57, %v4096_v20  ;;  %v3843_v51 = vsel %vm3841_vm6, %v3842_v45, %v8821_v24  ;;  %v15131_v24 = vld [vmem:[#allocation42_spill] sm:$0xff] }
 0x39b   : > { %v3931_v23 = vsel %vm3848_vm8, %v3930_v0, %v3929_v2  ;;  %v13061_v52 = vmul.u32.u64.low %v4102_v27, %v4101_v18  ;;  %v13062_v11 = vmul.u32.u64.high %v4102_v27, %v4101_v18, %v13061_v52  ;;  %v3840_v58 = vsel %vm3838_vm2, %v8819_v49, %v3839_v9 }
 0x39c   : > { %v7694_v28 = vmin.u32 %v4016_v62, %v13046_v16  ;;  %v4090_v19 = vsel %vm4086_vm7, %v4070_v17, %v4073_v30  ;;  %v4092_v42 = vsel %vm4088_vm1, %v4076_v13, %v4091_v21  ;;  %v3844_v33 = vsel %vm3837_vm4, %v3840_v58, %v3843_v51 }
 0x39d   : > { %v3934_v22 = vsel %vm13010_vm14, %v15112_v60, %v3931_v23  ;;  %v13076_v54 = vmul.u32.u64.low %v4102_v27, %v4097_v44  ;;  %v13077_v1 = vmul.u32.u64.high %v4102_v27, %v4097_v44, %v13076_v54  ;;  %v13085_v30 = vsel %vm4401_vm5, %v12894_v40, 920167782 }
 0x39e   : > { %v3845_v8 = vsel %vm3834_vm13, nan, %v3844_v33  ;;  %v4018_v13 = vclz %v7694_v28  ;;  %v15128_v48 = vor.u32 %v12855_v36, %v12874_v6  ;;  %v13097_v41 = vshrl.u32 %v12878_v61, 5 }
 0x39f   : > { %v13099_v2 = vpack.c.bf16 %v3845_v8, %v3741_v10  ;;  %v4093_v57 = vsel %vm4087_vm3, %v4090_v19, %v4092_v42  ;;  %v13104_v20 = vsub.s32 32, %v12900_v26  ;;  %8822 = vcosq.f32 %v3934_v22 }
 0x3a0   : > { %v13094_v47 = vsel %vm4401_vm5, %v15128_v48, 1326507024  ;;  %v7695_v56 = vadd.s32 4294967294, %v4018_v13  ;;  %vm4111_vm10 = vc.u32 %v13062_v11, %v13076_v54  ;;  %v13109_v36 = vand.u32 3, %v3939_v5 }
 0x3a1   : > { %15129 = vst [vmem:[#allocation21_spill] sm:$0xff] %v13099_v2  ;;  %8114 = vmatmul.mubr.bf16.gmra.mrb[20].mxu0 %v13099_v2  ;;  %vm3952_vm8 = vcmp.lt.s32.totalorder %v15122_v29, 0  ;;  %v4036_v6 = vsub.s32 4, %v13024_v38  ;;  %v4112_v61 = vadd.s32 1, %v13077_v1  ;;  %8824 = vsinq.f32 %v3934_v22 }
 0x3a2   : > { %vm7696_vm12 = vcmp.lt.s32.totalorder %v7695_v56, 0  ;;  %v4109_v31 = vmul.u32 %v4102_v27, %v4093_v57  ;;  %v4158_v49 = vand.u32 2147483647, %v15130_v39  ;;  %v4176_v45 = vshrl.u32 %v14818_v15, %v15131_v24  ;;  %v15132_v27 = vld [vmem:[#allocation52_spill] sm:$0xff] }
 0x3a3   : > { %v4021_v10 = vsel %vm7696_vm12, 0, %v7695_v56  ;;  %v4113_v18 = vsel %vm4111_vm10, %v4112_v61, %v13077_v1  ;;  %v4179_v5 = vshrl.u32 %v14756_v46, %v15131_v24  ;;  %v4006_v0 = vadd.s32 %v12961_v12, %v12975_v53 }
 0x3a4   : > { %v4022_v21 = vsub.s32 32, %v4021_v10  ;;  %v4026_v9 = vsub.s32 4294967266, %v4021_v10  ;;  %v4114_v62 = vadd.s32 %v4113_v18, %v4109_v31  ;;  %v4023_v17 = vshll.u32 %v13046_v16, %v4021_v10  ;;  %v15136_v10 = vld [vmem:[#allocation41_spill] sm:$0xff] }
 0x3a5   : > { %v4175_v44 = vshll.u32 %v14761_v7, %v15132_v27  ;;  %v4178_v51 = vshll.u32 %v14818_v15, %v15132_v27  ;;  %v4182_v23 = vshrl.u32 %v14781_v4, %v15131_v24  ;;  %v4181_v12 = vshll.u32 %v14756_v46, %v15132_v27 }
 0x3a6   : > { %v4024_v52 = vshrl.u32 %v4006_v0, %v4022_v21  ;;  %v4027_v58 = vadd.s32 127, %v4026_v9  ;;  %v4115_v28 = vadd.s32 536870912, %v4114_v62  ;;  %v4037_v53 = vsel %vm3952_vm8, %v4036_v6, %v13024_v38 }
 0x3a7   : > { %v4165_v16 = vand.u32 8388607, %v4158_v49  ;;  %v4177_v19 = vor.u32 %v4176_v45, %v4175_v44  ;;  %v4180_v42 = vor.u32 %v4179_v5, %v4178_v51  ;;  %v4183_v8 = vor.u32 %v4182_v23, %v4181_v12 }
 0x3a8   : > { %v4025_v33 = vor.u32 %v4024_v52, %v4023_v17  ;;  %v4028_v22 = vshll.u32 %v4027_v58, 23  ;;  %v13136_v1 = vshrl.u32 %v4115_v28, 30  ;;  %v13140_v13 = vshll.u32 %v14781_v4, %v12900_v26  ;;  %v15137_v17 = vld [vmem:[#allocation34_spill] sm:$0xff]  ;;  %v15138_v52 = vld [vmem:[#allocation53_spill] sm:$0xff]  ;;  %v15139_v58 = vld [vmem:[#allocation12_spill] sm:$0xff] }
 0x3a9   : > { %v13144_v48 = vshrl.u32 %v14759_v55, %v13104_v20  ;;  %vm3945_vm0 = vcmp.eq.s32.totalorder %v13109_v36, 2  ;;  %v15133_v38 = vand.u32 2147483647, %v15122_v29  ;;  %v8823_v56 = vpop.eup %8822  ;;  %vm4190_vm14 = vcmp.lt.s32.totalorder %v15136_v10, 1 }
 0x3aa   : > { %v4029_v6 = vor.u32 4788187, %v4028_v22  ;;  %v4117_v31 = vshll.u32 %v13136_v1, 30  ;;  %v4166_v18 = vor.u32 8388608, %v4165_v16  ;;  %vm4191_vm2 = vcmp.lt.s32.totalorder %v15136_v10, 2 }
 0x3ab   : > { %vm13149_vm11 = vcmp.le.f32.partialorder %v15133_v38, 0.7853982  ;;  %vm4192_vm4 = vcmp.lt.s32.totalorder %v15136_v10, 3  ;;  %v4198_v45 = vsel %vm4190_vm14, %v4177_v19, %v4180_v42  ;;  %v8825_v5 = vpop.eup %8824  ;;  %v4032_v21 = vcvt.s32.f32 %v4025_v33 }
 0x3ac   : > { %v4039_v61 = vsel %vm13149_vm11, 0, %v4037_v53  ;;  %v4030_v0 = vand.u32 2147483647, %v4029_v6  ;;  %v13161_v9 = vsub.s32 %v4114_v62, %v4117_v31  ;;  %v4200_v27 = vsel %vm4192_vm4, %v4183_v8, %v15137_v17 }
 0x3ad   : > { %v3946_v44 = vxor.u32 2147483648, %v8823_v56  ;;  %v4195_v51 = vsel %vm4193_vm15, %v4183_v8, 2102212464  ;;  %v4202_v23 = vsel %vm4190_vm14, %v4180_v42, %v4183_v8  ;;  %v4204_v28 = vsel %vm4192_vm4, %v15139_v58, %v15138_v52 }
 0x3ae   : > { %v4033_v12 = vmul.f32 %v4032_v21, %v4030_v0  ;;  %v4120_v62 = vsub.s32 0, %v13161_v9  ;;  %v4174_v53 = vshrl.u32 %v14761_v7, %v15131_v24  ;;  %v4205_v16 = vsel %vm4191_vm2, %v4202_v23, %v4204_v28 }
 0x3af   : > { %v3943_v33 = vxor.u32 2147483648, %v8825_v5  ;;  %v4043_v22 = vadd.s32 3, %v4039_v61  ;;  %v4201_v38 = vsel %vm4191_vm2, %v4198_v45, %v4200_v27  ;;  %v4206_v8 = vshll.u32 %v4166_v18, 8 }
 0x3b0   : > { %v4034_v6 = vxor.u32 2147483648, %v4033_v12  ;;  %v7698_v31 = vmin.u32 %v4120_v62, %v13161_v9  ;;  %v4194_v0 = vsel %vm4190_vm14, %v4174_v53, %v4177_v19  ;;  %v4196_v21 = vsel %vm4192_vm4, %v4180_v42, %v4195_v51  ;;  %v15141_v53 = vld [vmem:[#allocation30_spill] sm:$0xff] }
 0x3b1   : > { %vm3942_vm15 = vcmp.eq.s32.totalorder %v13109_v36, 0  ;;  %v3947_v24 = vsel %vm3945_vm0, %v3946_v44, %v8825_v5  ;;  %v13189_v17 = vmul.u32.u64.low %v4206_v8, %v4205_v16  ;;  %v13190_v61 = vmul.u32.u64.high %v4206_v8, %v4205_v16, %v13189_v17  ;;  %v15140_v5 = vld [vmem:[#allocation3_spill] sm:$0xff] }
 0x3b2   : > { %v4035_v18 = vsel %vm3952_vm8, %v4034_v6, %v4033_v12  ;;  %v4122_v45 = vclz %v7698_v31  ;;  %v13194_v27 = vmul.u32.u64.low %v4206_v8, %v4201_v38  ;;  %v13195_v23 = vmul.u32.u64.high %v4206_v8, %v4201_v38, %v13194_v27 }
 0x3b3   : > { %v3944_v19 = vsel %vm3942_vm15, %v8823_v56, %v3943_v33  ;;  %v4038_v42 = vsel %vm13149_vm11, %v15122_v29, %v4035_v18  ;;  %v4197_v51 = vsel %vm4191_vm2, %v4194_v0, %v4196_v21  ;;  %v14728_v44 = vand.u32 2147483647, %v15140_v5 }
 0x3b4   : > { %vm3938_vm1 = vweird.f32 %v15112_v60  ;;  %8826 = vcosq.f32 %v4038_v42  ;;  %v13205_v52 = vand.u32 3, %v4043_v22  ;;  %v7699_v58 = vadd.s32 4294967294, %v4122_v45  ;;  %v15142_v22 = vld [vmem:[#allocation36_spill] sm:$0xff] }
 0x3b5   : > { %vm3941_vm13 = vcmp.lt.s32.totalorder %v13109_v36, 2  ;;  %8828 = vsinq.f32 %v4038_v42  ;;  %v4110_v56 = vadd.s32 %v13076_v54, %v13062_v11  ;;  %vm4215_vm6 = vc.u32 %v13190_v61, %v13194_v27 }
 0x3b6   : > { %v3948_v57 = vsel %vm3941_vm13, %v3944_v19, %v3947_v24  ;;  %vm7700_vm7 = vcmp.lt.s32.totalorder %v7699_v58, 0  ;;  %v4213_v10 = vmul.u32 %v4206_v8, %v4197_v51  ;;  %v4216_v28 = vadd.s32 1, %v13195_v23 }
 0x3b7   : > { %v4125_v12 = vsel %vm7700_vm7, 0, %v7699_v58  ;;  %v4269_v62 = vand.u32 8388607, %v14728_v44  ;;  %v4280_v16 = vshrl.u32 %v14818_v15, %v15141_v53  ;;  %v4283_v36 = vshrl.u32 %v14756_v46, %v15141_v53 }
 0x3b8   : > { %vm4049_vm3 = vcmp.eq.s32.totalorder %v13205_v52, 2  ;;  %v4126_v11 = vsub.s32 32, %v4125_v12  ;;  %v4130_v54 = vsub.s32 4294967266, %v4125_v12  ;;  %v4217_v33 = vsel %vm4215_vm6, %v4216_v28, %v13195_v23 }
 0x3b9   : > { %v4282_v38 = vshll.u32 %v14818_v15, %v15142_v22  ;;  %vm4046_vm10 = vcmp.eq.s32.totalorder %v13205_v52, 0  ;;  %v4218_v8 = vadd.s32 %v4217_v33, %v4213_v10  ;;  %v4279_v6 = vshll.u32 %v14761_v7, %v15142_v22 }
 0x3ba   : > { %v4285_v31 = vshll.u32 %v14756_v46, %v15142_v22  ;;  %v4286_v0 = vshrl.u32 %v14781_v4, %v15141_v53  ;;  %vm4045_vm8 = vcmp.lt.s32.totalorder %v13205_v52, 2  ;;  %vm4056_vm12 = vcmp.lt.s32.totalorder %v15124_v35, 0 }
 0x3bb   : > { %v4127_v21 = vshll.u32 %v13161_v9, %v4125_v12  ;;  %v4128_v24 = vshrl.u32 %v4110_v56, %v4126_v11  ;;  %v4131_v17 = vadd.s32 127, %v4130_v54  ;;  %v4284_v18 = vor.u32 %v4283_v36, %v4282_v38  ;;  %v15143_v56 = vld [vmem:[#allocation24_spill] sm:$0xff] }
 0x3bc   : > { %vm4042_vm0 = vweird.f32 %v15122_v29  ;;  %v4140_v45 = vsub.s32 4, %v13136_v1  ;;  %v4219_v23 = vadd.s32 536870912, %v4218_v8  ;;  %v4281_v19 = vor.u32 %v4280_v16, %v4279_v6  ;;  %v15145_v16 = vld [vmem:[#allocation32_spill] sm:$0xff] }
 0x3bd   : > { %v4287_v42 = vor.u32 %v4286_v0, %v4285_v31  ;;  %v3949_v51 = vsel %vm3938_vm1, nan, %v3948_v57  ;;  %v4129_v58 = vor.u32 %v4128_v24, %v4127_v21  ;;  %v4132_v10 = vshll.u32 %v4131_v17, 23  ;;  %v15144_v57 = vld [vmem:[#allocation26_spill] sm:$0xff]  ;;  %v15146_v21 = vld [vmem:[#allocation43_spill] sm:$0xff] }
 0x3be   : > { %v4278_v28 = vshrl.u32 %v14761_v7, %v15141_v53  ;;  %v13239_v33 = vshrl.u32 %v4219_v23, 30  ;;  %v4270_v9 = vor.u32 8388608, %v4269_v62  ;;  %vm4294_vm11 = vcmp.lt.s32.totalorder %v15143_v56, 1  ;;  %v8827_v12 = vpop.eup %8826 }
 0x3bf   : > { %vm4296_vm14 = vcmp.lt.s32.totalorder %v15143_v56, 3  ;;  %v4133_v36 = vor.u32 4788187, %v4132_v10  ;;  %vm4295_vm2 = vcmp.lt.s32.totalorder %v15143_v56, 2  ;;  %v4306_v60 = vsel %vm4294_vm11, %v4284_v18, %v4287_v42  ;;  %v8829_v53 = vpop.eup %8828 }
 0x3c0   : > { %v4308_v11 = vsel %vm4296_vm14, %v15145_v16, %v15144_v57  ;;  %v4050_v54 = vxor.u32 2147483648, %v8827_v12  ;;  %v4221_v62 = vshll.u32 %v13239_v33, 30  ;;  %v4299_v22 = vsel %vm4297_vm9, %v4287_v42, 2102212464 }
 0x3c1   : > { %v4302_v38 = vsel %vm4294_vm11, %v4281_v19, %v4284_v18  ;;  %v4047_v6 = vxor.u32 2147483648, %v8829_v53  ;;  %v4134_v31 = vand.u32 2147483647, %v4133_v36  ;;  %v4136_v0 = vcvt.s32.f32 %v4129_v58  ;;  %v8690_v36 = vld [vmem:[%s15147_s23] sm:$0xff]   ;;  %v8691_v58 = vld [vmem:[%s15147_s23 + $0x8] sm:$0xff]  }
 0x3c2   : > { %v4304_v24 = vsel %vm4296_vm14, %v4287_v42, %v15146_v21  ;;  %v4051_v17 = vsel %vm4049_vm3, %v4050_v54, %v8829_v53  ;;  %v13260_v23 = vsub.s32 %v4218_v8, %v4221_v62  ;;  %v4298_v10 = vsel %vm4294_vm11, %v4278_v28, %v4281_v19  ;;  %v13272_v42 = vpop.f32.mrb[0].mxu0  ;;  %8125 = vmatprep.subr.bf16.mxu0 %v8690_v36 }
 0x3c3   : > { %v4309_v57 = vsel %vm4295_vm2, %v4306_v60, %v4308_v11  ;;  %v4048_v8 = vsel %vm4046_vm10, %v8827_v12, %v4047_v6  ;;  %v4137_v16 = vmul.f32 %v4136_v0, %v4134_v31  ;;  %v4300_v19 = vsel %vm4296_vm14, %v4284_v18, %v4299_v22  ;;  %v13280_v60 = vpop.f32.mrb[1].mxu0  ;;  %8453 = vmatprep.subr.bf16.mxu1 %v8690_v36  ;;  %v8692_v31 = vld [vmem:[%s15147_s23 + $0x10] sm:$0xff]  }
 0x3c4   : > { %v13278_v28 = vshll.u32 %v4270_v9, 8  ;;  %v4052_v11 = vsel %vm4045_vm8, %v4048_v8, %v4051_v17  ;;  %v13287_v53 = vsel %vm4056_vm12, %v4140_v45, %v13136_v1  ;;  %v4224_v54 = vsub.s32 0, %v13260_v23  ;;  %v13292_v62 = vpop.f32.mrb[2].mxu0  ;;  %8126 = vmatpush3.bf16.msra.mxu0 %v8690_v36  ;;  %8457 = vmatpush3.bf16.msra.mxu1 %v8690_v36 }
 0x3c5   : > { %v4305_v12 = vsel %vm4295_vm2, %v4302_v38, %v4304_v24  ;;  %v4053_v18 = vsel %vm4042_vm0, nan, %v4052_v11  ;;  %v4138_v9 = vxor.u32 2147483648, %v4137_v16  ;;  %v13300_v1 = vpop.f32.mrb[3].mxu0  ;;  %vm13306_vm9 = vcmp.le.f32.partialorder %v4054_v43, 0.7853982  ;;  %8127 = vmatprep.subr.bf16.mxu0 %v8691_v58  ;;  %8454 = vmatprep.subr.bf16.mxu1 %v8691_v58  ;;  %v15151_v24 = vld [vmem:[#allocation29_spill] sm:$0xff] }
 0x3c6   : > { %v13297_v52 = vmul.u32.u64.low %v13278_v28, %v4309_v57  ;;  %v13298_v22 = vmul.u32.u64.high %v13278_v28, %v4309_v57, %v13297_v52  ;;  %v13302_v45 = vpack.c.bf16 %v4053_v18, %v3949_v51  ;;  %v7702_v29 = vmin.u32 %v4224_v54, %v13260_v23  ;;  %v13316_v0 = vpop.f32.mrb[4].mxu0 }
 0x3c7   : > { %v4301_v6 = vsel %vm4295_vm2, %v4298_v10, %v4300_v19  ;;  %v4139_v51 = vsel %vm4056_vm12, %v4138_v9, %v4137_v16  ;;  %v13321_v43 = vmul.u32.u64.low %v13278_v28, %v4305_v12  ;;  %v13322_v21 = vmul.u32.u64.high %v13278_v28, %v4305_v12, %v13321_v43  ;;  %v13326_v56 = vpop.f32.mrb[5].mxu0 }
 0x3c8   : > { %15148 = vst [vmem:[#allocation19_spill] sm:$0xff] %v13302_v45  ;;  %v14727_v17 = vand.u32 2147483647, %v15151_v24  ;;  %v13330_v10 = vshll.u32 %v14759_v55, %v12900_v26  ;;  %v13334_v57 = vshrl.u32 %v14782_v3, %v13104_v20  ;;  %8117 = vmatprep.mubr.bf16.mxu0 %v13302_v45  ;;  %v4142_v36 = vsel %vm13306_vm9, %v15124_v35, %v4139_v51  ;;  %v13340_v16 = vpop.f32.mrb[6].mxu0 }
 0x3c9   : > { %v4226_v8 = vclz %v7702_v29  ;;  %v13344_v19 = vor.u32 %v13144_v48, %v13140_v13  ;;  %v4143_v55 = vsel %vm13306_vm9, 0, %v13287_v53  ;;  %vm4160_vm4 = vcmp.lt.s32.totalorder %v15130_v39, 0  ;;  %8128 = vmatpush3.bf16.msra.mxu0 %v8691_v58  ;;  %v13352_v11 = vpop.f32.mrb[7].mxu0  ;;  %8458 = vmatpush3.bf16.msra.mxu1 %v8691_v58  ;;  %v8693_v13 = vld [vmem:[%s15147_s23 + $0x18] sm:$0xff]  }
 0x3ca   : > { %v4214_v3 = vadd.s32 %v13194_v27, %v13190_v61  ;;  %v4244_v12 = vsub.s32 4, %v13239_v33  ;;  %v4317_v18 = vmul.u32 %v13278_v28, %v4301_v6  ;;  %vm4319_vm15 = vc.u32 %v13298_v22, %v13321_v43  ;;  %8129 = vmatprep.subr.bf16.mxu0 %v8692_v31  ;;  %8455 = vmatprep.subr.bf16.mxu1 %v8692_v31 }
 0x3cb   : > { %v7703_v54 = vadd.s32 4294967294, %v4226_v8  ;;  %8830 = vcosq.f32 %v4142_v36  ;;  %v4320_v48 = vadd.s32 1, %v13322_v21  ;;  %v4373_v61 = vand.u32 8388607, %v14727_v17 }
 0x3cc   : > { %v4384_v27 = vshrl.u32 %v14818_v15, %v12643_v34  ;;  %v4383_v58 = vshll.u32 %v14761_v7, %v12586_v50  ;;  %v4386_v28 = vshll.u32 %v14818_v15, %v12586_v50  ;;  %v4387_v53 = vshrl.u32 %v14756_v46, %v12643_v34 }
 0x3cd   : > { %vm7704_vm1 = vcmp.lt.s32.totalorder %v7703_v54, 0  ;;  %v4321_v52 = vsel %vm4319_vm15, %v4320_v48, %v13322_v21  ;;  %v4389_v38 = vshll.u32 %v14756_v46, %v12586_v50  ;;  %v4390_v29 = vshrl.u32 %v14781_v4, %v12643_v34  ;;  %8130 = vmatpush3.bf16.msra.mxu0 %v8692_v31  ;;  %8459 = vmatpush3.bf16.msra.mxu1 %v8692_v31 }
 0x3ce   : > { %v4229_v9 = vsel %vm7704_vm1, 0, %v7703_v54  ;;  %8832 = vsinq.f32 %v4142_v36  ;;  %v4322_v8 = vadd.s32 %v4321_v52, %v4317_v18  ;;  %8131 = vmatprep.subr.bf16.mxu0 %v8693_v13  ;;  %8456 = vmatprep.subr.bf16.mxu1 %v8693_v13  ;;  %vm4505_vm13 = vcmp.lt.s32.totalorder %v13097_v41, 4 }
 0x3cf   : > { %v4230_v6 = vsub.s32 32, %v4229_v9  ;;  %v4234_v51 = vsub.s32 4294967266, %v4229_v9  ;;  %vm13380_vm6 = vcmp.le.f32.partialorder %v4158_v49, 0.7853982  ;;  %v4385_v50 = vor.u32 %v4384_v27, %v4383_v58 }
 0x3d0   : > { %v4388_v54 = vor.u32 %v4387_v53, %v4386_v28  ;;  %v4391_v48 = vor.u32 %v4390_v29, %v4389_v38  ;;  %v4231_v17 = vshll.u32 %v13260_v23, %v4229_v9  ;;  %v4323_v63 = vadd.s32 536870912, %v4322_v8  ;;  %v13392_v23 = vpop.f32.mrb[8].mxu0 }
 0x3d1   : > { %v4232_v31 = vshrl.u32 %v4214_v3, %v4230_v6  ;;  %v4235_v36 = vadd.s32 127, %v4234_v51  ;;  %v4147_v44 = vadd.s32 3, %v4143_v55  ;;  %v4245_v18 = vsel %vm4160_vm4, %v4244_v12, %v13239_v33  ;;  %8132 = vmatpush3.bf16.msra.mxu0 %v8693_v13  ;;  %8460 = vmatpush3.bf16.msra.mxu1 %v8693_v13 }
 0x3d2   : > { %v4374_v52 = vor.u32 8388608, %v4373_v61  ;;  %vm4398_vm7 = vcmp.lt.s32.totalorder %v12584_v32, 1  ;;  %v13389_v27 = vshrl.u32 %v4323_v63, 30  ;;  %vm4400_vm3 = vcmp.lt.s32.totalorder %v12584_v32, 3 }
 0x3d3   : > { %v4233_v49 = vor.u32 %v4232_v31, %v4231_v17  ;;  %v4236_v45 = vshll.u32 %v4235_v36, 23  ;;  %v4406_v55 = vsel %vm4398_vm7, %v4385_v50, %v4388_v54  ;;  %v4408_v33 = vsel %vm4400_vm3, %v4391_v48, %v13085_v30  ;;  %v13405_v17 = vpop.f32.mrb[9].mxu0 }
 0x3d4   : > { %v4410_v3 = vsel %vm4398_vm7, %v4388_v54, %v4391_v48  ;;  %v4412_v63 = vsel %vm4400_vm3, %v12894_v40, %v13094_v47  ;;  %v4501_v12 = vor.u32 %v13334_v57, %v13330_v10  ;;  %v4325_v61 = vshll.u32 %v13389_v27, 30  ;;  %v13411_v58 = vpop.f32.mrb[10].mxu0 }
 0x3d5   : > { %v4237_v13 = vor.u32 4788187, %v4236_v45  ;;  %vm4399_vm10 = vcmp.lt.s32.totalorder %v12584_v32, 2  ;;  %v8831_v30 = vpop.eup %8830  ;;  %v4247_v28 = vsel %vm13380_vm6, 0, %v4245_v18  ;;  %v4403_v53 = vsel %vm4401_vm5, %v4391_v48, 2102212464 }
 0x3d6   : > { %v4413_v40 = vsel %vm4399_vm10, %v4410_v3, %v4412_v63  ;;  %v4414_v47 = vshll.u32 %v4374_v52, 8  ;;  %v13419_v9 = vpop.f32.mrb[11].mxu0  ;;  %v4240_v10 = vcvt.s32.f32 %v4233_v49  ;;  %v13421_v57 = vsub.s32 %v4322_v8, %v4325_v61 }
 0x3d7   : > { %v4238_v45 = vand.u32 2147483647, %v4237_v13  ;;  %v4409_v38 = vsel %vm4399_vm10, %v4406_v55, %v4408_v33  ;;  %v4148_v29 = vand.u32 3, %v4147_v44  ;;  %v4382_v6 = vshrl.u32 %v14761_v7, %v12643_v34  ;;  %v13449_v61 = vpop.f32.mrb[12].mxu0 }
 0x3d8   : > { %v13427_v51 = vmul.u32.u64.low %v4414_v47, %v4413_v40  ;;  %v13428_v31 = vmul.u32.u64.high %v4414_v47, %v4413_v40, %v13427_v51  ;;  %v8833_v48 = vpop.eup %8832  ;;  %v13433_v36 = vsel %vm4505_vm13, %v13344_v19, 920167782  ;;  %v4251_v52 = vadd.s32 3, %v4247_v28  ;;  %v13451_v28 = vpop.f32.mrb[13].mxu0 }
 0x3d9   : > { %v4241_v18 = vmul.f32 %v4240_v10, %v4238_v45  ;;  %v4328_v8 = vsub.s32 0, %v13421_v57  ;;  %v4402_v49 = vsel %vm4398_vm7, %v4382_v6, %v4385_v50  ;;  %v4404_v44 = vsel %vm4400_vm3, %v4388_v54, %v4403_v53  ;;  %v13460_v45 = vpop.f32.mrb[14].mxu0  ;;  %v15154_v6 = vld [vmem:[#allocation17_spill] sm:$0xff] }
 0x3da   : > { %v13440_v34 = vmul.u32.u64.low %v4414_v47, %v4409_v38  ;;  %v13441_v55 = vmul.u32.u64.high %v4414_v47, %v4409_v38, %v13440_v34  ;;  %v13446_v33 = vsel %vm4505_vm13, %v4501_v12, 1326507024  ;;  %v4154_v3 = vxor.u32 2147483648, %v8831_v30 }
 0x3db   : > { %v4242_v63 = vxor.u32 2147483648, %v4241_v18  ;;  %v7706_v13 = vmin.u32 %v4328_v8, %v13421_v57  ;;  %vm4149_vm5 = vcmp.lt.s32.totalorder %v4148_v29, 2  ;;  %vm4150_vm8 = vcmp.eq.s32.totalorder %v4148_v29, 0 }
 0x3dc   : > { %v4151_v50 = vxor.u32 2147483648, %v8833_v48  ;;  %vm4153_vm12 = vcmp.eq.s32.totalorder %v4148_v29, 2  ;;  %v13455_v53 = vand.u32 3, %v4251_v52  ;;  %vm4264_vm0 = vcmp.lt.s32.totalorder %v15140_v5, 0 }
 0x3dd   : > { %v4243_v54 = vsel %vm4160_vm4, %v4242_v63, %v4241_v18  ;;  %v4330_v12 = vclz %v7706_v13  ;;  %v4405_v40 = vsel %vm4399_vm10, %v4402_v49, %v4404_v44  ;;  %vm4146_vm11 = vweird.f32 %v15124_v35  ;;  %v13471_v18 = vpop.f32.mrb[15].mxu0 }
 0x3de   : > { %v4246_v10 = vsel %vm13380_vm6, %v15130_v39, %v4243_v54  ;;  %v4318_v38 = vadd.s32 %v13321_v43, %v13298_v22  ;;  %vm4423_vm14 = vc.u32 %v13428_v31, %v13440_v34  ;;  %v14730_v51 = vand.u32 2147483647, %v15154_v6 }
 0x3df   : > { %v4155_v32 = vsel %vm4153_vm12, %v4154_v3, %v8833_v48  ;;  %8834 = vcosq.f32 %v4246_v10  ;;  %v7707_v52 = vadd.s32 4294967294, %v4330_v12  ;;  %v4424_v8 = vadd.s32 1, %v13441_v55 }
 0x3e0   : > { %v4152_v49 = vsel %vm4150_vm8, %v8831_v30, %v4151_v50  ;;  %8836 = vsinq.f32 %v4246_v10  ;;  %v4421_v21 = vmul.u32 %v4414_v47, %v4405_v40  ;;  %v4488_v44 = vshrl.u32 %v14818_v15, %v13104_v20 }
 0x3e1   : > { %vm7708_vm2 = vcmp.lt.s32.totalorder %v7707_v52, 0  ;;  %v4348_v22 = vsub.s32 4, %v13389_v27  ;;  %v4425_v43 = vsel %vm4423_vm14, %v4424_v8, %v13441_v55  ;;  %v4491_v63 = vshrl.u32 %v14756_v46, %v13104_v20 }
 0x3e2   : > { %v4333_v48 = vsel %vm7708_vm2, 0, %v7707_v52  ;;  %v4426_v3 = vadd.s32 %v4425_v43, %v4421_v21  ;;  %v4477_v13 = vand.u32 8388607, %v14730_v51  ;;  %v4487_v30 = vshll.u32 %v14761_v7, %v12900_v26 }
 0x3e3   : > { %v4156_v47 = vsel %vm4149_vm5, %v4152_v49, %v4155_v32  ;;  %vm4257_vm9 = vcmp.eq.s32.totalorder %v13455_v53, 2  ;;  %v4334_v50 = vsub.s32 32, %v4333_v48  ;;  %v4338_v54 = vsub.s32 4294967266, %v4333_v48 }
 0x3e4   : > { %v4490_v55 = vshll.u32 %v14818_v15, %v12900_v26  ;;  %vm4254_vm4 = vcmp.eq.s32.totalorder %v13455_v53, 0  ;;  %v4427_v12 = vadd.s32 536870912, %v4426_v3  ;;  %v4489_v40 = vor.u32 %v4488_v44, %v4487_v30 }
 0x3e5   : > { %v4493_v10 = vshll.u32 %v14756_v46, %v12900_v26  ;;  %v4494_v52 = vshrl.u32 %v14781_v4, %v13104_v20  ;;  %vm4253_vm15 = vcmp.lt.s32.totalorder %v13455_v53, 2  ;;  %v4335_v29 = vshll.u32 %v13421_v57, %v4333_v48 }
 0x3e6   : > { %v4336_v32 = vshrl.u32 %v4318_v38, %v4334_v50  ;;  %v4339_v8 = vadd.s32 127, %v4338_v54  ;;  %v4492_v49 = vor.u32 %v4491_v63, %v4490_v55  ;;  %vm4250_vm1 = vweird.f32 %v15130_v39 }
 0x3e7   : > { %v4349_v21 = vsel %vm4264_vm0, %v4348_v22, %v13389_v27  ;;  %v4428_v44 = vshrl.u32 %v4427_v12, 30  ;;  %v4478_v43 = vor.u32 8388608, %v4477_v13  ;;  %v4495_v30 = vor.u32 %v4494_v52, %v4493_v10 }
 0x3e8   : > { %v4157_v26 = vsel %vm4146_vm11, nan, %v4156_v47  ;;  %v15155_v51 = vand.u32 2147483647, %v15140_v5  ;;  %v4337_v57 = vor.u32 %v4336_v32, %v4335_v29  ;;  %v4340_v38 = vshll.u32 %v4339_v8, 23 }
 0x3e9   : > { %v4486_v63 = vshrl.u32 %v14761_v7, %v13104_v20  ;;  %v4429_v48 = vshll.u32 %v4428_v44, 30  ;;  %vm4502_vm7 = vcmp.lt.s32.totalorder %v13097_v41, 1  ;;  %vm4503_vm3 = vcmp.lt.s32.totalorder %v13097_v41, 2  ;;  %v8835_v35 = vpop.eup %8834 }
 0x3ea   : > { %vm13504_vm6 = vcmp.le.f32.partialorder %v15155_v51, 0.7853982  ;;  %vm4504_vm10 = vcmp.lt.s32.totalorder %v13097_v41, 3  ;;  %v4341_v27 = vor.u32 4788187, %v4340_v38  ;;  %v4510_v51 = vsel %vm4502_vm7, %v4489_v40, %v4492_v49  ;;  %v8837_v13 = vpop.eup %8836 }
 0x3eb   : > { %v4512_v22 = vsel %vm4504_vm10, %v4495_v30, %v13433_v36  ;;  %v4516_v20 = vsel %vm4504_vm10, %v13344_v19, %v13446_v33  ;;  %v4258_v47 = vxor.u32 2147483648, %v8835_v35  ;;  %v13522_v50 = vsub.s32 %v4426_v3, %v4429_v48 }
 0x3ec   : > { %v4507_v54 = vsel %vm4505_vm13, %v4495_v30, 2102212464  ;;  %v4518_v55 = vshll.u32 %v4478_v43, 8  ;;  %v4255_v12 = vxor.u32 2147483648, %v8837_v13  ;;  %v4342_v10 = vand.u32 2147483647, %v4341_v27 }
 0x3ed   : > { %v4344_v52 = vcvt.s32.f32 %v4337_v57  ;;  %v4514_v29 = vsel %vm4502_vm7, %v4492_v49, %v4495_v30  ;;  %v4259_v36 = vsel %vm4257_vm9, %v4258_v47, %v8837_v13  ;;  %v4432_v32 = vsub.s32 0, %v13522_v50 }
 0x3ee   : > { %v4513_v19 = vsel %vm4503_vm3, %v4510_v51, %v4512_v22  ;;  %v4517_v33 = vsel %vm4503_vm3, %v4514_v29, %v4516_v20  ;;  %v4256_v3 = vsel %vm4254_vm4, %v8835_v35, %v4255_v12  ;;  %v4506_v48 = vsel %vm4502_vm7, %v4486_v63, %v4489_v40 }
 0x3ef   : > { %v4345_v8 = vmul.f32 %v4344_v52, %v4342_v10  ;;  %v13537_v43 = vmul.u32.u64.low %v4518_v55, %v4517_v33  ;;  %v13538_v57 = vmul.u32.u64.high %v4518_v55, %v4517_v33, %v13537_v43  ;;  %v4260_v30 = vsel %vm4253_vm15, %v4256_v3, %v4259_v36  ;;  %v15158_v10 = vld [vmem:[#allocation40_spill] sm:$0xff] }
 0x3f0   : > { %v7710_v38 = vmin.u32 %v4432_v32, %v13522_v50  ;;  %v4508_v27 = vsel %vm4504_vm10, %v4492_v49, %v4507_v54  ;;  %v4261_v51 = vsel %vm4250_vm1, nan, %v4260_v30  ;;  %v4351_v53 = vsel %vm13504_vm6, 0, %v4349_v21  ;;  %v15159_v49 = vld [vmem:[#allocation46_spill] sm:$0xff] }
 0x3f1   : > { %v4346_v22 = vxor.u32 2147483648, %v4345_v8  ;;  %v13549_v35 = vmul.u32.u64.low %v4518_v55, %v4513_v19  ;;  %v13550_v20 = vmul.u32.u64.high %v4518_v55, %v4513_v19, %v13549_v35  ;;  %v13553_v13 = vpack.c.bf16 %v4261_v51, %v4157_v26 }
 0x3f2   : > { %v4434_v47 = vclz %v7710_v38  ;;  %v4452_v12 = vsub.s32 4, %v4428_v44  ;;  %vm4609_vm13 = vcmp.lt.s32.totalorder %v15158_v10, 4  ;;  %v4509_v39 = vsel %vm4503_vm3, %v4506_v48, %v4508_v27 }
 0x3f3   : > { %v4347_v40 = vsel %vm4264_vm0, %v4346_v22, %v4345_v8  ;;  %v4602_v63 = vor.u32 %v12844_v37, %v15159_v49  ;;  %8118 = vmatmul.mubr.bf16.gmra.mrb[24].mxu0 %v13553_v13  ;;  %vm4527_vm5 = vc.u32 %v13538_v57, %v13549_v35  ;;  %v15160_v54 = vor.u32 %v12889_v25, %v12640_v59  ;;  %v15161_v25 = vld [vmem:[#allocation33_spill] sm:$0xff] }
 0x3f4   : > { %v4350_v26 = vsel %vm13504_vm6, %v15140_v5, %v4347_v40  ;;  %v7711_v21 = vadd.s32 4294967294, %v4434_v47  ;;  %v4355_v52 = vadd.s32 3, %v4351_v53  ;;  %vm4368_vm8 = vcmp.lt.s32.totalorder %v15151_v24, 0 }
 0x3f5   : > { %v4619_v41 = vsel %vm4609_vm13, %v15160_v54, 1326507024  ;;  %v4528_v37 = vadd.s32 1, %v13550_v20  ;;  %v4422_v29 = vadd.s32 %v13440_v34, %v13428_v31  ;;  %v4453_v2 = vsel %vm4368_vm8, %v4452_v12, %v4428_v44  ;;  %v15162_v31 = vld [vmem:[#allocation39_spill] sm:$0xff] }
 0x3f6   : > { %vm7712_vm12 = vcmp.lt.s32.totalorder %v7711_v21, 0  ;;  %v4525_v36 = vmul.u32 %v4518_v55, %v4509_v39  ;;  %8838 = vcosq.f32 %v4350_v26  ;;  %v4574_v19 = vand.u32 2147483647, %v15161_v25 }
 0x3f7   : > { %v4437_v32 = vsel %vm7712_vm12, 0, %v7711_v21  ;;  %v4529_v59 = vsel %vm4527_vm5, %v4528_v37, %v13550_v20  ;;  %v4592_v43 = vshrl.u32 %v14818_v15, %v12632_v14  ;;  %v4594_v34 = vshll.u32 %v14818_v15, %v15162_v31 }
 0x3f8   : > { %v4438_v33 = vsub.s32 32, %v4437_v32  ;;  %v4442_v3 = vsub.s32 4294967266, %v4437_v32  ;;  %v4530_v8 = vadd.s32 %v4529_v59, %v4525_v36  ;;  %v4439_v30 = vshll.u32 %v13522_v50, %v4437_v32 }
 0x3f9   : > { %v4595_v44 = vshrl.u32 %v14756_v46, %v12632_v14  ;;  %v4597_v55 = vshll.u32 %v14756_v46, %v15162_v31  ;;  %v4598_v51 = vshrl.u32 %v14781_v4, %v12632_v14  ;;  %8840 = vsinq.f32 %v4350_v26 }
 0x3fa   : > { %v4440_v38 = vshrl.u32 %v4422_v29, %v4438_v33  ;;  %v4443_v48 = vadd.s32 127, %v4442_v3  ;;  %v4531_v27 = vadd.s32 536870912, %v4530_v8  ;;  %v4581_v22 = vand.u32 8388607, %v4574_v19 }
 0x3fb   : > { %v4591_v50 = vshll.u32 %v14761_v7, %v15162_v31  ;;  %v4596_v15 = vor.u32 %v4595_v44, %v4594_v34  ;;  %v4599_v12 = vor.u32 %v4598_v51, %v4597_v55  ;;  %v4615_v46 = vsel %vm4609_vm13, %v4602_v63, 920167782 }
 0x3fc   : > { %v4441_v20 = vor.u32 %v4440_v38, %v4439_v30  ;;  %v4444_v53 = vshll.u32 %v4443_v48, 23  ;;  %v13598_v47 = vshrl.u32 %v4531_v27, 30  ;;  %v13602_v40 = vand.u32 3, %v4355_v52 }
 0x3fd   : > { %v15163_v4 = vand.u32 2147483647, %v15151_v24  ;;  %v4593_v49 = vor.u32 %v4592_v43, %v4591_v50  ;;  %vm4608_vm11 = vcmp.lt.s32.totalorder %v15158_v10, 3  ;;  %v4582_v29 = vor.u32 8388608, %v4581_v22 }
 0x3fe   : > { %v4445_v26 = vor.u32 4788187, %v4444_v53  ;;  %v4533_v54 = vshll.u32 %v13598_v47, 30  ;;  %v4448_v37 = vcvt.s32.f32 %v4441_v20  ;;  %vm4606_vm14 = vcmp.lt.s32.totalorder %v15158_v10, 1 }
 0x3ff   : > { %vm13606_vm0 = vcmp.le.f32.partialorder %v15163_v4, 0.7853982  ;;  %v4620_v52 = vsel %vm4608_vm11, %v4602_v63, %v4619_v41  ;;  %v4611_v59 = vsel %vm4609_vm13, %v4599_v12, 2102212464  ;;  %v4618_v33 = vsel %vm4606_vm14, %v4596_v15, %v4599_v12 }
 0x400   : > { %v4455_v21 = vsel %vm13606_vm0, 0, %v4453_v2  ;;  %v4446_v36 = vand.u32 2147483647, %v4445_v26  ;;  %v13617_v32 = vsub.s32 %v4530_v8, %v4533_v54  ;;  %v8839_v3 = vpop.eup %8838  ;;  %v4590_v43 = vshrl.u32 %v14761_v7, %v12632_v14  ;;  %v13634_v7 = vld [vmem:[%s15166_s30] ss:$0 sm:$0xff] }
 0x401   : > { %v4459_v2 = vadd.s32 3, %v4455_v21  ;;  %v4614_v30 = vsel %vm4606_vm14, %v4593_v49, %v4596_v15  ;;  %v4616_v31 = vsel %vm4608_vm11, %v4599_v12, %v4615_v46  ;;  %vm4607_vm2 = vcmp.lt.s32.totalorder %v15158_v10, 2 }
 0x402   : > { %v4449_v34 = vmul.f32 %v4448_v37, %v4446_v36  ;;  %v4536_v44 = vsub.s32 0, %v13617_v32  ;;  %v4610_v63 = vsel %vm4606_vm14, %v4590_v43, %v4593_v49  ;;  %v4612_v41 = vsel %vm4608_vm11, %v4596_v15, %v4611_v59 }
 0x403   : > { %v4621_v8 = vsel %vm4607_vm2, %v4618_v33, %v4620_v52  ;;  %v4622_v55 = vshll.u32 %v4582_v29, 8  ;;  %v4617_v48 = vsel %vm4607_vm2, %v4614_v30, %v4616_v31  ;;  %v8841_v27 = vpop.eup %8840  ;;  %vm4358_vm9 = vcmp.eq.s32.totalorder %v13602_v40, 0 }
 0x404   : > { %v4450_v14 = vxor.u32 2147483648, %v4449_v34  ;;  %v7714_v38 = vmin.u32 %v4536_v44, %v13617_v32  ;;  %vm4361_vm4 = vcmp.eq.s32.totalorder %v13602_v40, 2  ;;  %v13641_v51 = vand.u32 3, %v4459_v2 }
 0x405   : > { %v13643_v22 = vmul.u32.u64.low %v4622_v55, %v4621_v8  ;;  %v13644_v50 = vmul.u32.u64.high %v4622_v55, %v4621_v8, %v13643_v22  ;;  %v4613_v53 = vsel %vm4607_vm2, %v4610_v63, %v4612_v41  ;;  %v4808_v12 = vadd.f32 %v13272_v42, %v13634_v7 }
 0x406   : > { %v4451_v15 = vsel %vm4368_vm8, %v4450_v14, %v4449_v34  ;;  %v4538_v20 = vclz %v7714_v38  ;;  %v4526_v4 = vadd.s32 %v13549_v35, %v13538_v57  ;;  %v4362_v21 = vxor.u32 2147483648, %v8839_v3  ;;  %v13681_v34 = vpop.f32.mrb[16].mxu0 }
 0x407   : > { %v4454_v46 = vsel %vm13606_vm0, %v15151_v24, %v4451_v15  ;;  %v13657_v49 = vmul.u32.u64.low %v4622_v55, %v4617_v48  ;;  %v13658_v26 = vmul.u32.u64.high %v4622_v55, %v4617_v48, %v13657_v49  ;;  %v4800_v10 = vadd.f32 %v13634_v7, %v13280_v60  ;;  %v13687_v8 = vpop.f32.mrb[17].mxu0 }
 0x408   : > { %8842 = vcosq.f32 %v4454_v46  ;;  %v7715_v54 = vadd.s32 4294967294, %v4538_v20  ;;  %v4359_v37 = vxor.u32 2147483648, %v8841_v27  ;;  %v4629_v42 = vmul.u32 %v4622_v55, %v4613_v53  ;;  %v8112_v38 = vpop.f32.mrb[18].mxu0 }
 0x409   : > { %8844 = vsinq.f32 %v4454_v46  ;;  %v4811_v39 = vadd.f32 %v13292_v62, %v13634_v7  ;;  %vm4631_vm1 = vc.u32 %v13644_v50, %v13657_v49  ;;  %v4928_v57 = vmax.f32 %v4808_v12, 0.0  ;;  %v4866_v20 = vpop.f32.mrb[19].mxu0 }
 0x40a   : > { %vm7716_vm15 = vcmp.lt.s32.totalorder %v7715_v54, 0  ;;  %v4803_v35 = vadd.f32 %v13634_v7, %v13300_v1  ;;  %v4632_v52 = vadd.s32 1, %v13658_v26  ;;  %v4926_v36 = vmax.f32 %v4800_v10, 0.0 }
 0x40b   : > { %v4541_v29 = vsel %vm7716_vm15, 0, %v7715_v54  ;;  %v4929_v59 = vmax.f32 %v4811_v39, 0.0  ;;  %vm4357_vm6 = vcmp.lt.s32.totalorder %v13602_v40, 2  ;;  %v4824_v62 = vadd.f32 %v13316_v0, %v13634_v7 }
 0x40c   : > { %v4542_v60 = vsub.s32 32, %v4541_v29  ;;  %v4546_v33 = vsub.s32 4294967266, %v4541_v29  ;;  %v4927_v2 = vmax.f32 %v4803_v35, 0.0  ;;  %v4363_v43 = vsel %vm4361_vm4, %v4362_v21, %v8841_v27 }
 0x40d   : > { %vm4462_vm7 = vcmp.eq.s32.totalorder %v13641_v51, 0  ;;  %v4633_v1 = vsel %vm4631_vm1, %v4632_v52, %v13658_v26  ;;  %v13677_v30 = vpack.c.bf16 %v4929_v59, %v4928_v57  ;;  %v4816_v31 = vadd.f32 %v13634_v7, %v13326_v56 }
 0x40e   : > { %v4360_v44 = vsel %vm4358_vm9, %v8839_v3, %v4359_v37  ;;  %v4547_v63 = vadd.s32 127, %v4546_v33  ;;  %v4634_v41 = vadd.s32 %v4633_v1, %v4629_v42  ;;  %v13685_v0 = vpack.c.bf16 %v4927_v2, %v4926_v36 }
 0x40f   : > { %vm4354_vm3 = vweird.f32 %v15140_v5  ;;  %vm4458_vm10 = vweird.f32 %v15151_v24  ;;  %v4543_v55 = vshll.u32 %v13617_v32, %v4541_v29  ;;  %v4827_v56 = vadd.f32 %v13340_v16, %v13634_v7 }
 0x410   : > { %v4819_v14 = vadd.f32 %v13634_v7, %v13352_v11  ;;  %v4840_v3 = vadd.f32 %v13392_v23, %v13634_v7  ;;  %v4544_v48 = vshrl.u32 %v4526_v4, %v4542_v60  ;;  %v4548_v27 = vshll.u32 %v4547_v63, 23 }
 0x411   : > { %v4635_v22 = vadd.s32 536870912, %v4634_v41  ;;  %v4932_v15 = vmax.f32 %v4824_v62, 0.0  ;;  %v4930_v53 = vmax.f32 %v4816_v31, 0.0  ;;  %v4933_v12 = vmax.f32 %v4827_v56, 0.0 }
 0x412   : > { %v4931_v46 = vmax.f32 %v4819_v14, 0.0  ;;  %v4843_v32 = vadd.f32 %v13411_v58, %v13634_v7  ;;  %v8843_v26 = vpop.eup %8842  ;;  %v4549_v16 = vor.u32 4788187, %v4548_v27  ;;  %v4936_v11 = vmax.f32 %v4840_v3, 0.0 }
 0x413   : > { %v13700_v21 = vshrl.u32 %v4635_v22, 30  ;;  %v4832_v23 = vadd.f32 %v13634_v7, %v13405_v17  ;;  %v8845_v54 = vpop.eup %8844  ;;  %v4466_v4 = vxor.u32 2147483648, %v8843_v26  ;;  %v13704_v10 = vpack.c.bf16 %v4933_v12, %v4932_v15 }
 0x414   : > { %v13706_v37 = vpack.c.bf16 %v4931_v46, %v4930_v53  ;;  %v4937_v42 = vmax.f32 %v4843_v32, 0.0  ;;  %v4463_v39 = vxor.u32 2147483648, %v8845_v54  ;;  %vm4465_vm13 = vcmp.eq.s32.totalorder %v13641_v51, 2 }
 0x415   : > { %v4545_v57 = vor.u32 %v4544_v48, %v4543_v55  ;;  %v4637_v58 = vshll.u32 %v13700_v21, 30  ;;  %v4364_v35 = vsel %vm4357_vm6, %v4360_v44, %v4363_v43  ;;  %v4467_v29 = vsel %vm4465_vm13, %v4466_v4, %v8845_v54 }
 0x416   : > { %v13712_v52 = vpack.c.bf16 %v4937_v42, %v4936_v11  ;;  %v4835_v17 = vadd.f32 %v13634_v7, %v13419_v9  ;;  %vm4461_vm5 = vcmp.lt.s32.totalorder %v13641_v51, 2  ;;  %v4464_v36 = vsel %vm4462_vm7, %v8843_v26, %v4463_v39 }
 0x417   : > { %v4550_v59 = vand.u32 2147483647, %v4549_v16  ;;  %v4638_v60 = vsub.s32 %v4634_v41, %v4637_v58  ;;  %v4468_v33 = vsel %vm4461_vm5, %v4464_v36, %v4467_v29  ;;  %v4934_v2 = vmax.f32 %v4832_v23, 0.0 }
 0x418   : > { %v4935_v62 = vmax.f32 %v4835_v17, 0.0  ;;  %v4856_v40 = vadd.f32 %v13449_v61, %v13634_v7  ;;  %v4365_v43 = vsel %vm4354_vm3, nan, %v4364_v35  ;;  %v4469_v1 = vsel %vm4458_vm10, nan, %v4468_v33 }
 0x419   : > { %v4552_v9 = vcvt.s32.f32 %v4545_v57  ;;  %v4640_v31 = vsub.s32 0, %v4638_v60  ;;  %v13725_v44 = vpack.c.bf16 %v4469_v1, %v4365_v43  ;;  %v4848_v63 = vadd.f32 %v13634_v7, %v13451_v28 }
 0x41a   : > { %v13727_v51 = vpack.c.bf16 %v4935_v62, %v4934_v2  ;;  %v4859_v41 = vadd.f32 %v13460_v45, %v13634_v7  ;;  %v4851_v5 = vadd.f32 %v13634_v7, %v13471_v18  ;;  %v4940_v24 = vmax.f32 %v4856_v40, 0.0 }
 0x41b   : > { %v4553_v55 = vmul.f32 %v4552_v9, %v4550_v59  ;;  %v7718_v61 = vmin.u32 %v4640_v31, %v4638_v60  ;;  %8121 = vmatprep.mubr.bf16.mxu0 %v13725_v44  ;;  %v4872_v3 = vadd.f32 %v13681_v34, %v13634_v7  ;;  %v4938_v48 = vmax.f32 %v4848_v63, 0.0 }
 0x41c   : > { %v4941_v56 = vmax.f32 %v4859_v41, 0.0  ;;  %v4939_v22 = vmax.f32 %v4851_v5, 0.0  ;;  %v4864_v45 = vadd.f32 %v13634_v7, %v13687_v8  ;;  %v4875_v53 = vadd.f32 %v8112_v38, %v13634_v7 }
 0x41d   : > { %v4642_v14 = vclz %v7718_v61  ;;  %v4554_v28 = vxor.u32 2147483648, %v4553_v55  ;;  %vm4472_vm8 = vcmp.lt.s32.totalorder %v15154_v6, 0  ;;  %v4867_v12 = vadd.f32 %v13634_v7, %v4866_v20 }
 0x41e   : > { %v4965_v27 = vpack.c.bf16 %v4941_v56, %v4940_v24  ;;  %v4964_v18 = vpack.c.bf16 %v4939_v22, %v4938_v48  ;;  %vm5013_vm0 = vcmask 523264   ;;  %v4944_v46 = vmax.f32 %v4872_v3, 0.0 }
 0x41f   : > { %v7719_v15 = vadd.s32 4294967294, %v4642_v14  ;;  %v4945_v32 = vmax.f32 %v4875_v53, 0.0  ;;  %v4630_v34 = vadd.s32 %v13657_v49, %v13644_v50  ;;  %v4942_v16 = vmax.f32 %v4864_v45, 0.0 }
 0x420   : > { %8145 = vmatprep.mubr.msk.bf16.mxu1 %vm5013_vm0, %v4964_v18  ;;  %v4943_v11 = vmax.f32 %v4867_v12, 0.0  ;;  %v4555_v8 = vsel %vm4472_vm8, %v4554_v28, %v4553_v55  ;;  %v15167_v4 = vand.u32 2147483647, %v15154_v6  ;;  %v4556_v29 = vsub.s32 4, %v13598_v47 }
 0x421   : > { %vm7720_vm12 = vcmp.lt.s32.totalorder %v7719_v15, 0  ;;  %8146 = vmatmul.mubr.msk.bf16.vlgmr.msra.gmra.mrb[0].mxu1 %vm5013_vm0, %v4965_v27  ;;  %v4967_v20 = vpack.c.bf16 %v4945_v32, %v4944_v46  ;;  %v4660_v2 = vsub.s32 4, %v13700_v21  ;;  %vm4576_vm14 = vcmp.lt.s32.totalorder %v15161_v25, 0 }
 0x422   : > { %v4645_v26 = vsel %vm7720_vm12, 0, %v7719_v15  ;;  %v4966_v54 = vpack.c.bf16 %v4943_v11, %v4942_v16  ;;  %vm13751_vm11 = vcmp.le.f32.partialorder %v15167_v4, 0.7853982  ;;  %vm4575_vm2 = vcmp.le.f32.partialorder %v4574_v19, 0.7853982 }
 0x423   : > { %v4646_v38 = vsub.s32 32, %v4645_v26  ;;  %v4650_v23 = vsub.s32 4294967266, %v4645_v26  ;;  %v4647_v50 = vshll.u32 %v4638_v60, %v4645_v26  ;;  %v4558_v57 = vsel %vm13751_vm11, %v15154_v6, %v4555_v8 }
 0x424   : > { %8149 = vmatprep.mubr.msk.bf16.mxu1 %vm5013_vm0, %v4966_v54  ;;  %8846 = vcosq.f32 %v4558_v57  ;;  %v4557_v60 = vsel %vm4472_vm8, %v4556_v29, %v13598_v47  ;;  %v4661_v1 = vsel %vm4576_vm14, %v4660_v2, %v13700_v21  ;;  %vm4562_vm6 = vweird.f32 %v15154_v6 }
 0x425   : > { %v4648_v49 = vshrl.u32 %v4630_v34, %v4646_v38  ;;  %v4651_v39 = vadd.s32 127, %v4650_v23  ;;  %8848 = vsinq.f32 %v4558_v57  ;;  %v4559_v62 = vsel %vm13751_vm11, 0, %v4557_v60  ;;  %v8695_v38 = vld [vmem:[%s14470_s7 + $0x8] sm:$0xff]   ;;  %v8696_v23 = vld [vmem:[%s14470_s7 + $0x10] sm:$0xff]  }
 0x426   : > { %v4563_v9 = vadd.s32 3, %v4559_v62  ;;  %v4663_v41 = vsel %vm4575_vm2, 0, %v4661_v1  ;;  %vm4666_vm10 = vweird.f32 %v15161_v25  ;;  %vm7494_vm13 = vcmask 7168  }
 0x427   : > { %v4649_v58 = vor.u32 %v4648_v49, %v4647_v50  ;;  %v4652_v35 = vshll.u32 %v4651_v39, 23  ;;  %v4667_v24 = vadd.s32 3, %v4663_v41 }
 0x428   : > { %v4564_v55 = vand.u32 3, %v4563_v9 }
 0x429   : > { %v4653_v17 = vor.u32 4788187, %v4652_v35  ;;  %v4656_v59 = vcvt.s32.f32 %v4649_v58  ;;  %8150 = vmatmul.mubr.msk.bf16.gmra.mrb[4].mxu1 %vm5013_vm0, %v4967_v20  ;;  %v4668_v19 = vand.u32 3, %v4667_v24  ;;  %v8697_v20 = vld [vmem:[%s14470_s7 + $0x18] sm:$0xff]  }
 0x42a   : > { %vm4566_vm9 = vcmp.eq.s32.totalorder %v4564_v55, 0  ;;  %vm4569_vm4 = vcmp.eq.s32.totalorder %v4564_v55, 2  ;;  %vm4565_vm15 = vcmp.lt.s32.totalorder %v4564_v55, 2 }
 0x42b   : > { %v4654_v36 = vand.u32 2147483647, %v4653_v17  ;;  %vm4673_vm1 = vcmp.eq.s32.totalorder %v4668_v19, 2  ;;  %vm4670_vm7 = vcmp.eq.s32.totalorder %v4668_v19, 0  ;;  %vm4669_vm3 = vcmp.lt.s32.totalorder %v4668_v19, 2 }
 0x42d   : > { %v4657_v33 = vmul.f32 %v4656_v59, %v4654_v36 }
 0x42e   : > { %v8847_v63 = vpop.eup %8846 }
 0x42f   : > { %v4658_v40 = vxor.u32 2147483648, %v4657_v33  ;;  %v8849_v47 = vpop.eup %8848  ;;  %v4570_v5 = vxor.u32 2147483648, %v8847_v63 }
 0x430   : > { %v4567_v61 = vxor.u32 2147483648, %v8849_v47 }
 0x431   : > { %v4659_v43 = vsel %vm4576_vm14, %v4658_v40, %v4657_v33  ;;  %v4571_v14 = vsel %vm4569_vm4, %v4570_v5, %v8849_v47  ;;  %v13816_v33 = vld [vmem:[%s15170_s0] ss:$0 sm:$0xff] }
 0x432   : > { %v4662_v31 = vsel %vm4575_vm2, %v15161_v25, %v4659_v43  ;;  %v4568_v56 = vsel %vm4566_vm9, %v8847_v63, %v4567_v61 }
 0x433   : > { %8850 = vcosq.f32 %v4662_v31  ;;  %v4572_v48 = vsel %vm4565_vm15, %v4568_v56, %v4571_v14 }
 0x434   : > { %8852 = vsinq.f32 %v4662_v31  ;;  %v4573_v15 = vsel %vm4562_vm6, nan, %v4572_v48 }
 0x43d   : > { %v8851_v3 = vpop.eup %8850 }
 0x43e   : > { %v8853_v21 = vpop.eup %8852  ;;  %v4674_v27 = vxor.u32 2147483648, %v8851_v3 }
 0x43f   : > { %v4671_v22 = vxor.u32 2147483648, %v8853_v21 }
 0x440   : > { %v4675_v28 = vsel %vm4673_vm1, %v4674_v27, %v8853_v21 }
 0x441   : > { %v4672_v45 = vsel %vm4670_vm7, %v8851_v3, %v4671_v22 }
 0x442   : > { %v4676_v53 = vsel %vm4669_vm3, %v4672_v45, %v4675_v28 }
 0x443   : > { %v4677_v18 = vsel %vm4666_vm10, nan, %v4676_v53 }
 0x444   : > { %v13774_v12 = vpack.c.bf16 %v4677_v18, %v4573_v15 }
 0x446   : > { %8122 = vmatmul.mubr.bf16.gmra.mrb[28].mxu0 %v13774_v12 }
 0x447   : > { %8133 = vmatprep.mubr.msk.bf16.mxu0 %vm5013_vm0, %v13685_v0 }
 0x44e   : > { %8134 = vmatmul.mubr.msk.bf16.vlgmr.msra.gmra.mrb[32].mxu0 %vm5013_vm0, %v13677_v30 }
 0x44f   : > { %8137 = vmatprep.mubr.msk.bf16.mxu0 %vm5013_vm0, %v13706_v37 }
 0x456   : > { %8138 = vmatmul.mubr.msk.bf16.gmra.mrb[36].mxu0 %vm5013_vm0, %v13704_v10 }
 0x457   : > { %8141 = vmatprep.mubr.msk.bf16.mxu0 %vm5013_vm0, %v13727_v51 }
 0x45e   : > { %8142 = vmatmul.mubr.msk.bf16.gmra.mrb[40].mxu0 %vm5013_vm0, %v13712_v52  ;;  %v8694_v52 = vld [vmem:[%s14470_s7] sm:$0xff]  }
 0x45f   : > { %8165 = vmatprep.subr.bf16.mxu1 %v8694_v52 }
 0x460   : > { %8166 = vmatpush3.bf16.msra.mxu1 %v8694_v52 }
 0x461   : > { %8167 = vmatprep.subr.bf16.mxu1 %v8695_v38 }
 0x464   : > { %8168 = vmatpush3.bf16.msra.mxu1 %v8695_v38 }
 0x465   : > { %8169 = vmatprep.subr.bf16.mxu1 %v8696_v23 }
 0x468   : > { %8170 = vmatpush3.bf16.msra.mxu1 %v8696_v23 }
 0x469   : > { %8171 = vmatprep.subr.bf16.mxu1 %v8697_v20 }
 0x46c   : > { %8172 = vmatpush3.bf16.msra.mxu1 %v8697_v20 }
 0x474   : > { %v8115_v6 = vpop.f32.mrb[20].mxu0 }
 0x475   : > { %v4888_v25 = vadd.f32 %v8115_v6, %v13634_v7  ;;  %v4879_v46 = vpop.f32.mrb[21].mxu0 }
 0x476   : > { %v4880_v0 = vadd.f32 %v13634_v7, %v4879_v46  ;;  %v8116_v32 = vpop.f32.mrb[22].mxu0 }
 0x477   : > { %v4891_v30 = vadd.f32 %v8116_v32, %v13634_v7  ;;  %v4882_v34 = vpop.f32.mrb[23].mxu0  ;;  %v4948_v26 = vmax.f32 %v4888_v25, 0.0 }
 0x478   : > { %v4883_v37 = vadd.f32 %v13634_v7, %v4882_v34  ;;  %v4946_v16 = vmax.f32 %v4880_v0, 0.0 }
 0x479   : > { %v4949_v10 = vmax.f32 %v4891_v30, 0.0 }
 0x47a   : > { %v4947_v11 = vmax.f32 %v4883_v37, 0.0 }
 0x47b   : > { %v4969_v51 = vpack.c.bf16 %v4949_v10, %v4948_v26 }
 0x47c   : > { %v4968_v8 = vpack.c.bf16 %v4947_v11, %v4946_v16 }
 0x47e   : > { %8153 = vmatprep.mubr.msk.bf16.mxu1 %vm5013_vm0, %v4968_v8 }
 0x47f   : > { %8154 = vmatmul.mubr.msk.bf16.gmra.mrb[8].mxu1 %vm5013_vm0, %v4969_v51 }
 0x4c6   : > { %v8119_v54 = vpop.f32.mrb[24].mxu0 }
 0x4c7   : > { %v4904_v4 = vadd.f32 %v8119_v54, %v13634_v7  ;;  %v4895_v42 = vpop.f32.mrb[25].mxu0 }
 0x4c8   : > { %v4896_v50 = vadd.f32 %v13634_v7, %v4895_v42  ;;  %v8120_v49 = vpop.f32.mrb[26].mxu0 }
 0x4c9   : > { %v4907_v39 = vadd.f32 %v8120_v49, %v13634_v7  ;;  %v4898_v57 = vpop.f32.mrb[27].mxu0  ;;  %v4952_v35 = vmax.f32 %v4904_v4, 0.0 }
 0x4ca   : > { %v4899_v58 = vadd.f32 %v13634_v7, %v4898_v57  ;;  %v4950_v17 = vmax.f32 %v4896_v50, 0.0 }
 0x4cb   : > { %v4953_v29 = vmax.f32 %v4907_v39, 0.0 }
 0x4cc   : > { %v4951_v36 = vmax.f32 %v4899_v58, 0.0 }
 0x4cd   : > { %v4971_v59 = vpack.c.bf16 %v4953_v29, %v4952_v35 }
 0x4ce   : > { %v4970_v60 = vpack.c.bf16 %v4951_v36, %v4950_v17 }
 0x4d0   : > { %8157 = vmatprep.mubr.msk.bf16.mxu1 %vm5013_vm0, %v4970_v60 }
 0x4d1   : > { %8158 = vmatmul.mubr.msk.bf16.gmra.mrb[12].mxu1 %vm5013_vm0, %v4971_v59 }
 0x4f4   : > { %v8147_v2 = vpop.f32.mrb[0].mxu1 }
 0x4f5   : > { %v5153_v62 = vadd.f32 %v8147_v2, %v13816_v33  ;;  %v5144_v40 = vpop.f32.mrb[1].mxu1 }
 0x4f6   : > { %v5145_v43 = vadd.f32 %v13816_v33, %v5144_v40  ;;  %v8148_v1 = vpop.f32.mrb[2].mxu1 }
 0x4f7   : > { %v5156_v9 = vadd.f32 %v8148_v1, %v13816_v33  ;;  %v5147_v31 = vpop.f32.mrb[3].mxu1  ;;  %v5237_v47 = vmax.f32 %v5153_v62, 0.0 }
 0x4f8   : > { %v5148_v63 = vadd.f32 %v13816_v33, %v5147_v31  ;;  %v5235_v55 = vmax.f32 %v5145_v43, 0.0 }
 0x4f9   : > { %v5238_v41 = vmax.f32 %v5156_v9, 0.0 }
 0x4fa   : > { %v5236_v61 = vmax.f32 %v5148_v63, 0.0 }
 0x4fb   : > { %v13822_v5 = vpack.c.bf16 %v5238_v41, %v5237_v47 }
 0x4fc   : > { %v13824_v24 = vpack.c.bf16 %v5236_v61, %v5235_v55  ;;  %v8151_v56 = vpop.f32.mrb[4].mxu1  ;;  %v8698_v61 = vld [vmem:[%s14475_s12] sm:$0xff]  }
 0x4fd   : > { %v5169_v14 = vadd.f32 %v8151_v56, %v13816_v33  ;;  %v5160_v19 = vpop.f32.mrb[5].mxu1  ;;  %8245 = vmatprep.subr.bf16.mxu1 %v8698_v61 }
 0x4fe   : > { %v5161_v3 = vadd.f32 %v13816_v33, %v5160_v19  ;;  %v8152_v21 = vpop.f32.mrb[6].mxu1  ;;  %v8699_v19 = vld [vmem:[%s14475_s12 + $0x8] sm:$0xff]  }
 0x4ff   : > { %v5172_v48 = vadd.f32 %v8152_v21, %v13816_v33  ;;  %v5163_v27 = vpop.f32.mrb[7].mxu1  ;;  %v5241_v28 = vmax.f32 %v5169_v14, 0.0 }
 0x500   : > { %v5164_v22 = vadd.f32 %v13816_v33, %v5163_v27  ;;  %v5239_v45 = vmax.f32 %v5161_v3, 0.0 }
 0x501   : > { %v5242_v15 = vmax.f32 %v5172_v48, 0.0 }
 0x502   : > { %v5240_v53 = vmax.f32 %v5164_v22, 0.0 }
 0x503   : > { %v13830_v18 = vpack.c.bf16 %v5242_v15, %v5241_v28 }
 0x504   : > { %v13832_v6 = vpack.c.bf16 %v5240_v53, %v5239_v45  ;;  %v8700_v45 = vld [vmem:[%s14475_s12 + $0x10] sm:$0xff]  }
 0x519   : > { %v8123_v25 = vpop.f32.mrb[28].mxu0 }
 0x51a   : > { %v4920_v46 = vadd.f32 %v8123_v25, %v13634_v7  ;;  %v4911_v0 = vpop.f32.mrb[29].mxu0 }
 0x51b   : > { %v4912_v32 = vadd.f32 %v13634_v7, %v4911_v0  ;;  %v8124_v30 = vpop.f32.mrb[30].mxu0 }
 0x51c   : > { %v4923_v34 = vadd.f32 %v8124_v30, %v13634_v7  ;;  %v4914_v37 = vpop.f32.mrb[31].mxu0  ;;  %v4956_v10 = vmax.f32 %v4920_v46, 0.0 }
 0x51d   : > { %v4915_v26 = vadd.f32 %v13634_v7, %v4914_v37  ;;  %v4954_v11 = vmax.f32 %v4912_v32, 0.0  ;;  %v8701_v32 = vld [vmem:[%s14475_s12 + $0x18] sm:$0xff]  }
 0x51e   : > { %v4957_v16 = vmax.f32 %v4923_v34, 0.0 }
 0x51f   : > { %v4955_v51 = vmax.f32 %v4915_v26, 0.0 }
 0x520   : > { %v4973_v8 = vpack.c.bf16 %v4957_v16, %v4956_v10 }
 0x521   : > { %v4972_v52 = vpack.c.bf16 %v4955_v51, %v4954_v11  ;;  %v8135_v38 = vpop.f32.mrb[32].mxu0 }
 0x522   : > { %v5105_v23 = vadd.f32 %v8135_v38, %v13816_v33  ;;  %v5096_v20 = vpop.f32.mrb[33].mxu0 }
 0x523   : > { %8161 = vmatprep.mubr.msk.bf16.mxu1 %vm5013_vm0, %v4972_v52  ;;  %v5097_v54 = vadd.f32 %v13816_v33, %v5096_v20  ;;  %v8136_v4 = vpop.f32.mrb[34].mxu0  ;;  %v8704_v20 = vld [vmem:[%s14472_s9] sm:$0xff]  }
 0x524   : > { %8162 = vmatmul.mubr.msk.bf16.gmra.mrb[16].mxu1 %vm5013_vm0, %v4973_v8  ;;  %v5108_v42 = vadd.f32 %v8136_v4, %v13816_v33  ;;  %v5099_v7 = vpop.f32.mrb[35].mxu0  ;;  %v5225_v49 = vmax.f32 %v5105_v23, 0.0  ;;  %v8703_v23 = vld [vmem:[%s14475_s12 + $0x28] sm:$0xff]   ;;  %8205 = vmatprep.subr.bf16.mxu0 %v8704_v20 }
 0x525   : > { %v5100_v50 = vadd.f32 %v13816_v33, %v5099_v7  ;;  %v5223_v57 = vmax.f32 %v5097_v54, 0.0  ;;  %v8705_v54 = vld [vmem:[%s14475_s12 + $0x30] sm:$0xff]   ;;  %v8706_v4 = vld [vmem:[%s14472_s9 + $0x8] sm:$0xff]   ;;  %8206 = vmatpush3.bf16.msra.mxu0 %v8704_v20 }
 0x526   : > { %v5226_v39 = vmax.f32 %v5108_v42, 0.0  ;;  %8207 = vmatprep.subr.bf16.mxu0 %v8706_v4  ;;  %v8707_v42 = vld [vmem:[%s14475_s12 + $0x38] sm:$0xff]   ;;  %v8708_v7 = vld [vmem:[%s14472_s9 + $0x10] sm:$0xff]  }
 0x527   : > { %v5224_v58 = vmax.f32 %v5100_v50, 0.0  ;;  %v8709_v50 = vld [vmem:[%s14472_s9 + $0x18] sm:$0xff]  }
 0x528   : > { %v5256_v35 = vpack.c.bf16 %v5226_v39, %v5225_v49 }
 0x529   : > { %v5255_v29 = vpack.c.bf16 %v5224_v58, %v5223_v57  ;;  %v8139_v17 = vpop.f32.mrb[36].mxu0  ;;  %8208 = vmatpush3.bf16.msra.mxu0 %v8706_v4 }
 0x52a   : > { %v5121_v36 = vadd.f32 %v8139_v17, %v13816_v33  ;;  %v5112_v59 = vpop.f32.mrb[37].mxu0  ;;  %8209 = vmatprep.subr.bf16.mxu0 %v8708_v7 }
 0x52b   : > { %v5113_v60 = vadd.f32 %v13816_v33, %v5112_v59  ;;  %v8140_v2 = vpop.f32.mrb[38].mxu0  ;;  %8173 = vmatprep.mubr.msk.bf16.mxu1 %vm5013_vm0, %v5255_v29 }
 0x52c   : > { %v5124_v62 = vadd.f32 %v8140_v2, %v13816_v33  ;;  %v5115_v40 = vpop.f32.mrb[39].mxu0  ;;  %8174 = vmatmul.mubr.msk.bf16.vlgmr.msra.gmra.mrb[20].mxu1 %vm5013_vm0, %v5256_v35  ;;  %v5229_v1 = vmax.f32 %v5121_v36, 0.0 }
 0x52d   : > { %v5116_v43 = vadd.f32 %v13816_v33, %v5115_v40  ;;  %v5227_v31 = vmax.f32 %v5113_v60, 0.0  ;;  %8246 = vmatpush3.bf16.msra.mxu1 %v8698_v61  ;;  %8210 = vmatpush3.bf16.msra.mxu0 %v8708_v7 }
 0x52e   : > { %v5230_v9 = vmax.f32 %v5124_v62, 0.0  ;;  %8247 = vmatprep.subr.bf16.mxu1 %v8699_v19  ;;  %8211 = vmatprep.subr.bf16.mxu0 %v8709_v50 }
 0x52f   : > { %v5228_v63 = vmax.f32 %v5116_v43, 0.0 }
 0x530   : > { %v5258_v47 = vpack.c.bf16 %v5230_v9, %v5229_v1 }
 0x531   : > { %v5257_v41 = vpack.c.bf16 %v5228_v63, %v5227_v31  ;;  %v8143_v55 = vpop.f32.mrb[40].mxu0  ;;  %8248 = vmatpush3.bf16.msra.mxu1 %v8699_v19  ;;  %8212 = vmatpush3.bf16.msra.mxu0 %v8709_v50 }
 0x532   : > { %v5137_v56 = vadd.f32 %v8143_v55, %v13816_v33  ;;  %v5128_v14 = vpop.f32.mrb[41].mxu0  ;;  %8249 = vmatprep.subr.bf16.mxu1 %v8700_v45 }
 0x533   : > { %8177 = vmatprep.mubr.msk.bf16.mxu1 %vm5013_vm0, %v5257_v41  ;;  %v5129_v3 = vadd.f32 %v13816_v33, %v5128_v14  ;;  %v8144_v21 = vpop.f32.mrb[42].mxu0 }
 0x534   : > { %8178 = vmatmul.mubr.msk.bf16.gmra.mrb[24].mxu1 %vm5013_vm0, %v5258_v47  ;;  %v5140_v48 = vadd.f32 %v8144_v21, %v13816_v33  ;;  %v5131_v27 = vpop.f32.mrb[43].mxu0  ;;  %v5233_v28 = vmax.f32 %v5137_v56, 0.0  ;;  %v13921_v21 = vld [vmem:[%s14471_s8] ss:$0 sm:$0xff] }
 0x535   : > { %v5132_v22 = vadd.f32 %v13816_v33, %v5131_v27  ;;  %v5231_v53 = vmax.f32 %v5129_v3, 0.0  ;;  %8250 = vmatpush3.bf16.msra.mxu1 %v8700_v45 }
 0x536   : > { %v5234_v15 = vmax.f32 %v5140_v48, 0.0  ;;  %8251 = vmatprep.subr.bf16.mxu1 %v8701_v32 }
 0x537   : > { %v5232_v25 = vmax.f32 %v5132_v22, 0.0 }
 0x538   : > { %v5260_v46 = vpack.c.bf16 %v5234_v15, %v5233_v28 }
 0x539   : > { %v5259_v0 = vpack.c.bf16 %v5232_v25, %v5231_v53  ;;  %8252 = vmatpush3.bf16.msra.mxu1 %v8701_v32 }
 0x53b   : > { %8181 = vmatprep.mubr.msk.bf16.mxu1 %vm5013_vm0, %v5259_v0 }
 0x53c   : > { %8182 = vmatmul.mubr.msk.bf16.gmra.mrb[28].mxu1 %vm5013_vm0, %v5260_v46  ;;  %v15171_v46 = vld [vmem:[#allocation18_spill] sm:$0xff] }
 0x53d   : > { %8185 = vmatprep.mubr.msk.bf16.mxu1 %vm5013_vm0, %v13824_v24 }
 0x544   : > { %8186 = vmatmul.mubr.msk.bf16.gmra.mrb[32].mxu1 %vm5013_vm0, %v13822_v5 }
 0x545   : > { %8189 = vmatprep.mubr.msk.bf16.mxu1 %vm5013_vm0, %v13832_v6 }
 0x54c   : > { %8190 = vmatmul.mubr.msk.bf16.gmra.mrb[36].mxu1 %vm5013_vm0, %v13830_v18  ;;  %v8702_v18 = vld [vmem:[%s14475_s12 + $0x20] sm:$0xff]  }
 0x54d   : > { %8253 = vmatprep.subr.bf16.mxu1 %v8702_v18 }
 0x54e   : > { %8254 = vmatpush3.bf16.msra.mxu1 %v8702_v18 }
 0x54f   : > { %8255 = vmatprep.subr.bf16.mxu1 %v8703_v23 }
 0x552   : > { %v8155_v30 = vpop.f32.mrb[8].mxu1  ;;  %8256 = vmatpush3.bf16.msra.mxu1 %v8703_v23 }
 0x553   : > { %v5185_v34 = vadd.f32 %v8155_v30, %v13816_v33  ;;  %v5176_v37 = vpop.f32.mrb[9].mxu1  ;;  %8257 = vmatprep.subr.bf16.mxu1 %v8705_v54 }
 0x554   : > { %v5177_v26 = vadd.f32 %v13816_v33, %v5176_v37  ;;  %v8156_v10 = vpop.f32.mrb[10].mxu1 }
 0x555   : > { %v5188_v24 = vadd.f32 %v8156_v10, %v13816_v33  ;;  %v5179_v16 = vpop.f32.mrb[11].mxu1  ;;  %v5245_v51 = vmax.f32 %v5185_v34, 0.0 }
 0x556   : > { %v5180_v11 = vadd.f32 %v13816_v33, %v5179_v16  ;;  %v5243_v8 = vmax.f32 %v5177_v26, 0.0  ;;  %8258 = vmatpush3.bf16.msra.mxu1 %v8705_v54 }
 0x557   : > { %v5246_v5 = vmax.f32 %v5188_v24, 0.0  ;;  %8259 = vmatprep.subr.bf16.mxu1 %v8707_v42 }
 0x558   : > { %v5244_v52 = vmax.f32 %v5180_v11, 0.0 }
 0x559   : > { %v5266_v6 = vpack.c.bf16 %v5246_v5, %v5245_v51 }
 0x55a   : > { %v5265_v38 = vpack.c.bf16 %v5244_v52, %v5243_v8  ;;  %8260 = vmatpush3.bf16.msra.mxu1 %v8707_v42  ;;  %v15172_v8 = vld [vmem:[#allocation35_spill] sm:$0xff] }
 0x55c   : > { %8193 = vmatprep.mubr.msk.bf16.mxu1 %vm5013_vm0, %v5265_v38  ;;  %v15173_v38 = vld [vmem:[#allocation5_spill] sm:$0xff] }
 0x55d   : > { %8194 = vmatmul.mubr.msk.bf16.gmra.mrb[40].mxu1 %vm5013_vm0, %v5266_v6 }
 0x5a4   : > { %v8159_v49 = vpop.f32.mrb[12].mxu1 }
 0x5a5   : > { %v5201_v39 = vadd.f32 %v8159_v49, %v13816_v33  ;;  %v5192_v57 = vpop.f32.mrb[13].mxu1 }
 0x5a6   : > { %v5193_v58 = vadd.f32 %v13816_v33, %v5192_v57  ;;  %v8160_v35 = vpop.f32.mrb[14].mxu1 }
 0x5a7   : > { %v5204_v29 = vadd.f32 %v8160_v35, %v13816_v33  ;;  %v5195_v17 = vpop.f32.mrb[15].mxu1  ;;  %v5249_v59 = vmax.f32 %v5201_v39, 0.0  ;;  %v15174_v35 = vld [vmem:[#allocation4_spill] sm:$0xff] }
 0x5a8   : > { %v5196_v36 = vadd.f32 %v13816_v33, %v5195_v17  ;;  %v5247_v2 = vmax.f32 %v5193_v58, 0.0 }
 0x5a9   : > { %v5250_v60 = vmax.f32 %v5204_v29, 0.0 }
 0x5aa   : > { %v5248_v62 = vmax.f32 %v5196_v36, 0.0  ;;  %v15175_v36 = vld [vmem:[#allocation50_spill] sm:$0xff] }
 0x5ab   : > { %v5268_v40 = vpack.c.bf16 %v5250_v60, %v5249_v59 }
 0x5ac   : > { %v5267_v43 = vpack.c.bf16 %v5248_v62, %v5247_v2 }
 0x5ae   : > { %8197 = vmatprep.mubr.msk.bf16.mxu1 %vm5013_vm0, %v5267_v43 }
 0x5af   : > { %8198 = vmatmul.mubr.msk.bf16.gmra.mrb[44].mxu1 %vm5013_vm0, %v5268_v40 }
 0x5f7   : > { %v8163_v1 = vpop.f32.mrb[16].mxu1 }
 0x5f8   : > { %v5217_v9 = vadd.f32 %v8163_v1, %v13816_v33  ;;  %v5208_v31 = vpop.f32.mrb[17].mxu1 }
 0x5f9   : > { %v5209_v63 = vadd.f32 %v13816_v33, %v5208_v31  ;;  %v8164_v47 = vpop.f32.mrb[18].mxu1 }
 0x5fa   : > { %v5220_v41 = vadd.f32 %v8164_v47, %v13816_v33  ;;  %v5211_v55 = vpop.f32.mrb[19].mxu1  ;;  %v5253_v56 = vmax.f32 %v5217_v9, 0.0 }
 0x5fb   : > { %v5212_v61 = vadd.f32 %v13816_v33, %v5211_v55  ;;  %v5251_v19 = vmax.f32 %v5209_v63, 0.0  ;;  %v15176_v55 = vld [vmem:[#allocation55_spill] sm:$0xff] }
 0x5fc   : > { %v5254_v14 = vmax.f32 %v5220_v41, 0.0 }
 0x5fd   : > { %v5252_v3 = vmax.f32 %v5212_v61, 0.0 }
 0x5fe   : > { %v5270_v48 = vpack.c.bf16 %v5254_v14, %v5253_v56  ;;  %v15177_v14 = vld [vmem:[#allocation6_spill] sm:$0xff] }
 0x5ff   : > { %v5269_v27 = vpack.c.bf16 %v5252_v3, %v5251_v19  ;;  %v8175_v22 = vpop.f32.mrb[20].mxu1 }
 0x600   : > { %v5401_v28 = vadd.f32 %v8175_v22, %v13921_v21  ;;  %v5392_v15 = vpop.f32.mrb[21].mxu1 }
 0x601   : > { %8201 = vmatprep.mubr.msk.bf16.mxu1 %vm5013_vm0, %v5269_v27  ;;  %v5393_v45 = vadd.f32 %v13921_v21, %v5392_v15  ;;  %v8176_v33 = vpop.f32.mrb[22].mxu1 }
 0x602   : > { %8202 = vmatmul.mubr.msk.bf16.gmra.mrb[48].mxu1 %vm5013_vm0, %v5270_v48  ;;  %v5404_v53 = vadd.f32 %v8176_v33, %v13921_v21  ;;  %v5395_v25 = vpop.f32.mrb[23].mxu1  ;;  %v5521_v32 = vmax.f32 %v5401_v28, 0.0 }
 0x603   : > { %8261 = vmatprep.mubr.bf16.mxu1 %v15171_v46  ;;  %v5396_v0 = vadd.f32 %v13921_v21, %v5395_v25  ;;  %v5519_v34 = vmax.f32 %v5393_v45, 0.0 }
 0x604   : > { %v5522_v30 = vmax.f32 %v5404_v53, 0.0 }
 0x605   : > { %v5520_v37 = vmax.f32 %v5396_v0, 0.0  ;;  %v15178_v0 = vld [vmem:[#allocation51_spill] sm:$0xff] }
 0x606   : > { %v5552_v26 = vpack.c.bf16 %v5522_v30, %v5521_v32 }
 0x607   : > { %v5551_v10 = vpack.c.bf16 %v5520_v37, %v5519_v34  ;;  %v8179_v24 = vpop.f32.mrb[24].mxu1  ;;  %v15179_v34 = vld [vmem:[#allocation11_spill] sm:$0xff] }
 0x608   : > { %v5417_v16 = vadd.f32 %v8179_v24, %v13921_v21  ;;  %v5408_v11 = vpop.f32.mrb[25].mxu1 }
 0x609   : > { %v5409_v51 = vadd.f32 %v13921_v21, %v5408_v11  ;;  %v8180_v5 = vpop.f32.mrb[26].mxu1  ;;  %8213 = vmatprep.mubr.msk.bf16.mxu0 %vm5013_vm0, %v5551_v10 }
 0x60a   : > { %8262 = vmatmul.mubr.bf16.vlgmr.msra.gmra.mrb[52].mxu1 %v15172_v8  ;;  %v5420_v52 = vadd.f32 %v8180_v5, %v13921_v21  ;;  %v5411_v6 = vpop.f32.mrb[27].mxu1  ;;  %8214 = vmatmul.mubr.msk.bf16.vlgmr.msra.gmra.mrb[44].mxu0 %vm5013_vm0, %v5552_v26  ;;  %v5525_v23 = vmax.f32 %v5417_v16, 0.0  ;;  %v15180_v5 = vld [vmem:[#allocation16_spill] sm:$0xff]  ;;  %v15181_v8 = vld [vmem:[#allocation49_spill] sm:$0xff] }
 0x60b   : > { %8265 = vmatprep.mubr.bf16.mxu1 %v15173_v38  ;;  %v5412_v18 = vadd.f32 %v13921_v21, %v5411_v6  ;;  %v5523_v54 = vmax.f32 %v5409_v51, 0.0  ;;  %v15183_v6 = vld [vmem:[#allocation19_spill] sm:$0xff] }
 0x60c   : > { %v5526_v20 = vmax.f32 %v5420_v52, 0.0  ;;  %v15182_v52 = vld [vmem:[#allocation21_spill] sm:$0xff] }
 0x60d   : > { %v5524_v4 = vmax.f32 %v5412_v18, 0.0 }
 0x60e   : > { %v5554_v42 = vpack.c.bf16 %v5526_v20, %v5525_v23 }
 0x60f   : > { %v5553_v7 = vpack.c.bf16 %v5524_v4, %v5523_v54  ;;  %v8183_v50 = vpop.f32.mrb[28].mxu1 }
 0x610   : > { %v5433_v49 = vadd.f32 %v8183_v50, %v13921_v21  ;;  %v5424_v39 = vpop.f32.mrb[29].mxu1 }
 0x611   : > { %8217 = vmatprep.mubr.msk.bf16.mxu0 %vm5013_vm0, %v5553_v7  ;;  %v5425_v57 = vadd.f32 %v13921_v21, %v5424_v39  ;;  %v8184_v58 = vpop.f32.mrb[30].mxu1 }
 0x612   : > { %8266 = vmatmul.mubr.bf16.gmra.mrb[56].mxu1 %v15174_v35  ;;  %8218 = vmatmul.mubr.msk.bf16.gmra.mrb[48].mxu0 %vm5013_vm0, %v5554_v42  ;;  %v5436_v29 = vadd.f32 %v8184_v58, %v13921_v21  ;;  %v5427_v17 = vpop.f32.mrb[31].mxu1  ;;  %v5529_v60 = vmax.f32 %v5433_v49, 0.0 }
 0x613   : > { %8269 = vmatprep.mubr.bf16.mxu1 %v15175_v36  ;;  %v5428_v59 = vadd.f32 %v13921_v21, %v5427_v17  ;;  %v5527_v62 = vmax.f32 %v5425_v57, 0.0 }
 0x614   : > { %v5530_v2 = vmax.f32 %v5436_v29, 0.0  ;;  %v8710_v29 = vld [vmem:[%s14474_s11] sm:$0xff]  }
 0x615   : > { %v5528_v40 = vmax.f32 %v5428_v59, 0.0  ;;  %8293 = vmatprep.subr.bf16.mxu1 %v8710_v29 }
 0x616   : > { %v5556_v43 = vpack.c.bf16 %v5530_v2, %v5529_v60  ;;  %8294 = vmatpush3.bf16.msra.mxu1 %v8710_v29 }
 0x617   : > { %v5555_v1 = vpack.c.bf16 %v5528_v40, %v5527_v62  ;;  %v8187_v9 = vpop.f32.mrb[32].mxu1 }
 0x618   : > { %v5449_v31 = vadd.f32 %v8187_v9, %v13921_v21  ;;  %v5440_v63 = vpop.f32.mrb[33].mxu1 }
 0x619   : > { %8221 = vmatprep.mubr.msk.bf16.mxu0 %vm5013_vm0, %v5555_v1  ;;  %v5441_v47 = vadd.f32 %v13921_v21, %v5440_v63  ;;  %v8188_v41 = vpop.f32.mrb[34].mxu1 }
 0x61a   : > { %8270 = vmatmul.mubr.bf16.gmra.mrb[60].mxu1 %v15176_v55  ;;  %8222 = vmatmul.mubr.msk.bf16.gmra.mrb[52].mxu0 %vm5013_vm0, %v5556_v43  ;;  %v5452_v61 = vadd.f32 %v8188_v41, %v13921_v21  ;;  %v5443_v56 = vpop.f32.mrb[35].mxu1  ;;  %v5533_v3 = vmax.f32 %v5449_v31, 0.0 }
 0x61b   : > { %8273 = vmatprep.mubr.bf16.mxu1 %v15177_v14  ;;  %v5444_v19 = vadd.f32 %v13921_v21, %v5443_v56  ;;  %v5531_v27 = vmax.f32 %v5441_v47, 0.0 }
 0x61c   : > { %v5534_v48 = vmax.f32 %v5452_v61, 0.0 }
 0x61d   : > { %v5532_v22 = vmax.f32 %v5444_v19, 0.0 }
 0x61e   : > { %v5558_v28 = vpack.c.bf16 %v5534_v48, %v5533_v3 }
 0x61f   : > { %v5557_v15 = vpack.c.bf16 %v5532_v22, %v5531_v27  ;;  %v8191_v45 = vpop.f32.mrb[36].mxu1 }
 0x620   : > { %v5465_v33 = vadd.f32 %v8191_v45, %v13921_v21  ;;  %v5456_v53 = vpop.f32.mrb[37].mxu1 }
 0x621   : > { %8225 = vmatprep.mubr.msk.bf16.mxu0 %vm5013_vm0, %v5557_v15  ;;  %v5457_v25 = vadd.f32 %v13921_v21, %v5456_v53  ;;  %v8192_v46 = vpop.f32.mrb[38].mxu1 }
 0x622   : > { %8274 = vmatmul.mubr.bf16.gmra.mrb[64].mxu1 %v15178_v0  ;;  %8226 = vmatmul.mubr.msk.bf16.gmra.mrb[56].mxu0 %vm5013_vm0, %v5558_v28  ;;  %v5468_v32 = vadd.f32 %v8192_v46, %v13921_v21  ;;  %v5459_v30 = vpop.f32.mrb[39].mxu1  ;;  %v5537_v26 = vmax.f32 %v5465_v33, 0.0  ;;  %v14002_v33 = vld [vmem:[%s14473_s10] ss:$0 sm:$0xff] }
 0x623   : > { %8277 = vmatprep.mubr.bf16.mxu1 %v15179_v34  ;;  %v5460_v37 = vadd.f32 %v13921_v21, %v5459_v30  ;;  %v5535_v24 = vmax.f32 %v5457_v25, 0.0 }
 0x624   : > { %v5538_v10 = vmax.f32 %v5468_v32, 0.0 }
 0x625   : > { %v5536_v16 = vmax.f32 %v5460_v37, 0.0 }
 0x626   : > { %v5560_v11 = vpack.c.bf16 %v5538_v10, %v5537_v26 }
 0x627   : > { %v5559_v51 = vpack.c.bf16 %v5536_v16, %v5535_v24 }
 0x629   : > { %8229 = vmatprep.mubr.msk.bf16.mxu0 %vm5013_vm0, %v5559_v51 }
 0x62a   : > { %8278 = vmatmul.mubr.bf16.gmra.mrb[68].mxu1 %v15180_v5  ;;  %8230 = vmatmul.mubr.msk.bf16.gmra.mrb[60].mxu0 %vm5013_vm0, %v5560_v11 }
 0x62b   : > { %8281 = vmatprep.mubr.bf16.mxu1 %v15181_v8 }
 0x630   : > { %v8195_v38 = vpop.f32.mrb[40].mxu1 }
 0x631   : > { %v5481_v18 = vadd.f32 %v8195_v38, %v13921_v21  ;;  %v5472_v23 = vpop.f32.mrb[41].mxu1 }
 0x632   : > { %8282 = vmatmul.mubr.bf16.gmra.mrb[72].mxu1 %v15182_v52  ;;  %v5473_v20 = vadd.f32 %v13921_v21, %v5472_v23  ;;  %v8196_v54 = vpop.f32.mrb[42].mxu1 }
 0x633   : > { %8285 = vmatprep.mubr.bf16.mxu1 %v15183_v6  ;;  %v5484_v4 = vadd.f32 %v8196_v54, %v13921_v21  ;;  %v5475_v42 = vpop.f32.mrb[43].mxu1  ;;  %v5541_v50 = vmax.f32 %v5481_v18, 0.0 }
 0x634   : > { %v5476_v7 = vadd.f32 %v13921_v21, %v5475_v42  ;;  %v5539_v39 = vmax.f32 %v5473_v20, 0.0 }
 0x635   : > { %v5542_v49 = vmax.f32 %v5484_v4, 0.0 }
 0x636   : > { %v5540_v57 = vmax.f32 %v5476_v7, 0.0 }
 0x637   : > { %v5562_v58 = vpack.c.bf16 %v5542_v49, %v5541_v50 }
 0x638   : > { %v5561_v35 = vpack.c.bf16 %v5540_v57, %v5539_v39 }
 0x63a   : > { %8286 = vmatmul.mubr.bf16.gmra.mrb[76].mxu1 %v13553_v13  ;;  %8233 = vmatprep.mubr.msk.bf16.mxu0 %vm5013_vm0, %v5561_v35  ;;  %v8711_v13 = vld [vmem:[%s14474_s11 + $0x8] sm:$0xff]  }
 0x63b   : > { %8289 = vmatprep.mubr.bf16.mxu1 %v13725_v44  ;;  %8234 = vmatmul.mubr.msk.bf16.gmra.mrb[64].mxu0 %vm5013_vm0, %v5562_v58  ;;  %v8712_v44 = vld [vmem:[%s14474_s11 + $0x10] sm:$0xff]  }
 0x63c   : > { %8295 = vmatprep.subr.bf16.mxu1 %v8711_v13 }
 0x63d   : > { %8296 = vmatpush3.bf16.msra.mxu1 %v8711_v13 }
 0x63e   : > { %8297 = vmatprep.subr.bf16.mxu1 %v8712_v44 }
 0x641   : > { %8298 = vmatpush3.bf16.msra.mxu1 %v8712_v44 }
 0x642   : > { %8290 = vmatmul.mubr.bf16.gmra.mrb[80].mxu1 %v13774_v12  ;;  %v8713_v12 = vld [vmem:[%s14474_s11 + $0x18] sm:$0xff]  }
 0x643   : > { %8299 = vmatprep.subr.bf16.mxu1 %v8713_v12 }
 0x645   : > { %8300 = vmatpush3.bf16.msra.mxu1 %v8713_v12 }
 0x682   : > { %v8199_v17 = vpop.f32.mrb[44].mxu1 }
 0x683   : > { %v5497_v36 = vadd.f32 %v8199_v17, %v13921_v21  ;;  %v5488_v59 = vpop.f32.mrb[45].mxu1 }
 0x684   : > { %v5489_v60 = vadd.f32 %v13921_v21, %v5488_v59  ;;  %v8200_v2 = vpop.f32.mrb[46].mxu1 }
 0x685   : > { %v5500_v62 = vadd.f32 %v8200_v2, %v13921_v21  ;;  %v5491_v40 = vpop.f32.mrb[47].mxu1  ;;  %v5545_v1 = vmax.f32 %v5497_v36, 0.0 }
 0x686   : > { %v5492_v43 = vadd.f32 %v13921_v21, %v5491_v40  ;;  %v5543_v31 = vmax.f32 %v5489_v60, 0.0 }
 0x687   : > { %v5546_v9 = vmax.f32 %v5500_v62, 0.0 }
 0x688   : > { %v5544_v63 = vmax.f32 %v5492_v43, 0.0 }
 0x689   : > { %v5564_v47 = vpack.c.bf16 %v5546_v9, %v5545_v1 }
 0x68a   : > { %v5563_v41 = vpack.c.bf16 %v5544_v63, %v5543_v31 }
 0x68c   : > { %8237 = vmatprep.mubr.msk.bf16.mxu0 %vm5013_vm0, %v5563_v41 }
 0x68d   : > { %8238 = vmatmul.mubr.msk.bf16.gmra.mrb[68].mxu0 %vm5013_vm0, %v5564_v47 }
 0x6d5   : > { %v8203_v55 = vpop.f32.mrb[48].mxu1 }
 0x6d6   : > { %v5513_v61 = vadd.f32 %v8203_v55, %v13921_v21  ;;  %v5504_v56 = vpop.f32.mrb[49].mxu1 }
 0x6d7   : > { %v5505_v14 = vadd.f32 %v13921_v21, %v5504_v56  ;;  %v8204_v19 = vpop.f32.mrb[50].mxu1 }
 0x6d8   : > { %v5516_v3 = vadd.f32 %v8204_v19, %v13921_v21  ;;  %v5507_v48 = vpop.f32.mrb[51].mxu1  ;;  %v5549_v22 = vmax.f32 %v5513_v61, 0.0 }
 0x6d9   : > { %v5508_v27 = vadd.f32 %v13921_v21, %v5507_v48  ;;  %v5547_v15 = vmax.f32 %v5505_v14, 0.0 }
 0x6da   : > { %v5550_v28 = vmax.f32 %v5516_v3, 0.0 }
 0x6db   : > { %v5548_v45 = vmax.f32 %v5508_v27, 0.0 }
 0x6dc   : > { %v5566_v53 = vpack.c.bf16 %v5550_v28, %v5549_v22 }
 0x6dd   : > { %v5565_v25 = vpack.c.bf16 %v5548_v45, %v5547_v15  ;;  %v8215_v46 = vpop.f32.mrb[44].mxu0 }
 0x6de   : > { %v5697_v0 = vadd.f32 %v8215_v46, %v14002_v33  ;;  %v5688_v32 = vpop.f32.mrb[45].mxu0 }
 0x6df   : > { %8241 = vmatprep.mubr.msk.bf16.mxu0 %vm5013_vm0, %v5565_v25  ;;  %v5689_v30 = vadd.f32 %v14002_v33, %v5688_v32  ;;  %v8216_v21 = vpop.f32.mrb[46].mxu0 }
 0x6e0   : > { %8242 = vmatmul.mubr.msk.bf16.gmra.mrb[72].mxu0 %vm5013_vm0, %v5566_v53  ;;  %v5700_v34 = vadd.f32 %v8216_v21, %v14002_v33  ;;  %v5691_v37 = vpop.f32.mrb[47].mxu0  ;;  %v5817_v10 = vmax.f32 %v5697_v0, 0.0 }
 0x6e1   : > { %v5692_v26 = vadd.f32 %v14002_v33, %v5691_v37  ;;  %v5815_v16 = vmax.f32 %v5689_v30, 0.0 }
 0x6e2   : > { %v5818_v24 = vmax.f32 %v5700_v34, 0.0 }
 0x6e3   : > { %v5816_v11 = vmax.f32 %v5692_v26, 0.0 }
 0x6e4   : > { %v5848_v51 = vpack.c.bf16 %v5818_v24, %v5817_v10 }
 0x6e5   : > { %v5847_v5 = vpack.c.bf16 %v5816_v11, %v5815_v16  ;;  %v8219_v8 = vpop.f32.mrb[48].mxu0 }
 0x6e6   : > { %v5713_v52 = vadd.f32 %v8219_v8, %v14002_v33  ;;  %v5704_v6 = vpop.f32.mrb[49].mxu0 }
 0x6e7   : > { %v5705_v38 = vadd.f32 %v14002_v33, %v5704_v6  ;;  %v8220_v18 = vpop.f32.mrb[50].mxu0  ;;  %8301 = vmatprep.mubr.msk.bf16.mxu1 %vm5013_vm0, %v5847_v5 }
 0x6e8   : > { %v5716_v23 = vadd.f32 %v8220_v18, %v14002_v33  ;;  %v5707_v20 = vpop.f32.mrb[51].mxu0  ;;  %8302 = vmatmul.mubr.msk.bf16.vlgmr.msra.gmra.mrb[52].mxu1 %vm5013_vm0, %v5848_v51  ;;  %v5821_v4 = vmax.f32 %v5713_v52, 0.0 }
 0x6e9   : > { %v5708_v54 = vadd.f32 %v14002_v33, %v5707_v20  ;;  %v5819_v7 = vmax.f32 %v5705_v38, 0.0 }
 0x6ea   : > { %v5822_v42 = vmax.f32 %v5716_v23, 0.0 }
 0x6eb   : > { %v5820_v50 = vmax.f32 %v5708_v54, 0.0  ;;  %v8714_v54 = vld [vmem:[%s14477_s14] sm:$0xff]  }
 0x6ec   : > { %v5850_v49 = vpack.c.bf16 %v5822_v42, %v5821_v4  ;;  %v8715_v4 = vld [vmem:[%s14477_s14 + $0x8] sm:$0xff]   ;;  %8333 = vmatprep.subr.bf16.mxu0 %v8714_v54  ;;  %v8716_v42 = vld [vmem:[%s14477_s14 + $0x10] sm:$0xff]  }
 0x6ed   : > { %v5849_v39 = vpack.c.bf16 %v5820_v50, %v5819_v7  ;;  %v8223_v57 = vpop.f32.mrb[52].mxu0  ;;  %8334 = vmatpush3.bf16.msra.mxu0 %v8714_v54  ;;  %v8717_v7 = vld [vmem:[%s14477_s14 + $0x18] sm:$0xff]  }
 0x6ee   : > { %v5729_v58 = vadd.f32 %v8223_v57, %v14002_v33  ;;  %v5720_v35 = vpop.f32.mrb[53].mxu0  ;;  %8335 = vmatprep.subr.bf16.mxu0 %v8715_v4 }
 0x6ef   : > { %8305 = vmatprep.mubr.msk.bf16.mxu1 %vm5013_vm0, %v5849_v39  ;;  %v5721_v29 = vadd.f32 %v14002_v33, %v5720_v35  ;;  %v8224_v13 = vpop.f32.mrb[54].mxu0 }
 0x6f0   : > { %8306 = vmatmul.mubr.msk.bf16.gmra.mrb[56].mxu1 %vm5013_vm0, %v5850_v49  ;;  %v5732_v44 = vadd.f32 %v8224_v13, %v14002_v33  ;;  %v5723_v12 = vpop.f32.mrb[55].mxu0  ;;  %v5825_v36 = vmax.f32 %v5729_v58, 0.0 }
 0x6f1   : > { %v5724_v17 = vadd.f32 %v14002_v33, %v5723_v12  ;;  %v5823_v60 = vmax.f32 %v5721_v29, 0.0  ;;  %8336 = vmatpush3.bf16.msra.mxu0 %v8715_v4 }
 0x6f2   : > { %v5826_v59 = vmax.f32 %v5732_v44, 0.0  ;;  %8337 = vmatprep.subr.bf16.mxu0 %v8716_v42 }
 0x6f3   : > { %v5824_v2 = vmax.f32 %v5724_v17, 0.0 }
 0x6f4   : > { %v5852_v62 = vpack.c.bf16 %v5826_v59, %v5825_v36 }
 0x6f5   : > { %v5851_v40 = vpack.c.bf16 %v5824_v2, %v5823_v60  ;;  %v8227_v43 = vpop.f32.mrb[56].mxu0  ;;  %8338 = vmatpush3.bf16.msra.mxu0 %v8716_v42 }
 0x6f6   : > { %v5745_v1 = vadd.f32 %v8227_v43, %v14002_v33  ;;  %v5736_v9 = vpop.f32.mrb[57].mxu0  ;;  %8339 = vmatprep.subr.bf16.mxu0 %v8717_v7 }
 0x6f7   : > { %8309 = vmatprep.mubr.msk.bf16.mxu1 %vm5013_vm0, %v5851_v40  ;;  %v5737_v31 = vadd.f32 %v14002_v33, %v5736_v9  ;;  %v8228_v63 = vpop.f32.mrb[58].mxu0 }
 0x6f8   : > { %8310 = vmatmul.mubr.msk.bf16.gmra.mrb[60].mxu1 %vm5013_vm0, %v5852_v62  ;;  %v5748_v47 = vadd.f32 %v8228_v63, %v14002_v33  ;;  %v5739_v41 = vpop.f32.mrb[59].mxu0  ;;  %v5829_v61 = vmax.f32 %v5745_v1, 0.0 }
 0x6f9   : > { %v5740_v55 = vadd.f32 %v14002_v33, %v5739_v41  ;;  %v5827_v14 = vmax.f32 %v5737_v31, 0.0  ;;  %8340 = vmatpush3.bf16.msra.mxu0 %v8717_v7 }
 0x6fa   : > { %v5830_v56 = vmax.f32 %v5748_v47, 0.0 }
 0x6fb   : > { %v5828_v19 = vmax.f32 %v5740_v55, 0.0 }
 0x6fc   : > { %v5854_v3 = vpack.c.bf16 %v5830_v56, %v5829_v61  ;;  %v14067_v56 = vld [vmem:[%s14476_s13] ss:$0 sm:$0xff] }
 0x6fd   : > { %v5853_v48 = vpack.c.bf16 %v5828_v19, %v5827_v14  ;;  %v8231_v27 = vpop.f32.mrb[60].mxu0 }
 0x6fe   : > { %v5761_v22 = vadd.f32 %v8231_v27, %v14002_v33  ;;  %v5752_v28 = vpop.f32.mrb[61].mxu0 }
 0x6ff   : > { %8313 = vmatprep.mubr.msk.bf16.mxu1 %vm5013_vm0, %v5853_v48  ;;  %v5753_v15 = vadd.f32 %v14002_v33, %v5752_v28  ;;  %v8232_v45 = vpop.f32.mrb[62].mxu0 }
 0x700   : > { %8314 = vmatmul.mubr.msk.bf16.gmra.mrb[64].mxu1 %vm5013_vm0, %v5854_v3  ;;  %v5764_v53 = vadd.f32 %v8232_v45, %v14002_v33  ;;  %v5755_v25 = vpop.f32.mrb[63].mxu0  ;;  %v5833_v0 = vmax.f32 %v5761_v22, 0.0 }
 0x701   : > { %v5756_v46 = vadd.f32 %v14002_v33, %v5755_v25  ;;  %v5831_v30 = vmax.f32 %v5753_v15, 0.0 }
 0x702   : > { %v5834_v32 = vmax.f32 %v5764_v53, 0.0 }
 0x703   : > { %v5832_v21 = vmax.f32 %v5756_v46, 0.0 }
 0x704   : > { %v5856_v34 = vpack.c.bf16 %v5834_v32, %v5833_v0 }
 0x705   : > { %v5855_v37 = vpack.c.bf16 %v5832_v21, %v5831_v30 }
 0x707   : > { %8317 = vmatprep.mubr.msk.bf16.mxu1 %vm5013_vm0, %v5855_v37 }
 0x708   : > { %8318 = vmatmul.mubr.msk.bf16.gmra.mrb[68].mxu1 %vm5013_vm0, %v5856_v34 }
 0x70e   : > { %v8235_v26 = vpop.f32.mrb[64].mxu0 }
 0x70f   : > { %v5777_v10 = vadd.f32 %v8235_v26, %v14002_v33  ;;  %v5768_v24 = vpop.f32.mrb[65].mxu0 }
 0x710   : > { %v5769_v16 = vadd.f32 %v14002_v33, %v5768_v24  ;;  %v8236_v11 = vpop.f32.mrb[66].mxu0 }
 0x711   : > { %v5780_v51 = vadd.f32 %v8236_v11, %v14002_v33  ;;  %v5771_v5 = vpop.f32.mrb[67].mxu0  ;;  %v5837_v52 = vmax.f32 %v5777_v10, 0.0 }
 0x712   : > { %v5772_v8 = vadd.f32 %v14002_v33, %v5771_v5  ;;  %v5835_v38 = vmax.f32 %v5769_v16, 0.0 }
 0x713   : > { %v5838_v6 = vmax.f32 %v5780_v51, 0.0 }
 0x714   : > { %v5836_v18 = vmax.f32 %v5772_v8, 0.0 }
 0x715   : > { %v5858_v23 = vpack.c.bf16 %v5838_v6, %v5837_v52 }
 0x716   : > { %v5857_v20 = vpack.c.bf16 %v5836_v18, %v5835_v38 }
 0x718   : > { %8321 = vmatprep.mubr.msk.bf16.mxu1 %vm5013_vm0, %v5857_v20 }
 0x719   : > { %8322 = vmatmul.mubr.msk.bf16.gmra.mrb[72].mxu1 %vm5013_vm0, %v5858_v23 }
 0x760   : > { %v8239_v50 = vpop.f32.mrb[68].mxu0 }
 0x761   : > { %v5793_v49 = vadd.f32 %v8239_v50, %v14002_v33  ;;  %v5784_v39 = vpop.f32.mrb[69].mxu0 }
 0x762   : > { %v5785_v57 = vadd.f32 %v14002_v33, %v5784_v39  ;;  %v8240_v58 = vpop.f32.mrb[70].mxu0 }
 0x763   : > { %v5796_v35 = vadd.f32 %v8240_v58, %v14002_v33  ;;  %v5787_v29 = vpop.f32.mrb[71].mxu0  ;;  %v5841_v44 = vmax.f32 %v5793_v49, 0.0 }
 0x764   : > { %v5788_v13 = vadd.f32 %v14002_v33, %v5787_v29  ;;  %v5839_v17 = vmax.f32 %v5785_v57, 0.0 }
 0x765   : > { %v5842_v12 = vmax.f32 %v5796_v35, 0.0 }
 0x766   : > { %v5840_v36 = vmax.f32 %v5788_v13, 0.0 }
 0x767   : > { %v5860_v59 = vpack.c.bf16 %v5842_v12, %v5841_v44 }
 0x768   : > { %v5859_v60 = vpack.c.bf16 %v5840_v36, %v5839_v17 }
 0x76a   : > { %8325 = vmatprep.mubr.msk.bf16.mxu1 %vm5013_vm0, %v5859_v60 }
 0x76b   : > { %8326 = vmatmul.mubr.msk.bf16.gmra.mrb[76].mxu1 %vm5013_vm0, %v5860_v59 }
 0x7b3   : > { %v8243_v2 = vpop.f32.mrb[72].mxu0 }
 0x7b4   : > { %v5809_v62 = vadd.f32 %v8243_v2, %v14002_v33  ;;  %v5800_v40 = vpop.f32.mrb[73].mxu0 }
 0x7b5   : > { %v5801_v43 = vadd.f32 %v14002_v33, %v5800_v40  ;;  %v8244_v1 = vpop.f32.mrb[74].mxu0 }
 0x7b6   : > { %v5812_v9 = vadd.f32 %v8244_v1, %v14002_v33  ;;  %v5803_v31 = vpop.f32.mrb[75].mxu0  ;;  %v5845_v47 = vmax.f32 %v5809_v62, 0.0 }
 0x7b7   : > { %v5804_v63 = vadd.f32 %v14002_v33, %v5803_v31  ;;  %v5843_v55 = vmax.f32 %v5801_v43, 0.0 }
 0x7b8   : > { %v5846_v41 = vmax.f32 %v5812_v9, 0.0 }
 0x7b9   : > { %v5844_v61 = vmax.f32 %v5804_v63, 0.0 }
 0x7ba   : > { %v5862_v14 = vpack.c.bf16 %v5846_v41, %v5845_v47 }
 0x7bb   : > { %v5861_v19 = vpack.c.bf16 %v5844_v61, %v5843_v55  ;;  %v8303_v3 = vpop.f32.mrb[52].mxu1 }
 0x7bc   : > { %v6338_v48 = vadd.f32 %v8303_v3, %v14067_v56  ;;  %v6202_v27 = vpop.f32.mrb[53].mxu1 }
 0x7bd   : > { %8329 = vmatprep.mubr.msk.bf16.mxu1 %vm5013_vm0, %v5861_v19  ;;  %v6336_v22 = vadd.f32 %v14067_v56, %v6202_v27  ;;  %v8304_v33 = vpop.f32.mrb[54].mxu1 }
 0x7be   : > { %8330 = vmatmul.mubr.msk.bf16.gmra.mrb[80].mxu1 %vm5013_vm0, %v5862_v14  ;;  %v6339_v28 = vadd.f32 %v8304_v33, %v14067_v56  ;;  %v6205_v15 = vpop.f32.mrb[55].mxu1  ;;  %v6370_v53 = vmax.f32 %v6338_v48, 0.0 }
 0x7bf   : > { %v6337_v45 = vadd.f32 %v14067_v56, %v6205_v15  ;;  %v6368_v46 = vmax.f32 %v6336_v22, 0.0 }
 0x7c0   : > { %v6371_v25 = vmax.f32 %v6339_v28, 0.0 }
 0x7c1   : > { %v6369_v0 = vmax.f32 %v6337_v45, 0.0 }
 0x7c2   : > { %v6401_v32 = vpack.c.bf16 %v6371_v25, %v6370_v53 }
 0x7c3   : > { %v6400_v30 = vpack.c.bf16 %v6369_v0, %v6368_v46  ;;  %v8307_v21 = vpop.f32.mrb[56].mxu1 }
 0x7c4   : > { %v6342_v34 = vadd.f32 %v8307_v21, %v14067_v56  ;;  %v6218_v37 = vpop.f32.mrb[57].mxu1 }
 0x7c5   : > { %v6340_v26 = vadd.f32 %v14067_v56, %v6218_v37  ;;  %v8308_v10 = vpop.f32.mrb[58].mxu1  ;;  %8341 = vmatprep.mubr.msk.bf16.mxu0 %vm5013_vm0, %v6400_v30 }
 0x7c6   : > { %v6343_v24 = vadd.f32 %v8308_v10, %v14067_v56  ;;  %v6221_v16 = vpop.f32.mrb[59].mxu1  ;;  %8342 = vmatmul.mubr.msk.bf16.vlgmr.msra.gmra.mrb[76].mxu0 %vm5013_vm0, %v6401_v32  ;;  %v6374_v51 = vmax.f32 %v6342_v34, 0.0 }
 0x7c7   : > { %v6341_v11 = vadd.f32 %v14067_v56, %v6221_v16  ;;  %v6372_v8 = vmax.f32 %v6340_v26, 0.0 }
 0x7c8   : > { %v6375_v5 = vmax.f32 %v6343_v24, 0.0 }
 0x7c9   : > { %v6373_v52 = vmax.f32 %v6341_v11, 0.0  ;;  %v8718_v11 = vld [vmem:[%s14479_s16] sm:$0xff]  }
 0x7ca   : > { %v6403_v6 = vpack.c.bf16 %v6375_v5, %v6374_v51  ;;  %v8719_v51 = vld [vmem:[%s14479_s16 + $0x8] sm:$0xff]   ;;  %8373 = vmatprep.subr.bf16.mxu0 %v8718_v11  ;;  %v8720_v5 = vld [vmem:[%s14479_s16 + $0x10] sm:$0xff]  }
 0x7cb   : > { %v6402_v38 = vpack.c.bf16 %v6373_v52, %v6372_v8  ;;  %v8311_v18 = vpop.f32.mrb[60].mxu1  ;;  %8374 = vmatpush3.bf16.msra.mxu0 %v8718_v11  ;;  %v8721_v8 = vld [vmem:[%s14479_s16 + $0x18] sm:$0xff]  }
 0x7cc   : > { %v6346_v23 = vadd.f32 %v8311_v18, %v14067_v56  ;;  %v6234_v20 = vpop.f32.mrb[61].mxu1  ;;  %8375 = vmatprep.subr.bf16.mxu0 %v8719_v51 }
 0x7cd   : > { %8345 = vmatprep.mubr.msk.bf16.mxu0 %vm5013_vm0, %v6402_v38  ;;  %v6344_v54 = vadd.f32 %v14067_v56, %v6234_v20  ;;  %v8312_v4 = vpop.f32.mrb[62].mxu1 }
 0x7ce   : > { %8346 = vmatmul.mubr.msk.bf16.gmra.mrb[80].mxu0 %vm5013_vm0, %v6403_v6  ;;  %v6347_v42 = vadd.f32 %v8312_v4, %v14067_v56  ;;  %v6237_v7 = vpop.f32.mrb[63].mxu1  ;;  %v6378_v49 = vmax.f32 %v6346_v23, 0.0 }
 0x7cf   : > { %v6345_v50 = vadd.f32 %v14067_v56, %v6237_v7  ;;  %v6376_v57 = vmax.f32 %v6344_v54, 0.0  ;;  %8376 = vmatpush3.bf16.msra.mxu0 %v8719_v51 }
 0x7d0   : > { %v6379_v39 = vmax.f32 %v6347_v42, 0.0  ;;  %8377 = vmatprep.subr.bf16.mxu0 %v8720_v5 }
 0x7d1   : > { %v6377_v58 = vmax.f32 %v6345_v50, 0.0 }
 0x7d2   : > { %v6405_v35 = vpack.c.bf16 %v6379_v39, %v6378_v49 }
 0x7d3   : > { %v6404_v29 = vpack.c.bf16 %v6377_v58, %v6376_v57  ;;  %v8315_v13 = vpop.f32.mrb[64].mxu1  ;;  %8378 = vmatpush3.bf16.msra.mxu0 %v8720_v5 }
 0x7d4   : > { %v6350_v44 = vadd.f32 %v8315_v13, %v14067_v56  ;;  %v6250_v12 = vpop.f32.mrb[65].mxu1  ;;  %8379 = vmatprep.subr.bf16.mxu0 %v8721_v8 }
 0x7d5   : > { %8349 = vmatprep.mubr.msk.bf16.mxu0 %vm5013_vm0, %v6404_v29  ;;  %v6348_v17 = vadd.f32 %v14067_v56, %v6250_v12  ;;  %v8316_v36 = vpop.f32.mrb[66].mxu1 }
 0x7d6   : > { %8350 = vmatmul.mubr.msk.bf16.gmra.mrb[84].mxu0 %vm5013_vm0, %v6405_v35  ;;  %v6351_v59 = vadd.f32 %v8316_v36, %v14067_v56  ;;  %v6253_v60 = vpop.f32.mrb[67].mxu1  ;;  %v6382_v62 = vmax.f32 %v6350_v44, 0.0 }
 0x7d7   : > { %v6349_v2 = vadd.f32 %v14067_v56, %v6253_v60  ;;  %v6380_v43 = vmax.f32 %v6348_v17, 0.0  ;;  %8380 = vmatpush3.bf16.msra.mxu0 %v8721_v8 }
 0x7d8   : > { %v6383_v40 = vmax.f32 %v6351_v59, 0.0 }
 0x7d9   : > { %v6381_v1 = vmax.f32 %v6349_v2, 0.0 }
 0x7da   : > { %v6407_v9 = vpack.c.bf16 %v6383_v40, %v6382_v62  ;;  %v14132_v40 = vld [vmem:[%s14478_s15] ss:$0 sm:$0xff] }
 0x7db   : > { %v6406_v31 = vpack.c.bf16 %v6381_v1, %v6380_v43  ;;  %v8319_v63 = vpop.f32.mrb[68].mxu1 }
 0x7dc   : > { %v6354_v47 = vadd.f32 %v8319_v63, %v14067_v56  ;;  %v6266_v41 = vpop.f32.mrb[69].mxu1 }
 0x7dd   : > { %8353 = vmatprep.mubr.msk.bf16.mxu0 %vm5013_vm0, %v6406_v31  ;;  %v6352_v55 = vadd.f32 %v14067_v56, %v6266_v41  ;;  %v8320_v61 = vpop.f32.mrb[70].mxu1 }
 0x7de   : > { %8354 = vmatmul.mubr.msk.bf16.gmra.mrb[88].mxu0 %vm5013_vm0, %v6407_v9  ;;  %v6355_v14 = vadd.f32 %v8320_v61, %v14067_v56  ;;  %v6269_v19 = vpop.f32.mrb[71].mxu1  ;;  %v6386_v48 = vmax.f32 %v6354_v47, 0.0 }
 0x7df   : > { %v6353_v3 = vadd.f32 %v14067_v56, %v6269_v19  ;;  %v6384_v22 = vmax.f32 %v6352_v55, 0.0 }
 0x7e0   : > { %v6387_v27 = vmax.f32 %v6355_v14, 0.0 }
 0x7e1   : > { %v6385_v33 = vmax.f32 %v6353_v3, 0.0 }
 0x7e2   : > { %v6409_v28 = vpack.c.bf16 %v6387_v27, %v6386_v48 }
 0x7e3   : > { %v6408_v15 = vpack.c.bf16 %v6385_v33, %v6384_v22 }
 0x7e5   : > { %8357 = vmatprep.mubr.msk.bf16.mxu0 %vm5013_vm0, %v6408_v15 }
 0x7e6   : > { %8358 = vmatmul.mubr.msk.bf16.gmra.mrb[92].mxu0 %vm5013_vm0, %v6409_v28 }
 0x7ec   : > { %v8323_v45 = vpop.f32.mrb[72].mxu1 }
 0x7ed   : > { %v6358_v53 = vadd.f32 %v8323_v45, %v14067_v56  ;;  %v6282_v25 = vpop.f32.mrb[73].mxu1 }
 0x7ee   : > { %v6356_v46 = vadd.f32 %v14067_v56, %v6282_v25  ;;  %v8324_v0 = vpop.f32.mrb[74].mxu1 }
 0x7ef   : > { %v6359_v32 = vadd.f32 %v8324_v0, %v14067_v56  ;;  %v6285_v30 = vpop.f32.mrb[75].mxu1  ;;  %v6390_v34 = vmax.f32 %v6358_v53, 0.0 }
 0x7f0   : > { %v6357_v21 = vadd.f32 %v14067_v56, %v6285_v30  ;;  %v6388_v26 = vmax.f32 %v6356_v46, 0.0 }
 0x7f1   : > { %v6391_v37 = vmax.f32 %v6359_v32, 0.0 }
 0x7f2   : > { %v6389_v10 = vmax.f32 %v6357_v21, 0.0 }
 0x7f3   : > { %v6411_v24 = vpack.c.bf16 %v6391_v37, %v6390_v34 }
 0x7f4   : > { %v6410_v16 = vpack.c.bf16 %v6389_v10, %v6388_v26 }
 0x7f6   : > { %8361 = vmatprep.mubr.msk.bf16.mxu0 %vm5013_vm0, %v6410_v16 }
 0x7f7   : > { %8362 = vmatmul.mubr.msk.bf16.gmra.mrb[96].mxu0 %vm5013_vm0, %v6411_v24 }
 0x83e   : > { %v8327_v52 = vpop.f32.mrb[76].mxu1 }
 0x83f   : > { %v6362_v6 = vadd.f32 %v8327_v52, %v14067_v56  ;;  %v6298_v38 = vpop.f32.mrb[77].mxu1 }
 0x840   : > { %v6360_v18 = vadd.f32 %v14067_v56, %v6298_v38  ;;  %v8328_v23 = vpop.f32.mrb[78].mxu1 }
 0x841   : > { %v6363_v20 = vadd.f32 %v8328_v23, %v14067_v56  ;;  %v6301_v54 = vpop.f32.mrb[79].mxu1  ;;  %v6394_v42 = vmax.f32 %v6362_v6, 0.0 }
 0x842   : > { %v6361_v4 = vadd.f32 %v14067_v56, %v6301_v54  ;;  %v6392_v50 = vmax.f32 %v6360_v18, 0.0 }
 0x843   : > { %v6395_v7 = vmax.f32 %v6363_v20, 0.0 }
 0x844   : > { %v6393_v49 = vmax.f32 %v6361_v4, 0.0 }
 0x845   : > { %v6413_v39 = vpack.c.bf16 %v6395_v7, %v6394_v42 }
 0x846   : > { %v6412_v57 = vpack.c.bf16 %v6393_v49, %v6392_v50 }
 0x848   : > { %8365 = vmatprep.mubr.msk.bf16.mxu0 %vm5013_vm0, %v6412_v57 }
 0x849   : > { %8366 = vmatmul.mubr.msk.bf16.gmra.mrb[100].mxu0 %vm5013_vm0, %v6413_v39 }
 0x891   : > { %v8331_v58 = vpop.f32.mrb[80].mxu1 }
 0x892   : > { %v6366_v35 = vadd.f32 %v8331_v58, %v14067_v56  ;;  %v6314_v29 = vpop.f32.mrb[81].mxu1 }
 0x893   : > { %v6364_v13 = vadd.f32 %v14067_v56, %v6314_v29  ;;  %v8332_v44 = vpop.f32.mrb[82].mxu1 }
 0x894   : > { %v6367_v12 = vadd.f32 %v8332_v44, %v14067_v56  ;;  %v6317_v17 = vpop.f32.mrb[83].mxu1  ;;  %v6398_v59 = vmax.f32 %v6366_v35, 0.0 }
 0x895   : > { %v6365_v36 = vadd.f32 %v14067_v56, %v6317_v17  ;;  %v6396_v2 = vmax.f32 %v6364_v13, 0.0 }
 0x896   : > { %v6399_v60 = vmax.f32 %v6367_v12, 0.0 }
 0x897   : > { %v6397_v62 = vmax.f32 %v6365_v36, 0.0 }
 0x898   : > { %v6415_v43 = vpack.c.bf16 %v6399_v60, %v6398_v59 }
 0x899   : > { %v6414_v1 = vpack.c.bf16 %v6397_v62, %v6396_v2  ;;  %v8343_v9 = vpop.f32.mrb[76].mxu0 }
 0x89a   : > { %v6546_v31 = vadd.f32 %v8343_v9, %v14132_v40  ;;  %v6537_v63 = vpop.f32.mrb[77].mxu0 }
 0x89b   : > { %8369 = vmatprep.mubr.msk.bf16.mxu0 %vm5013_vm0, %v6414_v1  ;;  %v6538_v47 = vadd.f32 %v14132_v40, %v6537_v63  ;;  %v8344_v56 = vpop.f32.mrb[78].mxu0 }
 0x89c   : > { %8370 = vmatmul.mubr.msk.bf16.gmra.mrb[104].mxu0 %vm5013_vm0, %v6415_v43  ;;  %v6549_v41 = vadd.f32 %v8344_v56, %v14132_v40  ;;  %v6540_v55 = vpop.f32.mrb[79].mxu0  ;;  %v6666_v14 = vmax.f32 %v6546_v31, 0.0 }
 0x89d   : > { %v6541_v61 = vadd.f32 %v14132_v40, %v6540_v55  ;;  %v6664_v3 = vmax.f32 %v6538_v47, 0.0 }
 0x89e   : > { %v6667_v19 = vmax.f32 %v6549_v41, 0.0 }
 0x89f   : > { %v6665_v48 = vmax.f32 %v6541_v61, 0.0 }
 0x8a0   : > { %v6697_v27 = vpack.c.bf16 %v6667_v19, %v6666_v14 }
 0x8a1   : > { %v6696_v22 = vpack.c.bf16 %v6665_v48, %v6664_v3  ;;  %v8347_v33 = vpop.f32.mrb[80].mxu0 }
 0x8a2   : > { %v6562_v28 = vadd.f32 %v8347_v33, %v14132_v40  ;;  %v6553_v15 = vpop.f32.mrb[81].mxu0 }
 0x8a3   : > { %v6554_v45 = vadd.f32 %v14132_v40, %v6553_v15  ;;  %v8348_v53 = vpop.f32.mrb[82].mxu0  ;;  %8381 = vmatprep.mubr.msk.bf16.mxu0 %vm5013_vm0, %v6696_v22 }
 0x8a4   : > { %v6565_v25 = vadd.f32 %v8348_v53, %v14132_v40  ;;  %v6556_v46 = vpop.f32.mrb[83].mxu0  ;;  %8382 = vmatmul.mubr.msk.bf16.vlgmr.msra.gmra.mrb[108].mxu0 %vm5013_vm0, %v6697_v27  ;;  %v6670_v32 = vmax.f32 %v6562_v28, 0.0 }
 0x8a5   : > { %v6557_v0 = vadd.f32 %v14132_v40, %v6556_v46  ;;  %v6668_v21 = vmax.f32 %v6554_v45, 0.0 }
 0x8a6   : > { %v6671_v30 = vmax.f32 %v6565_v25, 0.0 }
 0x8a7   : > { %v6669_v34 = vmax.f32 %v6557_v0, 0.0  ;;  %v8722_v0 = vld [vmem:[%s14481_s18] sm:$0xff]  }
 0x8a8   : > { %v6699_v37 = vpack.c.bf16 %v6671_v30, %v6670_v32  ;;  %v8723_v32 = vld [vmem:[%s14481_s18 + $0x8] sm:$0xff]   ;;  %8413 = vmatprep.subr.bf16.mxu1 %v8722_v0  ;;  %v8724_v30 = vld [vmem:[%s14481_s18 + $0x10] sm:$0xff]  }
 0x8a9   : > { %v6698_v26 = vpack.c.bf16 %v6669_v34, %v6668_v21  ;;  %v8351_v10 = vpop.f32.mrb[84].mxu0  ;;  %8414 = vmatpush3.bf16.msra.mxu1 %v8722_v0  ;;  %v8725_v21 = vld [vmem:[%s14481_s18 + $0x18] sm:$0xff]  }
 0x8aa   : > { %v6578_v24 = vadd.f32 %v8351_v10, %v14132_v40  ;;  %v6569_v16 = vpop.f32.mrb[85].mxu0  ;;  %8415 = vmatprep.subr.bf16.mxu1 %v8723_v32 }
 0x8ab   : > { %8385 = vmatprep.mubr.msk.bf16.mxu0 %vm5013_vm0, %v6698_v26  ;;  %v6570_v11 = vadd.f32 %v14132_v40, %v6569_v16  ;;  %v8352_v51 = vpop.f32.mrb[86].mxu0 }
 0x8ac   : > { %8386 = vmatmul.mubr.msk.bf16.gmra.mrb[112].mxu0 %vm5013_vm0, %v6699_v37  ;;  %v6581_v5 = vadd.f32 %v8352_v51, %v14132_v40  ;;  %v6572_v8 = vpop.f32.mrb[87].mxu0  ;;  %v6674_v6 = vmax.f32 %v6578_v24, 0.0 }
 0x8ad   : > { %v6573_v52 = vadd.f32 %v14132_v40, %v6572_v8  ;;  %v6672_v18 = vmax.f32 %v6570_v11, 0.0  ;;  %8416 = vmatpush3.bf16.msra.mxu1 %v8723_v32 }
 0x8ae   : > { %v6675_v38 = vmax.f32 %v6581_v5, 0.0  ;;  %8417 = vmatprep.subr.bf16.mxu1 %v8724_v30 }
 0x8af   : > { %v6673_v23 = vmax.f32 %v6573_v52, 0.0 }
 0x8b0   : > { %v6701_v20 = vpack.c.bf16 %v6675_v38, %v6674_v6 }
 0x8b1   : > { %v6700_v54 = vpack.c.bf16 %v6673_v23, %v6672_v18  ;;  %v8355_v4 = vpop.f32.mrb[88].mxu0  ;;  %8418 = vmatpush3.bf16.msra.mxu1 %v8724_v30 }
 0x8b2   : > { %v6594_v42 = vadd.f32 %v8355_v4, %v14132_v40  ;;  %v6585_v7 = vpop.f32.mrb[89].mxu0  ;;  %8419 = vmatprep.subr.bf16.mxu1 %v8725_v21 }
 0x8b3   : > { %8389 = vmatprep.mubr.msk.bf16.mxu0 %vm5013_vm0, %v6700_v54  ;;  %v6586_v50 = vadd.f32 %v14132_v40, %v6585_v7  ;;  %v8356_v49 = vpop.f32.mrb[90].mxu0 }
 0x8b4   : > { %8390 = vmatmul.mubr.msk.bf16.gmra.mrb[116].mxu0 %vm5013_vm0, %v6701_v20  ;;  %v6597_v39 = vadd.f32 %v8356_v49, %v14132_v40  ;;  %v6588_v57 = vpop.f32.mrb[91].mxu0  ;;  %v6678_v35 = vmax.f32 %v6594_v42, 0.0 }
 0x8b5   : > { %v6589_v58 = vadd.f32 %v14132_v40, %v6588_v57  ;;  %v6676_v13 = vmax.f32 %v6586_v50, 0.0  ;;  %8420 = vmatpush3.bf16.msra.mxu1 %v8725_v21 }
 0x8b6   : > { %v6679_v29 = vmax.f32 %v6597_v39, 0.0 }
 0x8b7   : > { %v6677_v44 = vmax.f32 %v6589_v58, 0.0 }
 0x8b8   : > { %v6703_v12 = vpack.c.bf16 %v6679_v29, %v6678_v35  ;;  %v14197_v29 = vld [vmem:[%s14480_s17] ss:$0 sm:$0xff] }
 0x8b9   : > { %v6702_v17 = vpack.c.bf16 %v6677_v44, %v6676_v13  ;;  %v8359_v36 = vpop.f32.mrb[92].mxu0 }
 0x8ba   : > { %v6610_v59 = vadd.f32 %v8359_v36, %v14132_v40  ;;  %v6601_v60 = vpop.f32.mrb[93].mxu0 }
 0x8bb   : > { %8393 = vmatprep.mubr.msk.bf16.mxu0 %vm5013_vm0, %v6702_v17  ;;  %v6602_v2 = vadd.f32 %v14132_v40, %v6601_v60  ;;  %v8360_v62 = vpop.f32.mrb[94].mxu0 }
 0x8bc   : > { %8394 = vmatmul.mubr.msk.bf16.gmra.mrb[120].mxu0 %vm5013_vm0, %v6703_v12  ;;  %v6613_v43 = vadd.f32 %v8360_v62, %v14132_v40  ;;  %v6604_v1 = vpop.f32.mrb[95].mxu0  ;;  %v6682_v31 = vmax.f32 %v6610_v59, 0.0 }
 0x8bd   : > { %v6605_v9 = vadd.f32 %v14132_v40, %v6604_v1  ;;  %v6680_v47 = vmax.f32 %v6602_v2, 0.0 }
 0x8be   : > { %v6683_v63 = vmax.f32 %v6613_v43, 0.0 }
 0x8bf   : > { %v6681_v56 = vmax.f32 %v6605_v9, 0.0 }
 0x8c0   : > { %v6705_v41 = vpack.c.bf16 %v6683_v63, %v6682_v31 }
 0x8c1   : > { %v6704_v55 = vpack.c.bf16 %v6681_v56, %v6680_v47 }
 0x8c3   : > { %8397 = vmatprep.mubr.msk.bf16.mxu0 %vm5013_vm0, %v6704_v55 }
 0x8c4   : > { %8398 = vmatmul.mubr.msk.bf16.gmra.mrb[124].mxu0 %vm5013_vm0, %v6705_v41 }
 0x8ca   : > { %v8363_v61 = vpop.f32.mrb[96].mxu0 }
 0x8cb   : > { %v6626_v14 = vadd.f32 %v8363_v61, %v14132_v40  ;;  %v6617_v19 = vpop.f32.mrb[97].mxu0 }
 0x8cc   : > { %v6618_v3 = vadd.f32 %v14132_v40, %v6617_v19  ;;  %v8364_v48 = vpop.f32.mrb[98].mxu0 }
 0x8cd   : > { %v6629_v27 = vadd.f32 %v8364_v48, %v14132_v40  ;;  %v6620_v22 = vpop.f32.mrb[99].mxu0  ;;  %v6686_v28 = vmax.f32 %v6626_v14, 0.0 }
 0x8ce   : > { %v6621_v33 = vadd.f32 %v14132_v40, %v6620_v22  ;;  %v6684_v45 = vmax.f32 %v6618_v3, 0.0 }
 0x8cf   : > { %v6687_v15 = vmax.f32 %v6629_v27, 0.0 }
 0x8d0   : > { %v6685_v53 = vmax.f32 %v6621_v33, 0.0 }
 0x8d1   : > { %v6707_v25 = vpack.c.bf16 %v6687_v15, %v6686_v28 }
 0x8d2   : > { %v6706_v46 = vpack.c.bf16 %v6685_v53, %v6684_v45 }
 0x8d4   : > { %8401 = vmatprep.mubr.msk.bf16.mxu0 %vm5013_vm0, %v6706_v46 }
 0x8d5   : > { %8402 = vmatmul.mubr.msk.bf16.gmra.mrb[128].mxu0 %vm5013_vm0, %v6707_v25 }
 0x91c   : > { %v8367_v34 = vpop.f32.mrb[100].mxu0 }
 0x91d   : > { %v6642_v37 = vadd.f32 %v8367_v34, %v14132_v40  ;;  %v6633_v26 = vpop.f32.mrb[101].mxu0 }
 0x91e   : > { %v6634_v10 = vadd.f32 %v14132_v40, %v6633_v26  ;;  %v8368_v24 = vpop.f32.mrb[102].mxu0 }
 0x91f   : > { %v6645_v16 = vadd.f32 %v8368_v24, %v14132_v40  ;;  %v6636_v11 = vpop.f32.mrb[103].mxu0  ;;  %v6690_v5 = vmax.f32 %v6642_v37, 0.0 }
 0x920   : > { %v6637_v51 = vadd.f32 %v14132_v40, %v6636_v11  ;;  %v6688_v52 = vmax.f32 %v6634_v10, 0.0 }
 0x921   : > { %v6691_v8 = vmax.f32 %v6645_v16, 0.0 }
 0x922   : > { %v6689_v6 = vmax.f32 %v6637_v51, 0.0 }
 0x923   : > { %v6709_v38 = vpack.c.bf16 %v6691_v8, %v6690_v5 }
 0x924   : > { %v6708_v18 = vpack.c.bf16 %v6689_v6, %v6688_v52 }
 0x926   : > { %8405 = vmatprep.mubr.msk.bf16.mxu0 %vm5013_vm0, %v6708_v18 }
 0x927   : > { %8406 = vmatmul.mubr.msk.bf16.gmra.mrb[132].mxu0 %vm5013_vm0, %v6709_v38 }
 0x96f   : > { %v8371_v23 = vpop.f32.mrb[104].mxu0 }
 0x970   : > { %v6658_v20 = vadd.f32 %v8371_v23, %v14132_v40  ;;  %v6649_v54 = vpop.f32.mrb[105].mxu0 }
 0x971   : > { %v6650_v4 = vadd.f32 %v14132_v40, %v6649_v54  ;;  %v8372_v42 = vpop.f32.mrb[106].mxu0 }
 0x972   : > { %v6661_v7 = vadd.f32 %v8372_v42, %v14132_v40  ;;  %v6652_v50 = vpop.f32.mrb[107].mxu0  ;;  %v6694_v39 = vmax.f32 %v6658_v20, 0.0 }
 0x973   : > { %v6653_v49 = vadd.f32 %v14132_v40, %v6652_v50  ;;  %v6692_v58 = vmax.f32 %v6650_v4, 0.0 }
 0x974   : > { %v6695_v57 = vmax.f32 %v6661_v7, 0.0 }
 0x975   : > { %v6693_v35 = vmax.f32 %v6653_v49, 0.0 }
 0x976   : > { %v6711_v13 = vpack.c.bf16 %v6695_v57, %v6694_v39 }
 0x977   : > { %v6710_v44 = vpack.c.bf16 %v6693_v35, %v6692_v58  ;;  %v8383_v12 = vpop.f32.mrb[108].mxu0 }
 0x978   : > { %v6842_v17 = vadd.f32 %v8383_v12, %v14197_v29  ;;  %v6833_v36 = vpop.f32.mrb[109].mxu0 }
 0x979   : > { %8409 = vmatprep.mubr.msk.bf16.mxu0 %vm5013_vm0, %v6710_v44  ;;  %v6834_v59 = vadd.f32 %v14197_v29, %v6833_v36  ;;  %v8384_v40 = vpop.f32.mrb[110].mxu0 }
 0x97a   : > { %8410 = vmatmul.mubr.msk.bf16.gmra.mrb[136].mxu0 %vm5013_vm0, %v6711_v13  ;;  %v6845_v60 = vadd.f32 %v8384_v40, %v14197_v29  ;;  %v6836_v2 = vpop.f32.mrb[111].mxu0  ;;  %v6962_v43 = vmax.f32 %v6842_v17, 0.0 }
 0x97b   : > { %v6837_v62 = vadd.f32 %v14197_v29, %v6836_v2  ;;  %v6960_v9 = vmax.f32 %v6834_v59, 0.0 }
 0x97c   : > { %v6963_v1 = vmax.f32 %v6845_v60, 0.0 }
 0x97d   : > { %v6961_v31 = vmax.f32 %v6837_v62, 0.0 }
 0x97e   : > { %v6993_v63 = vpack.c.bf16 %v6963_v1, %v6962_v43 }
 0x97f   : > { %v6992_v47 = vpack.c.bf16 %v6961_v31, %v6960_v9  ;;  %v8387_v56 = vpop.f32.mrb[112].mxu0 }
 0x980   : > { %v6858_v41 = vadd.f32 %v8387_v56, %v14197_v29  ;;  %v6849_v55 = vpop.f32.mrb[113].mxu0 }
 0x981   : > { %v6850_v61 = vadd.f32 %v14197_v29, %v6849_v55  ;;  %v8388_v14 = vpop.f32.mrb[114].mxu0  ;;  %8421 = vmatprep.mubr.msk.bf16.mxu1 %vm5013_vm0, %v6992_v47 }
 0x982   : > { %v6861_v19 = vadd.f32 %v8388_v14, %v14197_v29  ;;  %v6852_v3 = vpop.f32.mrb[115].mxu0  ;;  %8422 = vmatmul.mubr.msk.bf16.vlgmr.msra.gmra.mrb[84].mxu1 %vm5013_vm0, %v6993_v63  ;;  %v6966_v27 = vmax.f32 %v6858_v41, 0.0 }
 0x983   : > { %v6853_v48 = vadd.f32 %v14197_v29, %v6852_v3  ;;  %v6964_v33 = vmax.f32 %v6850_v61, 0.0 }
 0x984   : > { %v6967_v22 = vmax.f32 %v6861_v19, 0.0 }
 0x985   : > { %v6965_v28 = vmax.f32 %v6853_v48, 0.0 }
 0x986   : > { %v6995_v15 = vpack.c.bf16 %v6967_v22, %v6966_v27 }
 0x987   : > { %v6994_v45 = vpack.c.bf16 %v6965_v28, %v6964_v33  ;;  %v8391_v53 = vpop.f32.mrb[116].mxu0 }
 0x988   : > { %v6874_v25 = vadd.f32 %v8391_v53, %v14197_v29  ;;  %v6865_v46 = vpop.f32.mrb[117].mxu0 }
 0x989   : > { %8425 = vmatprep.mubr.msk.bf16.mxu1 %vm5013_vm0, %v6994_v45  ;;  %v6866_v0 = vadd.f32 %v14197_v29, %v6865_v46  ;;  %v8392_v32 = vpop.f32.mrb[118].mxu0 }
 0x98a   : > { %8426 = vmatmul.mubr.msk.bf16.gmra.mrb[88].mxu1 %vm5013_vm0, %v6995_v15  ;;  %v6877_v30 = vadd.f32 %v8392_v32, %v14197_v29  ;;  %v6868_v21 = vpop.f32.mrb[119].mxu0  ;;  %v6970_v37 = vmax.f32 %v6874_v25, 0.0 }
 0x98b   : > { %v6869_v34 = vadd.f32 %v14197_v29, %v6868_v21  ;;  %v6968_v10 = vmax.f32 %v6866_v0, 0.0 }
 0x98c   : > { %v6971_v26 = vmax.f32 %v6877_v30, 0.0 }
 0x98d   : > { %v6969_v24 = vmax.f32 %v6869_v34, 0.0 }
 0x98e   : > { %v6997_v16 = vpack.c.bf16 %v6971_v26, %v6970_v37 }
 0x98f   : > { %v6996_v11 = vpack.c.bf16 %v6969_v24, %v6968_v10  ;;  %v8395_v51 = vpop.f32.mrb[120].mxu0 }
 0x990   : > { %v6890_v5 = vadd.f32 %v8395_v51, %v14197_v29  ;;  %v6881_v8 = vpop.f32.mrb[121].mxu0 }
 0x991   : > { %8429 = vmatprep.mubr.msk.bf16.mxu1 %vm5013_vm0, %v6996_v11  ;;  %v6882_v52 = vadd.f32 %v14197_v29, %v6881_v8  ;;  %v8396_v6 = vpop.f32.mrb[122].mxu0 }
 0x992   : > { %8430 = vmatmul.mubr.msk.bf16.gmra.mrb[92].mxu1 %vm5013_vm0, %v6997_v16  ;;  %v6893_v38 = vadd.f32 %v8396_v6, %v14197_v29  ;;  %v6884_v18 = vpop.f32.mrb[123].mxu0  ;;  %v6974_v20 = vmax.f32 %v6890_v5, 0.0 }
 0x993   : > { %v6885_v23 = vadd.f32 %v14197_v29, %v6884_v18  ;;  %v6972_v4 = vmax.f32 %v6882_v52, 0.0 }
 0x994   : > { %v6975_v54 = vmax.f32 %v6893_v38, 0.0  ;;  %v14250_v38 = vld [vmem:[%s14482_s19] ss:$0 sm:$0xff] }
 0x995   : > { %v6973_v42 = vmax.f32 %v6885_v23, 0.0 }
 0x996   : > { %v6999_v7 = vpack.c.bf16 %v6975_v54, %v6974_v20 }
 0x997   : > { %v6998_v50 = vpack.c.bf16 %v6973_v42, %v6972_v4  ;;  %v8399_v49 = vpop.f32.mrb[124].mxu0 }
 0x998   : > { %v6906_v39 = vadd.f32 %v8399_v49, %v14197_v29  ;;  %v6897_v57 = vpop.f32.mrb[125].mxu0 }
 0x999   : > { %8433 = vmatprep.mubr.msk.bf16.mxu1 %vm5013_vm0, %v6998_v50  ;;  %v6898_v58 = vadd.f32 %v14197_v29, %v6897_v57  ;;  %v8400_v35 = vpop.f32.mrb[126].mxu0 }
 0x99a   : > { %8434 = vmatmul.mubr.msk.bf16.gmra.mrb[96].mxu1 %vm5013_vm0, %v6999_v7  ;;  %v6909_v13 = vadd.f32 %v8400_v35, %v14197_v29  ;;  %v6900_v44 = vpop.f32.mrb[127].mxu0  ;;  %v6978_v17 = vmax.f32 %v6906_v39, 0.0 }
 0x99b   : > { %v6901_v12 = vadd.f32 %v14197_v29, %v6900_v44  ;;  %v6976_v59 = vmax.f32 %v6898_v58, 0.0 }
 0x99c   : > { %v6979_v36 = vmax.f32 %v6909_v13, 0.0 }
 0x99d   : > { %v6977_v40 = vmax.f32 %v6901_v12, 0.0 }
 0x99e   : > { %v7001_v60 = vpack.c.bf16 %v6979_v36, %v6978_v17 }
 0x99f   : > { %v7000_v2 = vpack.c.bf16 %v6977_v40, %v6976_v59 }
 0x9a1   : > { %8437 = vmatprep.mubr.msk.bf16.mxu1 %vm5013_vm0, %v7000_v2 }
 0x9a2   : > { %8438 = vmatmul.mubr.msk.bf16.gmra.mrb[100].mxu1 %vm5013_vm0, %v7001_v60 }
 0x9a8   : > { %v8403_v62 = vpop.f32.mrb[128].mxu0 }
 0x9a9   : > { %v6922_v43 = vadd.f32 %v8403_v62, %v14197_v29  ;;  %v6913_v1 = vpop.f32.mrb[129].mxu0 }
 0x9aa   : > { %v6914_v9 = vadd.f32 %v14197_v29, %v6913_v1  ;;  %v8404_v31 = vpop.f32.mrb[130].mxu0 }
 0x9ab   : > { %v6925_v63 = vadd.f32 %v8404_v31, %v14197_v29  ;;  %v6916_v47 = vpop.f32.mrb[131].mxu0  ;;  %v6982_v41 = vmax.f32 %v6922_v43, 0.0 }
 0x9ac   : > { %v6917_v56 = vadd.f32 %v14197_v29, %v6916_v47  ;;  %v6980_v61 = vmax.f32 %v6914_v9, 0.0 }
 0x9ad   : > { %v6983_v55 = vmax.f32 %v6925_v63, 0.0 }
 0x9ae   : > { %v6981_v14 = vmax.f32 %v6917_v56, 0.0 }
 0x9af   : > { %v7003_v19 = vpack.c.bf16 %v6983_v55, %v6982_v41 }
 0x9b0   : > { %v7002_v3 = vpack.c.bf16 %v6981_v14, %v6980_v61 }
 0x9b2   : > { %8441 = vmatprep.mubr.msk.bf16.mxu1 %vm5013_vm0, %v7002_v3 }
 0x9b3   : > { %8442 = vmatmul.mubr.msk.bf16.gmra.mrb[104].mxu1 %vm5013_vm0, %v7003_v19 }
 0x9fa   : > { %v8407_v48 = vpop.f32.mrb[132].mxu0 }
 0x9fb   : > { %v6938_v27 = vadd.f32 %v8407_v48, %v14197_v29  ;;  %v6929_v22 = vpop.f32.mrb[133].mxu0 }
 0x9fc   : > { %v6930_v33 = vadd.f32 %v14197_v29, %v6929_v22  ;;  %v8408_v28 = vpop.f32.mrb[134].mxu0 }
 0x9fd   : > { %v6941_v15 = vadd.f32 %v8408_v28, %v14197_v29  ;;  %v6932_v45 = vpop.f32.mrb[135].mxu0  ;;  %v6986_v25 = vmax.f32 %v6938_v27, 0.0 }
 0x9fe   : > { %v6933_v53 = vadd.f32 %v14197_v29, %v6932_v45  ;;  %v6984_v0 = vmax.f32 %v6930_v33, 0.0 }
 0x9ff   : > { %v6987_v46 = vmax.f32 %v6941_v15, 0.0 }
 0xa00   : > { %v6985_v32 = vmax.f32 %v6933_v53, 0.0 }
 0xa01   : > { %v7005_v30 = vpack.c.bf16 %v6987_v46, %v6986_v25 }
 0xa02   : > { %v7004_v21 = vpack.c.bf16 %v6985_v32, %v6984_v0 }
 0xa04   : > { %8445 = vmatprep.mubr.msk.bf16.mxu1 %vm5013_vm0, %v7004_v21 }
 0xa05   : > { %8446 = vmatmul.mubr.msk.bf16.gmra.mrb[108].mxu1 %vm5013_vm0, %v7005_v30 }
 0xa4d   : > { %v8411_v34 = vpop.f32.mrb[136].mxu0 }
 0xa4e   : > { %v6954_v37 = vadd.f32 %v8411_v34, %v14197_v29  ;;  %v6945_v26 = vpop.f32.mrb[137].mxu0 }
 0xa4f   : > { %v6946_v10 = vadd.f32 %v14197_v29, %v6945_v26  ;;  %v8412_v24 = vpop.f32.mrb[138].mxu0 }
 0xa50   : > { %v6957_v16 = vadd.f32 %v8412_v24, %v14197_v29  ;;  %v6948_v11 = vpop.f32.mrb[139].mxu0  ;;  %v6990_v5 = vmax.f32 %v6954_v37, 0.0 }
 0xa51   : > { %v6949_v51 = vadd.f32 %v14197_v29, %v6948_v11  ;;  %v6988_v52 = vmax.f32 %v6946_v10, 0.0  ;;  %v14258_v29 = vld [vmem:[%s14483_s20] ss:$0 sm:$0xff] }
 0xa52   : > { %v6991_v8 = vmax.f32 %v6957_v16, 0.0 }
 0xa53   : > { %v6989_v6 = vmax.f32 %v6949_v51, 0.0 }
 0xa54   : > { %v7007_v18 = vpack.c.bf16 %v6991_v8, %v6990_v5 }
 0xa55   : > { %v7006_v23 = vpack.c.bf16 %v6989_v6, %v6988_v52  ;;  %v8423_v20 = vpop.f32.mrb[84].mxu1 }
 0xa56   : > { %v7138_v54 = vadd.f32 %v8423_v20, %v14250_v38  ;;  %v7129_v4 = vpop.f32.mrb[85].mxu1 }
 0xa57   : > { %8449 = vmatprep.mubr.msk.bf16.mxu1 %vm5013_vm0, %v7006_v23  ;;  %v7130_v42 = vadd.f32 %v14250_v38, %v7129_v4  ;;  %v8424_v7 = vpop.f32.mrb[86].mxu1 }
 0xa58   : > { %8450 = vmatmul.mubr.msk.bf16.gmra.mrb[112].mxu1 %vm5013_vm0, %v7007_v18  ;;  %v7258_v50 = vmax.f32 %v7138_v54, 0.0  ;;  %v7141_v49 = vadd.f32 %v8424_v7, %v14250_v38  ;;  %v7132_v39 = vpop.f32.mrb[87].mxu1 }
 0xa59   : > { %v7256_v57 = vmax.f32 %v7130_v42, 0.0  ;;  %v7133_v58 = vadd.f32 %v14250_v38, %v7132_v39 }
 0xa5a   : > { %v7259_v35 = vmax.f32 %v7141_v49, 0.0  ;;  %v7297_v13 = vmul.f32 %v14258_v29, %v7258_v50 }
 0xa5b   : > { %v7295_v44 = vmul.f32 %v14258_v29, %v7256_v57  ;;  %v7257_v12 = vmax.f32 %v7133_v58, 0.0 }
 0xa5c   : > { %v7333_v17 = vsel %vm5013_vm0, %v7297_v13, 0.0  ;;  %v7298_v36 = vmul.f32 %v14258_v29, %v7259_v35 }
 0xa5d   : > { %7334 = vadd.xlane.f32.xlu0 %v7333_v17  ;;  %v8427_v59 = vpop.f32.mrb[88].mxu1  ;;  %v7327_v40 = vsel %vm5013_vm0, %v7295_v44, 0.0  ;;  %v7296_v60 = vmul.f32 %v14258_v29, %v7257_v12 }
 0xa5e   : > { %v7154_v2 = vadd.f32 %v8427_v59, %v14250_v38  ;;  %v7145_v62 = vpop.f32.mrb[89].mxu1  ;;  %7328 = vadd.xlane.f32.xlu1 %v7327_v40  ;;  %v7336_v55 = vsel %vm5013_vm0, %v7298_v36, 0.0 }
 0xa5f   : > { %v7146_v43 = vadd.f32 %v14250_v38, %v7145_v62  ;;  %v8428_v1 = vpop.f32.mrb[90].mxu1  ;;  %v7330_v9 = vsel %vm5013_vm0, %v7296_v60, 0.0 }
 0xa60   : > { %v7262_v31 = vmax.f32 %v7154_v2, 0.0  ;;  %v7157_v63 = vadd.f32 %v8428_v1, %v14250_v38  ;;  %v7148_v47 = vpop.f32.mrb[91].mxu1 }
 0xa61   : > { %v7260_v56 = vmax.f32 %v7146_v43, 0.0  ;;  %v7149_v41 = vadd.f32 %v14250_v38, %v7148_v47  ;;  %7331 = vadd.xlane.f32.xlu0 %v7330_v9 }
 0xa62   : > { %v7263_v61 = vmax.f32 %v7157_v63, 0.0  ;;  %7337 = vadd.xlane.f32.xlu1 %v7336_v55  ;;  %v7301_v14 = vmul.f32 %v14258_v29, %v7262_v31 }
 0xa63   : > { %v7261_v19 = vmax.f32 %v7149_v41, 0.0  ;;  %v7299_v27 = vmul.f32 %v14258_v29, %v7260_v56 }
 0xa64   : > { %v7302_v3 = vmul.f32 %v14258_v29, %v7263_v61  ;;  %v7345_v48 = vsel %vm5013_vm0, %v7301_v14, 0.0 }
 0xa65   : > { %7346 = vadd.xlane.f32.xlu0 %v7345_v48  ;;  %v8431_v22 = vpop.f32.mrb[92].mxu1  ;;  %v7300_v33 = vmul.f32 %v14258_v29, %v7261_v19  ;;  %v7339_v46 = vsel %vm5013_vm0, %v7299_v27, 0.0 }
 0xa66   : > { %v7348_v28 = vsel %vm5013_vm0, %v7302_v3, 0.0  ;;  %v7170_v15 = vadd.f32 %v8431_v22, %v14250_v38  ;;  %v7161_v45 = vpop.f32.mrb[93].mxu1 }
 0xa67   : > { %7349 = vadd.xlane.f32.xlu1 %v7348_v28  ;;  %v7162_v53 = vadd.f32 %v14250_v38, %v7161_v45  ;;  %v8432_v25 = vpop.f32.mrb[94].mxu1  ;;  %v7342_v37 = vsel %vm5013_vm0, %v7300_v33, 0.0 }
 0xa68   : > { %v7266_v0 = vmax.f32 %v7170_v15, 0.0  ;;  %v7173_v32 = vadd.f32 %v8432_v25, %v14250_v38  ;;  %v7164_v30 = vpop.f32.mrb[95].mxu1 }
 0xa69   : > { %7340 = vadd.xlane.f32.xlu0 %v7339_v46  ;;  %v7264_v21 = vmax.f32 %v7162_v53, 0.0  ;;  %v7165_v34 = vadd.f32 %v14250_v38, %v7164_v30 }
 0xa6a   : > { %v7267_v26 = vmax.f32 %v7173_v32, 0.0  ;;  %v7305_v10 = vmul.f32 %v14258_v29, %v7266_v0 }
 0xa6b   : > { %7343 = vadd.xlane.f32.xlu1 %v7342_v37  ;;  %v7265_v24 = vmax.f32 %v7165_v34, 0.0  ;;  %v7303_v51 = vmul.f32 %v14258_v29, %v7264_v21 }
 0xa6c   : > { %v7306_v16 = vmul.f32 %v14258_v29, %v7267_v26  ;;  %v7357_v11 = vsel %vm5013_vm0, %v7305_v10, 0.0 }
 0xa6d   : > { %7358 = vadd.xlane.f32.xlu0 %v7357_v11  ;;  %v8435_v5 = vpop.f32.mrb[96].mxu1  ;;  %v7304_v8 = vmul.f32 %v14258_v29, %v7265_v24  ;;  %v7351_v54 = vsel %vm5013_vm0, %v7303_v51, 0.0 }
 0xa6e   : > { %v7360_v52 = vsel %vm5013_vm0, %v7306_v16, 0.0  ;;  %v7186_v6 = vadd.f32 %v8435_v5, %v14250_v38  ;;  %v7177_v18 = vpop.f32.mrb[97].mxu1 }
 0xa6f   : > { %7361 = vadd.xlane.f32.xlu1 %v7360_v52  ;;  %v7178_v23 = vadd.f32 %v14250_v38, %v7177_v18  ;;  %v8436_v20 = vpop.f32.mrb[98].mxu1  ;;  %v7354_v39 = vsel %vm5013_vm0, %v7304_v8, 0.0 }
 0xa70   : > { %v7270_v4 = vmax.f32 %v7186_v6, 0.0  ;;  %v7189_v42 = vadd.f32 %v8436_v20, %v14250_v38  ;;  %v7180_v7 = vpop.f32.mrb[99].mxu1 }
 0xa71   : > { %7352 = vadd.xlane.f32.xlu0 %v7351_v54  ;;  %v7268_v50 = vmax.f32 %v7178_v23, 0.0  ;;  %v7181_v49 = vadd.f32 %v14250_v38, %v7180_v7 }
 0xa72   : > { %v7271_v57 = vmax.f32 %v7189_v42, 0.0  ;;  %v7309_v58 = vmul.f32 %v14258_v29, %v7270_v4 }
 0xa73   : > { %7355 = vadd.xlane.f32.xlu1 %v7354_v39  ;;  %v7269_v35 = vmax.f32 %v7181_v49, 0.0  ;;  %v7307_v12 = vmul.f32 %v14258_v29, %v7268_v50 }
 0xa74   : > { %v7310_v13 = vmul.f32 %v14258_v29, %v7271_v57  ;;  %v7369_v44 = vsel %vm5013_vm0, %v7309_v58, 0.0 }
 0xa75   : > { %7370 = vadd.xlane.f32.xlu0 %v7369_v44  ;;  %v8439_v17 = vpop.f32.mrb[100].mxu1  ;;  %v7308_v36 = vmul.f32 %v14258_v29, %v7269_v35  ;;  %v7363_v43 = vsel %vm5013_vm0, %v7307_v12, 0.0 }
 0xa76   : > { %v7372_v59 = vsel %vm5013_vm0, %v7310_v13, 0.0  ;;  %v7202_v40 = vadd.f32 %v8439_v17, %v14250_v38  ;;  %v7193_v60 = vpop.f32.mrb[101].mxu1 }
 0xa77   : > { %7373 = vadd.xlane.f32.xlu1 %v7372_v59  ;;  %v7194_v2 = vadd.f32 %v14250_v38, %v7193_v60  ;;  %v8440_v62 = vpop.f32.mrb[102].mxu1  ;;  %v7366_v56 = vsel %vm5013_vm0, %v7308_v36, 0.0  ;;  %v14343_v59 = vld [vmem:[#allocation2] ss:$0 sm:$0xff] }
 0xa78   : > { %v7274_v1 = vmax.f32 %v7202_v40, 0.0  ;;  %v7205_v9 = vadd.f32 %v8440_v62, %v14250_v38  ;;  %v7196_v31 = vpop.f32.mrb[103].mxu1 }
 0xa79   : > { %7364 = vadd.xlane.f32.xlu0 %v7363_v43  ;;  %v7272_v63 = vmax.f32 %v7194_v2, 0.0  ;;  %v7197_v47 = vadd.f32 %v14250_v38, %v7196_v31 }
 0xa7a   : > { %v7275_v41 = vmax.f32 %v7205_v9, 0.0  ;;  %v7313_v55 = vmul.f32 %v14258_v29, %v7274_v1 }
 0xa7b   : > { %7367 = vadd.xlane.f32.xlu1 %v7366_v56  ;;  %v7273_v61 = vmax.f32 %v7197_v47, 0.0  ;;  %v7311_v3 = vmul.f32 %v14258_v29, %v7272_v63 }
 0xa7c   : > { %v7314_v14 = vmul.f32 %v14258_v29, %v7275_v41  ;;  %v7381_v19 = vsel %vm5013_vm0, %v7313_v55, 0.0 }
 0xa7d   : > { %7382 = vadd.xlane.f32.xlu0 %v7381_v19  ;;  %v7312_v48 = vmul.f32 %v14258_v29, %v7273_v61  ;;  %v7375_v22 = vsel %vm5013_vm0, %v7311_v3, 0.0 }
 0xa7e   : > { %v7384_v27 = vsel %vm5013_vm0, %v7314_v14, 0.0 }
 0xa7f   : > { %7385 = vadd.xlane.f32.xlu1 %v7384_v27  ;;  %v7378_v33 = vsel %vm5013_vm0, %v7312_v48, 0.0 }
 0xa81   : > { %7376 = vadd.xlane.f32.xlu0 %v7375_v22 }
 0xa83   : > { %7379 = vadd.xlane.f32.xlu1 %v7378_v33 }
 0xa86   : > { %v8443_v28 = vpop.f32.mrb[104].mxu1 }
 0xa87   : > { %v7218_v15 = vadd.f32 %v8443_v28, %v14250_v38  ;;  %v7209_v45 = vpop.f32.mrb[105].mxu1 }
 0xa88   : > { %v7210_v53 = vadd.f32 %v14250_v38, %v7209_v45  ;;  %v8444_v25 = vpop.f32.mrb[106].mxu1 }
 0xa89   : > { %v7278_v46 = vmax.f32 %v7218_v15, 0.0  ;;  %v7221_v0 = vadd.f32 %v8444_v25, %v14250_v38  ;;  %v7212_v32 = vpop.f32.mrb[107].mxu1 }
 0xa8a   : > { %v7276_v30 = vmax.f32 %v7210_v53, 0.0  ;;  %v7213_v21 = vadd.f32 %v14250_v38, %v7212_v32 }
 0xa8b   : > { %v7279_v34 = vmax.f32 %v7221_v0, 0.0  ;;  %v7317_v37 = vmul.f32 %v14258_v29, %v7278_v46 }
 0xa8c   : > { %v7277_v26 = vmax.f32 %v7213_v21, 0.0  ;;  %v7315_v16 = vmul.f32 %v14258_v29, %v7276_v30 }
 0xa8d   : > { %v7318_v10 = vmul.f32 %v14258_v29, %v7279_v34  ;;  %v7393_v24 = vsel %vm5013_vm0, %v7317_v37, 0.0 }
 0xa8e   : > { %7394 = vadd.xlane.f32.xlu0 %v7393_v24  ;;  %v7316_v11 = vmul.f32 %v14258_v29, %v7277_v26  ;;  %v7387_v5 = vsel %vm5013_vm0, %v7315_v16, 0.0 }
 0xa8f   : > { %v7396_v51 = vsel %vm5013_vm0, %v7318_v10, 0.0 }
 0xa90   : > { %7397 = vadd.xlane.f32.xlu1 %v7396_v51  ;;  %v7390_v8 = vsel %vm5013_vm0, %v7316_v11, 0.0 }
 0xa92   : > { %7388 = vadd.xlane.f32.xlu0 %v7387_v5 }
 0xa94   : > { %7391 = vadd.xlane.f32.xlu1 %v7390_v8 }
 0xad8   : > { %v8447_v52 = vpop.f32.mrb[108].mxu1 }
 0xad9   : > { %v7234_v6 = vadd.f32 %v8447_v52, %v14250_v38  ;;  %v7225_v18 = vpop.f32.mrb[109].mxu1 }
 0xada   : > { %v7226_v23 = vadd.f32 %v14250_v38, %v7225_v18  ;;  %v8448_v20 = vpop.f32.mrb[110].mxu1 }
 0xadb   : > { %v7282_v54 = vmax.f32 %v7234_v6, 0.0  ;;  %v7237_v4 = vadd.f32 %v8448_v20, %v14250_v38  ;;  %v7228_v42 = vpop.f32.mrb[111].mxu1 }
 0xadc   : > { %v7280_v7 = vmax.f32 %v7226_v23, 0.0  ;;  %v7229_v50 = vadd.f32 %v14250_v38, %v7228_v42 }
 0xadd   : > { %v7321_v49 = vmul.f32 %v14258_v29, %v7282_v54  ;;  %v7283_v39 = vmax.f32 %v7237_v4, 0.0 }
 0xade   : > { %v7281_v57 = vmax.f32 %v7229_v50, 0.0  ;;  %v7319_v58 = vmul.f32 %v14258_v29, %v7280_v7 }
 0xadf   : > { %v7322_v35 = vmul.f32 %v14258_v29, %v7283_v39  ;;  %v7405_v13 = vsel %vm5013_vm0, %v7321_v49, 0.0 }
 0xae0   : > { %7406 = vadd.xlane.f32.xlu0 %v7405_v13  ;;  %v7320_v44 = vmul.f32 %v14258_v29, %v7281_v57  ;;  %v7399_v17 = vsel %vm5013_vm0, %v7319_v58, 0.0 }
 0xae1   : > { %v7408_v12 = vsel %vm5013_vm0, %v7322_v35, 0.0 }
 0xae2   : > { %7409 = vadd.xlane.f32.xlu1 %v7408_v12  ;;  %v7402_v36 = vsel %vm5013_vm0, %v7320_v44, 0.0 }
 0xae4   : > { %7400 = vadd.xlane.f32.xlu0 %v7399_v17 }
 0xae6   : > { %7403 = vadd.xlane.f32.xlu1 %v7402_v36 }
 0xaea   : > { %v7335_v40 = vpop.xlane.xlu0 %7334 }
 0xaeb   : > { %v7432_v60 = vadd.f32 %v14343_v59, %v7335_v40  ;;  %v7329_v2 = vpop.xlane.xlu1 %7328 }
 0xaec   : > { %v7430_v62 = vadd.f32 %v14343_v59, %v7329_v2 }
 0xaed   : > { %8854 = vtanh.f32 %v7432_v60 }
 0xaee   : > { %8856 = vtanh.f32 %v7430_v62  ;;  %v7332_v43 = vpop.xlane.xlu0 %7331 }
 0xaef   : > { %v7431_v1 = vadd.f32 %v14343_v59, %v7332_v43  ;;  %v7338_v9 = vpop.xlane.xlu1 %7337 }
 0xaf0   : > { %v7433_v31 = vadd.f32 %v14343_v59, %v7338_v9 }
 0xaf1   : > { %8858 = vtanh.f32 %v7431_v1 }
 0xaf2   : > { %8860 = vtanh.f32 %v7433_v31  ;;  %v7347_v63 = vpop.xlane.xlu0 %7346 }
 0xaf3   : > { %v7436_v47 = vadd.f32 %v14343_v59, %v7347_v63 }
 0xaf4   : > { %v7350_v56 = vpop.xlane.xlu1 %7349 }
 0xaf5   : > { %8862 = vtanh.f32 %v7436_v47  ;;  %v7437_v41 = vadd.f32 %v14343_v59, %v7350_v56 }
 0xaf6   : > { %v7341_v55 = vpop.xlane.xlu0 %7340 }
 0xaf7   : > { %v8855_v61 = vpop.eup %8854  ;;  %8864 = vtanh.f32 %v7437_v41  ;;  %v7434_v14 = vadd.f32 %v14343_v59, %v7341_v55 }
 0xaf8   : > { %v8857_v19 = vpop.eup %8856  ;;  %7497 = vst.msk [vmem:[%s14355_s6 + $0x10] sm:$0xff] %vm7494_vm13, %v8855_v61  ;;  %v7344_v3 = vpop.xlane.xlu1 %7343 }
 0xaf9   : > { %7495 = vst.msk [vmem:[%s14355_s6] sm:$0xff] %vm7494_vm13, %v8857_v19  ;;  %8866 = vtanh.f32 %v7434_v14  ;;  %v7435_v48 = vadd.f32 %v14343_v59, %v7344_v3 }
 0xafa   : > { %v7359_v27 = vpop.xlane.xlu0 %7358 }
 0xafb   : > { %v8859_v22 = vpop.eup %8858  ;;  %8868 = vtanh.f32 %v7435_v48  ;;  %v7440_v33 = vadd.f32 %v14343_v59, %v7359_v27 }
 0xafc   : > { %v8861_v28 = vpop.eup %8860  ;;  %7496 = vst.msk [vmem:[%s14355_s6 + $0x8] sm:$0xff] %vm7494_vm13, %v8859_v22  ;;  %v7362_v15 = vpop.xlane.xlu1 %7361 }
 0xafd   : > { %7498 = vst.msk [vmem:[%s14355_s6 + $0x18] sm:$0xff] %vm7494_vm13, %v8861_v28  ;;  %8870 = vtanh.f32 %v7440_v33  ;;  %v7441_v45 = vadd.f32 %v14343_v59, %v7362_v15 }
 0xafe   : > { %v7353_v53 = vpop.xlane.xlu0 %7352 }
 0xaff   : > { %v8863_v25 = vpop.eup %8862  ;;  %8872 = vtanh.f32 %v7441_v45  ;;  %v7438_v46 = vadd.f32 %v14343_v59, %v7353_v53 }
 0xb00   : > { %7501 = vst.msk [vmem:[%s14355_s6 + $0x30] sm:$0xff] %vm7494_vm13, %v8863_v25  ;;  %v7356_v0 = vpop.xlane.xlu1 %7355 }
 0xb01   : > { %v8865_v32 = vpop.eup %8864  ;;  %8874 = vtanh.f32 %v7438_v46  ;;  %v7439_v30 = vadd.f32 %v14343_v59, %v7356_v0 }
 0xb02   : > { %7502 = vst.msk [vmem:[%s14355_s6 + $0x38] sm:$0xff] %vm7494_vm13, %v8865_v32  ;;  %v7371_v21 = vpop.xlane.xlu0 %7370 }
 0xb03   : > { %v8867_v34 = vpop.eup %8866  ;;  %8876 = vtanh.f32 %v7439_v30  ;;  %v7444_v37 = vadd.f32 %v14343_v59, %v7371_v21 }
 0xb04   : > { %7499 = vst.msk [vmem:[%s14355_s6 + $0x20] sm:$0xff] %vm7494_vm13, %v8867_v34  ;;  %v7374_v26 = vpop.xlane.xlu1 %7373 }
 0xb05   : > { %v8869_v10 = vpop.eup %8868  ;;  %8878 = vtanh.f32 %v7444_v37  ;;  %v7445_v24 = vadd.f32 %v14343_v59, %v7374_v26 }
 0xb06   : > { %7500 = vst.msk [vmem:[%s14355_s6 + $0x28] sm:$0xff] %vm7494_vm13, %v8869_v10  ;;  %v7365_v16 = vpop.xlane.xlu0 %7364 }
 0xb07   : > { %v8871_v11 = vpop.eup %8870  ;;  %8880 = vtanh.f32 %v7445_v24  ;;  %v7442_v51 = vadd.f32 %v14343_v59, %v7365_v16 }
 0xb08   : > { %7505 = vst.msk [vmem:[%s14355_s6 + $0x50] sm:$0xff] %vm7494_vm13, %v8871_v11  ;;  %v7368_v5 = vpop.xlane.xlu1 %7367 }
 0xb09   : > { %v8873_v8 = vpop.eup %8872  ;;  %8882 = vtanh.f32 %v7442_v51  ;;  %v7443_v52 = vadd.f32 %v14343_v59, %v7368_v5 }
 0xb0a   : > { %7506 = vst.msk [vmem:[%s14355_s6 + $0x58] sm:$0xff] %vm7494_vm13, %v8873_v8  ;;  %v7383_v6 = vpop.xlane.xlu0 %7382 }
 0xb0b   : > { %v8875_v18 = vpop.eup %8874  ;;  %8884 = vtanh.f32 %v7443_v52  ;;  %v7448_v23 = vadd.f32 %v14343_v59, %v7383_v6 }
 0xb0c   : > { %7503 = vst.msk [vmem:[%s14355_s6 + $0x40] sm:$0xff] %vm7494_vm13, %v8875_v18  ;;  %v7386_v20 = vpop.xlane.xlu1 %7385 }
 0xb0d   : > { %v8877_v54 = vpop.eup %8876  ;;  %8886 = vtanh.f32 %v7448_v23  ;;  %v7449_v4 = vadd.f32 %v14343_v59, %v7386_v20 }
 0xb0e   : > { %7504 = vst.msk [vmem:[%s14355_s6 + $0x48] sm:$0xff] %vm7494_vm13, %v8877_v54  ;;  %v7377_v42 = vpop.xlane.xlu0 %7376 }
 0xb0f   : > { %v8879_v7 = vpop.eup %8878  ;;  %8888 = vtanh.f32 %v7449_v4  ;;  %v7446_v50 = vadd.f32 %v14343_v59, %v7377_v42 }
 0xb10   : > { %7509 = vst.msk [vmem:[%s14355_s6 + $0x70] sm:$0xff] %vm7494_vm13, %v8879_v7  ;;  %v7380_v49 = vpop.xlane.xlu1 %7379 }
 0xb11   : > { %v8881_v39 = vpop.eup %8880  ;;  %8890 = vtanh.f32 %v7446_v50  ;;  %v7447_v57 = vadd.f32 %v14343_v59, %v7380_v49 }
 0xb12   : > { %7510 = vst.msk [vmem:[%s14355_s6 + $0x78] sm:$0xff] %vm7494_vm13, %v8881_v39 }
 0xb13   : > { %v8883_v58 = vpop.eup %8882  ;;  %8892 = vtanh.f32 %v7447_v57 }
 0xb14   : > { %7507 = vst.msk [vmem:[%s14355_s6 + $0x60] sm:$0xff] %vm7494_vm13, %v8883_v58 }
 0xb15   : > { %v8885_v35 = vpop.eup %8884 }
 0xb16   : > { %7508 = vst.msk [vmem:[%s14355_s6 + $0x68] sm:$0xff] %vm7494_vm13, %v8885_v35 }
 0xb17   : > { %v8887_v13 = vpop.eup %8886 }
 0xb18   : > { %7513 = vst.msk [vmem:[%s14355_s6 + $0x90] sm:$0xff] %vm7494_vm13, %v8887_v13 }
 0xb19   : > { %v8889_v44 = vpop.eup %8888 }
 0xb1a   : > { %7514 = vst.msk [vmem:[%s14355_s6 + $0x98] sm:$0xff] %vm7494_vm13, %v8889_v44 }
 0xb1b   : > { %v8891_v12 = vpop.eup %8890  ;;  %v7395_v36 = vpop.xlane.xlu0 %7394 }
 0xb1c   : > { %7511 = vst.msk [vmem:[%s14355_s6 + $0x80] sm:$0xff] %vm7494_vm13, %v8891_v12  ;;  %v7452_v40 = vadd.f32 %v14343_v59, %v7395_v36 }
 0xb1d   : > { %v8893_v17 = vpop.eup %8892  ;;  %v7398_v60 = vpop.xlane.xlu1 %7397 }
 0xb1e   : > { %7512 = vst.msk [vmem:[%s14355_s6 + $0x88] sm:$0xff] %vm7494_vm13, %v8893_v17  ;;  %8894 = vtanh.f32 %v7452_v40  ;;  %v7453_v2 = vadd.f32 %v14343_v59, %v7398_v60 }
 0xb1f   : > { %v7389_v62 = vpop.xlane.xlu0 %7388 }
 0xb20   : > { %8896 = vtanh.f32 %v7453_v2  ;;  %v7450_v43 = vadd.f32 %v14343_v59, %v7389_v62 }
 0xb21   : > { %v7392_v1 = vpop.xlane.xlu1 %7391 }
 0xb22   : > { %8898 = vtanh.f32 %v7450_v43  ;;  %v7451_v9 = vadd.f32 %v14343_v59, %v7392_v1 }
 0xb24   : > { %8900 = vtanh.f32 %v7451_v9 }
 0xb28   : > { %v8895_v56 = vpop.eup %8894 }
 0xb29   : > { %7517 = vst.msk [vmem:[%s14355_s6 + $0xb0] sm:$0xff] %vm7494_vm13, %v8895_v56 }
 0xb2a   : > { %v8897_v19 = vpop.eup %8896 }
 0xb2b   : > { %v8451_v31 = vpop.f32.mrb[112].mxu1  ;;  %7518 = vst.msk [vmem:[%s14355_s6 + $0xb8] sm:$0xff] %vm7494_vm13, %v8897_v19 }
 0xb2c   : > { %v7250_v63 = vadd.f32 %v8451_v31, %v14250_v38  ;;  %v7241_v47 = vpop.f32.mrb[113].mxu1  ;;  %v8899_v22 = vpop.eup %8898 }
 0xb2d   : > { %v7242_v41 = vadd.f32 %v14250_v38, %v7241_v47  ;;  %v8452_v55 = vpop.f32.mrb[114].mxu1  ;;  %7515 = vst.msk [vmem:[%s14355_s6 + $0xa0] sm:$0xff] %vm7494_vm13, %v8899_v22 }
 0xb2e   : > { %v7253_v61 = vadd.f32 %v8452_v55, %v14250_v38  ;;  %v7244_v14 = vpop.f32.mrb[115].mxu1  ;;  %v7286_v3 = vmax.f32 %v7250_v63, 0.0  ;;  %v8901_v45 = vpop.eup %8900 }
 0xb2f   : > { %v7284_v48 = vmax.f32 %v7242_v41, 0.0  ;;  %v7245_v27 = vadd.f32 %v14250_v38, %v7244_v14  ;;  %7516 = vst.msk [vmem:[%s14355_s6 + $0xa8] sm:$0xff] %vm7494_vm13, %v8901_v45 }
 0xb30   : > { %v7287_v28 = vmax.f32 %v7253_v61, 0.0  ;;  %v7325_v53 = vmul.f32 %v14258_v29, %v7286_v3 }
 0xb31   : > { %v7323_v33 = vmul.f32 %v14258_v29, %v7284_v48  ;;  %v7285_v15 = vmax.f32 %v7245_v27, 0.0 }
 0xb32   : > { %v7326_v38 = vmul.f32 %v14258_v29, %v7287_v28  ;;  %v7417_v32 = vsel %vm5013_vm0, %v7325_v53, 0.0 }
 0xb33   : > { %v7324_v25 = vmul.f32 %v14258_v29, %v7285_v15  ;;  %v7411_v46 = vsel %vm5013_vm0, %v7323_v33, 0.0 }
 0xb34   : > { %7412 = vadd.xlane.f32.xlu0 %v7411_v46  ;;  %v7420_v30 = vsel %vm5013_vm0, %v7326_v38, 0.0 }
 0xb35   : > { %v7414_v0 = vsel %vm5013_vm0, %v7324_v25, 0.0 }
 0xb36   : > { %7415 = vadd.xlane.f32.xlu1 %v7414_v0 }
 0xb38   : > { %7418 = vadd.xlane.f32.xlu0 %v7417_v32 }
 0xb3a   : > { %7421 = vadd.xlane.f32.xlu1 %v7420_v30 }
 0xb6d   : > { %v7407_v21 = vpop.xlane.xlu0 %7406 }
 0xb6e   : > { %v7456_v34 = vadd.f32 %v14343_v59, %v7407_v21 }
 0xb6f   : > { %v7410_v37 = vpop.xlane.xlu1 %7409 }
 0xb70   : > { %8902 = vtanh.f32 %v7456_v34  ;;  %v7457_v29 = vadd.f32 %v14343_v59, %v7410_v37 }
 0xb71   : > { %v7401_v26 = vpop.xlane.xlu0 %7400 }
 0xb72   : > { %8904 = vtanh.f32 %v7457_v29  ;;  %v7454_v10 = vadd.f32 %v14343_v59, %v7401_v26 }
 0xb73   : > { %v7404_v24 = vpop.xlane.xlu1 %7403 }
 0xb74   : > { %8906 = vtanh.f32 %v7454_v10  ;;  %v7455_v16 = vadd.f32 %v14343_v59, %v7404_v24 }
 0xb76   : > { %8908 = vtanh.f32 %v7455_v16 }
 0xb7a   : > { %v8903_v11 = vpop.eup %8902 }
 0xb7b   : > { %7521 = vst.msk [vmem:[%s14355_s6 + $0xd0] sm:$0xff] %vm7494_vm13, %v8903_v11 }
 0xb7c   : > { %v8905_v51 = vpop.eup %8904 }
 0xb7d   : > { %7522 = vst.msk [vmem:[%s14355_s6 + $0xd8] sm:$0xff] %vm7494_vm13, %v8905_v51 }
 0xb7e   : > { %v8907_v5 = vpop.eup %8906 }
 0xb7f   : > { %7519 = vst.msk [vmem:[%s14355_s6 + $0xc0] sm:$0xff] %vm7494_vm13, %v8907_v5 }
 0xb80   : > { %v8909_v8 = vpop.eup %8908 }
 0xb81   : > { %7520 = vst.msk [vmem:[%s14355_s6 + $0xc8] sm:$0xff] %vm7494_vm13, %v8909_v8 }
 0xbc1   : > { %v7413_v52 = vpop.xlane.xlu0 %7412 }
 0xbc2   : > { %v7458_v6 = vadd.f32 %v14343_v59, %v7413_v52 }
 0xbc3   : > { %v7416_v18 = vpop.xlane.xlu1 %7415 }
 0xbc4   : > { %8910 = vtanh.f32 %v7458_v6  ;;  %v7459_v23 = vadd.f32 %v14343_v59, %v7416_v18 }
 0xbc5   : > { %v7419_v20 = vpop.xlane.xlu0 %7418 }
 0xbc6   : > { %8912 = vtanh.f32 %v7459_v23  ;;  %v7460_v54 = vadd.f32 %v14343_v59, %v7419_v20 }
 0xbc7   : > { %v7422_v4 = vpop.xlane.xlu1 %7421 }
 0xbc8   : > { %8914 = vtanh.f32 %v7460_v54  ;;  %v7461_v42 = vadd.f32 %v14343_v59, %v7422_v4 }
 0xbca   : > { %8916 = vtanh.f32 %v7461_v42 }
 0xbce   : > { %v8911_v7 = vpop.eup %8910 }
 0xbcf   : > { %7523 = vst.msk [vmem:[%s14355_s6 + $0xe0] sm:$0xff] %vm7494_vm13, %v8911_v7 }
 0xbd0   : > { %v8913_v50 = vpop.eup %8912 }
 0xbd1   : > { %7524 = vst.msk [vmem:[%s14355_s6 + $0xe8] sm:$0xff] %vm7494_vm13, %v8913_v50 }
 0xbd2   : > { %v8915_v49 = vpop.eup %8914 }
 0xbd3   : > { %7525 = vst.msk [vmem:[%s14355_s6 + $0xf0] sm:$0xff] %vm7494_vm13, %v8915_v49 }
 0xbd4   : > { %v8917_v39 = vpop.eup %8916 }
 0xbd5   : > { %7526 = vst.msk [vmem:[%s14355_s6 + $0xf8] sm:$0xff] %vm7494_vm13, %v8917_v39 }
 0xbd6 PF: > { %s34_s29 = sadd.s32 1, %s8928_s29  }
 0xbd7   : > { %p31_p4 = scmp.ge.s32.totalorder %s34_s29, 4  }
 0xbd9   :  { %33 = sbr.rel (!%p31_p4) target bundleno = 8 (0x8), region = 138 }

</bundles_post_ra>
